<compile_context>
chip_gen: v7x
topology: tpu7x:2x2x1
jax: 0.10.0
libtpu: 0.0.40
codegen_flags: <defaults>
</compile_context>

<pallas_src>
import jax
import jax.numpy as jnp
from jax.experimental import pallas as pl
from jax.experimental.pallas import tpu as pltpu

# ---- model config (mirrors gpt.py constants) ----
N_EMBED = 384
N_HEAD = 6
HEAD_SIZE = N_EMBED // N_HEAD        # 64
N_LAYER = 6
BLOCK_SIZE = 256
VOCAB_SIZE = 65                      # e.g. tiny-shakespeare char vocab
VOCAB_PAD = 128                      # lane-dense padded vocab for the lm_head
LN_EPS = 1e-5
NEG_INF = -1e30                      # large finite negative (robust vs -inf)


def _layernorm(x, g, b):
    mu = jnp.mean(x, axis=-1, keepdims=True)
    var = jnp.mean((x - mu) ** 2, axis=-1, keepdims=True)
    return (x - mu) * jax.lax.rsqrt(var + LN_EPS) * g + b


# -------------------- fused transformer stack + lm_head kernel --------------------
def model_kernel(x_ref, vec_ref, wqkv_ref, wo_ref, w1_ref, b1_ref, w2_ref,
                 lnf_ref, wl_ref, bl_ref, out_ref, x_sc):
    l = pl.program_id(1)

    # Load the residual stream into the VMEM accumulator at the first layer.
    @pl.when(l == 0)
    def _():
        x_sc[...] = x_ref[...]

    Bt, T, C = x_sc.shape
    M = Bt * T
    bf16 = jnp.bfloat16

    # Packed per-layer vectors: [ln1 g, ln1 b, proj bias, ln2 g, ln2 b, ffn bias]
    vecs = vec_ref[0]                                     # (6, C) f32
    ln1g, ln1b, bo = vecs[0:1], vecs[1:2], vecs[2:3]
    ln2g, ln2b, b2 = vecs[3:4], vecs[4:5], vecs[5:6]

    x = x_sc[...].reshape(M, C)                           # (M, C) f32 residual

    # --- multi-head causal self-attention over ln1(x) ---
    h = _layernorm(x, ln1g, ln1b)
    # Fused QKV projection: one lane-dense N=1152 matmul, M = Bt*T rows.
    qkv = jnp.dot(h.astype(bf16), wqkv_ref[0],
                  preferred_element_type=jnp.float32)     # (M, 3C) f32
    qkvb = qkv.astype(bf16).reshape(Bt, T, 3 * C)

    row = jax.lax.broadcasted_iota(jnp.int32, (T, T), 0)
    col = jax.lax.broadcasted_iota(jnp.int32, (T, T), 1)
    causal = (row >= col)[None]                           # (1, T, T)
    scale = HEAD_SIZE ** -0.5

    # TODO(synk): attention/residual dropout are identity (eval semantics).
    # NOTE: per-head 64-lane slices start mid-vreg; acceptable while DMA-bound.
    heads = []
    for hd in range(N_HEAD):                              # static, unrolled
        o0 = hd * HEAD_SIZE
        qh = qkvb[:, :, o0:o0 + HEAD_SIZE]                        # (Bt, T, 64)
        kh = qkvb[:, :, C + o0:C + o0 + HEAD_SIZE]
        vh = qkvb[:, :, 2 * C + o0:2 * C + o0 + HEAD_SIZE]
        # bf16 operands, f32 accumulation; no explicit transpose.
        s = jnp.einsum('bqd,bkd->bqk', qh, kh,
                       preferred_element_type=jnp.float32) * scale
        s = jnp.where(causal, s, NEG_INF)
        s = s - jnp.max(s, axis=-1, keepdims=True)
        p = jnp.exp(s)
        p = p * pl.reciprocal(jnp.sum(p, axis=-1, keepdims=True), approx=True)
        oh = jnp.einsum('bqk,bkd->bqd', p.astype(bf16), vh,
                        preferred_element_type=jnp.float32)       # (Bt, T, 64)
        heads.append(oh.astype(bf16))

    # One full-K output projection instead of six K=64 passes.
    concat = jnp.concatenate(heads, axis=-1).reshape(M, C)        # (M, C) bf16
    attn = jnp.dot(concat, wo_ref[0], preferred_element_type=jnp.float32)
    x = x + attn + bo

    # --- feed-forward over ln2(x) ---
    h2 = _layernorm(x, ln2g, ln2b)
    f = jnp.dot(h2.astype(bf16), w1_ref[0],
                preferred_element_type=jnp.float32) + b1_ref[0]
    f = jnp.maximum(f, 0.0)
    f = jnp.dot(f.astype(bf16), w2_ref[0],
                preferred_element_type=jnp.float32) + b2
    x = x + f

    x_sc[...] = x.reshape(Bt, T, C)

    # --- fused final LayerNorm + lm_head epilogue (last layer only) ---
    @pl.when(l == pl.num_programs(1) - 1)
    def _():
        lnf = lnf_ref[...]                                 # (2, C): [gamma, beta]
        hf = _layernorm(x, lnf[0:1], lnf[1:2])
        logits = jnp.dot(hf.astype(bf16), wl_ref[...],
                         preferred_element_type=jnp.float32) + bl_ref[...]
        out_ref[...] = logits.reshape(Bt, T, wl_ref.shape[1])


def _pick_b_tile(B, T):
    """Batch-tile so per-core live activations fit v7x's 64 MiB VMEM."""
    # ~3-4 MiB of live activations per sequence at T=256 -> cap ~8 sequences.
    # TODO(synk): re-derive per generation (v5e/v6e: 128 MiB VMEM, ~2x tile).
    cap = max(1, min(8, (8 * 256) // max(T, 8)))
    bt = 1
    for cand in range(1, min(B, cap) + 1):
        if B % cand == 0:
            bt = cand
    # Keep >=2 batch blocks so both v7x TensorCores receive work when possible.
    if bt > 1 and B // bt < 2:
        for cand in range(bt - 1, 0, -1):
            if B % cand == 0 and B // cand >= 2:
                bt = cand
                break
    return bt


def run_model(x, bp, hp):
    B, T, C = x.shape
    bt = _pick_b_tile(B, T)
    vp = hp["wl"].shape[1]

    def layer_spec(arr):
        nd = arr.ndim - 1
        return pl.BlockSpec((1,) + arr.shape[1:],
                            lambda b, l, _nd=nd: (l,) + (0,) * _nd)

    def resident_spec(arr):
        nd = arr.ndim
        return pl.BlockSpec(arr.shape, lambda b, l, _nd=nd: (0,) * _nd)

    return pl.pallas_call(
        model_kernel,
        out_shape=jax.ShapeDtypeStruct((B, T, vp), jnp.float32),
        grid=(B // bt, N_LAYER),
        in_specs=[pl.BlockSpec((bt, T, C), lambda b, l: (b, 0, 0)),
                  layer_spec(bp["vec"]),
                  layer_spec(bp["wqkv"]),
                  layer_spec(bp["wo"]),
                  layer_spec(bp["w1"]),
                  layer_spec(bp["b1"]),
                  layer_spec(bp["w2"]),
                  resident_spec(hp["lnf"]),
                  resident_spec(hp["wl"]),
                  resident_spec(hp["bl"])],
        out_specs=pl.BlockSpec((bt, T, vp), lambda b, l: (b, 0, 0)),
        scratch_shapes=[pltpu.VMEM((bt, T, C), jnp.float32)],
        compiler_params=pltpu.CompilerParams(
            dimension_semantics=("parallel", "arbitrary"),
            vmem_limit_bytes=48 * 1024 * 1024),
    )(x, bp["vec"], bp["wqkv"], bp["wo"], bp["w1"], bp["b1"], bp["w2"],
      hp["lnf"], hp["wl"], hp["bl"])


# --------------------------- parameter init (deterministic) ---------------------------
def init_params(key):
    std = 0.02
    C, L = N_EMBED, N_LAYER
    f32, bf16 = jnp.float32, jnp.bfloat16
    keys = jax.random.split(key, 7)

    params = {
        "tok_emb": jax.random.normal(keys[0], (VOCAB_SIZE, C), f32) * std,
        "pos_emb": jax.random.normal(keys[1], (BLOCK_SIZE, C), f32) * std,
    }

    # Six per-layer (1,C) vectors packed into one (L, 6, C) array:
    # rows = [ln1 gamma, ln1 beta, proj bias, ln2 gamma, ln2 beta, ffn-out bias].
    vec = jnp.zeros((L, 6, C), f32)
    vec = vec.at[:, 0, :].set(1.0)   # ln1 gamma
    vec = vec.at[:, 3, :].set(1.0)   # ln2 gamma

    # Per-layer weights stacked along a leading N_LAYER axis, stored (in, out).
    params["blocks"] = {
        "vec": vec,
        # fused (query|key|value) projection, no bias
        "wqkv": (jax.random.normal(keys[2], (L, C, 3 * C), f32) * std).astype(bf16),
        "wo": (jax.random.normal(keys[3], (L, C, C), f32) * std).astype(bf16),
        "w1": (jax.random.normal(keys[4], (L, C, 4 * C), f32) * std).astype(bf16),
        "b1": jnp.zeros((L, 1, 4 * C), f32),
        "w2": (jax.random.normal(keys[5], (L, 4 * C, C), f32) * std).astype(bf16),
    }
    # TODO(synk): generation-conditional weight quantization (int8 on v5e/v6e,
    # fp8 on v7x) with per-output-channel scales would halve weight HBM traffic.

    # lm_head padded to a lane-dense 128-wide vocab; padded columns are zero.
    wl = jnp.zeros((C, VOCAB_PAD), f32)
    wl = wl.at[:, :VOCAB_SIZE].set(
        jax.random.normal(keys[6], (C, VOCAB_SIZE), f32) * std)
    params["head"] = {
        "lnf": jnp.concatenate([jnp.ones((1, C), f32), jnp.zeros((1, C), f32)], 0),
        "wl": wl.astype(bf16),
        "bl": jnp.zeros((1, VOCAB_PAD), f32),
    }
    return params


def bigram_lang_model_forward(idx, params):
    """Forward pass with target=None -> returns logits of shape (B, T, vocab_size)."""
    B, T = idx.shape
    tok = jnp.take(params["tok_emb"], idx, axis=0)           # (B, T, C) gather (glue)
    pos = params["pos_emb"][:T][None, :, :]                  # (1, T, C)
    x = (tok + pos).astype(jnp.float32)
    logits = run_model(x, params["blocks"], params["head"])  # (B, T, VOCAB_PAD)
    return logits[..., :VOCAB_SIZE]                          # drop lane padding
    # TODO(synk): cross-entropy loss (target != None) and generate() sampling
    # are host-side / plain-JAX concerns and are not implemented as kernels.


if __name__ == "__main__":
    key = jax.random.PRNGKey(0)
    pkey, ikey = jax.random.split(key)
    params = init_params(pkey)

    B, T = 2, 64                                             # T <= block_size
    idx = jax.random.randint(ikey, (B, T), 0, VOCAB_SIZE, dtype=jnp.int32)

    logits = bigram_lang_model_forward(idx, params)
    logits = jax.block_until_ready(logits)

    assert logits.shape == (B, T, VOCAB_SIZE)
    assert logits.dtype == jnp.float32
    assert bool(jnp.all(jnp.isfinite(logits)))
    print("KERNEL_OK")
</pallas_src>

<mosaic_0001>
module attributes {stable_mosaic.version = 11 : i64} {
  func.func @model_kernel(%arg0: i32, %arg1: i32, %arg2: memref<1x64x384xf32, #tpu.memory_space<vmem>>, %arg3: memref<1x6x384xf32, #tpu.memory_space<vmem>>, %arg4: memref<1x384x1152xbf16, #tpu.memory_space<vmem>>, %arg5: memref<1x384x384xbf16, #tpu.memory_space<vmem>>, %arg6: memref<1x384x1536xbf16, #tpu.memory_space<vmem>>, %arg7: memref<1x1x1536xf32, #tpu.memory_space<vmem>>, %arg8: memref<1x1536x384xbf16, #tpu.memory_space<vmem>>, %arg9: memref<2x384xf32, #tpu.memory_space<vmem>>, %arg10: memref<384x128xbf16, #tpu.memory_space<vmem>>, %arg11: memref<1x128xf32, #tpu.memory_space<vmem>>, %arg12: memref<1x64x128xf32, #tpu.memory_space<vmem>>, %arg13: memref<1x64x384xf32, #tpu.memory_space<vmem>>) attributes {dimension_semantics = [#tpu.dimension_semantics<parallel>, #tpu.dimension_semantics<arbitrary>], iteration_bounds = array<i64: 2, 6>, scalar_prefetch = 0 : i64, scratch_operands = 1 : i64, tpu.core_type = #tpu.core_type<tc>, window_params = [{transform_indices = @transform_0, window_bounds = array<i64: 1, 64, 384>}, {transform_indices = @transform_1, window_bounds = array<i64: 1, 6, 384>}, {transform_indices = @transform_2, window_bounds = array<i64: 1, 384, 1152>}, {transform_indices = @transform_3, window_bounds = array<i64: 1, 384, 384>}, {transform_indices = @transform_4, window_bounds = array<i64: 1, 384, 1536>}, {transform_indices = @transform_5, window_bounds = array<i64: 1, 1, 1536>}, {transform_indices = @transform_6, window_bounds = array<i64: 1, 1536, 384>}, {pipeline_mode = #tpu.pipeline_mode<synchronous>, transform_indices = @transform_7, window_bounds = array<i64: 2, 384>}, {pipeline_mode = #tpu.pipeline_mode<synchronous>, transform_indices = @transform_8, window_bounds = array<i64: 384, 128>}, {pipeline_mode = #tpu.pipeline_mode<synchronous>, transform_indices = @transform_9, window_bounds = array<i64: 1, 128>}, {transform_indices = @transform_10, window_bounds = array<i64: 1, 64, 128>}]} {
    %c0_i32 = arith.constant 0 : i32
    %0 = arith.cmpi eq, %arg1, %c0_i32 : i32
    %1 = arith.extui %0 : i1 to i32
    %c0_i32_0 = arith.constant 0 : i32
    %2 = arith.cmpi ne, %1, %c0_i32_0 : i32
    scf.if %2 {
      %c0_75 = arith.constant 0 : index
      %c0_76 = arith.constant 0 : index
      %c0_77 = arith.constant 0 : index
      %223 = vector.load %arg2[%c0_75, %c0_76, %c0_77] : memref<1x64x384xf32, #tpu.memory_space<vmem>>, vector<1x64x384xf32>
      %c0_78 = arith.constant 0 : index
      %c0_79 = arith.constant 0 : index
      %c0_80 = arith.constant 0 : index
      %224 = vector.load %arg13[%c0_78, %c0_79, %c0_80] : memref<1x64x384xf32, #tpu.memory_space<vmem>>, vector<1x64x384xf32>
      tpu.vector_store %arg13[%c0_78, %c0_79, %c0_80], %223 {strides = array<i32>} : memref<1x64x384xf32, #tpu.memory_space<vmem>>, vector<1x64x384xf32>,
    } else {
    }
    %c0 = arith.constant 0 : index
    %c0_1 = arith.constant 0 : index
    %c0_2 = arith.constant 0 : index
    %3 = vector.load %arg3[%c0, %c0_1, %c0_2] : memref<1x6x384xf32, #tpu.memory_space<vmem>>, vector<1x6x384xf32>
    %4 = vector.shape_cast %3 : vector<1x6x384xf32> to vector<6x384xf32>
    %5 = vector.extract_strided_slice %4 {offsets = [0, 0], sizes = [1, 384], strides = [1, 1]} : vector<6x384xf32> to vector<1x384xf32>
    %6 = vector.extract_strided_slice %4 {offsets = [1, 0], sizes = [1, 384], strides = [1, 1]} : vector<6x384xf32> to vector<1x384xf32>
    %7 = vector.extract_strided_slice %4 {offsets = [2, 0], sizes = [1, 384], strides = [1, 1]} : vector<6x384xf32> to vector<1x384xf32>
    %8 = vector.extract_strided_slice %4 {offsets = [3, 0], sizes = [1, 384], strides = [1, 1]} : vector<6x384xf32> to vector<1x384xf32>
    %9 = vector.extract_strided_slice %4 {offsets = [4, 0], sizes = [1, 384], strides = [1, 1]} : vector<6x384xf32> to vector<1x384xf32>
    %10 = vector.extract_strided_slice %4 {offsets = [5, 0], sizes = [1, 384], strides = [1, 1]} : vector<6x384xf32> to vector<1x384xf32>
    %c0_3 = arith.constant 0 : index
    %c0_4 = arith.constant 0 : index
    %c0_5 = arith.constant 0 : index
    %11 = vector.load %arg13[%c0_3, %c0_4, %c0_5] : memref<1x64x384xf32, #tpu.memory_space<vmem>>, vector<1x64x384xf32>
    %12 = vector.shape_cast %11 : vector<1x64x384xf32> to vector<64x384xf32>
    %cst = arith.constant dense<0.000000e+00> : vector<64xf32>
    %13 = vector.multi_reduction <add>, %12, %cst [1] : vector<64x384xf32> to vector<64xf32>
    %14 = vector.shape_cast %13 : vector<64xf32> to vector<64x1xf32>
    %cst_6 = arith.constant 3.840000e+02 : f32
    %15 = vector.broadcast %cst_6 : f32 to vector<64x1xf32>
    %16 = arith.divf %14, %15 : vector<64x1xf32>
    %17 = vector.broadcast %16 : vector<64x1xf32> to vector<64x384xf32>
    %18 = arith.subf %12, %17 : vector<64x384xf32>
    %19 = arith.mulf %18, %18 : vector<64x384xf32>
    %cst_7 = arith.constant dense<0.000000e+00> : vector<64xf32>
    %20 = vector.multi_reduction <add>, %19, %cst_7 [1] : vector<64x384xf32> to vector<64xf32>
    %21 = vector.shape_cast %20 : vector<64xf32> to vector<64x1xf32>
    %cst_8 = arith.constant 3.840000e+02 : f32
    %22 = vector.broadcast %cst_8 : f32 to vector<64x1xf32>
    %23 = arith.divf %21, %22 : vector<64x1xf32>
    %24 = vector.broadcast %16 : vector<64x1xf32> to vector<64x384xf32>
    %25 = arith.subf %12, %24 : vector<64x384xf32>
    %cst_9 = arith.constant 9.99999974E-6 : f32
    %26 = vector.broadcast %cst_9 : f32 to vector<64x1xf32>
    %27 = arith.addf %23, %26 : vector<64x1xf32>
    %28 = math.rsqrt %27 : vector<64x1xf32>
    %29 = vector.broadcast %28 : vector<64x1xf32> to vector<64x384xf32>
    %30 = arith.mulf %25, %29 : vector<64x384xf32>
    %31 = vector.broadcast %5 : vector<1x384xf32> to vector<64x384xf32>
    %32 = arith.mulf %30, %31 : vector<64x384xf32>
    %33 = vector.broadcast %6 : vector<1x384xf32> to vector<64x384xf32>
    %34 = arith.addf %32, %33 : vector<64x384xf32>
    %35 = arith.truncf %34 : vector<64x384xf32> to vector<64x384xbf16>
    %c0_10 = arith.constant 0 : index
    %c0_11 = arith.constant 0 : index
    %c0_12 = arith.constant 0 : index
    %36 = vector.load %arg4[%c0_10, %c0_11, %c0_12] : memref<1x384x1152xbf16, #tpu.memory_space<vmem>>, vector<1x384x1152xbf16>
    %37 = vector.shape_cast %36 : vector<1x384x1152xbf16> to vector<384x1152xbf16>
    %cst_13 = arith.constant dense<0.000000e+00> : vector<64x1152xf32>
    %38 = tpu.matmul %35, %37, %cst_13 {dimension_numbers = #tpu.dot_dimension_numbers<[1], [0], [0], [1], [0, 0, 1, 1], [], []>} : vector<64x384xbf16>, vector<384x1152xbf16>, vector<64x1152xf32> -> vector<64x1152xf32>
    %39 = arith.truncf %38 : vector<64x1152xf32> to vector<64x1152xbf16>
    %40 = vector.shape_cast %39 : vector<64x1152xbf16> to vector<1x64x1152xbf16>
    %41 = tpu.iota {dimensions = array<i32: 0>} : vector<64x64xi32>
    %42 = tpu.iota {dimensions = array<i32: 1>} : vector<64x64xi32>
    %43 = arith.cmpi sge, %41, %42 : vector<64x64xi32>
    %44 = vector.shape_cast %43 : vector<64x64xi1> to vector<1x64x64xi1>
    %45 = vector.extract_strided_slice %40 {offsets = [0, 0, 0], sizes = [1, 64, 64], strides = [1, 1, 1]} : vector<1x64x1152xbf16> to vector<1x64x64xbf16>
    %46 = vector.extract_strided_slice %40 {offsets = [0, 0, 384], sizes = [1, 64, 64], strides = [1, 1, 1]} : vector<1x64x1152xbf16> to vector<1x64x64xbf16>
    %47 = vector.extract_strided_slice %40 {offsets = [0, 0, 768], sizes = [1, 64, 64], strides = [1, 1, 1]} : vector<1x64x1152xbf16> to vector<1x64x64xbf16>
    "tpu.trace_start"() <{level = 10 : i32, message = "bqd,bkd->bqk"}> : () -> ()
    %cst_14 = arith.constant dense<0.000000e+00> : vector<1x64x64xf32>
    %48 = tpu.matmul %45, %46, %cst_14 {dimension_numbers = #tpu.dot_dimension_numbers<[2], [2], [1], [1], [0, 0, 0, 1, 1, 1], [0], [0]>} : vector<1x64x64xbf16>, vector<1x64x64xbf16>, vector<1x64x64xf32> -> vector<1x64x64xf32>
    "tpu.trace_stop"() : () -> ()
    %cst_15 = arith.constant 1.250000e-01 : f32
    %49 = vector.broadcast %cst_15 : f32 to vector<1x64x64xf32>
    %50 = arith.mulf %48, %49 : vector<1x64x64xf32>
    %cst_16 = arith.constant -1.000000e+30 : f32
    %51 = vector.broadcast %cst_16 : f32 to vector<1x64x64xf32>
    %52 = arith.select %44, %50, %51 : vector<1x64x64xi1>, vector<1x64x64xf32>
    %cst_17 = arith.constant dense<0xFF800000> : vector<1x64xf32>
    %53 = vector.multi_reduction <maximumf>, %52, %cst_17 [2] : vector<1x64x64xf32> to vector<1x64xf32>
    %54 = vector.shape_cast %53 : vector<1x64xf32> to vector<1x64x1xf32>
    %55 = vector.broadcast %54 : vector<1x64x1xf32> to vector<1x64x64xf32>
    %56 = arith.subf %52, %55 : vector<1x64x64xf32>
    %57 = math.exp %56 : vector<1x64x64xf32>
    %cst_18 = arith.constant dense<0.000000e+00> : vector<1x64xf32>
    %58 = vector.multi_reduction <add>, %57, %cst_18 [2] : vector<1x64x64xf32> to vector<1x64xf32>
    %59 = vector.shape_cast %58 : vector<1x64xf32> to vector<1x64x1xf32>
    %60 = tpu.reciprocal %59 {approx = true} : vector<1x64x1xf32> -> vector<1x64x1xf32>
    %61 = vector.broadcast %60 : vector<1x64x1xf32> to vector<1x64x64xf32>
    %62 = arith.mulf %57, %61 : vector<1x64x64xf32>
    %63 = arith.truncf %62 : vector<1x64x64xf32> to vector<1x64x64xbf16>
    "tpu.trace_start"() <{level = 10 : i32, message = "bqk,bkd->bqd"}> : () -> ()
    %cst_19 = arith.constant dense<0.000000e+00> : vector<1x64x64xf32>
    %64 = tpu.matmul %63, %47, %cst_19 {dimension_numbers = #tpu.dot_dimension_numbers<[2], [1], [1], [2], [0, 0, 0, 1, 1, 2], [0], [0]>} : vector<1x64x64xbf16>, vector<1x64x64xbf16>, vector<1x64x64xf32> -> vector<1x64x64xf32>
    "tpu.trace_stop"() : () -> ()
    %65 = arith.truncf %64 : vector<1x64x64xf32> to vector<1x64x64xbf16>
    %66 = vector.extract_strided_slice %40 {offsets = [0, 0, 64], sizes = [1, 64, 64], strides = [1, 1, 1]} : vector<1x64x1152xbf16> to vector<1x64x64xbf16>
    %67 = vector.extract_strided_slice %40 {offsets = [0, 0, 448], sizes = [1, 64, 64], strides = [1, 1, 1]} : vector<1x64x1152xbf16> to vector<1x64x64xbf16>
    %68 = vector.extract_strided_slice %40 {offsets = [0, 0, 832], sizes = [1, 64, 64], strides = [1, 1, 1]} : vector<1x64x1152xbf16> to vector<1x64x64xbf16>
    "tpu.trace_start"() <{level = 10 : i32, message = "bqd,bkd->bqk"}> : () -> ()
    %cst_20 = arith.constant dense<0.000000e+00> : vector<1x64x64xf32>
    %69 = tpu.matmul %66, %67, %cst_20 {dimension_numbers = #tpu.dot_dimension_numbers<[2], [2], [1], [1], [0, 0, 0, 1, 1, 1], [0], [0]>} : vector<1x64x64xbf16>, vector<1x64x64xbf16>, vector<1x64x64xf32> -> vector<1x64x64xf32>
    "tpu.trace_stop"() : () -> ()
    %cst_21 = arith.constant 1.250000e-01 : f32
    %70 = vector.broadcast %cst_21 : f32 to vector<1x64x64xf32>
    %71 = arith.mulf %69, %70 : vector<1x64x64xf32>
    %cst_22 = arith.constant -1.000000e+30 : f32
    %72 = vector.broadcast %cst_22 : f32 to vector<1x64x64xf32>
    %73 = arith.select %44, %71, %72 : vector<1x64x64xi1>, vector<1x64x64xf32>
    %cst_23 = arith.constant dense<0xFF800000> : vector<1x64xf32>
    %74 = vector.multi_reduction <maximumf>, %73, %cst_23 [2] : vector<1x64x64xf32> to vector<1x64xf32>
    %75 = vector.shape_cast %74 : vector<1x64xf32> to vector<1x64x1xf32>
    %76 = vector.broadcast %75 : vector<1x64x1xf32> to vector<1x64x64xf32>
    %77 = arith.subf %73, %76 : vector<1x64x64xf32>
    %78 = math.exp %77 : vector<1x64x64xf32>
    %cst_24 = arith.constant dense<0.000000e+00> : vector<1x64xf32>
    %79 = vector.multi_reduction <add>, %78, %cst_24 [2] : vector<1x64x64xf32> to vector<1x64xf32>
    %80 = vector.shape_cast %79 : vector<1x64xf32> to vector<1x64x1xf32>
    %81 = tpu.reciprocal %80 {approx = true} : vector<1x64x1xf32> -> vector<1x64x1xf32>
    %82 = vector.broadcast %81 : vector<1x64x1xf32> to vector<1x64x64xf32>
    %83 = arith.mulf %78, %82 : vector<1x64x64xf32>
    %84 = arith.truncf %83 : vector<1x64x64xf32> to vector<1x64x64xbf16>
    "tpu.trace_start"() <{level = 10 : i32, message = "bqk,bkd->bqd"}> : () -> ()
    %cst_25 = arith.constant dense<0.000000e+00> : vector<1x64x64xf32>
    %85 = tpu.matmul %84, %68, %cst_25 {dimension_numbers = #tpu.dot_dimension_numbers<[2], [1], [1], [2], [0, 0, 0, 1, 1, 2], [0], [0]>} : vector<1x64x64xbf16>, vector<1x64x64xbf16>, vector<1x64x64xf32> -> vector<1x64x64xf32>
    "tpu.trace_stop"() : () -> ()
    %86 = arith.truncf %85 : vector<1x64x64xf32> to vector<1x64x64xbf16>
    %87 = vector.extract_strided_slice %40 {offsets = [0, 0, 128], sizes = [1, 64, 64], strides = [1, 1, 1]} : vector<1x64x1152xbf16> to vector<1x64x64xbf16>
    %88 = vector.extract_strided_slice %40 {offsets = [0, 0, 512], sizes = [1, 64, 64], strides = [1, 1, 1]} : vector<1x64x1152xbf16> to vector<1x64x64xbf16>
    %89 = vector.extract_strided_slice %40 {offsets = [0, 0, 896], sizes = [1, 64, 64], strides = [1, 1, 1]} : vector<1x64x1152xbf16> to vector<1x64x64xbf16>
    "tpu.trace_start"() <{level = 10 : i32, message = "bqd,bkd->bqk"}> : () -> ()
    %cst_26 = arith.constant dense<0.000000e+00> : vector<1x64x64xf32>
    %90 = tpu.matmul %87, %88, %cst_26 {dimension_numbers = #tpu.dot_dimension_numbers<[2], [2], [1], [1], [0, 0, 0, 1, 1, 1], [0], [0]>} : vector<1x64x64xbf16>, vector<1x64x64xbf16>, vector<1x64x64xf32> -> vector<1x64x64xf32>
    "tpu.trace_stop"() : () -> ()
    %cst_27 = arith.constant 1.250000e-01 : f32
    %91 = vector.broadcast %cst_27 : f32 to vector<1x64x64xf32>
    %92 = arith.mulf %90, %91 : vector<1x64x64xf32>
    %cst_28 = arith.constant -1.000000e+30 : f32
    %93 = vector.broadcast %cst_28 : f32 to vector<1x64x64xf32>
    %94 = arith.select %44, %92, %93 : vector<1x64x64xi1>, vector<1x64x64xf32>
    %cst_29 = arith.constant dense<0xFF800000> : vector<1x64xf32>
    %95 = vector.multi_reduction <maximumf>, %94, %cst_29 [2] : vector<1x64x64xf32> to vector<1x64xf32>
    %96 = vector.shape_cast %95 : vector<1x64xf32> to vector<1x64x1xf32>
    %97 = vector.broadcast %96 : vector<1x64x1xf32> to vector<1x64x64xf32>
    %98 = arith.subf %94, %97 : vector<1x64x64xf32>
    %99 = math.exp %98 : vector<1x64x64xf32>
    %cst_30 = arith.constant dense<0.000000e+00> : vector<1x64xf32>
    %100 = vector.multi_reduction <add>, %99, %cst_30 [2] : vector<1x64x64xf32> to vector<1x64xf32>
    %101 = vector.shape_cast %100 : vector<1x64xf32> to vector<1x64x1xf32>
    %102 = tpu.reciprocal %101 {approx = true} : vector<1x64x1xf32> -> vector<1x64x1xf32>
    %103 = vector.broadcast %102 : vector<1x64x1xf32> to vector<1x64x64xf32>
    %104 = arith.mulf %99, %103 : vector<1x64x64xf32>
    %105 = arith.truncf %104 : vector<1x64x64xf32> to vector<1x64x64xbf16>
    "tpu.trace_start"() <{level = 10 : i32, message = "bqk,bkd->bqd"}> : () -> ()
    %cst_31 = arith.constant dense<0.000000e+00> : vector<1x64x64xf32>
    %106 = tpu.matmul %105, %89, %cst_31 {dimension_numbers = #tpu.dot_dimension_numbers<[2], [1], [1], [2], [0, 0, 0, 1, 1, 2], [0], [0]>} : vector<1x64x64xbf16>, vector<1x64x64xbf16>, vector<1x64x64xf32> -> vector<1x64x64xf32>
    "tpu.trace_stop"() : () -> ()
    %107 = arith.truncf %106 : vector<1x64x64xf32> to vector<1x64x64xbf16>
    %108 = vector.extract_strided_slice %40 {offsets = [0, 0, 192], sizes = [1, 64, 64], strides = [1, 1, 1]} : vector<1x64x1152xbf16> to vector<1x64x64xbf16>
    %109 = vector.extract_strided_slice %40 {offsets = [0, 0, 576], sizes = [1, 64, 64], strides = [1, 1, 1]} : vector<1x64x1152xbf16> to vector<1x64x64xbf16>
    %110 = vector.extract_strided_slice %40 {offsets = [0, 0, 960], sizes = [1, 64, 64], strides = [1, 1, 1]} : vector<1x64x1152xbf16> to vector<1x64x64xbf16>
    "tpu.trace_start"() <{level = 10 : i32, message = "bqd,bkd->bqk"}> : () -> ()
    %cst_32 = arith.constant dense<0.000000e+00> : vector<1x64x64xf32>
    %111 = tpu.matmul %108, %109, %cst_32 {dimension_numbers = #tpu.dot_dimension_numbers<[2], [2], [1], [1], [0, 0, 0, 1, 1, 1], [0], [0]>} : vector<1x64x64xbf16>, vector<1x64x64xbf16>, vector<1x64x64xf32> -> vector<1x64x64xf32>
    "tpu.trace_stop"() : () -> ()
    %cst_33 = arith.constant 1.250000e-01 : f32
    %112 = vector.broadcast %cst_33 : f32 to vector<1x64x64xf32>
    %113 = arith.mulf %111, %112 : vector<1x64x64xf32>
    %cst_34 = arith.constant -1.000000e+30 : f32
    %114 = vector.broadcast %cst_34 : f32 to vector<1x64x64xf32>
    %115 = arith.select %44, %113, %114 : vector<1x64x64xi1>, vector<1x64x64xf32>
    %cst_35 = arith.constant dense<0xFF800000> : vector<1x64xf32>
    %116 = vector.multi_reduction <maximumf>, %115, %cst_35 [2] : vector<1x64x64xf32> to vector<1x64xf32>
    %117 = vector.shape_cast %116 : vector<1x64xf32> to vector<1x64x1xf32>
    %118 = vector.broadcast %117 : vector<1x64x1xf32> to vector<1x64x64xf32>
    %119 = arith.subf %115, %118 : vector<1x64x64xf32>
    %120 = math.exp %119 : vector<1x64x64xf32>
    %cst_36 = arith.constant dense<0.000000e+00> : vector<1x64xf32>
    %121 = vector.multi_reduction <add>, %120, %cst_36 [2] : vector<1x64x64xf32> to vector<1x64xf32>
    %122 = vector.shape_cast %121 : vector<1x64xf32> to vector<1x64x1xf32>
    %123 = tpu.reciprocal %122 {approx = true} : vector<1x64x1xf32> -> vector<1x64x1xf32>
    %124 = vector.broadcast %123 : vector<1x64x1xf32> to vector<1x64x64xf32>
    %125 = arith.mulf %120, %124 : vector<1x64x64xf32>
    %126 = arith.truncf %125 : vector<1x64x64xf32> to vector<1x64x64xbf16>
    "tpu.trace_start"() <{level = 10 : i32, message = "bqk,bkd->bqd"}> : () -> ()
    %cst_37 = arith.constant dense<0.000000e+00> : vector<1x64x64xf32>
    %127 = tpu.matmul %126, %110, %cst_37 {dimension_numbers = #tpu.dot_dimension_numbers<[2], [1], [1], [2], [0, 0, 0, 1, 1, 2], [0], [0]>} : vector<1x64x64xbf16>, vector<1x64x64xbf16>, vector<1x64x64xf32> -> vector<1x64x64xf32>
    "tpu.trace_stop"() : () -> ()
    %128 = arith.truncf %127 : vector<1x64x64xf32> to vector<1x64x64xbf16>
    %129 = vector.extract_strided_slice %40 {offsets = [0, 0, 256], sizes = [1, 64, 64], strides = [1, 1, 1]} : vector<1x64x1152xbf16> to vector<1x64x64xbf16>
    %130 = vector.extract_strided_slice %40 {offsets = [0, 0, 640], sizes = [1, 64, 64], strides = [1, 1, 1]} : vector<1x64x1152xbf16> to vector<1x64x64xbf16>
    %131 = vector.extract_strided_slice %40 {offsets = [0, 0, 1024], sizes = [1, 64, 64], strides = [1, 1, 1]} : vector<1x64x1152xbf16> to vector<1x64x64xbf16>
    "tpu.trace_start"() <{level = 10 : i32, message = "bqd,bkd->bqk"}> : () -> ()
    %cst_38 = arith.constant dense<0.000000e+00> : vector<1x64x64xf32>
    %132 = tpu.matmul %129, %130, %cst_38 {dimension_numbers = #tpu.dot_dimension_numbers<[2], [2], [1], [1], [0, 0, 0, 1, 1, 1], [0], [0]>} : vector<1x64x64xbf16>, vector<1x64x64xbf16>, vector<1x64x64xf32> -> vector<1x64x64xf32>
    "tpu.trace_stop"() : () -> ()
    %cst_39 = arith.constant 1.250000e-01 : f32
    %133 = vector.broadcast %cst_39 : f32 to vector<1x64x64xf32>
    %134 = arith.mulf %132, %133 : vector<1x64x64xf32>
    %cst_40 = arith.constant -1.000000e+30 : f32
    %135 = vector.broadcast %cst_40 : f32 to vector<1x64x64xf32>
    %136 = arith.select %44, %134, %135 : vector<1x64x64xi1>, vector<1x64x64xf32>
    %cst_41 = arith.constant dense<0xFF800000> : vector<1x64xf32>
    %137 = vector.multi_reduction <maximumf>, %136, %cst_41 [2] : vector<1x64x64xf32> to vector<1x64xf32>
    %138 = vector.shape_cast %137 : vector<1x64xf32> to vector<1x64x1xf32>
    %139 = vector.broadcast %138 : vector<1x64x1xf32> to vector<1x64x64xf32>
    %140 = arith.subf %136, %139 : vector<1x64x64xf32>
    %141 = math.exp %140 : vector<1x64x64xf32>
    %cst_42 = arith.constant dense<0.000000e+00> : vector<1x64xf32>
    %142 = vector.multi_reduction <add>, %141, %cst_42 [2] : vector<1x64x64xf32> to vector<1x64xf32>
    %143 = vector.shape_cast %142 : vector<1x64xf32> to vector<1x64x1xf32>
    %144 = tpu.reciprocal %143 {approx = true} : vector<1x64x1xf32> -> vector<1x64x1xf32>
    %145 = vector.broadcast %144 : vector<1x64x1xf32> to vector<1x64x64xf32>
    %146 = arith.mulf %141, %145 : vector<1x64x64xf32>
    %147 = arith.truncf %146 : vector<1x64x64xf32> to vector<1x64x64xbf16>
    "tpu.trace_start"() <{level = 10 : i32, message = "bqk,bkd->bqd"}> : () -> ()
    %cst_43 = arith.constant dense<0.000000e+00> : vector<1x64x64xf32>
    %148 = tpu.matmul %147, %131, %cst_43 {dimension_numbers = #tpu.dot_dimension_numbers<[2], [1], [1], [2], [0, 0, 0, 1, 1, 2], [0], [0]>} : vector<1x64x64xbf16>, vector<1x64x64xbf16>, vector<1x64x64xf32> -> vector<1x64x64xf32>
    "tpu.trace_stop"() : () -> ()
    %149 = arith.truncf %148 : vector<1x64x64xf32> to vector<1x64x64xbf16>
    %150 = vector.extract_strided_slice %40 {offsets = [0, 0, 320], sizes = [1, 64, 64], strides = [1, 1, 1]} : vector<1x64x1152xbf16> to vector<1x64x64xbf16>
    %151 = vector.extract_strided_slice %40 {offsets = [0, 0, 704], sizes = [1, 64, 64], strides = [1, 1, 1]} : vector<1x64x1152xbf16> to vector<1x64x64xbf16>
    %152 = vector.extract_strided_slice %40 {offsets = [0, 0, 1088], sizes = [1, 64, 64], strides = [1, 1, 1]} : vector<1x64x1152xbf16> to vector<1x64x64xbf16>
    "tpu.trace_start"() <{level = 10 : i32, message = "bqd,bkd->bqk"}> : () -> ()
    %cst_44 = arith.constant dense<0.000000e+00> : vector<1x64x64xf32>
    %153 = tpu.matmul %150, %151, %cst_44 {dimension_numbers = #tpu.dot_dimension_numbers<[2], [2], [1], [1], [0, 0, 0, 1, 1, 1], [0], [0]>} : vector<1x64x64xbf16>, vector<1x64x64xbf16>, vector<1x64x64xf32> -> vector<1x64x64xf32>
    "tpu.trace_stop"() : () -> ()
    %cst_45 = arith.constant 1.250000e-01 : f32
    %154 = vector.broadcast %cst_45 : f32 to vector<1x64x64xf32>
    %155 = arith.mulf %153, %154 : vector<1x64x64xf32>
    %cst_46 = arith.constant -1.000000e+30 : f32
    %156 = vector.broadcast %cst_46 : f32 to vector<1x64x64xf32>
    %157 = arith.select %44, %155, %156 : vector<1x64x64xi1>, vector<1x64x64xf32>
    %cst_47 = arith.constant dense<0xFF800000> : vector<1x64xf32>
    %158 = vector.multi_reduction <maximumf>, %157, %cst_47 [2] : vector<1x64x64xf32> to vector<1x64xf32>
    %159 = vector.shape_cast %158 : vector<1x64xf32> to vector<1x64x1xf32>
    %160 = vector.broadcast %159 : vector<1x64x1xf32> to vector<1x64x64xf32>
    %161 = arith.subf %157, %160 : vector<1x64x64xf32>
    %162 = math.exp %161 : vector<1x64x64xf32>
    %cst_48 = arith.constant dense<0.000000e+00> : vector<1x64xf32>
    %163 = vector.multi_reduction <add>, %162, %cst_48 [2] : vector<1x64x64xf32> to vector<1x64xf32>
    %164 = vector.shape_cast %163 : vector<1x64xf32> to vector<1x64x1xf32>
    %165 = tpu.reciprocal %164 {approx = true} : vector<1x64x1xf32> -> vector<1x64x1xf32>
    %166 = vector.broadcast %165 : vector<1x64x1xf32> to vector<1x64x64xf32>
    %167 = arith.mulf %162, %166 : vector<1x64x64xf32>
    %168 = arith.truncf %167 : vector<1x64x64xf32> to vector<1x64x64xbf16>
    "tpu.trace_start"() <{level = 10 : i32, message = "bqk,bkd->bqd"}> : () -> ()
    %cst_49 = arith.constant dense<0.000000e+00> : vector<1x64x64xf32>
    %169 = tpu.matmul %168, %152, %cst_49 {dimension_numbers = #tpu.dot_dimension_numbers<[2], [1], [1], [2], [0, 0, 0, 1, 1, 2], [0], [0]>} : vector<1x64x64xbf16>, vector<1x64x64xbf16>, vector<1x64x64xf32> -> vector<1x64x64xf32>
    "tpu.trace_stop"() : () -> ()
    %170 = arith.truncf %169 : vector<1x64x64xf32> to vector<1x64x64xbf16>
    %171 = tpu.concatenate %65, %86, %107, %128, %149, %170 in 2 : vector<1x64x64xbf16>, vector<1x64x64xbf16>, vector<1x64x64xbf16>, vector<1x64x64xbf16>, vector<1x64x64xbf16>, vector<1x64x64xbf16> -> vector<1x64x384xbf16>
    %172 = vector.shape_cast %171 : vector<1x64x384xbf16> to vector<64x384xbf16>
    %c0_50 = arith.constant 0 : index
    %c0_51 = arith.constant 0 : index
    %c0_52 = arith.constant 0 : index
    %173 = vector.load %arg5[%c0_50, %c0_51, %c0_52] : memref<1x384x384xbf16, #tpu.memory_space<vmem>>, vector<1x384x384xbf16>
    %174 = vector.shape_cast %173 : vector<1x384x384xbf16> to vector<384x384xbf16>
    %cst_53 = arith.constant dense<0.000000e+00> : vector<64x384xf32>
    %175 = tpu.matmul %172, %174, %cst_53 {dimension_numbers = #tpu.dot_dimension_numbers<[1], [0], [0], [1], [0, 0, 1, 1], [], []>} : vector<64x384xbf16>, vector<384x384xbf16>, vector<64x384xf32> -> vector<64x384xf32>
    %176 = arith.addf %12, %175 : vector<64x384xf32>
    %177 = vector.broadcast %7 : vector<1x384xf32> to vector<64x384xf32>
    %178 = arith.addf %176, %177 : vector<64x384xf32>
    %cst_54 = arith.constant dense<0.000000e+00> : vector<64xf32>
    %179 = vector.multi_reduction <add>, %178, %cst_54 [1] : vector<64x384xf32> to vector<64xf32>
    %180 = vector.shape_cast %179 : vector<64xf32> to vector<64x1xf32>
    %cst_55 = arith.constant 3.840000e+02 : f32
    %181 = vector.broadcast %cst_55 : f32 to vector<64x1xf32>
    %182 = arith.divf %180, %181 : vector<64x1xf32>
    %183 = vector.broadcast %182 : vector<64x1xf32> to vector<64x384xf32>
    %184 = arith.subf %178, %183 : vector<64x384xf32>
    %185 = arith.mulf %184, %184 : vector<64x384xf32>
    %cst_56 = arith.constant dense<0.000000e+00> : vector<64xf32>
    %186 = vector.multi_reduction <add>, %185, %cst_56 [1] : vector<64x384xf32> to vector<64xf32>
    %187 = vector.shape_cast %186 : vector<64xf32> to vector<64x1xf32>
    %cst_57 = arith.constant 3.840000e+02 : f32
    %188 = vector.broadcast %cst_57 : f32 to vector<64x1xf32>
    %189 = arith.divf %187, %188 : vector<64x1xf32>
    %190 = vector.broadcast %182 : vector<64x1xf32> to vector<64x384xf32>
    %191 = arith.subf %178, %190 : vector<64x384xf32>
    %cst_58 = arith.constant 9.99999974E-6 : f32
    %192 = vector.broadcast %cst_58 : f32 to vector<64x1xf32>
    %193 = arith.addf %189, %192 : vector<64x1xf32>
    %194 = math.rsqrt %193 : vector<64x1xf32>
    %195 = vector.broadcast %194 : vector<64x1xf32> to vector<64x384xf32>
    %196 = arith.mulf %191, %195 : vector<64x384xf32>
    %197 = vector.broadcast %8 : vector<1x384xf32> to vector<64x384xf32>
    %198 = arith.mulf %196, %197 : vector<64x384xf32>
    %199 = vector.broadcast %9 : vector<1x384xf32> to vector<64x384xf32>
    %200 = arith.addf %198, %199 : vector<64x384xf32>
    %201 = arith.truncf %200 : vector<64x384xf32> to vector<64x384xbf16>
    %c0_59 = arith.constant 0 : index
    %c0_60 = arith.constant 0 : index
    %c0_61 = arith.constant 0 : index
    %202 = vector.load %arg6[%c0_59, %c0_60, %c0_61] : memref<1x384x1536xbf16, #tpu.memory_space<vmem>>, vector<1x384x1536xbf16>
    %203 = vector.shape_cast %202 : vector<1x384x1536xbf16> to vector<384x1536xbf16>
    %cst_62 = arith.constant dense<0.000000e+00> : vector<64x1536xf32>
    %204 = tpu.matmul %201, %203, %cst_62 {dimension_numbers = #tpu.dot_dimension_numbers<[1], [0], [0], [1], [0, 0, 1, 1], [], []>} : vector<64x384xbf16>, vector<384x1536xbf16>, vector<64x1536xf32> -> vector<64x1536xf32>
    %c0_63 = arith.constant 0 : index
    %c0_64 = arith.constant 0 : index
    %c0_65 = arith.constant 0 : index
    %205 = vector.load %arg7[%c0_63, %c0_64, %c0_65] : memref<1x1x1536xf32, #tpu.memory_space<vmem>>, vector<1x1x1536xf32>
    %206 = vector.shape_cast %205 : vector<1x1x1536xf32> to vector<1x1536xf32>
    %207 = vector.broadcast %206 : vector<1x1536xf32> to vector<64x1536xf32>
    %208 = arith.addf %204, %207 : vector<64x1536xf32>
    %cst_66 = arith.constant 0.000000e+00 : f32
    %209 = vector.broadcast %cst_66 : f32 to vector<64x1536xf32>
    %210 = arith.maximumf %208, %209 : vector<64x1536xf32>
    %211 = arith.truncf %210 : vector<64x1536xf32> to vector<64x1536xbf16>
    %c0_67 = arith.constant 0 : index
    %c0_68 = arith.constant 0 : index
    %c0_69 = arith.constant 0 : index
    %212 = vector.load %arg8[%c0_67, %c0_68, %c0_69] : memref<1x1536x384xbf16, #tpu.memory_space<vmem>>, vector<1x1536x384xbf16>
    %213 = vector.shape_cast %212 : vector<1x1536x384xbf16> to vector<1536x384xbf16>
    %cst_70 = arith.constant dense<0.000000e+00> : vector<64x384xf32>
    %214 = tpu.matmul %211, %213, %cst_70 {dimension_numbers = #tpu.dot_dimension_numbers<[1], [0], [0], [1], [0, 0, 1, 1], [], []>} : vector<64x1536xbf16>, vector<1536x384xbf16>, vector<64x384xf32> -> vector<64x384xf32>
    %215 = vector.broadcast %10 : vector<1x384xf32> to vector<64x384xf32>
    %216 = arith.addf %214, %215 : vector<64x384xf32>
    %217 = arith.addf %178, %216 : vector<64x384xf32>
    %218 = vector.shape_cast %217 : vector<64x384xf32> to vector<1x64x384xf32>
    %c0_71 = arith.constant 0 : index
    %c0_72 = arith.constant 0 : index
    %c0_73 = arith.constant 0 : index
    %219 = vector.load %arg13[%c0_71, %c0_72, %c0_73] : memref<1x64x384xf32, #tpu.memory_space<vmem>>, vector<1x64x384xf32>
    tpu.vector_store %arg13[%c0_71, %c0_72, %c0_73], %218 {strides = array<i32>} : memref<1x64x384xf32, #tpu.memory_space<vmem>>, vector<1x64x384xf32>,
    %c5_i32 = arith.constant 5 : i32
    %220 = arith.cmpi eq, %arg1, %c5_i32 : i32
    %221 = arith.extui %220 : i1 to i32
    %c0_i32_74 = arith.constant 0 : i32
    %222 = arith.cmpi ne, %221, %c0_i32_74 : i32
    scf.if %222 {
      %c0_75 = arith.constant 0 : index
      %c0_76 = arith.constant 0 : index
      %223 = vector.load %arg9[%c0_75, %c0_76] : memref<2x384xf32, #tpu.memory_space<vmem>>, vector<2x384xf32>
      %224 = vector.extract_strided_slice %223 {offsets = [0, 0], sizes = [1, 384], strides = [1, 1]} : vector<2x384xf32> to vector<1x384xf32>
      %225 = vector.extract_strided_slice %223 {offsets = [1, 0], sizes = [1, 384], strides = [1, 1]} : vector<2x384xf32> to vector<1x384xf32>
      %cst_77 = arith.constant dense<0.000000e+00> : vector<64xf32>
      %226 = vector.multi_reduction <add>, %217, %cst_77 [1] : vector<64x384xf32> to vector<64xf32>
      %227 = vector.shape_cast %226 : vector<64xf32> to vector<64x1xf32>
      %cst_78 = arith.constant 3.840000e+02 : f32
      %228 = vector.broadcast %cst_78 : f32 to vector<64x1xf32>
      %229 = arith.divf %227, %228 : vector<64x1xf32>
      %230 = vector.broadcast %229 : vector<64x1xf32> to vector<64x384xf32>
      %231 = arith.subf %217, %230 : vector<64x384xf32>
      %232 = arith.mulf %231, %231 : vector<64x384xf32>
      %cst_79 = arith.constant dense<0.000000e+00> : vector<64xf32>
      %233 = vector.multi_reduction <add>, %232, %cst_79 [1] : vector<64x384xf32> to vector<64xf32>
      %234 = vector.shape_cast %233 : vector<64xf32> to vector<64x1xf32>
      %cst_80 = arith.constant 3.840000e+02 : f32
      %235 = vector.broadcast %cst_80 : f32 to vector<64x1xf32>
      %236 = arith.divf %234, %235 : vector<64x1xf32>
      %237 = vector.broadcast %229 : vector<64x1xf32> to vector<64x384xf32>
      %238 = arith.subf %217, %237 : vector<64x384xf32>
      %cst_81 = arith.constant 9.99999974E-6 : f32
      %239 = vector.broadcast %cst_81 : f32 to vector<64x1xf32>
      %240 = arith.addf %236, %239 : vector<64x1xf32>
      %241 = math.rsqrt %240 : vector<64x1xf32>
      %242 = vector.broadcast %241 : vector<64x1xf32> to vector<64x384xf32>
      %243 = arith.mulf %238, %242 : vector<64x384xf32>
      %244 = vector.broadcast %224 : vector<1x384xf32> to vector<64x384xf32>
      %245 = arith.mulf %243, %244 : vector<64x384xf32>
      %246 = vector.broadcast %225 : vector<1x384xf32> to vector<64x384xf32>
      %247 = arith.addf %245, %246 : vector<64x384xf32>
      %248 = arith.truncf %247 : vector<64x384xf32> to vector<64x384xbf16>
      %c0_82 = arith.constant 0 : index
      %c0_83 = arith.constant 0 : index
      %249 = vector.load %arg10[%c0_82, %c0_83] : memref<384x128xbf16, #tpu.memory_space<vmem>>, vector<384x128xbf16>
      %cst_84 = arith.constant dense<0.000000e+00> : vector<64x128xf32>
      %250 = tpu.matmul %248, %249, %cst_84 {dimension_numbers = #tpu.dot_dimension_numbers<[1], [0], [0], [1], [0, 0, 1, 1], [], []>} : vector<64x384xbf16>, vector<384x128xbf16>, vector<64x128xf32> -> vector<64x128xf32>
      %c0_85 = arith.constant 0 : index
      %c0_86 = arith.constant 0 : index
      %251 = vector.load %arg11[%c0_85, %c0_86] : memref<1x128xf32, #tpu.memory_space<vmem>>, vector<1x128xf32>
      %252 = vector.broadcast %251 : vector<1x128xf32> to vector<64x128xf32>
      %253 = arith.addf %250, %252 : vector<64x128xf32>
      %254 = vector.shape_cast %253 : vector<64x128xf32> to vector<1x64x128xf32>
      %c0_87 = arith.constant 0 : index
      %c0_88 = arith.constant 0 : index
      %c0_89 = arith.constant 0 : index
      %255 = vector.load %arg12[%c0_87, %c0_88, %c0_89] : memref<1x64x128xf32, #tpu.memory_space<vmem>>, vector<1x64x128xf32>
      tpu.vector_store %arg12[%c0_87, %c0_88, %c0_89], %254 {strides = array<i32>} : memref<1x64x128xf32, #tpu.memory_space<vmem>>, vector<1x64x128xf32>,
    } else {
    }
    return
  }
  func.func @transform_0(%arg0: i32, %arg1: i32) -> (i32, i32, i32) {
    %c0_i32 = arith.constant 0 : i32
    %c0_i32_0 = arith.constant 0 : i32
    %c0_i32_1 = arith.constant 0 : i32
    return %arg0, %c0_i32, %c0_i32_0 : i32, i32, i32
  }
  func.func @transform_1(%arg0: i32, %arg1: i32) -> (i32, i32, i32) {
    %c0_i32 = arith.constant 0 : i32
    %c0_i32_0 = arith.constant 0 : i32
    %c0_i32_1 = arith.constant 0 : i32
    return %arg1, %c0_i32, %c0_i32_0 : i32, i32, i32
  }
  func.func @transform_2(%arg0: i32, %arg1: i32) -> (i32, i32, i32) {
    %c0_i32 = arith.constant 0 : i32
    %c0_i32_0 = arith.constant 0 : i32
    %c0_i32_1 = arith.constant 0 : i32
    return %arg1, %c0_i32, %c0_i32_0 : i32, i32, i32
  }
  func.func @transform_3(%arg0: i32, %arg1: i32) -> (i32, i32, i32) {
    %c0_i32 = arith.constant 0 : i32
    %c0_i32_0 = arith.constant 0 : i32
    %c0_i32_1 = arith.constant 0 : i32
    return %arg1, %c0_i32, %c0_i32_0 : i32, i32, i32
  }
  func.func @transform_4(%arg0: i32, %arg1: i32) -> (i32, i32, i32) {
    %c0_i32 = arith.constant 0 : i32
    %c0_i32_0 = arith.constant 0 : i32
    %c0_i32_1 = arith.constant 0 : i32
    return %arg1, %c0_i32, %c0_i32_0 : i32, i32, i32
  }
  func.func @transform_5(%arg0: i32, %arg1: i32) -> (i32, i32, i32) {
    %c0_i32 = arith.constant 0 : i32
    %c0_i32_0 = arith.constant 0 : i32
    %c0_i32_1 = arith.constant 0 : i32
    return %arg1, %c0_i32, %c0_i32_0 : i32, i32, i32
  }
  func.func @transform_6(%arg0: i32, %arg1: i32) -> (i32, i32, i32) {
    %c0_i32 = arith.constant 0 : i32
    %c0_i32_0 = arith.constant 0 : i32
    %c0_i32_1 = arith.constant 0 : i32
    return %arg1, %c0_i32, %c0_i32_0 : i32, i32, i32
  }
  func.func @transform_7(%arg0: i32, %arg1: i32) -> (i32, i32) {
    %c0_i32 = arith.constant 0 : i32
    %c0_i32_0 = arith.constant 0 : i32
    %c0_i32_1 = arith.constant 0 : i32
    return %c0_i32, %c0_i32_0 : i32, i32
  }
  func.func @transform_8(%arg0: i32, %arg1: i32) -> (i32, i32) {
    %c0_i32 = arith.constant 0 : i32
    %c0_i32_0 = arith.constant 0 : i32
    %c0_i32_1 = arith.constant 0 : i32
    return %c0_i32, %c0_i32_0 : i32, i32
  }
  func.func @transform_9(%arg0: i32, %arg1: i32) -> (i32, i32) {
    %c0_i32 = arith.constant 0 : i32
    %c0_i32_0 = arith.constant 0 : i32
    %c0_i32_1 = arith.constant 0 : i32
    return %c0_i32, %c0_i32_0 : i32, i32
  }
  func.func @transform_10(%arg0: i32, %arg1: i32) -> (i32, i32, i32) {
    %c0_i32 = arith.constant 0 : i32
    %c0_i32_0 = arith.constant 0 : i32
    %c0_i32_1 = arith.constant 0 : i32
    return %arg0, %c0_i32, %c0_i32_0 : i32, i32, i32
  }
}

</mosaic_0001>

<bundles_post_ra>
// kernel: tpu_custom_call.1
= control target key start
LH: loop header
LB: loop body
LE: loop exit
PB: predicated region body
PF: predicated region fallthrough
CT: control target
= control target key end

     0   :  { %s20987_s0 = inlined_call_operand.hbm [shape: f32[2,64,384], index: 0, kind: input, shape index: {}]   ;;  %s20988_s1 = inlined_call_operand.hbm [shape: f32[6,6,384], index: 1, kind: input, shape index: {}]   ;;  %s20989_s2 = inlined_call_operand.hbm [shape: bf16[6,384,1152], index: 2, kind: input, shape index: {}]   ;;  %s20990_s3 = inlined_call_operand.hbm [shape: bf16[6,384,384], index: 3, kind: input, shape index: {}]   ;;  %s20991_s4 = inlined_call_operand.hbm [shape: bf16[6,384,1536], index: 4, kind: input, shape index: {}]   ;;  %s20992_s5 = inlined_call_operand.hbm [shape: f32[6,1,1536], index: 5, kind: input, shape index: {}]   ;;  %s20993_s6 = inlined_call_operand.hbm [shape: bf16[6,1536,384], index: 6, kind: input, shape index: {}]   ;;  %s20994_s7 = inlined_call_operand.hbm [shape: f32[2,384], index: 7, kind: input, shape index: {}]   ;;  %s20995_s8 = inlined_call_operand.hbm [shape: bf16[384,128], index: 8, kind: input, shape index: {}]   ;;  %s20996_s9 = inlined_call_operand.hbm [shape: f32[1,128], index: 9, kind: input, shape index: {}]   ;;  %s20997_s10 = inlined_call_operand.hbm [shape: f32[2,64,128], index: 10, kind: output, shape index: {}]  }
   0x1   :  { %21069 = sst [smem:[#allocation58_spill]] %s20987_s0 }
   0x2   :  { %21070 = sst [smem:[#allocation59_spill]] %s20988_s1 }
   0x3   :  { %21071 = sst [smem:[#allocation60_spill]] %s20989_s2 }
   0x4   :  { %21072 = sst [smem:[#allocation61_spill]] %s20990_s3 }
   0x5   :  { %21073 = sst [smem:[#allocation62_spill]] %s20991_s4 }
   0x6   :  { %21074 = sst [smem:[#allocation63_spill]] %s20992_s5 }
   0x7   :  { %21075 = sst [smem:[#allocation64_spill]] %s20993_s6 }
   0x8   :  { %21076 = sst [smem:[#allocation65_spill]] %s20994_s7 }
   0x9   :  { %21077 = sst [smem:[#allocation66_spill]] %s20995_s8 }
   0xa   :  { %21078 = sst [smem:[#allocation67_spill]] %s20997_s10 }
   0xb   :  { %15 = vsyncpa [#allocation4], 0 }
   0xc   :  { %17 = vsyncpa [#allocation4 + $0x1], 0 }
   0xd   :  { %18 = vsyncpa [#allocation7], 0 }
   0xe   :  { %20 = vsyncpa [#allocation7 + $0x1], 0 }
   0xf   :  { %21 = vsyncpa [#allocation10], 0 }
  0x10   :  { %23 = vsyncpa [#allocation10 + $0x1], 0 }
  0x11   :  { %24 = vsyncpa [#allocation13], 0 }
  0x12   :  { %26 = vsyncpa [#allocation13 + $0x1], 0 }
  0x13   :  { %27 = vsyncpa [#allocation16], 0 }
  0x14   :  { %28 = vsyncpa [#allocation19], 0 }
  0x15   :  { %29 = vsyncpa [#allocation5], 0 }
  0x16   :  { %31 = vsyncpa [#allocation5 + $0x1], 0  ;;  %s16908_s13 = smov 0   ;;  %s16910_s14 = smov 0  }
  0x17   :  { %s16912_s15 = smov 0   ;;  %s16914_s16 = smov 0  }
  0x18   :  { %s16916_s17 = smov 0   ;;  %s16918_s18 = smov 0  }
  0x19   :  { %s16920_s19 = smov 0   ;;  %s16922_s20 = smov 0  }
  0x1a   :  { %s16924_s21 = smov 0   ;;  %s16926_s22 = smov 0  }
  0x1b   :  { %s16928_s23 = smov 0  }
  0x1c LB: > { %21079 = sst [smem:[#allocation28_spill]] %s16790_s14  ;;  %s16962_s24 = sadd.s32 4294967295, %s16826_s23   ;;  %s16826_s23 = sphi %s16928_s23, %s37_s23   ;;  %s16822_s22 = sphi %s16926_s22, %s21255_s22   ;;  %s16818_s21 = sphi %s16924_s21, %s21254_s21   ;;  %s16814_s20 = sphi %s16922_s20, %s21253_s20   ;;  %s16810_s19 = sphi %s16920_s19, %s21252_s19   ;;  %s16806_s18 = sphi %s16918_s18, %s21251_s18   ;;  %s16802_s17 = sphi %s16916_s17, %s21250_s17   ;;  %s16798_s16 = sphi %s16914_s16, %s21249_s16   ;;  %s16794_s15 = sphi %s16912_s15, %s21247_s15   ;;  %s16790_s14 = sphi %s16910_s14, %s21246_s14   ;;  %s16786_s13 = sphi %s16908_s13, %s21245_s13  }
  0x1d   : > { %21080 = sst [smem:[#allocation29_spill]] %s16794_s15  ;;  %s12546_s25 = sadd.s32 4294967294, %s16826_s23  }
  0x1e   : > { %21081 = sst [smem:[#allocation30_spill]] %s16798_s16  ;;  %p69_p0 = scmp.ne.s32.totalorder %s16802_s17, %s16798_s16 }
  0x1f   : > { %21082 = sst [smem:[#allocation31_spill]] %s16810_s19  ;;  %p21005_p1 = scmp.eq.s32.totalorder %s16962_s24, 0 }
  0x20   : > { %21083 = sst [smem:[#allocation32_spill]] %s16814_s20  ;;  %p95_p2 = scmp.ne.s32.totalorder %s16790_s14, %s16786_s13 }
  0x21   : > { %p16972_p4 = por %p21005_p1, %p69_p0  ;;  %p318_p5 = scmp.eq.s32.totalorder %s12546_s25, 11 }
  0x22   : > { %p16978_p6 = por %p95_p2, %p21005_p1  ;;  %p12547_p7 = scmp.ge.s32.totalorder %s16826_s23, 1 }
  0x23   : > { %s21084_s26 = scalar_select %p16972_p4, 1, 0 }
  0x24   : > { %s21086_s27 = scalar_select %p16978_p6, 1, 0 }
  0x25   : > { %21085 = sst [smem:[#allocation33_spill]] %s21084_s26  ;;  %p16983_p8 = por %p318_p5, %p69_p0 }
  0x26   : > { %21087 = sst [smem:[#allocation34_spill]] %s21086_s27  ;;  %p325_p9 = scmp.lt.s32.totalorder %s16826_s23, 13 }
  0x27   : > { %s21088_s28 = scalar_select %p16983_p8, 1, 0 }
  0x28   : > { %p16988_p10 = pnand %p12547_p7, %p325_p9  ;;  %s16828_s30 = smov [#allocation15]  }
  0x29   : > { %21089 = sst [smem:[#allocation35_spill]] %s21088_s28  ;;  %s338_s11 = sshll.u32 %s16828_s30, 4  ;;  %s339_s11 = int_to_ptr.vmem [resolvable:$true] %s338_s11 }
  0x2a   : > { %s21090_s29 = scalar_select %p16988_p10, 1, 0 }
  0x2b   : > { %p14705_p11 = pneg %p16988_p10  ;;  %s46_s13 = sadd.s32 1, %s16818_s21 }
  0x2c   : > { %21091 = sst [smem:[#allocation36_spill]] %s21090_s29  ;;  %p17002_p0 = scmp.ge.s32.totalorder %s46_s13, 6 }
  0x2d   : > { %p16996_p12 = pnand %p14705_p11, %p21005_p1  ;;  %s21094_s7 = sld [smem:[#allocation65_spill]] }
  0x2e   : > { %s21093_s25 = scalar_select %p17002_p0, 1, 0 }
  0x2f   : > { %s21092_s12 = scalar_select %p16996_p12, 1, 0 }
  0x30   : > { %p17014_p5 = pneg %p16996_p12 }
  0x32   : > { %s21095_s19 = scalar_select %p17014_p5, 1, 0 }
  0x33   : > { %s16390_s10 = scalar_lea.hbm %s21094_s7, 96 }
  0x34   : > { %p16391_p2 = scmp.ne.s32.totalorder %s21094_s7, %s16390_s10  ;;  %p16397_p11 = scmp.lt.u32.totalorder %s16390_s10, %s21094_s7 }
  0x36   : > { %p16393_p7 = pnand %p17014_p5, %p16391_p2 }
  0x38   : > { %p16394_p9 = pneg %p16393_p7 }
  0x3a   : > { %p16399_p1 = pnand %p16397_p11, %p16394_p9 }
  0x3c   : > { %16402 = shalt.err (!%p16399_p1)
}
  0x3d   : > { %s16403_s16 = scalar_lea.vmem %s339_s11, 96  ;;  %p16411_p6 = scmp.lt.s32.totalorder %s339_s11, %s339_s11 }
  0x3e   : > { %p16404_p3 = scmp.ne.s32.totalorder %s339_s11, %s16403_s16  ;;  %p16412_p4 = scmp.lt.s32.totalorder %s16403_s16, %s16403_s16 }
  0x40   : > { %p16406_p13 = pnand %p16404_p3, %p17014_p5  ;;  %p16413_p10 = por %p16412_p4, %p16411_p6 }
  0x42   : > { %p16407_p8 = pneg %p16406_p13 }
  0x44   : > { %p16414_p0 = pnand %p16413_p10, %p16407_p8 }
  0x46   : > { %16417 = shalt.err (!%p16414_p0)
}
  0x47   : > { %14708 = dma.hbm_to_vmem [thread:$0]  (!%p16996_p12), %s21094_s7, 96, %s339_s11, [#allocation16]  }
  0x48   : > { %p21096_p1 = scmp.ne.s32.totalorder %s21093_s25, 0  ;;  %s82_s10 = sadd.s32 1, %s16794_s15 }
  0x49   : > { %p89_p3 = scmp.ne.s32.totalorder %s16794_s15, %s16790_s14  ;;  %p21014_p4 = scmp.lt.s32.totalorder %s16826_s23, 12 }
  0x4a   : > { %s21257_s13 = smov (%p21096_p1, %s46_s13), 0  ;;  %p21098_p8 = scmp.eq.s32.totalorder %s16826_s23, 0 }
  0x4b   : > { %21097 = sst [smem:[#allocation37_spill]] %s21257_s13  ;;  %s79_s26 = ssub.s32 %s16818_s21, %s21257_s13 }
  0x4c   : > { %p80_p6 = scmp.eq.s32.totalorder %s79_s26, 0  ;;  %p91_p10 = por %p89_p3, %p21098_p8 }
  0x4d   : > { %s17043_s27 = sand.u32 1, %s16826_s23   ;;  %s17046_s30 = sand.u32 1, %s16794_s15  }
  0x4e   : > { %s17049_s16 = scalar_select %p80_p6, %s16794_s15, %s82_s10  }
  0x4f   : > { %s14659_s11 = smul.u32 24, %s17046_s30  ;;  %p17055_p13 = pnand %p21014_p4, %p91_p10 }
  0x50   : > { %21099 = sst [smem:[#allocation38_spill]] %s17049_s16  ;;  %s14660_s20 = smul.u32 384, %s16818_s21 }
  0x51   : > { %s21100_s28 = scalar_select %p17055_p13, 1, 0 }
  0x52   : > { %s21101_s1 = sld [smem:[#allocation59_spill]]  ;;  %s398_s14 = scalar_lea.vmem [#allocation6], %s14659_s11 }
  0x53   : > { %s406_s10 = sshll.u32 %s398_s14, 4  ;;  %p17071_p2 = pneg %p17055_p13  ;;  %s17064_s10 = int_to_ptr.vmem [resolvable:$true] %s406_s10 }
  0x55   : > { %s21102_s29 = scalar_select %p17071_p2, 1, 0 }
  0x58   : > { %s17062_s26 = scalar_lea.hbm %s21101_s1, %s14660_s20  ;;  %s16423_s20 = scalar_lea.hbm %s21101_s1, 2304 }
  0x59   : > { %s16418_s15 = scalar_lea.hbm %s17062_s26, 384  ;;  %p16424_p11 = scmp.lt.u32.totalorder %s17062_s26, %s21101_s1 }
  0x5a   : > { %p16419_p0 = scmp.ne.s32.totalorder %s17062_s26, %s16418_s15  ;;  %p16425_p3 = scmp.lt.u32.totalorder %s16423_s20, %s16418_s15 }
  0x5b   : > { %p16427_p8 = scmp.lt.u32.totalorder %s16418_s15, %s17062_s26 }
  0x5c   : > { %p16421_p7 = pnand %p17071_p2, %p16419_p0  ;;  %p16426_p6 = por %p16425_p3, %p16424_p11 }
  0x5e   : > { %p16422_p9 = pneg %p16421_p7  ;;  %p16428_p10 = por %p16427_p8, %p16426_p6 }
  0x60   : > { %p16429_p4 = pnand %p16428_p10, %p16422_p9 }
  0x62   : > { %16432 = shalt.err (!%p16429_p4)
}
  0x63   : > { %s16433_s16 = scalar_lea.vmem %s17064_s10, 384  ;;  %s16829_s7 = smov [#allocation6]  }
  0x64   : > { %p16434_p0 = scmp.ne.s32.totalorder %s17064_s10, %s16433_s16  ;;  %s16438_s13 = sshll.u32 %s16829_s7, 4  ;;  %s16439_s13 = int_to_ptr.vmem [resolvable:$false] %s16438_s13 }
  0x65   : > { %s16440_s11 = scalar_lea.vmem %s16439_s13, 768  ;;  %p16441_p12 = scmp.lt.s32.totalorder %s17064_s10, %s16439_s13 }
  0x66   : > { %p16436_p7 = pnand %p16434_p0, %p17071_p2  ;;  %p16442_p5 = scmp.lt.s32.totalorder %s16440_s11, %s16433_s16 }
  0x68   : > { %p16437_p1 = pneg %p16436_p7  ;;  %p16443_p11 = por %p16442_p5, %p16441_p12 }
  0x6a   : > { %p16444_p3 = pnand %p16443_p11, %p16437_p1 }
  0x6c   : > { %16447 = shalt.err (!%p16444_p3)
}
  0x6d   : > { %s21103_s15 = scalar_lea.sflag [#allocation7], %s17043_s27  ;;  %s14663_s20 = smul.u32 576, %s17046_s30 }
  0x6e   : > { %14721 = dma.hbm_to_vmem [thread:$0]  (!%p17055_p13), %s17062_s26, 384, %s17064_s10, %s21103_s15  }
  0x6f   : > { %s14664_s14 = smul.u32 9216, %s16818_s21  ;;  %s21104_s3 = sld [smem:[#allocation61_spill]] }
  0x70   : > { %s438_s11 = scalar_lea.vmem [#allocation9], %s14663_s20  ;;  %s14667_s6 = smul.u32 12, %s17046_s30 }
  0x71   : > { %s445_s1 = sshll.u32 %s438_s11, 4  ;;  %s21027_s4 = scalar_lea.sflag [#allocation10], %s17043_s27  ;;  %s17103_s1 = int_to_ptr.vmem [resolvable:$true] %s445_s1 }
  0x75   : > { %s17101_s16 = scalar_lea.hbm %s21104_s3, %s14664_s14  ;;  %s16453_s15 = scalar_lea.hbm %s21104_s3, 55296 }
  0x76   : > { %s16448_s2 = scalar_lea.hbm %s17101_s16, 9216  ;;  %p16454_p4 = scmp.lt.u32.totalorder %s17101_s16, %s21104_s3 }
  0x77   : > { %p16449_p12 = scmp.ne.s32.totalorder %s17101_s16, %s16448_s2  ;;  %p16455_p9 = scmp.lt.u32.totalorder %s16453_s15, %s16448_s2 }
  0x78   : > { %p16457_p8 = scmp.lt.u32.totalorder %s16448_s2, %s17101_s16 }
  0x79   : > { %p16451_p5 = pnand %p16449_p12, %p17071_p2  ;;  %p16456_p6 = por %p16455_p9, %p16454_p4 }
  0x7b   : > { %p16452_p1 = pneg %p16451_p5  ;;  %p16458_p10 = por %p16457_p8, %p16456_p6 }
  0x7d   : > { %p16459_p0 = pnand %p16458_p10, %p16452_p1 }
  0x7f   : > { %16462 = shalt.err (!%p16459_p0)
}
  0x80   : > { %s16463_s20 = scalar_lea.vmem %s17103_s1, 9216  ;;  %s16830_s13 = smov [#allocation9]  }
  0x81   : > { %p16464_p7 = scmp.ne.s32.totalorder %s17103_s1, %s16463_s20  ;;  %s16468_s11 = sshll.u32 %s16830_s13, 4  ;;  %s16469_s11 = int_to_ptr.vmem [resolvable:$false] %s16468_s11 }
  0x82   : > { %s16470_s26 = scalar_lea.vmem %s16469_s11, 18432  ;;  %p16471_p12 = scmp.lt.s32.totalorder %s17103_s1, %s16469_s11 }
  0x83   : > { %p16466_p11 = pnand %p16464_p7, %p17071_p2  ;;  %p16472_p5 = scmp.lt.s32.totalorder %s16470_s26, %s16463_s20 }
  0x85   : > { %p16467_p3 = pneg %p16466_p11  ;;  %p16473_p4 = por %p16472_p5, %p16471_p12 }
  0x87   : > { %p16474_p9 = pnand %p16473_p4, %p16467_p3 }
  0x89   : > { %16477 = shalt.err (!%p16474_p9)
}
  0x8a   : > { %s21022_s2 = smov 192   ;;  %s21026_s10 = smov 12  }
  0x8b   : > { %14727 = dma.hbm_to_vmem [thread:$0]  (!%p17055_p13), %s17101_s16, 9216, %s17103_s1, %s21027_s4, %s21022_s2, %s21022_s2, %s21026_s10  }
  0x8c   : > { %s14668_s15 = smul.u32 192, %s16818_s21  ;;  %s480_s14 = scalar_lea.vmem [#allocation12], %s14667_s6 }
  0x8d   : > { %s488_s7 = sshll.u32 %s480_s14, 4  ;;  %s21105_s5 = sld [smem:[#allocation63_spill]]  ;;  %s489_s7 = int_to_ptr.vmem [resolvable:$true] %s488_s7 }
  0x8e   : > { %s21025_s26 = scalar_lea.sflag [#allocation13], %s17043_s27 }
  0x93   : > { %s17139_s11 = scalar_lea.hbm %s21105_s5, %s14668_s15  ;;  %s16483_s6 = scalar_lea.hbm %s21105_s5, 1152 }
  0x94   : > { %s16478_s3 = scalar_lea.hbm %s17139_s11, 192  ;;  %p16484_p10 = scmp.lt.u32.totalorder %s17139_s11, %s21105_s5 }
  0x95   : > { %p16479_p1 = scmp.ne.s32.totalorder %s17139_s11, %s16478_s3  ;;  %p16485_p0 = scmp.lt.u32.totalorder %s16483_s6, %s16478_s3 }
  0x96   : > { %p16487_p11 = scmp.lt.u32.totalorder %s16478_s3, %s17139_s11 }
  0x97   : > { %p16481_p6 = pnand %p16479_p1, %p17071_p2  ;;  %p16486_p7 = por %p16485_p0, %p16484_p10 }
  0x99   : > { %p16482_p8 = pneg %p16481_p6  ;;  %p16488_p3 = por %p16487_p11, %p16486_p7 }
  0x9b   : > { %p16489_p12 = pnand %p16488_p3, %p16482_p8 }
  0x9d   : > { %16492 = shalt.err (!%p16489_p12)
}
  0x9e   : > { %s16493_s15 = scalar_lea.vmem %s489_s7, 192  ;;  %s16833_s20 = smov [#allocation12]  }
  0x9f   : > { %p16494_p5 = scmp.ne.s32.totalorder %s489_s7, %s16493_s15  ;;  %s16498_s13 = sshll.u32 %s16833_s20, 4  ;;  %s16499_s13 = int_to_ptr.vmem [resolvable:$false] %s16498_s13 }
  0xa0   : > { %s16500_s1 = scalar_lea.vmem %s16499_s13, 384  ;;  %p16501_p1 = scmp.lt.s32.totalorder %s489_s7, %s16499_s13 }
  0xa1   : > { %p16496_p4 = pnand %p16494_p5, %p17071_p2  ;;  %p16502_p6 = scmp.lt.s32.totalorder %s16500_s1, %s16493_s15 }
  0xa3   : > { %p16497_p9 = pneg %p16496_p4  ;;  %p16503_p13 = por %p16502_p6, %p16501_p1 }
  0xa5   : > { %p16504_p0 = pnand %p16503_p13, %p16497_p9 }
  0xa7   : > { %16507 = shalt.err (!%p16504_p0)
}
  0xa8   : > { %p21106_p10 = scmp.ne.s32.totalorder %s21100_s28, 0  ;;  %s16834_s3 = smov [#allocation17]  }
  0xa9   : > { %s348_s2 = sshll.u32 %s16834_s3, 4  ;;  %s21107_s8 = sld [smem:[#allocation66_spill]]  ;;  %s349_s2 = int_to_ptr.vmem [resolvable:$true] %s348_s2 }
  0xaa   : > { %14733 = dma.hbm_to_vmem [thread:$0]  (!%p21106_p10), %s17139_s11, 192, %s489_s7, %s21025_s26  }
  0xab   : > { %p21108_p13 = scmp.ne.s32.totalorder %s21095_s19, 0 }
  0xaf   : > { %s16508_s14 = scalar_lea.hbm %s21107_s8, 3072 }
  0xb0   : > { %p16509_p8 = scmp.ne.s32.totalorder %s21107_s8, %s16508_s14  ;;  %p16515_p3 = scmp.lt.u32.totalorder %s16508_s14, %s21107_s8 }
  0xb2   : > { %p16511_p7 = pnand %p16509_p8, %p21108_p13 }
  0xb4   : > { %p16512_p11 = pneg %p16511_p7 }
  0xb6   : > { %p16517_p12 = pnand %p16515_p3, %p16512_p11 }
  0xb8   : > { %16520 = shalt.err (!%p16517_p12)
}
  0xb9   : > { %s16521_s7 = scalar_lea.vmem %s349_s2, 3072  ;;  %p16529_p1 = scmp.lt.s32.totalorder %s349_s2, %s349_s2 }
  0xba   : > { %p16522_p5 = scmp.ne.s32.totalorder %s349_s2, %s16521_s7  ;;  %p16530_p6 = scmp.lt.s32.totalorder %s16521_s7, %s16521_s7 }
  0xbc   : > { %p16524_p4 = pnand %p16522_p5, %p21108_p13  ;;  %p16531_p0 = por %p16530_p6, %p16529_p1 }
  0xbe   : > { %p16525_p9 = pneg %p16524_p4 }
  0xc0   : > { %p16532_p10 = pnand %p16531_p0, %p16525_p9 }
  0xc2   : > { %16535 = shalt.err (!%p16532_p10)
}
  0xc3   : > { %s16835_s11 = smov 64   ;;  %s16836_s3 = smov 4  }
  0xc4   : > { %p21109_p8 = scmp.ne.s32.totalorder %s21092_s12, 0  ;;  %s16837_s14 = smov [#allocation18]  }
  0xc5   : > { %s362_s20 = sshll.u32 %s16837_s14, 4  ;;  %s16536_s1 = scalar_lea.hbm %s20996_s9, 16  ;;  %s363_s20 = int_to_ptr.vmem [resolvable:$true] %s362_s20 }
  0xc6   : > { %14711 = dma.hbm_to_vmem [thread:$0]  (!%p21109_p8), %s21107_s8, 3072, %s349_s2, [#allocation16], %s16835_s11, %s16835_s11, %s16836_s3  }
  0xc7   : > { %p16537_p10 = scmp.ne.s32.totalorder %s20996_s9, %s16536_s1  ;;  %p16543_p3 = scmp.lt.u32.totalorder %s16536_s1, %s20996_s9 }
  0xc9   : > { %p16539_p7 = pnand %p16537_p10, %p21108_p13 }
  0xcb   : > { %p16540_p11 = pneg %p16539_p7 }
  0xcd   : > { %p16545_p12 = pnand %p16543_p3, %p16540_p11 }
  0xcf   : > { %16548 = shalt.err (!%p16545_p12)
}
  0xd0   : > { %s16549_s2 = scalar_lea.vmem %s363_s20, 16  ;;  %s16556_s11 = scalar_lea.vmem %s363_s20, 32 }
  0xd1   : > { %p16550_p5 = scmp.ne.s32.totalorder %s363_s20, %s16549_s2  ;;  %p16557_p1 = scmp.lt.s32.totalorder %s363_s20, %s363_s20 }
  0xd2   : > { %p16558_p6 = scmp.lt.s32.totalorder %s16556_s11, %s16549_s2 }
  0xd3   : > { %p16552_p4 = pnand %p16550_p5, %p21108_p13 }
  0xd4   : > { %p16559_p0 = por %p16558_p6, %p16557_p1 }
  0xd5   : > { %p16553_p9 = pneg %p16552_p4 }
  0xd7   : > { %p16560_p2 = pnand %p16559_p0, %p16553_p9 }
  0xd9   : > { %16563 = shalt.err (!%p16560_p2)
}
  0xda   : > { %14714 = dma.hbm_to_vmem [thread:$0]  (!%p21109_p8), %s20996_s9, 16, %s363_s20, [#allocation19]  }
  0xdb   : > { %s49_s4 = sadd.s32 1, %s16822_s22  ;;  %p21110_p13 = scmp.ne.s32.totalorder %s21093_s25, 0 }
  0xdc   : > { %s56_s19 = sadd.s32 1, %s16806_s18  ;;  %p63_p2 = scmp.ne.s32.totalorder %s16806_s18, %s16802_s17 }
  0xdd   : > { %s21259_s4 = smov (!%p21110_p13, %s49_s4), %s16822_s22  ;;  %s373_s12 = sand.u32 1, %s16806_s18  }
  0xde   : > { %p51_p10 = scmp.ge.s32.totalorder %s21259_s4, 2  ;;  %p21111_p7 = scmp.eq.s32.totalorder %s16826_s23, 0 }
  0xdf   : > { %p21112_p3 = scmp.eq.s32.totalorder %s16962_s24, 11  ;;  %s14657_s16 = smul.u32 192, %s373_s12 }
  0xe0   : > { %p65_p11 = por %p21111_p7, %p63_p2  ;;  %s21261_s4 = smov (%p51_p10, %s21259_s4), 0 }
  0xe1   : > { %p17209_p12 = por %p21112_p3, %p63_p2  ;;  %s53_s25 = ssub.s32 %s16822_s22, %s21261_s4 }
  0xe2   : > { %s14658_s6 = smul.u32 3072, %s16822_s22  ;;  %p54_p8 = scmp.eq.s32.totalorder %s53_s25, 0 }
  0xe3   : > { %s21113_s10 = scalar_select %p17209_p12, 1, 0 }
  0xe4   : > { %s21114_s0 = sld [smem:[#allocation58_spill]]  ;;  %s377_s15 = scalar_lea.vmem [#allocation3], %s14657_s16 }
  0xe5   : > { %s384_s1 = sshll.u32 %s377_s15, 4  ;;  %p21115_p5 = scmp.lt.s32.totalorder %s16826_s23, 12  ;;  %s17226_s1 = int_to_ptr.vmem [resolvable:$true] %s384_s1 }
  0xe6   : > { %s17224_s7 = scalar_select %p54_p8, %s16806_s18, %s56_s19  }
  0xe7   : > { %p17230_p4 = pnand %p21115_p5, %p65_p11  ;;  %s14661_s11 = smul.u32 1728, %s17046_s30 }
  0xe8   : > { %s17235_s26 = scalar_lea.sflag [#allocation4], %s373_s12 }
  0xe9   : > { %p16566_p1 = pneg %p17230_p4 }
  0xea   : > { %s17221_s13 = scalar_lea.hbm %s21114_s0, %s14658_s6  ;;  %s16569_s25 = scalar_lea.hbm %s21114_s0, 6144 }
  0xeb   : > { %s16564_s3 = scalar_lea.hbm %s17221_s13, 3072  ;;  %p16570_p13 = scmp.lt.u32.totalorder %s17221_s13, %s21114_s0 }
  0xec   : > { %p16565_p9 = scmp.ne.s32.totalorder %s17221_s13, %s16564_s3  ;;  %p16571_p2 = scmp.lt.u32.totalorder %s16569_s25, %s16564_s3 }
  0xed   : > { %p16573_p7 = scmp.lt.u32.totalorder %s16564_s3, %s17221_s13 }
  0xee   : > { %p16567_p6 = pnand %p16566_p1, %p16565_p9  ;;  %p16572_p10 = por %p16571_p2, %p16570_p13 }
  0xf0   : > { %p16568_p0 = pneg %p16567_p6  ;;  %p16574_p11 = por %p16573_p7, %p16572_p10 }
  0xf2   : > { %p16575_p3 = pnand %p16574_p11, %p16568_p0 }
  0xf4   : > { %16578 = shalt.err (!%p16575_p3)
}
  0xf5   : > { %s16579_s12 = scalar_lea.vmem %s17226_s1, 3072  ;;  %s16838_s20 = smov [#allocation3]  }
  0xf6   : > { %p16580_p8 = scmp.ne.s32.totalorder %s17226_s1, %s16579_s12  ;;  %s16584_s15 = sshll.u32 %s16838_s20, 4  ;;  %s16585_s15 = int_to_ptr.vmem [resolvable:$false] %s16584_s15 }
  0xf7   : > { %s16586_s19 = scalar_lea.vmem %s16585_s15, 6144  ;;  %p16587_p6 = scmp.lt.s32.totalorder %s17226_s1, %s16585_s15 }
  0xf8   : > { %p16582_p5 = pnand %p16580_p8, %p16566_p1  ;;  %p16588_p13 = scmp.lt.s32.totalorder %s16586_s19, %s16579_s12 }
  0xfa   : > { %p16583_p9 = pneg %p16582_p5  ;;  %p16589_p2 = por %p16588_p13, %p16587_p6 }
  0xfc   : > { %p16590_p10 = pnand %p16589_p2, %p16583_p9 }
  0xfe   : > { %16593 = shalt.err (!%p16590_p10)
}
  0xff   : > { %s16839_s3 = smov 384   ;;  %s16840_s16 = smov 24  }
 0x100   : > { %14718 = dma.hbm_to_vmem [thread:$0]  (!%p17230_p4), %s17221_s13, 3072, %s17226_s1, %s17235_s26, %s16839_s3, %s16839_s3, %s16840_s16  }
 0x101   : > { %s14662_s25 = smul.u32 27648, %s16818_s21  ;;  %s417_s6 = scalar_lea.vmem [#allocation8], %s14661_s11 }
 0x102   : > { %s424_s14 = sshll.u32 %s417_s6, 4  ;;  %s21117_s15 = sld [smem:[#allocation60_spill]]  ;;  %s17271_s14 = int_to_ptr.vmem [resolvable:$true] %s424_s14 }
 0x103   : > { %s14665_s5 = smul.u32 2304, %s17046_s30  ;;  %p21119_p0 = scmp.ne.s32.totalorder %s21102_s29, 0 }
 0x108   : > { %s21118_s0 = smov %s21117_s15  ;;  %s17269_s19 = scalar_lea.hbm %s21117_s15, %s14662_s25 }
 0x109   : > { %s16594_s8 = scalar_lea.hbm %s17269_s19, 27648  ;;  %s16599_s2 = scalar_lea.hbm %s21118_s0, 165888 }
 0x10a   : > { %p16595_p1 = scmp.ne.s32.totalorder %s17269_s19, %s16594_s8  ;;  %p16600_p11 = scmp.lt.u32.totalorder %s17269_s19, %s21118_s0 }
 0x10b   : > { %p16601_p3 = scmp.lt.u32.totalorder %s16599_s2, %s16594_s8  ;;  %p16603_p5 = scmp.lt.u32.totalorder %s16594_s8, %s17269_s19 }
 0x10c   : > { %p16597_p4 = pnand %p16595_p1, %p21119_p0 }
 0x10d   : > { %p16602_p8 = por %p16601_p3, %p16600_p11 }
 0x10e   : > { %p16598_p7 = pneg %p16597_p4 }
 0x10f   : > { %p16604_p9 = por %p16603_p5, %p16602_p8 }
 0x111   : > { %p16605_p6 = pnand %p16604_p9, %p16598_p7 }
 0x113   : > { %16608 = shalt.err (!%p16605_p6)
}
 0x114   : > { %s16609_s3 = scalar_lea.vmem %s17271_s14, 27648  ;;  %s16841_s16 = smov [#allocation8]  }
 0x115   : > { %p16610_p13 = scmp.ne.s32.totalorder %s17271_s14, %s16609_s3  ;;  %s16614_s25 = sshll.u32 %s16841_s16, 4  ;;  %s16615_s25 = int_to_ptr.vmem [resolvable:$false] %s16614_s25 }
 0x116   : > { %s16616_s6 = scalar_lea.vmem %s16615_s25, 55296  ;;  %p16617_p1 = scmp.lt.s32.totalorder %s17271_s14, %s16615_s25 }
 0x117   : > { %p16612_p2 = pnand %p16610_p13, %p21119_p0  ;;  %p16618_p4 = scmp.lt.s32.totalorder %s16616_s6, %s16609_s3 }
 0x119   : > { %p16613_p10 = pneg %p16612_p2  ;;  %p16619_p11 = por %p16618_p4, %p16617_p1 }
 0x11b   : > { %p16620_p3 = pnand %p16619_p11, %p16613_p10 }
 0x11d   : > { %16623 = shalt.err (!%p16620_p3)
}
 0x11e   : > { %s16842_s8 = smov 576   ;;  %s16843_s12 = smov 36  }
 0x11f   : > { %p21120_p7 = scmp.ne.s32.totalorder %s21100_s28, 0  ;;  %s21121_s20 = scalar_lea.sflag [#allocation7], %s17043_s27 }
 0x120   : > { %s14666_s15 = smul.u32 36864, %s16818_s21  ;;  %s459_s13 = scalar_lea.vmem [#allocation11], %s14665_s5 }
 0x121   : > { %14724 = dma.hbm_to_vmem [thread:$0]  (!%p21120_p7), %s17269_s19, 27648, %s17271_s14, %s21121_s20, %s16842_s8, %s16842_s8, %s16843_s12  }
 0x122   : > { %s466_s1 = sshll.u32 %s459_s13, 4  ;;  %s21122_s26 = sld [smem:[#allocation62_spill]]  ;;  %s17307_s1 = int_to_ptr.vmem [resolvable:$true] %s466_s1 }
 0x128   : > { %s17305_s3 = scalar_lea.hbm %s21122_s26, %s14666_s15  ;;  %s16629_s25 = scalar_lea.hbm %s21122_s26, 221184 }
 0x129   : > { %s16624_s16 = scalar_lea.hbm %s17305_s3, 36864  ;;  %p16630_p6 = scmp.lt.u32.totalorder %s17305_s3, %s21122_s26 }
 0x12a   : > { %p16625_p8 = scmp.ne.s32.totalorder %s17305_s3, %s16624_s16  ;;  %p16631_p13 = scmp.lt.u32.totalorder %s16629_s25, %s16624_s16 }
 0x12b   : > { %p16633_p10 = scmp.lt.u32.totalorder %s16624_s16, %s17305_s3 }
 0x12c   : > { %p16627_p5 = pnand %p16625_p8, %p21119_p0  ;;  %p16632_p2 = por %p16631_p13, %p16630_p6 }
 0x12e   : > { %p16628_p9 = pneg %p16627_p5  ;;  %p16634_p1 = por %p16633_p10, %p16632_p2 }
 0x130   : > { %p16635_p4 = pnand %p16634_p1, %p16628_p9 }
 0x132   : > { %16638 = shalt.err (!%p16635_p4)
}
 0x133   : > { %s16639_s12 = scalar_lea.vmem %s17307_s1, 36864  ;;  %s16844_s20 = smov [#allocation11]  }
 0x134   : > { %p16640_p11 = scmp.ne.s32.totalorder %s17307_s1, %s16639_s12  ;;  %s16644_s13 = sshll.u32 %s16844_s20, 4  ;;  %s16645_s13 = int_to_ptr.vmem [resolvable:$false] %s16644_s13 }
 0x135   : > { %s16646_s2 = scalar_lea.vmem %s16645_s13, 73728  ;;  %p16647_p5 = scmp.lt.s32.totalorder %s17307_s1, %s16645_s13 }
 0x136   : > { %p16642_p3 = pnand %p16640_p11, %p21119_p0  ;;  %p16648_p12 = scmp.lt.s32.totalorder %s16646_s2, %s16639_s12 }
 0x138   : > { %p16643_p8 = pneg %p16642_p3  ;;  %p16649_p6 = por %p16648_p12, %p16647_p5 }
 0x13a   : > { %p16650_p13 = pnand %p16649_p6, %p16643_p8 }
 0x13c   : > { %16653 = shalt.err (!%p16650_p13)
}
 0x13d   : > { %s16845_s11 = smov 768   ;;  %s16846_s16 = smov 48  }
 0x13e   : > { %s21123_s14 = scalar_lea.sflag [#allocation10], %s17043_s27  ;;  %s21124_s6 = sld [smem:[#allocation64_spill]] }
 0x13f   : > { %14730 = dma.hbm_to_vmem [thread:$0]  (!%p21120_p7), %s17305_s3, 36864, %s17307_s1, %s21123_s14, %s16845_s11, %s16845_s11, %s16846_s16  }
 0x140   : > { %s499_s12 = scalar_lea.vmem [#allocation14], %s14665_s5 }
 0x141   : > { %s506_s20 = sshll.u32 %s499_s12, 4  ;;  %s17341_s20 = int_to_ptr.vmem [resolvable:$true] %s506_s20 }
 0x144   : > { %s17337_s8 = scalar_lea.hbm %s21124_s6, %s14666_s15  ;;  %s16659_s2 = scalar_lea.hbm %s21124_s6, 221184 }
 0x145   : > { %s16654_s13 = scalar_lea.hbm %s17337_s8, 36864  ;;  %p16660_p10 = scmp.lt.u32.totalorder %s17337_s8, %s21124_s6 }
 0x146   : > { %p16655_p12 = scmp.ne.s32.totalorder %s17337_s8, %s16654_s13  ;;  %p16661_p1 = scmp.lt.u32.totalorder %s16659_s2, %s16654_s13 }
 0x147   : > { %p16663_p11 = scmp.lt.u32.totalorder %s16654_s13, %s17337_s8 }
 0x148   : > { %p16657_p9 = pnand %p16655_p12, %p21119_p0  ;;  %p16662_p4 = por %p16661_p1, %p16660_p10 }
 0x14a   : > { %p16658_p2 = pneg %p16657_p9  ;;  %p16664_p3 = por %p16663_p11, %p16662_p4 }
 0x14c   : > { %p16665_p8 = pnand %p16664_p3, %p16658_p2 }
 0x14e   : > { %16668 = shalt.err (!%p16665_p8)
}
 0x14f   : > { %s16669_s5 = scalar_lea.vmem %s17341_s20, 36864  ;;  %s16847_s30 = smov [#allocation14]  }
 0x150   : > { %p16670_p5 = scmp.ne.s32.totalorder %s17341_s20, %s16669_s5  ;;  %s16674_s16 = sshll.u32 %s16847_s30, 4  ;;  %s16675_s16 = int_to_ptr.vmem [resolvable:$false] %s16674_s16 }
 0x151   : > { %s16676_s14 = scalar_lea.vmem %s16675_s16, 73728  ;;  %p16677_p12 = scmp.lt.s32.totalorder %s17341_s20, %s16675_s16 }
 0x152   : > { %p16672_p6 = pnand %p16670_p5, %p21119_p0  ;;  %p16678_p9 = scmp.lt.s32.totalorder %s16676_s14, %s16669_s5 }
 0x154   : > { %p16673_p13 = pneg %p16672_p6  ;;  %p16679_p10 = por %p16678_p9, %p16677_p12 }
 0x156   : > { %p16680_p1 = pnand %p16679_p10, %p16673_p13 }
 0x158   : > { %16683 = shalt.err (!%p16680_p1)
}
 0x159   : > { %s21125_s19 = smov 12   ;;  %s21126_s25 = smov 192  }
 0x15a   : > { %s21127_s12 = scalar_lea.sflag [#allocation13], %s17043_s27  ;;  %s21128_s29 = sld [smem:[#allocation36_spill]] }
 0x15b   : > { %14736 = dma.hbm_to_vmem [thread:$0]  (!%p21120_p7), %s17337_s8, 36864, %s17341_s20, %s21127_s12, %s21126_s25, %s21126_s25, %s21125_s19  }
 0x160   : > { %p21129_p0 = scmp.ne.s32.totalorder %s21128_s29, 0 }
 0x162   : > { %518 = sbr.rel (%p21129_p0) target bundleno = 6532 (0x1984), region = 60 }
 0x169   : > { %s21130_s13 = sld [smem:[#allocation33_spill]]  ;;  %s17372_s1 = sand.u32 1, %s16802_s17  }
 0x16a   : > { %s14671_s3 = smul.u32 192, %s17372_s1  ;;  %s521_s2 = scalar_lea.sflag [#allocation4], %s17372_s1 }
 0x16c   : > { %s17376_s28 = scalar_lea.vmem [#allocation3], %s14671_s3 }
 0x16f   : > { %p21131_p2 = scmp.ne.s32.totalorder %s21130_s13, 0 }
 0x171   : > { %16757 = dma.done.wait (%p21131_p2), %s521_s2, 3072  }
 0x172   : > { %16759 = vsyncadd (%p21131_p2), %s521_s2, 4294964224  ;;  %s21132_s27 = sld [smem:[#allocation28_spill]]  ;;  %s529_s20 = sand.u32 1, %s16962_s24  }
 0x173   : > { %s21133_s8 = sld [smem:[#allocation34_spill]]  ;;  %s530_s5 = scalar_lea.sflag [#allocation7], %s529_s20 }
 0x178   : > { %s531_s15 = sand.u32 1, %s21132_s27  }
 0x179   : > { %s14672_s11 = smul.u32 24, %s531_s15  ;;  %p21134_p7 = scmp.ne.s32.totalorder %s21133_s8, 0 }
 0x17b   : > { %s17384_s30 = scalar_lea.vmem [#allocation6], %s14672_s11 }
 0x17c   : > { %16761 = dma.done.wait (%p21134_p7), %s530_s5, 28032  }
 0x17d   : > { %16763 = vsyncadd (%p21134_p7), %s530_s5, 4294939264  ;;  %s14673_s16 = smul.u32 1728, %s531_s15  ;;  %s548_s25 = scalar_lea.sflag [#allocation10], %s529_s20 }
 0x17e   : > { %s14674_s14 = smul.u32 576, %s531_s15 }
 0x17f   : > { %s17390_s19 = scalar_lea.vmem [#allocation8], %s14673_s16 }
 0x180   : > { %s17392_s12 = scalar_lea.vmem [#allocation9], %s14674_s14 }
 0x181   : > { %16765 = dma.done.wait (%p21134_p7), %s548_s25, 46080  }
 0x182   : > { %16767 = vsyncadd (%p21134_p7), %s548_s25, 4294921216  ;;  %s14675_s29 = smul.u32 2304, %s531_s15  ;;  %s566_s2 = scalar_lea.sflag [#allocation13], %s529_s20 }
 0x183   : > { %s14676_s13 = smul.u32 12, %s531_s15 }
 0x184   : > { %s17398_s3 = scalar_lea.vmem [#allocation11], %s14675_s29 }
 0x185   : > { %s17400_s27 = scalar_lea.vmem [#allocation12], %s14676_s13 }
 0x186   : > { %16769 = dma.done.wait (%p21134_p7), %s566_s2, 37056  }
 0x187   : > { %16771 = vsyncadd (%p21134_p7), %s566_s2, 4294930240  ;;  %s17406_s11 = scalar_lea.vmem [#allocation14], %s14675_s29  ;;  %p21135_p4 = scmp.eq.s32.totalorder %s16962_s24, 0 }
 0x189   : > { %16773 = dma.done.wait (%p21135_p4), [#allocation16], 3168   ;;  %p21136_p11 = pmov %p21135_p4 }
 0x18a   : > { %p21137_p3 = pmov %p21135_p4 }
 0x18b   : > { %16775 = vsyncadd (%p21136_p11), [#allocation16], 4294964128 }
 0x18c   : > { %16777 = dma.done.wait (%p21137_p3), [#allocation19], 16   ;;  %p21138_p8 = pmov %p21137_p3 }
 0x18d   : > { %s12563_s20 = sshll.u32 %s17372_s1, 6  ;;  %s21139_s8 = sld [smem:[#allocation31_spill]] }
 0x18e   : > { %16779 = vsyncadd (%p21138_p8), [#allocation19], 4294967280  ;;  %s17417_s15 = scalar_lea.vmem [#allocation20], %s12563_s20 }
 0x193   : > { %p12564_p5 = scmp.ne.s32.totalorder %s21139_s8, 0 }
 0x194   : > { %v662_v0 = vld [vmem:[%s17376_s28] sm:$0xff] (!%p12564_p5)  ;;  %v663_v1 = vld [vmem:[%s17376_s28 + $0x8] sm:$0xff] (!%p12564_p5)  ;;  %v664_v2 = vld [vmem:[%s17376_s28 + $0x10] sm:$0xff] (!%p12564_p5) }
 0x195   : > { %661 = sbr.rel (%p12564_p5) target bundleno = 417 (0x1a1), region = 104  ;;  %686 = vst [vmem:[#allocation2] sm:$0xff] (!%p12564_p5), %v662_v0  ;;  %687 = vst [vmem:[#allocation2 + $0x8] sm:$0xff] (!%p12564_p5), %v663_v1  ;;  %v665_v3 = vld [vmem:[%s17376_s28 + $0x18] sm:$0xff] (!%p12564_p5)  ;;  %v666_v4 = vld [vmem:[%s17376_s28 + $0x20] sm:$0xff] (!%p12564_p5) }
 0x196   : > { %688 = vst [vmem:[#allocation2 + $0x10] sm:$0xff] (!%p12564_p5), %v664_v2  ;;  %v667_v5 = vld [vmem:[%s17376_s28 + $0x28] sm:$0xff] (!%p12564_p5)  ;;  %689 = vst [vmem:[#allocation2 + $0x18] sm:$0xff] (!%p12564_p5), %v665_v3  ;;  %v668_v6 = vld [vmem:[%s17376_s28 + $0x30] sm:$0xff] (!%p12564_p5) }
 0x197   : > { %690 = vst [vmem:[#allocation2 + $0x20] sm:$0xff] (!%p12564_p5), %v666_v4  ;;  %691 = vst [vmem:[#allocation2 + $0x28] sm:$0xff] (!%p12564_p5), %v667_v5  ;;  %v669_v7 = vld [vmem:[%s17376_s28 + $0x38] sm:$0xff] (!%p12564_p5)  ;;  %v670_v8 = vld [vmem:[%s17376_s28 + $0x40] sm:$0xff] (!%p12564_p5) }
 0x198   : > { %692 = vst [vmem:[#allocation2 + $0x30] sm:$0xff] (!%p12564_p5), %v668_v6  ;;  %693 = vst [vmem:[#allocation2 + $0x38] sm:$0xff] (!%p12564_p5), %v669_v7  ;;  %v671_v9 = vld [vmem:[%s17376_s28 + $0x48] sm:$0xff] (!%p12564_p5)  ;;  %v672_v10 = vld [vmem:[%s17376_s28 + $0x50] sm:$0xff] (!%p12564_p5) }
 0x199   : > { %694 = vst [vmem:[#allocation2 + $0x40] sm:$0xff] (!%p12564_p5), %v670_v8  ;;  %v673_v11 = vld [vmem:[%s17376_s28 + $0x58] sm:$0xff] (!%p12564_p5)  ;;  %695 = vst [vmem:[#allocation2 + $0x48] sm:$0xff] (!%p12564_p5), %v671_v9  ;;  %v674_v12 = vld [vmem:[%s17376_s28 + $0x60] sm:$0xff] (!%p12564_p5) }
 0x19a   : > { %696 = vst [vmem:[#allocation2 + $0x50] sm:$0xff] (!%p12564_p5), %v672_v10  ;;  %697 = vst [vmem:[#allocation2 + $0x58] sm:$0xff] (!%p12564_p5), %v673_v11  ;;  %v675_v13 = vld [vmem:[%s17376_s28 + $0x68] sm:$0xff] (!%p12564_p5)  ;;  %v676_v14 = vld [vmem:[%s17376_s28 + $0x70] sm:$0xff] (!%p12564_p5) }
 0x19b   : > { %698 = vst [vmem:[#allocation2 + $0x60] sm:$0xff] (!%p12564_p5), %v674_v12  ;;  %699 = vst [vmem:[#allocation2 + $0x68] sm:$0xff] (!%p12564_p5), %v675_v13  ;;  %v677_v15 = vld [vmem:[%s17376_s28 + $0x78] sm:$0xff] (!%p12564_p5)  ;;  %v678_v16 = vld [vmem:[%s17376_s28 + $0x80] sm:$0xff] (!%p12564_p5) }
 0x19c   : > { %700 = vst [vmem:[#allocation2 + $0x70] sm:$0xff] %v676_v14  ;;  %v679_v17 = vld [vmem:[%s17376_s28 + $0x88] sm:$0xff]  ;;  %701 = vst [vmem:[#allocation2 + $0x78] sm:$0xff] %v677_v15  ;;  %v680_v18 = vld [vmem:[%s17376_s28 + $0x90] sm:$0xff] }
 0x19d   : > { %702 = vst [vmem:[#allocation2 + $0x80] sm:$0xff] %v678_v16  ;;  %703 = vst [vmem:[#allocation2 + $0x88] sm:$0xff] %v679_v17  ;;  %v681_v19 = vld [vmem:[%s17376_s28 + $0x98] sm:$0xff]  ;;  %v682_v20 = vld [vmem:[%s17376_s28 + $0xa0] sm:$0xff] }
 0x19e   : > { %704 = vst [vmem:[#allocation2 + $0x90] sm:$0xff] %v680_v18  ;;  %705 = vst [vmem:[#allocation2 + $0x98] sm:$0xff] %v681_v19  ;;  %v683_v21 = vld [vmem:[%s17376_s28 + $0xa8] sm:$0xff]  ;;  %v684_v22 = vld [vmem:[%s17376_s28 + $0xb0] sm:$0xff] }
 0x19f   : > { %706 = vst [vmem:[#allocation2 + $0xa0] sm:$0xff] %v682_v20  ;;  %v685_v23 = vld [vmem:[%s17376_s28 + $0xb8] sm:$0xff]  ;;  %707 = vst [vmem:[#allocation2 + $0xa8] sm:$0xff] %v683_v21 }
 0x1a0   : > { %708 = vst [vmem:[#allocation2 + $0xb0] sm:$0xff] %v684_v22  ;;  %709 = vst [vmem:[#allocation2 + $0xb8] sm:$0xff] %v685_v23 }
 0x1a1 PF: > { %v17444_v24 = vld [vmem:[#allocation2] sm:$0xff]  ;;  %v17446_v25 = vld [vmem:[#allocation2 + $0x8] sm:$0xff]  ;;  %v14854_v0 = vld [vmem:[%s17390_s19 + $0x4] ss:$36 sps:$4 sm:$0xff]   ;;  %vm3103_vm0 = vcmask 523264   ;;  %s16849_s24 = smov 64  }
 0x1a2   : > { %v17448_v26 = vld [vmem:[#allocation2 + $0x10] sm:$0xff]  ;;  %v737_v27 = vadd.f32 %v17446_v25, %v17444_v24  ;;  %v716_v32 = vld [vmem:[#allocation2 + $0x18] sm:$0xff]  ;;  %2334 = vmatprep.subr.bf16.mxu0 %v14854_v0  ;;  %v14860_v4 = vld [vmem:[%s17390_s19 + $0x94] ss:$36 sps:$4 sm:$0xff]   ;;  %s21235_s28 = sld [smem:[#allocation31_spill]] }
 0x1a3   : > { %v717_v33 = vld [vmem:[#allocation2 + $0x20] sm:$0xff]  ;;  %v718_v34 = vld [vmem:[#allocation2 + $0x28] sm:$0xff]  ;;  %v14856_v1 = vld [vmem:[%s17390_s19] ss:$36 sps:$4 sm:$0xff]  }
 0x1a4   : > { %v17452_v28 = vld [vmem:[#allocation2 + $0x30] sm:$0xff]  ;;  %v17454_v29 = vld [vmem:[#allocation2 + $0x38] sm:$0xff]  ;;  %v738_v35 = vadd.f32 %v737_v27, %v17448_v26  ;;  %v741_v36 = vadd.f32 %v717_v33, %v716_v32  ;;  %v729_v47 = vld [vmem:[#allocation2 + $0x80] sm:$0xff]  ;;  %2335 = vmatpush1.bf16.msra.mxu0 %v14856_v1 }
 0x1a5   : > { %v17456_v30 = vld [vmem:[#allocation2 + $0x40] sm:$0xff]  ;;  %v745_v31 = vadd.f32 %v17454_v29, %v17452_v28  ;;  %v722_v37 = vld [vmem:[#allocation2 + $0x48] sm:$0xff]  ;;  %v731_v51 = vld [vmem:[#allocation2 + $0x90] sm:$0xff] }
 0x1a6   : > { %v723_v38 = vld [vmem:[#allocation2 + $0x50] sm:$0xff]  ;;  %v724_v39 = vld [vmem:[#allocation2 + $0x58] sm:$0xff]  ;;  %739 = vadd.xlane.f32.xlu0 %v738_v35  ;;  %v742_v44 = vadd.f32 %v741_v36, %v718_v34  ;;  %v730_v53 = vld [vmem:[#allocation2 + $0x88] sm:$0xff] }
 0x1a7   : > { %v746_v40 = vadd.f32 %v745_v31, %v17456_v30  ;;  %v749_v41 = vadd.f32 %v723_v38, %v722_v37  ;;  %v725_v42 = vld [vmem:[#allocation2 + $0x60] sm:$0xff]  ;;  %v726_v43 = vld [vmem:[#allocation2 + $0x68] sm:$0xff]  ;;  %v732_v52 = vld [vmem:[#allocation2 + $0x98] sm:$0xff] }
 0x1a8   : > { %v753_v45 = vadd.f32 %v726_v43, %v725_v42  ;;  %v728_v46 = vld [vmem:[#allocation2 + $0x78] sm:$0xff]  ;;  %v727_v49 = vld [vmem:[#allocation2 + $0x70] sm:$0xff]  ;;  %v734_v54 = vld [vmem:[#allocation2 + $0xa8] sm:$0xff]  ;;  %v761_v58 = vadd.f32 %v732_v52, %v731_v51  ;;  %p13477_p6 = scmp.ne.s32.totalorder %s21235_s28, 5 }
 0x1a9   : > { %747 = vadd.xlane.f32.xlu1 %v746_v40  ;;  %v750_v48 = vadd.f32 %v749_v41, %v724_v39  ;;  %v757_v50 = vadd.f32 %v729_v47, %v728_v46  ;;  %v735_v55 = vld [vmem:[#allocation2 + $0xb0] sm:$0xff]  ;;  %v733_v56 = vld [vmem:[#allocation2 + $0xa0] sm:$0xff]  ;;  %v736_v59 = vld [vmem:[#allocation2 + $0xb8] sm:$0xff] }
 0x1aa   : > { %743 = vadd.xlane.f32.xlu0 %v742_v44  ;;  %v754_v57 = vadd.f32 %v753_v45, %v727_v49  ;;  %v765_v61 = vadd.f32 %v735_v55, %v734_v54  ;;  %v762_v62 = vadd.f32 %v761_v58, %v733_v56  ;;  %v14857_v2 = vld [vmem:[%s17390_s19 + $0x4c] ss:$36 sps:$4 sm:$0xff]   ;;  %v14884_v8 = vld [vmem:[%s17390_s19 + $0x4d4] ss:$36 sps:$4 sm:$0xff]   ;;  %v14863_v9 = vld [vmem:[%s17390_s19 + $0xdc] ss:$36 sps:$4 sm:$0xff]  }
 0x1ab   : > { %v758_v60 = vadd.f32 %v757_v50, %v730_v53  ;;  %v14859_v3 = vld [vmem:[%s17390_s19 + $0x48] ss:$36 sps:$4 sm:$0xff]   ;;  %2336 = vmatprep.subr.bf16.mxu0 %v14857_v2  ;;  %v14862_v6 = vld [vmem:[%s17390_s19 + $0x90] ss:$36 sps:$4 sm:$0xff]   ;;  %v14865_v11 = vld [vmem:[%s17390_s19 + $0xd8] ss:$36 sps:$4 sm:$0xff]  }
 0x1ac   : > { %v766_v63 = vadd.f32 %v765_v61, %v736_v59  ;;  %v14878_v5 = vld [vmem:[%s17390_s19 + $0x48c] ss:$36 sps:$4 sm:$0xff]   ;;  %2337 = vmatpush1.bf16.msra.mxu0 %v14859_v3  ;;  %v14866_v12 = vld [vmem:[%s17390_s19 + $0x124] ss:$36 sps:$4 sm:$0xff]   ;;  %v14872_v16 = vld [vmem:[%s17390_s19 + $0x1b4] ss:$36 sps:$4 sm:$0xff]  }
 0x1ad   : > { %751 = vadd.xlane.f32.xlu1 %v750_v48  ;;  %v14882_v7 = vld [vmem:[%s17390_s19 + $0x488] ss:$36 sps:$4 sm:$0xff]   ;;  %2553 = vmatprep.subr.bf16.mxu1 %v14878_v5  ;;  %v14888_v10 = vld [vmem:[%s17390_s19 + $0x4d0] ss:$36 sps:$4 sm:$0xff]   ;;  %v14868_v13 = vld [vmem:[%s17390_s19 + $0x120] ss:$36 sps:$4 sm:$0xff]  }
 0x1ae   : > { %755 = vadd.xlane.f32.xlu0 %v754_v57  ;;  %2338 = vmatprep.subr.bf16.mxu0 %v14860_v4  ;;  %v14869_v14 = vld [vmem:[%s17390_s19 + $0x16c] ss:$36 sps:$4 sm:$0xff]   ;;  %v14875_v18 = vld [vmem:[%s17390_s19 + $0x1fc] ss:$36 sps:$4 sm:$0xff]   ;;  %v14880_v20 = vld [vmem:[%s17390_s19 + $0x244] ss:$36 sps:$4 sm:$0xff]  }
 0x1af   : > { %2554 = vmatpush1.bf16.msra.mxu1 %v14882_v7  ;;  %v14871_v15 = vld [vmem:[%s17390_s19 + $0x168] ss:$36 sps:$4 sm:$0xff]   ;;  %v14874_v17 = vld [vmem:[%s17390_s19 + $0x1b0] ss:$36 sps:$4 sm:$0xff]   ;;  %v14877_v19 = vld [vmem:[%s17390_s19 + $0x1f8] ss:$36 sps:$4 sm:$0xff]  }
 0x1b0   : > { %2555 = vmatprep.subr.bf16.mxu1 %v14884_v8  ;;  %2339 = vmatpush1.bf16.msra.mxu0 %v14862_v6  ;;  %v14883_v21 = vld [vmem:[%s17390_s19 + $0x240] ss:$36 sps:$4 sm:$0xff]   ;;  %v14886_v22 = vld [vmem:[%s17390_s19 + $0x28c] ss:$36 sps:$4 sm:$0xff]   ;;  %v16304_v48 = vld [vmem:[#allocation2 + $0x28] sm:$0xff] }
 0x1b1   : > { %759 = vadd.xlane.f32.xlu1 %v758_v60  ;;  %2340 = vmatprep.subr.bf16.mxu0 %v14863_v9  ;;  %v16302_v43 = vld [vmem:[#allocation2 + $0x18] sm:$0xff]  ;;  %v16303_v45 = vld [vmem:[#allocation2 + $0x20] sm:$0xff]  ;;  %v16305_v50 = vld [vmem:[#allocation2 + $0x48] sm:$0xff] }
 0x1b2   : > { %763 = vadd.xlane.f32.xlu0 %v762_v62  ;;  %v16306_v52 = vld [vmem:[#allocation2 + $0x50] sm:$0xff]  ;;  %v16307_v56 = vld [vmem:[#allocation2 + $0x58] sm:$0xff]  ;;  %v16308_v3 = vld [vmem:[#allocation2 + $0x60] sm:$0xff] }
 0x1b3   : > { %2556 = vmatpush1.bf16.msra.mxu1 %v14888_v10  ;;  %v16309_v5 = vld [vmem:[#allocation2 + $0x68] sm:$0xff]  ;;  %v16310_v9 = vld [vmem:[#allocation2 + $0x78] sm:$0xff] }
 0x1b4   : > { %2341 = vmatpush1.bf16.msra.mxu0 %v14865_v11  ;;  %v16311_v11 = vld [vmem:[#allocation2 + $0x80] sm:$0xff] }
 0x1b5   : > { %767 = vadd.xlane.f32.xlu1 %v766_v63  ;;  %2342 = vmatprep.subr.bf16.mxu0 %v14866_v12 }
 0x1b8   : > { %2343 = vmatpush1.bf16.msra.mxu0 %v14868_v13 }
 0x1b9   : > { %2344 = vmatprep.subr.bf16.mxu0 %v14869_v14 }
 0x1bc   : > { %2345 = vmatpush1.bf16.msra.mxu0 %v14871_v15  ;;  %v16312_v15 = vld [vmem:[#allocation2 + $0x70] sm:$0xff] }
 0x1bd   : > { %2346 = vmatprep.subr.bf16.mxu0 %v14872_v16 }
 0x1c0   : > { %2347 = vmatpush1.bf16.msra.mxu0 %v14874_v17 }
 0x1c1   : > { %2348 = vmatprep.subr.bf16.mxu0 %v14875_v18 }
 0x1c4   : > { %2349 = vmatpush1.bf16.msra.mxu0 %v14877_v19 }
 0x1c5   : > { %2350 = vmatprep.subr.bf16.mxu0 %v14880_v20 }
 0x1c8   : > { %2351 = vmatpush1.bf16.msra.mxu0 %v14883_v21 }
 0x1c9   : > { %2352 = vmatprep.subr.bf16.mxu0 %v14886_v22 }
 0x233   : > { %v740_v23 = vpop.xlane.xlu0 %739 }
 0x234   : > { %v770_v27 = vmul.f32 0.0026041667, %v740_v23 }
 0x236   : > { %v748_v31 = vpop.xlane.xlu1 %747  ;;  %v17486_v33 = vsub.f32 %v17444_v24, %v770_v27  ;;  %v17489_v34 = vsub.f32 %v17446_v25, %v770_v27  ;;  %v17492_v35 = vsub.f32 %v17448_v26, %v770_v27 }
 0x237   : > { %v772_v32 = vmul.f32 0.0026041667, %v748_v31  ;;  %v744_v38 = vpop.xlane.xlu0 %743  ;;  %v16313_v31 = vld [vmem:[#allocation2 + $0x88] sm:$0xff] }
 0x238   : > { %v771_v40 = vmul.f32 0.0026041667, %v744_v38  ;;  %v802_v24 = vmul.f32 %v17486_v33, %v17486_v33  ;;  %v803_v25 = vmul.f32 %v17489_v34, %v17489_v34  ;;  %v804_v26 = vmul.f32 %v17492_v35, %v17492_v35  ;;  %v16314_v38 = vld [vmem:[#allocation2 + $0x90] sm:$0xff] }
 0x239   : > { %v17495_v36 = vsub.f32 %v17452_v28, %v772_v32  ;;  %v17498_v37 = vsub.f32 %v17454_v29, %v772_v32  ;;  %v17501_v39 = vsub.f32 %v17456_v30, %v772_v32 }
 0x23a   : > { %v752_v41 = vpop.xlane.xlu1 %751  ;;  %v17515_v44 = vsub.f32 %v16302_v43, %v771_v40  ;;  %v17517_v46 = vsub.f32 %v16303_v45, %v771_v40  ;;  %v826_v47 = vadd.f32 %v803_v25, %v802_v24  ;;  %v17519_v49 = vsub.f32 %v16304_v48, %v771_v40  ;;  %v16318_v48 = vld [vmem:[#allocation2 + $0xa0] sm:$0xff] }
 0x23b   : > { %v773_v28 = vmul.f32 0.0026041667, %v752_v41  ;;  %v808_v29 = vmul.f32 %v17495_v36, %v17495_v36  ;;  %v809_v42 = vmul.f32 %v17498_v37, %v17498_v37  ;;  %v810_v30 = vmul.f32 %v17501_v39, %v17501_v39  ;;  %v756_v54 = vpop.xlane.xlu0 %755  ;;  %v16315_v41 = vld [vmem:[#allocation2 + $0x98] sm:$0xff] }
 0x23c   : > { %v774_v58 = vmul.f32 0.0026041667, %v756_v54  ;;  %v827_v59 = vadd.f32 %v826_v47, %v804_v26  ;;  %v805_v61 = vmul.f32 %v17515_v44, %v17515_v44  ;;  %v806_v62 = vmul.f32 %v17517_v46, %v17517_v46  ;;  %v16316_v26 = vld [vmem:[#allocation2 + $0xa8] sm:$0xff] }
 0x23d   : > { %v17521_v51 = vsub.f32 %v16305_v50, %v773_v28  ;;  %v17523_v53 = vsub.f32 %v16306_v52, %v773_v28  ;;  %v834_v55 = vadd.f32 %v809_v42, %v808_v29  ;;  %v17525_v57 = vsub.f32 %v16307_v56, %v773_v28  ;;  %v16317_v29 = vld [vmem:[#allocation2 + $0xb0] sm:$0xff]  ;;  %v16319_v56 = vld [vmem:[#allocation2 + $0xb8] sm:$0xff] }
 0x23e   : > { %v760_v60 = vpop.xlane.xlu1 %759  ;;  %v807_v1 = vmul.f32 %v17519_v49, %v17519_v49  ;;  %v17535_v4 = vsub.f32 %v16308_v3, %v774_v58  ;;  %v17537_v6 = vsub.f32 %v16309_v5, %v774_v58  ;;  %828 = vadd.xlane.f32.xlu0 %v827_v59  ;;  %v830_v7 = vadd.f32 %v806_v62, %v805_v61 }
 0x23f   : > { %v775_v63 = vmul.f32 0.0026041667, %v760_v60  ;;  %v835_v0 = vadd.f32 %v834_v55, %v810_v30  ;;  %v811_v2 = vmul.f32 %v17521_v51, %v17521_v51  ;;  %v812_v8 = vmul.f32 %v17523_v53, %v17523_v53  ;;  %v764_v13 = vpop.xlane.xlu0 %763 }
 0x240   : > { %v813_v14 = vmul.f32 %v17525_v57, %v17525_v57  ;;  %v17547_v16 = vsub.f32 %v16312_v15, %v774_v58  ;;  %v776_v17 = vmul.f32 0.0026041667, %v764_v13  ;;  %v831_v18 = vadd.f32 %v830_v7, %v807_v1  ;;  %v14889_v7 = vld [vmem:[%s17390_s19 + $0x288] ss:$36 sps:$4 sm:$0xff]   ;;  %v14895_v13 = vld [vmem:[%s17390_s19 + $0x2d0] ss:$36 sps:$4 sm:$0xff]  }
 0x241   : > { %v17541_v10 = vsub.f32 %v16310_v9, %v775_v63  ;;  %v17543_v12 = vsub.f32 %v16311_v11, %v775_v63  ;;  %v838_v20 = vadd.f32 %v812_v8, %v811_v2  ;;  %v814_v21 = vmul.f32 %v17535_v4, %v17535_v4  ;;  %2353 = vmatpush1.bf16.msra.mxu0 %v14889_v7  ;;  %v14890_v8 = vld [vmem:[%s17390_s19 + $0x51c] ss:$36 sps:$4 sm:$0xff]   ;;  %v14892_v9 = vld [vmem:[%s17390_s19 + $0x2d4] ss:$36 sps:$4 sm:$0xff]  }
 0x242   : > { %v768_v19 = vpop.xlane.xlu1 %767  ;;  %v815_v23 = vmul.f32 %v17537_v6, %v17537_v6  ;;  %v816_v27 = vmul.f32 %v17547_v16, %v17547_v16  ;;  %v17555_v32 = vsub.f32 %v16313_v31, %v775_v63  ;;  %v17557_v40 = vsub.f32 %v16314_v38, %v776_v17  ;;  %836 = vadd.xlane.f32.xlu0 %v835_v0  ;;  %v14894_v11 = vld [vmem:[%s17390_s19 + $0x518] ss:$36 sps:$4 sm:$0xff]   ;;  %v14912_v31 = vld [vmem:[%s17390_s19 + $0x5f0] ss:$36 sps:$4 sm:$0xff]   ;;  %v14913_v38 = vld [vmem:[%s17390_s19 + $0x3a8] ss:$36 sps:$4 sm:$0xff]  }
 0x243   : > { %v777_v22 = vmul.f32 0.0026041667, %v768_v19  ;;  %v17559_v24 = vsub.f32 %v16315_v41, %v776_v17  ;;  %832 = vadd.xlane.f32.xlu1 %v831_v18  ;;  %v839_v25 = vadd.f32 %v838_v20, %v813_v14  ;;  %v817_v43 = vmul.f32 %v17541_v10, %v17541_v10  ;;  %2557 = vmatprep.subr.bf16.mxu1 %v14890_v8  ;;  %v14896_v14 = vld [vmem:[%s17390_s19 + $0x564] ss:$36 sps:$4 sm:$0xff]   ;;  %v14898_v15 = vld [vmem:[%s17390_s19 + $0x31c] ss:$36 sps:$4 sm:$0xff]  }
 0x244   : > { %v842_v30 = vadd.f32 %v815_v23, %v814_v21  ;;  %v818_v45 = vmul.f32 %v17543_v12, %v17543_v12  ;;  %v819_v47 = vmul.f32 %v17555_v32, %v17555_v32  ;;  %v17571_v50 = vsub.f32 %v16318_v48, %v776_v17  ;;  %2354 = vmatprep.subr.bf16.mxu0 %v14892_v9  ;;  %v14900_v17 = vld [vmem:[%s17390_s19 + $0x560] ss:$36 sps:$4 sm:$0xff]   ;;  %v14901_v18 = vld [vmem:[%s17390_s19 + $0x318] ss:$36 sps:$4 sm:$0xff]   ;;  %v14902_v19 = vld [vmem:[%s17390_s19 + $0x5ac] ss:$36 sps:$4 sm:$0xff]  }
 0x245   : > { %v17561_v28 = vsub.f32 %v16316_v26, %v777_v22  ;;  %v17563_v42 = vsub.f32 %v16317_v29, %v777_v22  ;;  %v820_v52 = vmul.f32 %v17557_v40, %v17557_v40  ;;  %v821_v55 = vmul.f32 %v17559_v24, %v17559_v24  ;;  %2558 = vmatpush1.bf16.msra.mxu1 %v14894_v11  ;;  %v14904_v20 = vld [vmem:[%s17390_s19 + $0x364] ss:$36 sps:$4 sm:$0xff]   ;;  %v14908_v23 = vld [vmem:[%s17390_s19 + $0x5f4] ss:$36 sps:$4 sm:$0xff]   ;;  %v14914_v41 = vld [vmem:[%s17390_s19 + $0x63c] ss:$36 sps:$4 sm:$0xff]  }
 0x246   : > { %v843_v54 = vadd.f32 %v842_v30, %v816_v27  ;;  %v17577_v58 = vsub.f32 %v16319_v56, %v777_v22  ;;  %v846_v60 = vadd.f32 %v818_v45, %v817_v43  ;;  %v822_v61 = vmul.f32 %v17571_v50, %v17571_v50  ;;  %2355 = vmatpush1.bf16.msra.mxu0 %v14895_v13  ;;  %v14906_v21 = vld [vmem:[%s17390_s19 + $0x5a8] ss:$36 sps:$4 sm:$0xff]   ;;  %v14907_v22 = vld [vmem:[%s17390_s19 + $0x360] ss:$36 sps:$4 sm:$0xff]   ;;  %v14918_v26 = vld [vmem:[%s17390_s19 + $0x638] ss:$36 sps:$4 sm:$0xff]  }
 0x247   : > { %v823_v59 = vmul.f32 %v17561_v28, %v17561_v28  ;;  %840 = vadd.xlane.f32.xlu1 %v839_v25  ;;  %v824_v62 = vmul.f32 %v17563_v42, %v17563_v42  ;;  %v850_v63 = vadd.f32 %v821_v55, %v820_v52  ;;  %2559 = vmatprep.subr.bf16.mxu1 %v14896_v14  ;;  %v14910_v27 = vld [vmem:[%s17390_s19 + $0x3ac] ss:$36 sps:$4 sm:$0xff]   ;;  %v14916_v25 = vld [vmem:[%s17390_s19 + $0x3f4] ss:$36 sps:$4 sm:$0xff]   ;;  %v14920_v30 = vld [vmem:[%s17390_s19 + $0x684] ss:$36 sps:$4 sm:$0xff]   ;;  %v906_v56 = vlaneseq }
 0x248   : > { %844 = vadd.xlane.f32.xlu0 %v843_v54  ;;  %v825_v0 = vmul.f32 %v17577_v58, %v17577_v58  ;;  %v847_v1 = vadd.f32 %v846_v60, %v819_v47  ;;  %2356 = vmatprep.subr.bf16.mxu0 %v14898_v15  ;;  %v14919_v29 = vld [vmem:[%s17390_s19 + $0x3f0] ss:$36 sps:$4 sm:$0xff]   ;;  %v14922_v43 = vld [vmem:[%s17390_s19 + $0x43c] ss:$36 sps:$4 sm:$0xff]   ;;  %v21031_v52 = vmov 0  }
 0x249   : > { %v854_v2 = vadd.f32 %v824_v62, %v823_v59  ;;  %v851_v3 = vadd.f32 %v850_v63, %v822_v61  ;;  %2560 = vmatpush1.bf16.msra.mxu1 %v14900_v17  ;;  %v14924_v45 = vld [vmem:[%s17390_s19 + $0x680] ss:$36 sps:$4 sm:$0xff]   ;;  %v14925_v47 = vld [vmem:[%s17390_s19 + $0x438] ss:$36 sps:$4 sm:$0xff]   ;;  %2585 = vmatprep.mubr.bf16.mxu1 %v21031_v52  ;;  %v17616_v63 = vshrl.u32 %v906_v56, 7 }
 0x24a   : > { %2357 = vmatpush1.bf16.msra.mxu0 %v14901_v18  ;;  %2561 = vmatprep.subr.bf16.mxu1 %v14902_v19  ;;  %v14928_v48 = vld [vmem:[%s17390_s19 + $0x1c] ss:$36 sps:$4 sm:$0xff]   ;;  %v14931_v54 = vld [vmem:[%s17390_s19 + $0x484] ss:$36 sps:$4 sm:$0xff]  }
 0x24b   : > { %848 = vadd.xlane.f32.xlu1 %v847_v1  ;;  %v855_v5 = vadd.f32 %v854_v2, %v825_v0  ;;  %2358 = vmatprep.subr.bf16.mxu0 %v14904_v20  ;;  %21140 = vst [vmem:[#allocation39_spill] sm:$0xff] %v17616_v63  ;;  %v17619_v7 = vsub.s32 0, %v17616_v63  ;;  %v711_v11 = vld [vmem:[%s17384_s30 + $0x8] sm:$0x3f]  ;;  %v712_v13 = vld [vmem:[%s17384_s30 + $0x10] sm:$0x3f] }
 0x24c   : > { %852 = vadd.xlane.f32.xlu0 %v851_v3 }
 0x24d   : > { %2562 = vmatpush1.bf16.msra.mxu1 %v14906_v21  ;;  %21141 = vst [vmem:[#allocation40_spill] sm:$0xff] %v17619_v7  ;;  %v17624_v21 = vsub.s32 1, %v17616_v63 }
 0x24e   : > { %2359 = vmatpush1.bf16.msra.mxu0 %v14907_v22  ;;  %2563 = vmatprep.subr.bf16.mxu1 %v14908_v23  ;;  %v17627_v23 = vrot.slane %v711_v11, %v17619_v7 }
 0x24f   : > { %856 = vadd.xlane.f32.xlu1 %v855_v5  ;;  %2360 = vmatprep.subr.bf16.mxu0 %v14910_v27  ;;  %21142 = vst [vmem:[#allocation41_spill] sm:$0xff] %v17624_v21  ;;  %v17630_v27 = vrot.slane %v712_v13, %v17619_v7 }
 0x251   : > { %2564 = vmatpush1.bf16.msra.mxu1 %v14912_v31  ;;  %v710_v31 = vld [vmem:[%s17384_s30] sm:$0x3f] }
 0x252   : > { %2361 = vmatpush1.bf16.msra.mxu0 %v14913_v38  ;;  %2565 = vmatprep.subr.bf16.mxu1 %v14914_v41 }
 0x253   : > { %2362 = vmatprep.subr.bf16.mxu0 %v14916_v25 }
 0x255   : > { %2566 = vmatpush1.bf16.msra.mxu1 %v14918_v26 }
 0x256   : > { %2363 = vmatpush1.bf16.msra.mxu0 %v14919_v29  ;;  %2567 = vmatprep.subr.bf16.mxu1 %v14920_v30 }
 0x257   : > { %2364 = vmatprep.subr.bf16.mxu0 %v14922_v43 }
 0x259   : > { %2568 = vmatpush1.bf16.msra.mxu1 %v14924_v45 }
 0x25a   : > { %2365 = vmatpush1.bf16.msra.mxu0 %v14925_v47  ;;  %2772 = vmatprep.subr.bf16.mxu1 %v14928_v48  ;;  %v17637_v47 = vrot.slane %v710_v31, %v17619_v7 }
 0x25b   : > { %2407 = vmatprep.subr.bf16.mxu0 %v14931_v54  ;;  %v17641_v54 = vrot.slane %v711_v11, %v17624_v21 }
 0x2cb   : > { %v829_v55 = vpop.xlane.xlu0 %828 }
 0x2cc   : > { %v858_v59 = vmul.f32 0.0026041667, %v829_v55 }
 0x2ce   : > { %v866_v60 = vadd.f32 1e-05, %v858_v59  ;;  %v17645_v59 = vrot.slane %v712_v13, %v17624_v21 }
 0x2cf   : > { %v837_v62 = vpop.xlane.xlu0 %836 }
 0x2d0   : > { %v833_v61 = vpop.xlane.xlu1 %832  ;;  %16078 = vrsqrt.f32 %v866_v60  ;;  %v860_v1 = vmul.f32 0.0026041667, %v837_v62  ;;  %v17650_v62 = vrot.slane %v710_v31, %v17624_v21 }
 0x2d1   : > { %v859_v0 = vmul.f32 0.0026041667, %v833_v61 }
 0x2d2   : > { %v868_v3 = vadd.f32 1e-05, %v860_v1 }
 0x2d3   : > { %v867_v2 = vadd.f32 1e-05, %v859_v0 }
 0x2d4   : > { %v841_v5 = vpop.xlane.xlu1 %840 }
 0x2d5   : > { %16080 = vrsqrt.f32 %v867_v2  ;;  %v861_v8 = vmul.f32 0.0026041667, %v841_v5  ;;  %v845_v9 = vpop.xlane.xlu0 %844 }
 0x2d6   : > { %16082 = vrsqrt.f32 %v868_v3  ;;  %v862_v14 = vmul.f32 0.0026041667, %v845_v9  ;;  %v14926_v9 = vld [vmem:[%s17390_s19 + $0x18] ss:$36 sps:$4 sm:$0xff]  }
 0x2d7   : > { %v869_v15 = vadd.f32 1e-05, %v861_v8 }
 0x2d8   : > { %v870_v17 = vadd.f32 1e-05, %v862_v14  ;;  %v849_v18 = vpop.xlane.xlu1 %848 }
 0x2d9   : > { %16084 = vrsqrt.f32 %v869_v15  ;;  %v863_v19 = vmul.f32 0.0026041667, %v849_v18  ;;  %v853_v20 = vpop.xlane.xlu0 %852  ;;  %v14929_v15 = vld [vmem:[%s17390_s19 + $0x480] ss:$36 sps:$4 sm:$0xff]  }
 0x2da   : > { %v864_v22 = vmul.f32 0.0026041667, %v853_v20  ;;  %v16079_v38 = vpop.eup %16078  ;;  %16086 = vrsqrt.f32 %v870_v17  ;;  %v14934_v18 = vld [vmem:[%s17390_s19 + $0x64] ss:$36 sps:$4 sm:$0xff]  }
 0x2db   : > { %v871_v41 = vadd.f32 1e-05, %v863_v19  ;;  %v883_v29 = vmul.f32 %v16079_v38, %v17489_v34  ;;  %v884_v30 = vmul.f32 %v16079_v38, %v17492_v35  ;;  %v882_v45 = vmul.f32 %v16079_v38, %v17486_v33 }
 0x2dc   : > { %v872_v25 = vadd.f32 1e-05, %v864_v22  ;;  %v857_v26 = vpop.xlane.xlu1 %856 }
 0x2dd   : > { %16088 = vrsqrt.f32 %v871_v41  ;;  %v865_v43 = vmul.f32 0.0026041667, %v857_v26  ;;  %v919_v48 = vmul.f32 %v17627_v23, %v883_v29  ;;  %v920_v55 = vmul.f32 %v17630_v27, %v884_v30 }
 0x2de   : > { %16090 = vrsqrt.f32 %v872_v25  ;;  %v918_v1 = vmul.f32 %v17637_v47, %v882_v45 }
 0x2df   : > { %v16081_v34 = vpop.eup %16080  ;;  %v873_v35 = vadd.f32 1e-05, %v865_v43  ;;  %v955_v5 = vadd.f32 %v17641_v54, %v919_v48 }
 0x2e0   : > { %v16083_v60 = vpop.eup %16082  ;;  %v886_v33 = vmul.f32 %v16081_v34, %v17517_v46  ;;  %v887_v61 = vmul.f32 %v16081_v34, %v17519_v49  ;;  %v885_v0 = vmul.f32 %v16081_v34, %v17515_v44  ;;  %v956_v49 = vadd.f32 %v17645_v59, %v920_v55  ;;  %v14935_v55 = vld [vmem:[%s17390_s19 + $0x4c8] ss:$36 sps:$4 sm:$0xff]  }
 0x2e1   : > { %16092 = vrsqrt.f32 %v873_v35  ;;  %v889_v2 = vmul.f32 %v16083_v60, %v17498_v37  ;;  %v890_v13 = vmul.f32 %v16083_v60, %v17501_v39  ;;  %v888_v14 = vmul.f32 %v16083_v60, %v17495_v36  ;;  %v14937_v39 = vld [vmem:[%s17390_s19 + $0x4cc] ss:$36 sps:$4 sm:$0xff]  }
 0x2e2   : > { %v922_v3 = vmul.f32 %v17627_v23, %v886_v33  ;;  %v923_v46 = vmul.f32 %v17630_v27, %v887_v61  ;;  %v921_v11 = vmul.f32 %v17637_v47, %v885_v0  ;;  %v954_v31 = vadd.f32 %v17650_v62, %v918_v1  ;;  %v14940_v1 = vld [vmem:[%s17390_s19 + $0xac] ss:$36 sps:$4 sm:$0xff]  }
 0x2e3   : > { %v16085_v8 = vpop.eup %16084  ;;  %v925_v44 = vmul.f32 %v17627_v23, %v889_v2  ;;  %v926_v43 = vmul.f32 %v17630_v27, %v890_v13  ;;  %v924_v34 = vmul.f32 %v17637_v47, %v888_v14  ;;  %v14943_v2 = vld [vmem:[%s17390_s19 + $0x514] ss:$36 sps:$4 sm:$0xff]  }
 0x2e4   : > { %v958_v37 = vadd.f32 %v17641_v54, %v922_v3  ;;  %v959_v17 = vadd.f32 %v17645_v59, %v923_v46  ;;  %v892_v19 = vmul.f32 %v16085_v8, %v17523_v53  ;;  %v893_v20 = vmul.f32 %v16085_v8, %v17525_v57  ;;  %v16087_v22 = vpop.eup %16086 }
 0x2e5   : > { %v957_v38 = vadd.f32 %v17650_v62, %v921_v11  ;;  %v891_v36 = vmul.f32 %v16085_v8, %v17521_v51  ;;  %v961_v30 = vadd.f32 %v17641_v54, %v925_v44  ;;  %v14932_v51 = vld [vmem:[%s17390_s19 + $0x60] ss:$36 sps:$4 sm:$0xff]   ;;  %v895_v35 = vmul.f32 %v16087_v22, %v17537_v6  ;;  %v14938_v6 = vld [vmem:[%s17390_s19 + $0xa8] ss:$36 sps:$4 sm:$0xff]   ;;  %v14941_v8 = vld [vmem:[%s17390_s19 + $0x510] ss:$36 sps:$4 sm:$0xff]  }
 0x2e6   : > { %v17674_v41 = vpack.c.bf16 %v958_v37, %v955_v5  ;;  %v17676_v25 = vpack.c.bf16 %v959_v17, %v956_v49  ;;  %v928_v26 = vmul.f32 %v17627_v23, %v892_v19  ;;  %v929_v53 = vmul.f32 %v17630_v27, %v893_v20  ;;  %v14949_v17 = vld [vmem:[%s17390_s19 + $0x55c] ss:$36 sps:$4 sm:$0xff]  }
 0x2e7   : > { %v16089_v29 = vpop.eup %16088  ;;  %v17680_v57 = vpack.c.bf16 %v957_v38, %v954_v31  ;;  %v927_v45 = vmul.f32 %v17637_v47, %v891_v36  ;;  %v931_v3 = vmul.f32 %v17627_v23, %v895_v35  ;;  %v896_v11 = vmul.f32 %v16087_v22, %v17547_v16  ;;  %v14952_v36 = vld [vmem:[%s17390_s19 + $0x13c] ss:$36 sps:$4 sm:$0xff]  }
 0x2e8   : > { %2366 = vmatprep.mubr.bf16.mxu0 %v17674_v41  ;;  %2586 = vmatmul.mubr.bf16.vlgmr.msra.gmra.mrb[0].mxu1 %v17676_v25  ;;  %v964_v48 = vadd.f32 %v17641_v54, %v928_v26  ;;  %v965_v60 = vadd.f32 %v17645_v59, %v929_v53  ;;  %v898_v33 = vmul.f32 %v16089_v29, %v17543_v12  ;;  %v17695_v61 = vpop.eup %16090  ;;  %v14955_v26 = vld [vmem:[%s17390_s19 + $0x5a4] ss:$36 sps:$4 sm:$0xff]  }
 0x2e9   : > { %2773 = vmatpush1.bf16.msra.mxu1 %v14926_v9  ;;  %2367 = vmatmul.mubr.bf16.vlgmr.msra.gmra.mrb[0].mxu0 %v17680_v57  ;;  %v962_v12 = vadd.f32 %v17645_v59, %v926_v43  ;;  %v963_v46 = vadd.f32 %v17650_v62, %v927_v45  ;;  %v960_v9 = vadd.f32 %v17650_v62, %v924_v34  ;;  %v14950_v43 = vld [vmem:[%s17390_s19 + $0x138] ss:$36 sps:$4 sm:$0xff]  }
 0x2ea   : > { %2408 = vmatpush1.bf16.msra.mxu0 %v14929_v15  ;;  %2774 = vmatprep.subr.bf16.mxu1 %v14934_v18  ;;  %v17697_v0 = vpack.c.bf16 %v964_v48, %v961_v30  ;;  %v934_v49 = vmul.f32 %v17627_v23, %v898_v33  ;;  %v899_v44 = vmul.f32 %v16089_v29, %v17555_v32  ;;  %v14946_v15 = vld [vmem:[%s17390_s19 + $0xf4] ss:$36 sps:$4 sm:$0xff]  }
 0x2eb   : > { %v16093_v5 = vpop.eup %16092  ;;  %2409 = vmatprep.subr.bf16.mxu0 %v14937_v39  ;;  %2595 = vmatprep.mubr.bf16.mxu1 %v21031_v52  ;;  %v897_v13 = vmul.f32 %v16089_v29, %v17541_v10  ;;  %v17713_v14 = vpack.c.bf16 %v965_v60, %v962_v12  ;;  %v894_v18 = vmul.f32 %v16087_v22, %v17535_v4  ;;  %v14947_v22 = vld [vmem:[%s17390_s19 + $0x558] ss:$36 sps:$4 sm:$0xff]   ;;  %v14964_v12 = vld [vmem:[%s17390_s19 + $0x1cc] ss:$36 sps:$4 sm:$0xff]  }
 0x2ec   : > { %2376 = vmatprep.mubr.bf16.mxu0 %v17697_v0  ;;  %v970_v37 = vadd.f32 %v17641_v54, %v934_v49  ;;  %v904_v19 = vmul.f32 %v16093_v5, %v17563_v42  ;;  %v967_v16 = vadd.f32 %v17641_v54, %v931_v3  ;;  %v935_v32 = vmul.f32 %v17630_v27, %v899_v44  ;;  %v14944_v42 = vld [vmem:[%s17390_s19 + $0xf0] ss:$36 sps:$4 sm:$0xff]   ;;  %v14956_v3 = vld [vmem:[%s17390_s19 + $0x180] ss:$36 sps:$4 sm:$0xff]  }
 0x2ed   : > { %2775 = vmatpush1.bf16.msra.mxu1 %v14932_v51  ;;  %v901_v10 = vmul.f32 %v17695_v61, %v17559_v24  ;;  %v17724_v20 = vpack.c.bf16 %v963_v46, %v960_v9  ;;  %v933_v31 = vmul.f32 %v17637_v47, %v897_v13  ;;  %v932_v38 = vmul.f32 %v17630_v27, %v896_v11  ;;  %v14953_v51 = vld [vmem:[%s17390_s19 + $0x5a0] ss:$36 sps:$4 sm:$0xff]   ;;  %v14967_v46 = vld [vmem:[%s17390_s19 + $0x634] ss:$36 sps:$4 sm:$0xff]  }
 0x2ee   : > { %2410 = vmatpush1.bf16.msra.mxu0 %v14935_v55  ;;  %2776 = vmatprep.subr.bf16.mxu1 %v14940_v1  ;;  %v17728_v4 = vpack.c.bf16 %v970_v37, %v967_v16  ;;  %v940_v39 = vmul.f32 %v17627_v23, %v904_v19  ;;  %v930_v24 = vmul.f32 %v17637_v47, %v894_v18  ;;  %v14958_v1 = vld [vmem:[%s17390_s19 + $0x184] ss:$36 sps:$4 sm:$0xff]   ;;  %v14965_v9 = vld [vmem:[%s17390_s19 + $0x630] ss:$36 sps:$4 sm:$0xff]   ;;  %v14973_v37 = vld [vmem:[%s17390_s19 + $0x67c] ss:$36 sps:$4 sm:$0xff]  }
 0x2ef   : > { %2411 = vmatprep.subr.bf16.mxu0 %v14943_v2  ;;  %v971_v53 = vadd.f32 %v17645_v59, %v935_v32  ;;  %v937_v29 = vmul.f32 %v17627_v23, %v901_v10  ;;  %v905_v30 = vmul.f32 %v16093_v5, %v17577_v58  ;;  %v969_v45 = vadd.f32 %v17650_v62, %v933_v31  ;;  %v14961_v2 = vld [vmem:[%s17390_s19 + $0x5ec] ss:$36 sps:$4 sm:$0xff]   ;;  %v14970_v13 = vld [vmem:[%s17390_s19 + $0x214] ss:$36 sps:$4 sm:$0xff]   ;;  %v14982_v32 = vld [vmem:[%s17390_s19 + $0x2a4] ss:$36 sps:$4 sm:$0xff]  }
 0x2f0   : > { %2596 = vmatmul.mubr.bf16.gmra.mrb[4].mxu1 %v17713_v14  ;;  %v968_v48 = vadd.f32 %v17645_v59, %v932_v38  ;;  %v976_v55 = vadd.f32 %v17641_v54, %v940_v39  ;;  %v902_v23 = vmul.f32 %v17695_v61, %v17571_v50  ;;  %v903_v58 = vmul.f32 %v16093_v5, %v17561_v28  ;;  %v14979_v18 = vld [vmem:[%s17390_s19 + $0xc] ss:$36 sps:$4 sm:$0xff]   ;;  %v14974_v19 = vld [vmem:[%s17390_s19 + $0x258] ss:$36 sps:$4 sm:$0xff]   ;;  %v14980_v31 = vld [vmem:[%s17390_s19 + $0x2a0] ss:$36 sps:$4 sm:$0xff]  }
 0x2f1   : > { %2777 = vmatpush1.bf16.msra.mxu1 %v14938_v6  ;;  %2377 = vmatmul.mubr.bf16.gmra.mrb[4].mxu0 %v17724_v20  ;;  %v966_v34 = vadd.f32 %v17650_v62, %v930_v24  ;;  %v900_v35 = vmul.f32 %v17695_v61, %v17557_v40  ;;  %v973_v33 = vadd.f32 %v17641_v54, %v937_v29  ;;  %v14959_v61 = vld [vmem:[%s17390_s19 + $0x5e8] ss:$36 sps:$4 sm:$0xff]   ;;  %v14985_v10 = vld [vmem:[%s17390_s19 + $0x54] ss:$36 sps:$4 sm:$0xff]   ;;  %v14991_v38 = vld [vmem:[%s17390_s19 + $0x9c] ss:$36 sps:$4 sm:$0xff]  }
 0x2f2   : > { %2412 = vmatpush1.bf16.msra.mxu0 %v14941_v8  ;;  %2386 = vmatprep.mubr.bf16.mxu0 %v17728_v4  ;;  %v17754_v60 = vpack.c.bf16 %v971_v53, %v968_v48  ;;  %v941_v50 = vmul.f32 %v17630_v27, %v905_v30  ;;  %v939_v5 = vmul.f32 %v17637_v47, %v903_v58  ;;  %v14962_v8 = vld [vmem:[%s17390_s19 + $0x1c8] ss:$36 sps:$4 sm:$0xff]   ;;  %v14989_v24 = vld [vmem:[%s17390_s19 + $0x98] ss:$36 sps:$4 sm:$0xff]   ;;  %v14992_v53 = vld [vmem:[%s17390_s19 + $0x330] ss:$36 sps:$4 sm:$0xff]  }
 0x2f3   : > { %2778 = vmatprep.subr.bf16.mxu1 %v14946_v15  ;;  %2413 = vmatprep.subr.bf16.mxu0 %v14949_v17  ;;  %v17760_v28 = vpack.c.bf16 %v969_v45, %v966_v34  ;;  %v17765_v40 = vpack.c.bf16 %v976_v55, %v973_v33  ;;  %v938_v54 = vmul.f32 %v17630_v27, %v902_v23  ;;  %v14968_v17 = vld [vmem:[%s17390_s19 + $0x210] ss:$36 sps:$4 sm:$0xff]   ;;  %v14977_v16 = vld [vmem:[%s17390_s19 + $0x8] ss:$36 sps:$4 sm:$0xff]   ;;  %v14995_v29 = vld [vmem:[%s17390_s19 + $0xe0] ss:$36 sps:$4 sm:$0xff]  }
 0x2f4   : > { %2605 = vmatprep.mubr.bf16.mxu1 %v21031_v52  ;;  %v936_v6 = vmul.f32 %v17637_v47, %v900_v35  ;;  %v977_v49 = vadd.f32 %v17645_v59, %v941_v50  ;;  %v975_v27 = vadd.f32 %v17650_v62, %v939_v5  ;;  %v14986_v39 = vld [vmem:[%s17390_s19 + $0x2e8] ss:$36 sps:$4 sm:$0xff]   ;;  %v15000_v30 = vld [vmem:[%s17390_s19 + $0x37c] ss:$36 sps:$4 sm:$0xff]   ;;  %v15009_v55 = vld [vmem:[%s17390_s19 + $0x174] ss:$36 sps:$4 sm:$0xff]  }
 0x2f5   : > { %2779 = vmatpush1.bf16.msra.mxu1 %v14944_v42  ;;  %v974_v47 = vadd.f32 %v17645_v59, %v938_v54  ;;  %v14971_v59 = vld [vmem:[%s17390_s19 + $0x678] ss:$36 sps:$4 sm:$0xff]   ;;  %v14983_v42 = vld [vmem:[%s17390_s19 + $0x50] ss:$36 sps:$4 sm:$0xff]   ;;  %v15006_v48 = vld [vmem:[%s17390_s19 + $0x3c4] ss:$36 sps:$4 sm:$0xff]  }
 0x2f6   : > { %2414 = vmatpush1.bf16.msra.mxu0 %v14947_v22  ;;  %2780 = vmatprep.subr.bf16.mxu1 %v14952_v36  ;;  %v972_v11 = vadd.f32 %v17650_v62, %v936_v6  ;;  %v14976_v62 = vld [vmem:[%s17390_s19 + $0x25c] ss:$36 sps:$4 sm:$0xff]   ;;  %v14988_v22 = vld [vmem:[%s17390_s19 + $0x2ec] ss:$36 sps:$4 sm:$0xff]   ;;  %v14994_v36 = vld [vmem:[%s17390_s19 + $0x334] ss:$36 sps:$4 sm:$0xff]  }
 0x2f7   : > { %2415 = vmatprep.subr.bf16.mxu0 %v14955_v26  ;;  %v17781_v44 = vpack.c.bf16 %v977_v49, %v974_v47  ;;  %v14997_v26 = vld [vmem:[%s17390_s19 + $0xe4] ss:$36 sps:$4 sm:$0xff]   ;;  %v14998_v45 = vld [vmem:[%s17390_s19 + $0x378] ss:$36 sps:$4 sm:$0xff]   ;;  %v15007_v58 = vld [vmem:[%s17390_s19 + $0x170] ss:$36 sps:$4 sm:$0xff]  }
 0x2f8   : > { %2606 = vmatmul.mubr.bf16.gmra.mrb[8].mxu1 %v17754_v60  ;;  %v17785_v15 = vpack.c.bf16 %v975_v27, %v972_v11  ;;  %v15004_v23 = vld [vmem:[%s17390_s19 + $0x3c0] ss:$36 sps:$4 sm:$0xff]   ;;  %v15012_v34 = vld [vmem:[%s17390_s19 + $0x40c] ss:$36 sps:$4 sm:$0xff]   ;;  %v15022_v6 = vld [vmem:[%s17390_s19 + $0x498] ss:$36 sps:$4 sm:$0xff]  }
 0x2f9   : > { %2781 = vmatpush1.bf16.msra.mxu1 %v14950_v43  ;;  %2387 = vmatmul.mubr.bf16.gmra.mrb[8].mxu0 %v17760_v28  ;;  %v15003_v43 = vld [vmem:[%s17390_s19 + $0x12c] ss:$36 sps:$4 sm:$0xff]   ;;  %v15015_v35 = vld [vmem:[%s17390_s19 + $0x1bc] ss:$36 sps:$4 sm:$0xff]   ;;  %v15021_v50 = vld [vmem:[%s17390_s19 + $0x204] ss:$36 sps:$4 sm:$0xff]  }
 0x2fa   : > { %2416 = vmatpush1.bf16.msra.mxu0 %v14953_v51  ;;  %2396 = vmatprep.mubr.bf16.mxu0 %v17765_v40  ;;  %v15001_v51 = vld [vmem:[%s17390_s19 + $0x128] ss:$36 sps:$4 sm:$0xff]   ;;  %v15019_v5 = vld [vmem:[%s17390_s19 + $0x200] ss:$36 sps:$4 sm:$0xff]   ;;  %v15033_v49 = vld [vmem:[%s17390_s19 + $0x294] ss:$36 sps:$4 sm:$0xff]  }
 0x2fb   : > { %2782 = vmatprep.subr.bf16.mxu1 %v14958_v1  ;;  %2417 = vmatprep.subr.bf16.mxu0 %v14961_v2  ;;  %v15010_v33 = vld [vmem:[%s17390_s19 + $0x408] ss:$36 sps:$4 sm:$0xff]   ;;  %v15013_v1 = vld [vmem:[%s17390_s19 + $0x1b8] ss:$36 sps:$4 sm:$0xff]   ;;  %v15031_v27 = vld [vmem:[%s17390_s19 + $0x290] ss:$36 sps:$4 sm:$0xff]  }
 0x2fc   : > { %2615 = vmatprep.mubr.bf16.mxu1 %v21031_v52  ;;  %v15018_v2 = vld [vmem:[%s17390_s19 + $0x454] ss:$36 sps:$4 sm:$0xff]   ;;  %v15027_v54 = vld [vmem:[%s17390_s19 + $0x24c] ss:$36 sps:$4 sm:$0xff]   ;;  %v15039_v11 = vld [vmem:[%s17390_s19 + $0x2dc] ss:$36 sps:$4 sm:$0xff]  }
 0x2fd   : > { %2783 = vmatpush1.bf16.msra.mxu1 %v14956_v3  ;;  %v15016_v3 = vld [vmem:[%s17390_s19 + $0x450] ss:$36 sps:$4 sm:$0xff]   ;;  %v15034_v47 = vld [vmem:[%s17390_s19 + $0x528] ss:$36 sps:$4 sm:$0xff]  }
 0x2fe   : > { %2418 = vmatpush1.bf16.msra.mxu0 %v14959_v61  ;;  %2784 = vmatprep.subr.bf16.mxu1 %v14964_v12  ;;  %v15024_v61 = vld [vmem:[%s17390_s19 + $0x49c] ss:$36 sps:$4 sm:$0xff]   ;;  %v15025_v12 = vld [vmem:[%s17390_s19 + $0x248] ss:$36 sps:$4 sm:$0xff]  }
 0x2ff   : > { %2419 = vmatprep.subr.bf16.mxu0 %v14967_v46  ;;  %v15030_v46 = vld [vmem:[%s17390_s19 + $0x4e4] ss:$36 sps:$4 sm:$0xff]  }
 0x300   : > { %2616 = vmatmul.mubr.bf16.gmra.mrb[12].mxu1 %v17781_v44 }
 0x301   : > { %2785 = vmatpush1.bf16.msra.mxu1 %v14962_v8  ;;  %2397 = vmatmul.mubr.bf16.gmra.mrb[12].mxu0 %v17785_v15  ;;  %v15028_v8 = vld [vmem:[%s17390_s19 + $0x4e0] ss:$36 sps:$4 sm:$0xff]  }
 0x302   : > { %2420 = vmatpush1.bf16.msra.mxu0 %v14965_v9  ;;  %2804 = vmatprep.mubr.bf16.mxu1 %v17674_v41  ;;  %v15036_v9 = vld [vmem:[%s17390_s19 + $0x52c] ss:$36 sps:$4 sm:$0xff]  }
 0x303   : > { %2786 = vmatprep.subr.bf16.mxu1 %v14970_v13  ;;  %2421 = vmatprep.subr.bf16.mxu0 %v14973_v37  ;;  %v15037_v13 = vld [vmem:[%s17390_s19 + $0x2d8] ss:$36 sps:$4 sm:$0xff]  }
 0x304   : > { %2439 = vmatprep.mubr.bf16.mxu0 %v21031_v52  ;;  %v15042_v37 = vld [vmem:[%s17390_s19 + $0x574] ss:$36 sps:$4 sm:$0xff]  }
 0x305   : > { %2787 = vmatpush1.bf16.msra.mxu1 %v14968_v17  ;;  %v15045_v17 = vld [vmem:[%s17390_s19 + $0x324] ss:$36 sps:$4 sm:$0xff]  }
 0x306   : > { %2422 = vmatpush1.bf16.msra.mxu0 %v14971_v59  ;;  %2788 = vmatprep.subr.bf16.mxu1 %v14976_v62  ;;  %v15040_v59 = vld [vmem:[%s17390_s19 + $0x570] ss:$36 sps:$4 sm:$0xff]   ;;  %v15043_v62 = vld [vmem:[%s17390_s19 + $0x320] ss:$36 sps:$4 sm:$0xff]  }
 0x307   : > { %2480 = vmatprep.subr.bf16.mxu0 %v14979_v18  ;;  %v15048_v18 = vld [vmem:[%s17390_s19 + $0x5bc] ss:$36 sps:$4 sm:$0xff]  }
 0x309   : > { %2789 = vmatpush1.bf16.msra.mxu1 %v14974_v19  ;;  %2440 = vmatmul.mubr.bf16.vlgmr.msra.gmra.mrb[0].mxu0 %v17676_v25  ;;  %v15046_v19 = vld [vmem:[%s17390_s19 + $0x5b8] ss:$36 sps:$4 sm:$0xff]  }
 0x30a   : > { %2481 = vmatpush1.bf16.msra.mxu0 %v14977_v16  ;;  %2790 = vmatprep.subr.bf16.mxu1 %v14982_v32  ;;  %v15051_v16 = vld [vmem:[%s17390_s19 + $0x36c] ss:$36 sps:$4 sm:$0xff]  }
 0x30b   : > { %2482 = vmatprep.subr.bf16.mxu0 %v14985_v10  ;;  %2449 = vmatprep.mubr.bf16.mxu0 %v21031_v52  ;;  %v15049_v32 = vld [vmem:[%s17390_s19 + $0x368] ss:$36 sps:$4 sm:$0xff]  }
 0x30c   : > { %v15054_v10 = vld [vmem:[%s17390_s19 + $0x604] ss:$36 sps:$4 sm:$0xff]  }
 0x30d   : > { %2791 = vmatpush1.bf16.msra.mxu1 %v14980_v31  ;;  %v15057_v31 = vld [vmem:[%s17390_s19 + $0x3b4] ss:$36 sps:$4 sm:$0xff]  }
 0x30e   : > { %2483 = vmatpush1.bf16.msra.mxu0 %v14983_v42  ;;  %2792 = vmatprep.subr.bf16.mxu1 %v14988_v22  ;;  %v15052_v42 = vld [vmem:[%s17390_s19 + $0x600] ss:$36 sps:$4 sm:$0xff]   ;;  %v15055_v22 = vld [vmem:[%s17390_s19 + $0x3b0] ss:$36 sps:$4 sm:$0xff]  }
 0x30f   : > { %2484 = vmatprep.subr.bf16.mxu0 %v14991_v38  ;;  %v15060_v38 = vld [vmem:[%s17390_s19 + $0x64c] ss:$36 sps:$4 sm:$0xff]  }
 0x311   : > { %2793 = vmatpush1.bf16.msra.mxu1 %v14986_v39  ;;  %2450 = vmatmul.mubr.bf16.gmra.mrb[4].mxu0 %v17713_v14  ;;  %v15063_v39 = vld [vmem:[%s17390_s19 + $0x3fc] ss:$36 sps:$4 sm:$0xff]  }
 0x312   : > { %2485 = vmatpush1.bf16.msra.mxu0 %v14989_v24  ;;  %2794 = vmatprep.subr.bf16.mxu1 %v14994_v36  ;;  %v15058_v24 = vld [vmem:[%s17390_s19 + $0x648] ss:$36 sps:$4 sm:$0xff]   ;;  %v15061_v36 = vld [vmem:[%s17390_s19 + $0x3f8] ss:$36 sps:$4 sm:$0xff]  }
 0x313   : > { %2486 = vmatprep.subr.bf16.mxu0 %v14997_v26  ;;  %2459 = vmatprep.mubr.bf16.mxu0 %v21031_v52  ;;  %v15066_v26 = vld [vmem:[%s17390_s19 + $0x694] ss:$36 sps:$4 sm:$0xff]  }
 0x315   : > { %2795 = vmatpush1.bf16.msra.mxu1 %v14992_v53  ;;  %v15069_v53 = vld [vmem:[%s17390_s19 + $0x444] ss:$36 sps:$4 sm:$0xff]  }
 0x316   : > { %2487 = vmatpush1.bf16.msra.mxu0 %v14995_v29  ;;  %2796 = vmatprep.subr.bf16.mxu1 %v15000_v30  ;;  %v15064_v29 = vld [vmem:[%s17390_s19 + $0x690] ss:$36 sps:$4 sm:$0xff]   ;;  %v15067_v30 = vld [vmem:[%s17390_s19 + $0x440] ss:$36 sps:$4 sm:$0xff]  }
 0x317   : > { %2488 = vmatprep.subr.bf16.mxu0 %v15003_v43  ;;  %v15070_v43 = vld [vmem:[%s17390_s19 + $0x4a0] ss:$36 sps:$4 sm:$0xff]  }
 0x319   : > { %2797 = vmatpush1.bf16.msra.mxu1 %v14998_v45  ;;  %2460 = vmatmul.mubr.bf16.gmra.mrb[8].mxu0 %v17754_v60  ;;  %v15073_v45 = vld [vmem:[%s17390_s19 + $0x14] ss:$36 sps:$4 sm:$0xff]  }
 0x31a   : > { %2489 = vmatpush1.bf16.msra.mxu0 %v15001_v51  ;;  %2798 = vmatprep.subr.bf16.mxu1 %v15006_v48  ;;  %v15071_v51 = vld [vmem:[%s17390_s19 + $0x10] ss:$36 sps:$4 sm:$0xff]   ;;  %v15074_v48 = vld [vmem:[%s17390_s19 + $0x4e8] ss:$36 sps:$4 sm:$0xff]  }
 0x31b   : > { %2490 = vmatprep.subr.bf16.mxu0 %v15009_v55  ;;  %2469 = vmatprep.mubr.bf16.mxu0 %v21031_v52  ;;  %v15077_v55 = vld [vmem:[%s17390_s19 + $0x5c] ss:$36 sps:$4 sm:$0xff]  }
 0x31d   : > { %2799 = vmatpush1.bf16.msra.mxu1 %v15004_v23  ;;  %v15075_v23 = vld [vmem:[%s17390_s19 + $0x58] ss:$36 sps:$4 sm:$0xff]  }
 0x31e   : > { %2491 = vmatpush1.bf16.msra.mxu0 %v15007_v58  ;;  %2800 = vmatprep.subr.bf16.mxu1 %v15012_v34  ;;  %v15078_v58 = vld [vmem:[%s17390_s19 + $0x530] ss:$36 sps:$4 sm:$0xff]   ;;  %v15081_v34 = vld [vmem:[%s17390_s19 + $0xa4] ss:$36 sps:$4 sm:$0xff]  }
 0x31f   : > { %2492 = vmatprep.subr.bf16.mxu0 %v15015_v35  ;;  %v15079_v35 = vld [vmem:[%s17390_s19 + $0xa0] ss:$36 sps:$4 sm:$0xff]  }
 0x321   : > { %2801 = vmatpush1.bf16.msra.mxu1 %v15010_v33  ;;  %2470 = vmatmul.mubr.bf16.gmra.mrb[12].mxu0 %v17781_v44  ;;  %v15082_v33 = vld [vmem:[%s17390_s19 + $0x578] ss:$36 sps:$4 sm:$0xff]  }
 0x322   : > { %2493 = vmatpush1.bf16.msra.mxu0 %v15013_v1  ;;  %2512 = vmatprep.mubr.bf16.mxu0 %v17674_v41  ;;  %v15085_v1 = vld [vmem:[%s17390_s19 + $0xec] ss:$36 sps:$4 sm:$0xff]  }
 0x323   : > { %2802 = vmatprep.subr.bf16.mxu1 %v15018_v2  ;;  %2494 = vmatprep.subr.bf16.mxu0 %v15021_v50  ;;  %v15083_v2 = vld [vmem:[%s17390_s19 + $0xe8] ss:$36 sps:$4 sm:$0xff]   ;;  %v15086_v50 = vld [vmem:[%s17390_s19 + $0x5c0] ss:$36 sps:$4 sm:$0xff]  }
 0x325   : > { %2803 = vmatpush1.bf16.msra.mxu1 %v15016_v3  ;;  %v15089_v3 = vld [vmem:[%s17390_s19 + $0x134] ss:$36 sps:$4 sm:$0xff]  }
 0x326   : > { %2495 = vmatpush1.bf16.msra.mxu0 %v15019_v5  ;;  %2845 = vmatprep.subr.bf16.mxu1 %v15024_v61  ;;  %v15087_v5 = vld [vmem:[%s17390_s19 + $0x130] ss:$36 sps:$4 sm:$0xff]   ;;  %v15090_v61 = vld [vmem:[%s17390_s19 + $0x608] ss:$36 sps:$4 sm:$0xff]  }
 0x327   : > { %2496 = vmatprep.subr.bf16.mxu0 %v15027_v54  ;;  %v15093_v54 = vld [vmem:[%s17390_s19 + $0x17c] ss:$36 sps:$4 sm:$0xff]  }
 0x328   : > { %2805 = vmatmul.mubr.bf16.vlgmr.msra.gmra.mrb[16].mxu1 %v17680_v57 }
 0x329   : > { %2814 = vmatprep.mubr.bf16.mxu1 %v17697_v0  ;;  %2846 = vmatpush1.bf16.msra.mxu1 %v15022_v6  ;;  %v15091_v6 = vld [vmem:[%s17390_s19 + $0x178] ss:$36 sps:$4 sm:$0xff]  }
 0x32a   : > { %2497 = vmatpush1.bf16.msra.mxu0 %v15025_v12  ;;  %2847 = vmatprep.subr.bf16.mxu1 %v15030_v46  ;;  %v15094_v12 = vld [vmem:[%s17390_s19 + $0x650] ss:$36 sps:$4 sm:$0xff]   ;;  %v15097_v46 = vld [vmem:[%s17390_s19 + $0x1c4] ss:$36 sps:$4 sm:$0xff]  }
 0x32b   : > { %2498 = vmatprep.subr.bf16.mxu0 %v15033_v49  ;;  %v15095_v49 = vld [vmem:[%s17390_s19 + $0x1c0] ss:$36 sps:$4 sm:$0xff]  }
 0x32d   : > { %2848 = vmatpush1.bf16.msra.mxu1 %v15028_v8  ;;  %v15098_v8 = vld [vmem:[%s17390_s19 + $0x698] ss:$36 sps:$4 sm:$0xff]  }
 0x32e   : > { %2499 = vmatpush1.bf16.msra.mxu0 %v15031_v27  ;;  %2849 = vmatprep.subr.bf16.mxu1 %v15036_v9  ;;  %v15101_v27 = vld [vmem:[%s17390_s19 + $0x20c] ss:$36 sps:$4 sm:$0xff]  }
 0x32f   : > { %2500 = vmatprep.subr.bf16.mxu0 %v15039_v11  ;;  %v15099_v9 = vld [vmem:[%s17390_s19 + $0x208] ss:$36 sps:$4 sm:$0xff]   ;;  %v15102_v11 = vld [vmem:[%s17390_s19 + $0x250] ss:$36 sps:$4 sm:$0xff]  }
 0x330   : > { %2815 = vmatmul.mubr.bf16.gmra.mrb[20].mxu1 %v17724_v20 }
 0x331   : > { %2824 = vmatprep.mubr.bf16.mxu1 %v17728_v4  ;;  %2850 = vmatpush1.bf16.msra.mxu1 %v15034_v47  ;;  %v15104_v47 = vld [vmem:[%s17390_s19 + $0x254] ss:$36 sps:$4 sm:$0xff]  }
 0x332   : > { %2501 = vmatpush1.bf16.msra.mxu0 %v15037_v13  ;;  %2851 = vmatprep.subr.bf16.mxu1 %v15042_v37  ;;  %v15107_v13 = vld [vmem:[%s17390_s19 + $0x29c] ss:$36 sps:$4 sm:$0xff]  }
 0x333   : > { %2502 = vmatprep.subr.bf16.mxu0 %v15045_v17  ;;  %v15105_v37 = vld [vmem:[%s17390_s19 + $0x298] ss:$36 sps:$4 sm:$0xff]   ;;  %v15110_v17 = vld [vmem:[%s17390_s19 + $0x2e4] ss:$36 sps:$4 sm:$0xff]  }
 0x335   : > { %2852 = vmatpush1.bf16.msra.mxu1 %v15040_v59  ;;  %v15108_v59 = vld [vmem:[%s17390_s19 + $0x2e0] ss:$36 sps:$4 sm:$0xff]  }
 0x336   : > { %2503 = vmatpush1.bf16.msra.mxu0 %v15043_v62  ;;  %2853 = vmatprep.subr.bf16.mxu1 %v15048_v18  ;;  %v15113_v62 = vld [vmem:[%s17390_s19 + $0x32c] ss:$36 sps:$4 sm:$0xff]  }
 0x337   : > { %2504 = vmatprep.subr.bf16.mxu0 %v15051_v16  ;;  %v15111_v18 = vld [vmem:[%s17390_s19 + $0x328] ss:$36 sps:$4 sm:$0xff]   ;;  %v15114_v16 = vld [vmem:[%s17390_s19 + $0x370] ss:$36 sps:$4 sm:$0xff]  }
 0x338   : > { %2825 = vmatmul.mubr.bf16.gmra.mrb[24].mxu1 %v17760_v28 }
 0x339   : > { %2834 = vmatprep.mubr.bf16.mxu1 %v17765_v40  ;;  %2854 = vmatpush1.bf16.msra.mxu1 %v15046_v19  ;;  %v15116_v19 = vld [vmem:[%s17390_s19 + $0x374] ss:$36 sps:$4 sm:$0xff]  }
 0x33a   : > { %2505 = vmatpush1.bf16.msra.mxu0 %v15049_v32  ;;  %2855 = vmatprep.subr.bf16.mxu1 %v15054_v10  ;;  %v15119_v32 = vld [vmem:[%s17390_s19 + $0x3bc] ss:$36 sps:$4 sm:$0xff]  }
 0x33b   : > { %2506 = vmatprep.subr.bf16.mxu0 %v15057_v31  ;;  %v15117_v10 = vld [vmem:[%s17390_s19 + $0x3b8] ss:$36 sps:$4 sm:$0xff]   ;;  %v15122_v31 = vld [vmem:[%s17390_s19 + $0x404] ss:$36 sps:$4 sm:$0xff]  }
 0x33d   : > { %2856 = vmatpush1.bf16.msra.mxu1 %v15052_v42  ;;  %v15120_v42 = vld [vmem:[%s17390_s19 + $0x400] ss:$36 sps:$4 sm:$0xff]  }
 0x33e   : > { %2507 = vmatpush1.bf16.msra.mxu0 %v15055_v22  ;;  %2857 = vmatprep.subr.bf16.mxu1 %v15060_v38  ;;  %v15125_v22 = vld [vmem:[%s17390_s19 + $0x44c] ss:$36 sps:$4 sm:$0xff]  }
 0x33f   : > { %2508 = vmatprep.subr.bf16.mxu0 %v15063_v39  ;;  %v15123_v38 = vld [vmem:[%s17390_s19 + $0x448] ss:$36 sps:$4 sm:$0xff]   ;;  %v15128_v39 = vld [vmem:[%s17390_s19 + $0x494] ss:$36 sps:$4 sm:$0xff]  }
 0x340   : > { %2835 = vmatmul.mubr.bf16.gmra.mrb[28].mxu1 %v17785_v15 }
 0x341   : > { %2858 = vmatpush1.bf16.msra.mxu1 %v15058_v24  ;;  %2877 = vmatprep.mubr.bf16.mxu1 %v21031_v52  ;;  %v15126_v24 = vld [vmem:[%s17390_s19 + $0x490] ss:$36 sps:$4 sm:$0xff]  }
 0x342   : > { %2509 = vmatpush1.bf16.msra.mxu0 %v15061_v36  ;;  %2859 = vmatprep.subr.bf16.mxu1 %v15066_v26  ;;  %v15131_v36 = vld [vmem:[%s17390_s19 + $0x4dc] ss:$36 sps:$4 sm:$0xff]  }
 0x343   : > { %2510 = vmatprep.subr.bf16.mxu0 %v15069_v53  ;;  %v15129_v26 = vld [vmem:[%s17390_s19 + $0x4d8] ss:$36 sps:$4 sm:$0xff]   ;;  %v15134_v53 = vld [vmem:[%s17390_s19 + $0x524] ss:$36 sps:$4 sm:$0xff]  }
 0x345   : > { %2860 = vmatpush1.bf16.msra.mxu1 %v15064_v29  ;;  %v15132_v29 = vld [vmem:[%s17390_s19 + $0x520] ss:$36 sps:$4 sm:$0xff]  }
 0x346   : > { %2511 = vmatpush1.bf16.msra.mxu0 %v15067_v30  ;;  %14001 = vmatprep.subr.bf16.mxu1 %v15070_v43  ;;  %v15137_v30 = vld [vmem:[%s17390_s19 + $0x56c] ss:$36 sps:$4 sm:$0xff]  }
 0x347   : > { %2626 = vmatprep.subr.bf16.mxu0 %v15073_v45  ;;  %v15140_v45 = vld [vmem:[%s17390_s19 + $0x5b4] ss:$36 sps:$4 sm:$0xff]  }
 0x348   : > { %2878 = vmatmul.mubr.bf16.vlgmr.msra.gmra.mrb[16].mxu1 %v17676_v25 }
 0x349   : > { %2513 = vmatmul.mubr.bf16.vlgmr.msra.gmra.mrb[16].mxu0 %v17680_v57  ;;  %14002 = vmatpush3.bf16.msra.mxu1 %v15070_v43  ;;  %v15135_v43 = vld [vmem:[%s17390_s19 + $0x568] ss:$36 sps:$4 sm:$0xff]  }
 0x34a   : > { %2522 = vmatprep.mubr.bf16.mxu0 %v17697_v0  ;;  %2627 = vmatpush1.bf16.msra.mxu0 %v15071_v51  ;;  %v15138_v51 = vld [vmem:[%s17390_s19 + $0x5b0] ss:$36 sps:$4 sm:$0xff]  }
 0x34b   : > { %14003 = vmatprep.subr.bf16.mxu1 %v15074_v48  ;;  %2628 = vmatprep.subr.bf16.mxu0 %v15077_v55  ;;  %v15141_v55 = vld [vmem:[%s17390_s19 + $0x5f8] ss:$36 sps:$4 sm:$0xff]  }
 0x34c   : > { %2887 = vmatprep.mubr.bf16.mxu1 %v21031_v52 }
 0x34d   : > { %14004 = vmatpush3.bf16.msra.mxu1 %v15074_v48  ;;  %v15143_v48 = vld [vmem:[%s17390_s19 + $0x5fc] ss:$36 sps:$4 sm:$0xff]  }
 0x34e   : > { %2629 = vmatpush1.bf16.msra.mxu0 %v15075_v23  ;;  %14005 = vmatprep.subr.bf16.mxu1 %v15078_v58  ;;  %v15146_v23 = vld [vmem:[%s17390_s19 + $0x644] ss:$36 sps:$4 sm:$0xff]  }
 0x34f   : > { %2630 = vmatprep.subr.bf16.mxu0 %v15081_v34  ;;  %v15149_v34 = vld [vmem:[%s17390_s19 + $0x68c] ss:$36 sps:$4 sm:$0xff]  }
 0x350   : > { %2888 = vmatmul.mubr.bf16.gmra.mrb[20].mxu1 %v17713_v14 }
 0x351   : > { %2523 = vmatmul.mubr.bf16.gmra.mrb[20].mxu0 %v17724_v20  ;;  %14006 = vmatpush3.bf16.msra.mxu1 %v15078_v58  ;;  %v15144_v58 = vld [vmem:[%s17390_s19 + $0x640] ss:$36 sps:$4 sm:$0xff]  }
 0x352   : > { %2532 = vmatprep.mubr.bf16.mxu0 %v17728_v4  ;;  %2631 = vmatpush1.bf16.msra.mxu0 %v15079_v35  ;;  %v15147_v35 = vld [vmem:[%s17390_s19 + $0x688] ss:$36 sps:$4 sm:$0xff]  }
 0x353   : > { %14007 = vmatprep.subr.bf16.mxu1 %v15082_v33  ;;  %2632 = vmatprep.subr.bf16.mxu0 %v15085_v1  ;;  %v15151_v1 = vld [vmem:[%s17390_s19 + $0x20] ss:$36 sps:$4 sm:$0xff]  }
 0x354   : > { %2897 = vmatprep.mubr.bf16.mxu1 %v21031_v52 }
 0x355   : > { %14008 = vmatpush3.bf16.msra.mxu1 %v15082_v33  ;;  %v15150_v33 = vld [vmem:[%s17390_s19 + $0x260] ss:$36 sps:$4 sm:$0xff]  }
 0x356   : > { %2633 = vmatpush1.bf16.msra.mxu0 %v15083_v2  ;;  %14009 = vmatprep.subr.bf16.mxu1 %v15086_v50  ;;  %v15152_v2 = vld [vmem:[%s17390_s19 + $0x2a8] ss:$36 sps:$4 sm:$0xff]  }
 0x357   : > { %2634 = vmatprep.subr.bf16.mxu0 %v15089_v3  ;;  %v15154_v3 = vld [vmem:[%s17390_s19 + $0x2f0] ss:$36 sps:$4 sm:$0xff]  }
 0x358   : > { %2898 = vmatmul.mubr.bf16.gmra.mrb[24].mxu1 %v17754_v60 }
 0x359   : > { %2533 = vmatmul.mubr.bf16.gmra.mrb[24].mxu0 %v17760_v28  ;;  %14010 = vmatpush3.bf16.msra.mxu1 %v15086_v50  ;;  %v15153_v50 = vld [vmem:[%s17390_s19 + $0x68] ss:$36 sps:$4 sm:$0xff]  }
 0x35a   : > { %2542 = vmatprep.mubr.bf16.mxu0 %v17765_v40  ;;  %2635 = vmatpush1.bf16.msra.mxu0 %v15087_v5  ;;  %v15155_v5 = vld [vmem:[%s17390_s19 + $0xb0] ss:$36 sps:$4 sm:$0xff]  }
 0x35b   : > { %14011 = vmatprep.subr.bf16.mxu1 %v15090_v61  ;;  %2636 = vmatprep.subr.bf16.mxu0 %v15093_v54  ;;  %v15157_v54 = vld [vmem:[%s17390_s19 + $0xf8] ss:$36 sps:$4 sm:$0xff]  }
 0x35c   : > { %2907 = vmatprep.mubr.bf16.mxu1 %v21031_v52 }
 0x35d   : > { %14012 = vmatpush3.bf16.msra.mxu1 %v15090_v61  ;;  %v15156_v61 = vld [vmem:[%s17390_s19 + $0x338] ss:$36 sps:$4 sm:$0xff]  }
 0x35e   : > { %2637 = vmatpush1.bf16.msra.mxu0 %v15091_v6  ;;  %14013 = vmatprep.subr.bf16.mxu1 %v15094_v12  ;;  %v15159_v6 = vld [vmem:[%s17390_s19 + $0x140] ss:$36 sps:$4 sm:$0xff]  }
 0x35f   : > { %2638 = vmatprep.subr.bf16.mxu0 %v15097_v46  ;;  %v15161_v46 = vld [vmem:[%s17390_s19 + $0x188] ss:$36 sps:$4 sm:$0xff]  }
 0x360   : > { %2908 = vmatmul.mubr.bf16.gmra.mrb[28].mxu1 %v17781_v44 }
 0x361   : > { %2543 = vmatmul.mubr.bf16.gmra.mrb[28].mxu0 %v17785_v15  ;;  %14014 = vmatpush3.bf16.msra.mxu1 %v15094_v12  ;;  %v15160_v12 = vld [vmem:[%s17390_s19 + $0x3c8] ss:$36 sps:$4 sm:$0xff]  }
 0x362   : > { %14017 = vmatprep.mubr.bf16.mxu1 %v17676_v25  ;;  %2639 = vmatpush1.bf16.msra.mxu0 %v15095_v49  ;;  %v15162_v49 = vld [vmem:[%s17390_s19 + $0x410] ss:$36 sps:$4 sm:$0xff]  }
 0x363   : > { %2658 = vmatprep.mubr.bf16.mxu0 %v17674_v41  ;;  %14015 = vmatprep.subr.bf16.mxu1 %v15098_v8 }
 0x364   : > { %2640 = vmatprep.subr.bf16.mxu0 %v15101_v27 }
 0x365   : > { %14016 = vmatpush3.bf16.msra.mxu1 %v15098_v8 }
 0x366   : > { %2641 = vmatpush1.bf16.msra.mxu0 %v15099_v9 }
 0x367   : > { %2642 = vmatprep.subr.bf16.mxu0 %v15104_v47  ;;  %v15163_v47 = vld [vmem:[%s17390_s19 + $0x1d0] ss:$36 sps:$4 sm:$0xff]  }
 0x368   : > { %14018 = vmatmul.mubr.bf16.vlgmr.msra.gmra.mrb[32].mxu1 %v17713_v14 }
 0x369   : > { %14021 = vmatprep.mubr.bf16.mxu1 %v17754_v60 }
 0x36a   : > { %2643 = vmatpush1.bf16.msra.mxu0 %v15102_v11  ;;  %v15164_v11 = vld [vmem:[%s17390_s19 + $0x458] ss:$36 sps:$4 sm:$0xff]  }
 0x36b   : > { %2644 = vmatprep.subr.bf16.mxu0 %v15107_v13 }
 0x36e   : > { %2645 = vmatpush1.bf16.msra.mxu0 %v15105_v37 }
 0x36f   : > { %2646 = vmatprep.subr.bf16.mxu0 %v15110_v17 }
 0x370   : > { %14022 = vmatmul.mubr.bf16.gmra.mrb[36].mxu1 %v17781_v44 }
 0x372   : > { %2647 = vmatpush1.bf16.msra.mxu0 %v15108_v59 }
 0x373   : > { %2648 = vmatprep.subr.bf16.mxu0 %v15113_v62 }
 0x376   : > { %2649 = vmatpush1.bf16.msra.mxu0 %v15111_v18 }
 0x377   : > { %2650 = vmatprep.subr.bf16.mxu0 %v15116_v19 }
 0x37a   : > { %2651 = vmatpush1.bf16.msra.mxu0 %v15114_v16 }
 0x37b   : > { %2652 = vmatprep.subr.bf16.mxu0 %v15119_v32 }
 0x37e   : > { %2653 = vmatpush1.bf16.msra.mxu0 %v15117_v10 }
 0x37f   : > { %2654 = vmatprep.subr.bf16.mxu0 %v15122_v31 }
 0x382   : > { %2655 = vmatpush1.bf16.msra.mxu0 %v15120_v42 }
 0x383   : > { %2656 = vmatprep.subr.bf16.mxu0 %v15125_v22 }
 0x386   : > { %2657 = vmatpush1.bf16.msra.mxu0 %v15123_v38 }
 0x387   : > { %2699 = vmatprep.subr.bf16.mxu0 %v15128_v39 }
 0x389   : > { %2659 = vmatmul.mubr.bf16.vlgmr.msra.gmra.mrb[32].mxu0 %v17680_v57 }
 0x38a   : > { %2668 = vmatprep.mubr.bf16.mxu0 %v17697_v0  ;;  %2700 = vmatpush1.bf16.msra.mxu0 %v15126_v24 }
 0x38b   : > { %2701 = vmatprep.subr.bf16.mxu0 %v15131_v36 }
 0x38e   : > { %2702 = vmatpush1.bf16.msra.mxu0 %v15129_v26 }
 0x38f   : > { %2703 = vmatprep.subr.bf16.mxu0 %v15134_v53 }
 0x391   : > { %2669 = vmatmul.mubr.bf16.gmra.mrb[36].mxu0 %v17724_v20 }
 0x392   : > { %2678 = vmatprep.mubr.bf16.mxu0 %v17728_v4  ;;  %2704 = vmatpush1.bf16.msra.mxu0 %v15132_v29 }
 0x393   : > { %2705 = vmatprep.subr.bf16.mxu0 %v15137_v30 }
 0x396   : > { %2706 = vmatpush1.bf16.msra.mxu0 %v15135_v43 }
 0x397   : > { %2707 = vmatprep.subr.bf16.mxu0 %v15140_v45 }
 0x399   : > { %2679 = vmatmul.mubr.bf16.gmra.mrb[40].mxu0 %v17760_v28 }
 0x39a   : > { %2688 = vmatprep.mubr.bf16.mxu0 %v17765_v40  ;;  %2708 = vmatpush1.bf16.msra.mxu0 %v15138_v51 }
 0x39b   : > { %2709 = vmatprep.subr.bf16.mxu0 %v15143_v48 }
 0x39e   : > { %2710 = vmatpush1.bf16.msra.mxu0 %v15141_v55 }
 0x39f   : > { %2711 = vmatprep.subr.bf16.mxu0 %v15146_v23 }
 0x3a1   : > { %2689 = vmatmul.mubr.bf16.gmra.mrb[44].mxu0 %v17785_v15 }
 0x3a2   : > { %2712 = vmatpush1.bf16.msra.mxu0 %v15144_v58  ;;  %2731 = vmatprep.mubr.bf16.mxu0 %v21031_v52 }
 0x3a3   : > { %2713 = vmatprep.subr.bf16.mxu0 %v15149_v34 }
 0x3a6   : > { %2714 = vmatpush1.bf16.msra.mxu0 %v15147_v35 }
 0x3a7   : > { %13509 = vmatprep.subr.bf16.mxu0 %v15150_v33 }
 0x3a9   : > { %2732 = vmatmul.mubr.bf16.vlgmr.msra.gmra.mrb[32].mxu0 %v17676_v25  ;;  %v15158_v25 = vld [vmem:[%s17390_s19 + $0x380] ss:$36 sps:$4 sm:$0xff]  }
 0x3aa   : > { %13510 = vmatpush3.bf16.msra.mxu0 %v15151_v1  ;;  %2741 = vmatprep.mubr.bf16.mxu0 %v21031_v52 }
 0x3ab   : > { %13511 = vmatprep.subr.bf16.mxu0 %v15152_v2 }
 0x3ae   : > { %13512 = vmatpush3.bf16.msra.mxu0 %v15153_v50 }
 0x3af   : > { %13513 = vmatprep.subr.bf16.mxu0 %v15154_v3 }
 0x3b1   : > { %2742 = vmatmul.mubr.bf16.gmra.mrb[36].mxu0 %v17713_v14 }
 0x3b2   : > { %13514 = vmatpush3.bf16.msra.mxu0 %v15155_v5  ;;  %2751 = vmatprep.mubr.bf16.mxu0 %v21031_v52 }
 0x3b3   : > { %13515 = vmatprep.subr.bf16.mxu0 %v15156_v61 }
 0x3b6   : > { %13516 = vmatpush3.bf16.msra.mxu0 %v15157_v54 }
 0x3b7   : > { %13517 = vmatprep.subr.bf16.mxu0 %v15158_v25 }
 0x3b9   : > { %2752 = vmatmul.mubr.bf16.gmra.mrb[40].mxu0 %v17754_v60  ;;  %v15165_v60 = vld [vmem:[%s17390_s19 + $0x218] ss:$36 sps:$4 sm:$0xff]  }
 0x3ba   : > { %13518 = vmatpush3.bf16.msra.mxu0 %v15159_v6  ;;  %2761 = vmatprep.mubr.bf16.mxu0 %v21031_v52 }
 0x3bb   : > { %v17974_v14 = vpop.f32.mrb[0].mxu1  ;;  %13519 = vmatprep.subr.bf16.mxu0 %v15160_v12 }
 0x3bc   : > { %v17977_v8 = vpop.f32.mrb[1].mxu1 }
 0x3bd   : > { %v17979_v27 = vpop.f32.mrb[2].mxu1 }
 0x3be   : > { %13520 = vmatpush3.bf16.msra.mxu0 %v15161_v46  ;;  %v17981_v9 = vpop.f32.mrb[3].mxu1 }
 0x3bf   : > { %13521 = vmatprep.subr.bf16.mxu0 %v15162_v49 }
 0x3c1   : > { %2762 = vmatmul.mubr.bf16.gmra.mrb[44].mxu0 %v17781_v44 }
 0x3c2   : > { %13522 = vmatpush3.bf16.msra.mxu0 %v15163_v47  ;;  %2950 = vmatprep.mubr.bf16.mxu0 %v17674_v41 }
 0x3c3   : > { %v17988_v13 = vpop.f32.mrb[4].mxu1  ;;  %13523 = vmatprep.subr.bf16.mxu0 %v15164_v11 }
 0x3c4   : > { %v17990_v37 = vpop.f32.mrb[5].mxu1 }
 0x3c5   : > { %v17992_v17 = vpop.f32.mrb[6].mxu1 }
 0x3c6   : > { %13524 = vmatpush3.bf16.msra.mxu0 %v15165_v60  ;;  %v17994_v59 = vpop.f32.mrb[7].mxu1 }
 0x3c9   : > { %2951 = vmatmul.mubr.bf16.vlgmr.msra.gmra.mrb[48].mxu0 %v17680_v57 }
 0x3ca   : > { %2958 = vmatprep.mubr.bf16.mxu0 %v17697_v0 }
 0x3cb   : > { %v17998_v62 = vpop.f32.mrb[8].mxu1 }
 0x3cc   : > { %v18000_v44 = vpop.f32.mrb[9].mxu1 }
 0x3cd   : > { %v18002_v41 = vpop.f32.mrb[10].mxu1 }
 0x3ce   : > { %v18004_v18 = vpop.f32.mrb[11].mxu1 }
 0x3d1   : > { %2959 = vmatmul.mubr.bf16.gmra.mrb[52].mxu0 %v17724_v20 }
 0x3d2   : > { %2966 = vmatprep.mubr.bf16.mxu0 %v17728_v4 }
 0x3d3   : > { %v18008_v19 = vpop.f32.mrb[12].mxu1 }
 0x3d4   : > { %v18010_v16 = vpop.f32.mrb[13].mxu1 }
 0x3d5   : > { %v18012_v32 = vpop.f32.mrb[14].mxu1 }
 0x3d6   : > { %v18014_v57 = vpop.f32.mrb[15].mxu1 }
 0x3d9   : > { %2967 = vmatmul.mubr.bf16.gmra.mrb[56].mxu0 %v17760_v28 }
 0x3da   : > { %2974 = vmatprep.mubr.bf16.mxu0 %v17765_v40 }
 0x3dc   : > { %v2441_v0 = vpop.f32.mrb[0].mxu0 }
 0x3dd   : > { %v2443_v10 = vpop.f32.mrb[1].mxu0 }
 0x3de   : > { %v2445_v31 = vpop.f32.mrb[2].mxu0 }
 0x3df   : > { %v3048_v42 = vpack.c.bf16 %v2445_v31, %v2441_v0  ;;  %v2447_v22 = vpop.f32.mrb[3].mxu0 }
 0x3e0   : > { %v18018_v20 = vpack.c.bf16 %v2447_v22, %v2443_v10 }
 0x3e1   : > { %2975 = vmatmul.mubr.bf16.gmra.mrb[60].mxu0 %v17785_v15 }
 0x3e2   : > { %14033 = vmatprep.mubr.msk.bf16.mxu0 %vm3103_vm0, %v3048_v42 }
 0x3e4   : > { %v2451_v4 = vpop.f32.mrb[4].mxu0 }
 0x3e5   : > { %v2453_v38 = vpop.f32.mrb[5].mxu0 }
 0x3e6   : > { %v2455_v39 = vpop.f32.mrb[6].mxu0 }
 0x3e7   : > { %v18022_v24 = vpack.c.bf16 %v2455_v39, %v2451_v4  ;;  %v2457_v28 = vpop.f32.mrb[7].mxu0 }
 0x3e8   : > { %v18024_v36 = vpack.c.bf16 %v2457_v28, %v2453_v38 }
 0x3ec   : > { %v2461_v40 = vpop.f32.mrb[8].mxu0 }
 0x3ed   : > { %v2463_v26 = vpop.f32.mrb[9].mxu0 }
 0x3ee   : > { %v2465_v53 = vpop.f32.mrb[10].mxu0 }
 0x3ef   : > { %v18026_v29 = vpack.c.bf16 %v2465_v53, %v2461_v40  ;;  %v2467_v30 = vpop.f32.mrb[11].mxu0 }
 0x3f0   : > { %v18028_v43 = vpack.c.bf16 %v2467_v30, %v2463_v26 }
 0x3f4   : > { %v2471_v45 = vpop.f32.mrb[12].mxu0 }
 0x3f5   : > { %v2473_v15 = vpop.f32.mrb[13].mxu0 }
 0x3f6   : > { %v2475_v51 = vpop.f32.mrb[14].mxu0 }
 0x3f7   : > { %v18030_v48 = vpack.c.bf16 %v2475_v51, %v2471_v45  ;;  %v2477_v55 = vpop.f32.mrb[15].mxu0 }
 0x3f8   : > { %v18032_v23 = vpack.c.bf16 %v2477_v55, %v2473_v15 }
 0x41b   : > { %v2879_v58 = vpop.f32.mrb[16].mxu1 }
 0x41c   : > { %v2514_v34 = vpop.f32.mrb[16].mxu0  ;;  %v2881_v35 = vpop.f32.mrb[17].mxu1 }
 0x41d   : > { %v2588_v33 = vadd.f32 %v17974_v14, %v2514_v34  ;;  %v2516_v1 = vpop.f32.mrb[17].mxu0  ;;  %v2883_v2 = vpop.f32.mrb[18].mxu1 }
 0x41e   : > { %v2590_v50 = vadd.f32 %v17977_v8, %v2516_v1  ;;  %v18036_v3 = vpack.c.bf16 %v2883_v2, %v2879_v58  ;;  %v2518_v5 = vpop.f32.mrb[18].mxu0  ;;  %v2885_v61 = vpop.f32.mrb[19].mxu1 }
 0x41f   : > { %v2592_v54 = vadd.f32 %v17979_v27, %v2518_v5  ;;  %v18039_v25 = vpack.c.bf16 %v2885_v61, %v2881_v35  ;;  %v2520_v6 = vpop.f32.mrb[19].mxu0 }
 0x420   : > { %v2594_v12 = vadd.f32 %v17981_v9, %v2520_v6 }
 0x421   : > { %v18042_v46 = vpack.c.bf16 %v2592_v54, %v2588_v33 }
 0x422   : > { %v3051_v49 = vpack.c.bf16 %v2594_v12, %v2590_v50 }
 0x423   : > { %v2889_v47 = vpop.f32.mrb[20].mxu1 }
 0x424   : > { %v2891_v14 = vpop.f32.mrb[21].mxu1  ;;  %3398 = vrot.lane.b32.xlu0 %v3051_v49, %s16849_s24  ;;  %v2524_v8 = vpop.f32.mrb[20].mxu0  ;;  %14633 = vmatprep.subr.msk.bf16.mxu0 %vm3103_vm0, %v3051_v49  ;;  %v3117_v11 = vsel %vm3103_vm0, %v3051_v49, 0 }
 0x425   : > { %v2598_v27 = vadd.f32 %v17988_v13, %v2524_v8  ;;  %v2526_v60 = vpop.f32.mrb[21].mxu0  ;;  %v2893_v0 = vpop.f32.mrb[22].mxu1  ;;  %14026 = vmatpush3.bf16.xpose.msra.mxu0 %v3117_v11 }
 0x426   : > { %v2600_v9 = vadd.f32 %v17990_v37, %v2526_v60  ;;  %v18049_v10 = vpack.c.bf16 %v2893_v0, %v2889_v47  ;;  %v2528_v31 = vpop.f32.mrb[22].mxu0  ;;  %v2895_v22 = vpop.f32.mrb[23].mxu1 }
 0x427   : > { %v2602_v4 = vadd.f32 %v17992_v17, %v2528_v31  ;;  %v18052_v38 = vpack.c.bf16 %v2895_v22, %v2891_v14  ;;  %v2530_v39 = vpop.f32.mrb[23].mxu0 }
 0x428   : > { %v2604_v28 = vadd.f32 %v17994_v59, %v2530_v39  ;;  %3386 = vrot.lane.b32.xlu0 %v3048_v42, %s16849_s24 }
 0x429   : > { %v18056_v40 = vpack.c.bf16 %v2602_v4, %v2598_v27 }
 0x42a   : > { %v3060_v13 = vpack.c.bf16 %v2604_v28, %v2600_v9 }
 0x42b   : > { %21143 = vst [vmem:[#allocation42_spill] sm:$0xff] %v18056_v40  ;;  %v2899_v26 = vpop.f32.mrb[24].mxu1 }
 0x42c   : > { %v2901_v53 = vpop.f32.mrb[25].mxu1  ;;  %3390 = vrot.lane.b32.xlu0 %v18026_v29, %s16849_s24  ;;  %3400 = vrot.lane.b32.xlu1 %v3060_v13, %s16849_s24  ;;  %v2534_v37 = vpop.f32.mrb[24].mxu0  ;;  %v3120_v17 = vsel %vm3103_vm0, %v3060_v13, 0 }
 0x42d   : > { %v2608_v30 = vadd.f32 %v17998_v62, %v2534_v37  ;;  %14634 = vmatprep.subr.msk.bf16.mxu0 %vm3103_vm0, %v3060_v13  ;;  %v2536_v59 = vpop.f32.mrb[25].mxu0  ;;  %v2903_v45 = vpop.f32.mrb[26].mxu1 }
 0x42e   : > { %v2610_v42 = vadd.f32 %v18000_v44, %v2536_v59  ;;  %v18065_v15 = vpack.c.bf16 %v2903_v45, %v2899_v26  ;;  %14028 = vmatpush3.bf16.xpose.msra.mxu0 %v3120_v17  ;;  %v2538_v51 = vpop.f32.mrb[26].mxu0  ;;  %v2905_v55 = vpop.f32.mrb[27].mxu1 }
 0x42f   : > { %v2612_v58 = vadd.f32 %v18002_v41, %v2538_v51  ;;  %v18068_v34 = vpack.c.bf16 %v2905_v55, %v2901_v53  ;;  %v2540_v35 = vpop.f32.mrb[27].mxu0 }
 0x430   : > { %v2614_v33 = vadd.f32 %v18004_v18, %v2540_v35 }
 0x431   : > { %v18071_v1 = vpack.c.bf16 %v2612_v58, %v2608_v30 }
 0x432   : > { %v3069_v62 = vpack.c.bf16 %v2614_v33, %v2610_v42 }
 0x433   : > { %21144 = vst [vmem:[#allocation43_spill] sm:$0xff] %v18071_v1  ;;  %v2909_v2 = vpop.f32.mrb[28].mxu1 }
 0x434   : > { %v2911_v50 = vpop.f32.mrb[29].mxu1  ;;  %3402 = vrot.lane.b32.xlu1 %v3069_v62, %s16849_s24  ;;  %v2544_v44 = vpop.f32.mrb[28].mxu0  ;;  %14635 = vmatprep.subr.msk.bf16.mxu0 %vm3103_vm0, %v3069_v62  ;;  %v3123_v5 = vsel %vm3103_vm0, %v3069_v62, 0 }
 0x435   : > { %v2618_v61 = vadd.f32 %v18008_v19, %v2544_v44  ;;  %v2546_v41 = vpop.f32.mrb[29].mxu0  ;;  %v2913_v54 = vpop.f32.mrb[30].mxu1 }
 0x436   : > { %v2620_v6 = vadd.f32 %v18010_v16, %v2546_v41  ;;  %v18078_v12 = vpack.c.bf16 %v2913_v54, %v2909_v2  ;;  %14030 = vmatpush3.bf16.xpose.msra.mxu0 %v3123_v5  ;;  %v2548_v18 = vpop.f32.mrb[30].mxu0  ;;  %v2915_v49 = vpop.f32.mrb[31].mxu1 }
 0x437   : > { %v2622_v47 = vadd.f32 %v18012_v32, %v2548_v18  ;;  %v18081_v14 = vpack.c.bf16 %v2915_v49, %v2911_v50  ;;  %v2550_v8 = vpop.f32.mrb[31].mxu0 }
 0x438   : > { %v2624_v11 = vadd.f32 %v18014_v57, %v2550_v8 }
 0x439   : > { %v18084_v27 = vpack.c.bf16 %v2622_v47, %v2618_v61 }
 0x43a   : > { %v3078_v60 = vpack.c.bf16 %v2624_v11, %v2620_v6 }
 0x43b   : > { %21145 = vst [vmem:[#allocation44_spill] sm:$0xff] %v18084_v27  ;;  %v18086_v19 = vpop.f32.mrb[32].mxu1 }
 0x43c   : > { %v3017_v0 = vpop.f32.mrb[33].mxu1  ;;  %3404 = vrot.lane.b32.xlu1 %v3078_v60, %s16849_s24  ;;  %14636 = vmatprep.subr.msk.bf16.mxu0 %vm3103_vm0, %v3078_v60  ;;  %v3126_v16 = vsel %vm3103_vm0, %v3078_v60, 0 }
 0x43d   : > { %v18091_v9 = vpop.f32.mrb[34].mxu1 }
 0x43e   : > { %14032 = vmatpush3.bf16.xpose.msra.mxu0 %v3126_v16  ;;  %v3020_v32 = vpop.f32.mrb[35].mxu1 }
 0x43f   : > { %14041 = vmatprep.subr.bf16.mxu0 %v18036_v3 }
 0x440   : > { %3388 = vrot.lane.b32.xlu1 %v18022_v24, %s16849_s24 }
 0x443   : > { %v18096_v57 = vpop.f32.mrb[36].mxu1 }
 0x444   : > { %v18098_v31 = vpop.f32.mrb[37].mxu1  ;;  %3392 = vrot.lane.b32.xlu1 %v18030_v48, %s16849_s24 }
 0x445   : > { %14034 = vmatmul.mubr.msk.bf16.vlgmr.msra.gmra.mrb[64].mxu0 %vm3103_vm0, %v18022_v24  ;;  %v18104_v22 = vpop.f32.mrb[38].mxu1 }
 0x446   : > { %14037 = vmatprep.mubr.msk.bf16.mxu0 %vm3103_vm0, %v18026_v29  ;;  %14042 = vmatpush3.bf16.msra.mxu0 %v18036_v3  ;;  %v18109_v4 = vpop.f32.mrb[39].mxu1 }
 0x447   : > { %14043 = vmatprep.subr.bf16.mxu0 %v18049_v10 }
 0x44a   : > { %14044 = vmatpush3.bf16.msra.mxu0 %v18049_v10 }
 0x44b   : > { %14045 = vmatprep.subr.bf16.mxu0 %v18065_v15 }
 0x44d   : > { %14038 = vmatmul.mubr.msk.bf16.gmra.mrb[68].mxu0 %vm3103_vm0, %v18030_v48 }
 0x44e   : > { %14046 = vmatpush3.bf16.msra.mxu0 %v18065_v15 }
 0x44f   : > { %14047 = vmatprep.subr.bf16.mxu0 %v18078_v12 }
 0x452   : > { %14048 = vmatpush3.bf16.msra.mxu0 %v18078_v12 }
 0x47c   : > { %v2733_v24 = vpop.f32.mrb[32].mxu0 }
 0x47d   : > { %v2735_v29 = vpop.f32.mrb[33].mxu0 }
 0x47e   : > { %v2737_v39 = vpop.f32.mrb[34].mxu0 }
 0x47f   : > { %v18119_v28 = vpack.c.bf16 %v2737_v39, %v2733_v24  ;;  %v2739_v13 = vpop.f32.mrb[35].mxu0 }
 0x480   : > { %v18121_v26 = vpack.c.bf16 %v2739_v13, %v2735_v29 }
 0x484   : > { %v2743_v53 = vpop.f32.mrb[36].mxu0 }
 0x485   : > { %v2745_v37 = vpop.f32.mrb[37].mxu0 }
 0x486   : > { %v2747_v17 = vpop.f32.mrb[38].mxu0 }
 0x487   : > { %v18123_v30 = vpack.c.bf16 %v2747_v17, %v2743_v53  ;;  %v2749_v48 = vpop.f32.mrb[39].mxu0 }
 0x488   : > { %v18125_v59 = vpack.c.bf16 %v2749_v48, %v2745_v37 }
 0x48c   : > { %v2753_v45 = vpop.f32.mrb[40].mxu0 }
 0x48d   : > { %v2755_v42 = vpop.f32.mrb[41].mxu0 }
 0x48e   : > { %v2757_v51 = vpop.f32.mrb[42].mxu0 }
 0x48f   : > { %v18127_v55 = vpack.c.bf16 %v2757_v51, %v2753_v45  ;;  %v2759_v58 = vpop.f32.mrb[43].mxu0 }
 0x490   : > { %v18129_v35 = vpack.c.bf16 %v2759_v58, %v2755_v42 }
 0x494   : > { %v2763_v33 = vpop.f32.mrb[44].mxu0 }
 0x495   : > { %v2765_v62 = vpop.f32.mrb[45].mxu0 }
 0x496   : > { %v3399_v2 = vpop.permute.xlu0 %3398  ;;  %v2767_v50 = vpop.f32.mrb[46].mxu0 }
 0x497   : > { %v18131_v44 = vpack.c.bf16 %v2767_v50, %v2763_v33  ;;  %v2769_v5 = vpop.f32.mrb[47].mxu0  ;;  %14637 = vmatprep.subr.msk.bf16.mxu1 %vm3103_vm0, %v3399_v2  ;;  %v3419_v61 = vsel %vm3103_vm0, %v3399_v2, 0 }
 0x498   : > { %v18135_v41 = vpack.c.bf16 %v2769_v5, %v2765_v62  ;;  %14058 = vmatpush3.bf16.xpose.msra.mxu1 %v3419_v61 }
 0x49a   : > { %v3387_v54 = vpop.permute.xlu0 %3386 }
 0x49b   : > { %14065 = vmatprep.mubr.msk.bf16.mxu1 %vm3103_vm0, %v3387_v54 }
 0x49c   : > { %v13525_v6 = vpop.f32.mrb[48].mxu0 }
 0x49d   : > { %v13526_v18 = vpop.f32.mrb[49].mxu0 }
 0x49e   : > { %v13527_v49 = vadd.f32 %v13526_v18, %v13525_v6  ;;  %v3401_v47 = vpop.permute.xlu1 %3400  ;;  %v13528_v8 = vpop.f32.mrb[50].mxu0 }
 0x49f   : > { %14638 = vmatprep.subr.msk.bf16.mxu1 %vm3103_vm0, %v3401_v47  ;;  %v3422_v11 = vsel %vm3103_vm0, %v3401_v47, 0  ;;  %v13529_v16 = vpop.f32.mrb[51].mxu0 }
 0x4a0   : > { %v3018_v60 = vadd.f32 %v13527_v49, %v3017_v0  ;;  %14060 = vmatpush3.bf16.xpose.msra.mxu1 %v3422_v11  ;;  %v13530_v24 = vadd.f32 %v13529_v16, %v13528_v8  ;;  %v3391_v16 = vpop.permute.xlu0 %3390 }
 0x4a2   : > { %v3021_v29 = vadd.f32 %v13530_v24, %v3020_v32 }
 0x4a4   : > { %v13531_v39 = vpop.f32.mrb[52].mxu0  ;;  %v18140_v53 = vpack.c.bf16 %v3021_v29, %v3018_v60 }
 0x4a5   : > { %v13532_v13 = vpop.f32.mrb[53].mxu0 }
 0x4a6   : > { %v13533_v37 = vadd.f32 %v13532_v13, %v13531_v39  ;;  %v3403_v17 = vpop.permute.xlu1 %3402  ;;  %v13534_v48 = vpop.f32.mrb[54].mxu0 }
 0x4a7   : > { %v13535_v45 = vpop.f32.mrb[55].mxu0  ;;  %14639 = vmatprep.subr.msk.bf16.mxu1 %vm3103_vm0, %v3403_v17  ;;  %v3425_v42 = vsel %vm3103_vm0, %v3403_v17, 0 }
 0x4a8   : > { %v3026_v51 = vadd.f32 %v18086_v19, %v13533_v37  ;;  %v13536_v58 = vadd.f32 %v13535_v45, %v13534_v48  ;;  %14062 = vmatpush3.bf16.xpose.msra.mxu1 %v3425_v42  ;;  %v3094_v37 = vand.u32 127, %v906_v56 }
 0x4aa   : > { %v3029_v0 = vadd.f32 %v18091_v9, %v13536_v58  ;;  %vm18177_vm2 = vcmp.ge.s32.totalorder %v17616_v63, %v3094_v37 }
 0x4ac   : > { %v13537_v33 = vpop.f32.mrb[56].mxu0  ;;  %v18146_v32 = vpack.c.bf16 %v3029_v0, %v3026_v51 }
 0x4ad   : > { %v13538_v62 = vpop.f32.mrb[57].mxu0 }
 0x4ae   : > { %v13539_v2 = vadd.f32 %v13538_v62, %v13537_v33  ;;  %v13540_v50 = vpop.f32.mrb[58].mxu0  ;;  %v3405_v5 = vpop.permute.xlu1 %3404  ;;  %v3088_v33 = vadd.s32 24, %v17616_v63 }
 0x4af   : > { %v13541_v61 = vpop.f32.mrb[59].mxu0  ;;  %14640 = vmatprep.subr.msk.bf16.mxu1 %vm3103_vm0, %v3405_v5  ;;  %v3428_v54 = vsel %vm3103_vm0, %v3405_v5, 0 }
 0x4b0   : > { %v3034_v6 = vadd.f32 %v13539_v2, %v18098_v31  ;;  %v13542_v18 = vadd.f32 %v13541_v61, %v13540_v50  ;;  %14064 = vmatpush3.bf16.xpose.msra.mxu1 %v3428_v54  ;;  %vm18200_vm4 = vcmp.ge.s32.totalorder %v3088_v33, %v3094_v37 }
 0x4b1   : > { %14105 = vmatprep.subr.bf16.mxu1 %v18039_v25 }
 0x4b2   : > { %v3037_v19 = vadd.f32 %v13542_v18, %v18109_v4  ;;  %v3389_v8 = vpop.permute.xlu1 %3388 }
 0x4b4   : > { %v13543_v9 = vpop.f32.mrb[60].mxu0  ;;  %v18153_v49 = vpack.c.bf16 %v3037_v19, %v3034_v6  ;;  %v3092_v19 = vadd.s32 56, %v17616_v63 }
 0x4b5   : > { %v13544_v47 = vpop.f32.mrb[61].mxu0 }
 0x4b6   : > { %v13545_v11 = vadd.f32 %v13544_v47, %v13543_v9  ;;  %v13546_v60 = vpop.f32.mrb[62].mxu0  ;;  %v3393_v13 = vpop.permute.xlu1 %3392  ;;  %v3089_v9 = vadd.s32 32, %v17616_v63  ;;  %vm18215_vm5 = vcmp.ge.s32.totalorder %v3092_v19, %v3094_v37 }
 0x4b7   : > { %v13547_v24 = vpop.f32.mrb[63].mxu0  ;;  %14066 = vmatmul.mubr.msk.bf16.vlgmr.msra.gmra.mrb[40].mxu1 %vm3103_vm0, %v3389_v8 }
 0x4b8   : > { %v3042_v29 = vadd.f32 %v18096_v57, %v13545_v11  ;;  %v13548_v31 = vadd.f32 %v13547_v24, %v13546_v60  ;;  %14069 = vmatprep.mubr.msk.bf16.mxu1 %vm3103_vm0, %v3391_v16  ;;  %14106 = vmatpush3.bf16.msra.mxu1 %v18039_v25  ;;  %v3087_v57 = vadd.s32 16, %v17616_v63  ;;  %v3090_v60 = vadd.s32 40, %v17616_v63 }
 0x4b9   : > { %14107 = vmatprep.subr.bf16.mxu1 %v18052_v38  ;;  %vm18219_vm6 = vcmp.ge.s32.totalorder %v3089_v9, %v3094_v37 }
 0x4ba   : > { %v3045_v4 = vadd.f32 %v18104_v22, %v13548_v31  ;;  %v3086_v22 = vadd.s32 8, %v17616_v63  ;;  %vm18172_vm1 = vcmp.ge.s32.totalorder %v3087_v57, %v3094_v37  ;;  %v3091_v57 = vadd.s32 48, %v17616_v63 }
 0x4bb   : > { %vm18226_vm7 = vcmp.ge.s32.totalorder %v3090_v60, %v3094_v37 }
 0x4bc   : > { %14108 = vmatpush3.bf16.msra.mxu1 %v18052_v38  ;;  %v18162_v39 = vpack.c.bf16 %v3045_v4, %v3042_v29  ;;  %vm18186_vm3 = vcmp.ge.s32.totalorder %v3086_v22, %v3094_v37  ;;  %vm18240_vm8 = vcmp.ge.s32.totalorder %v3091_v57, %v3094_v37 }
 0x4bd   : > { %14109 = vmatprep.subr.bf16.mxu1 %v18068_v34 }
 0x4bf   : > { %14070 = vmatmul.mubr.msk.bf16.gmra.mrb[44].mxu1 %vm3103_vm0, %v3393_v13 }
 0x4c0   : > { %14110 = vmatpush3.bf16.msra.mxu1 %v18068_v34 }
 0x4c1   : > { %14111 = vmatprep.subr.bf16.mxu1 %v18081_v14 }
 0x4c4   : > { %14112 = vmatpush3.bf16.msra.mxu1 %v18081_v14 }
 0x518   : > { %v14035_v17 = vpop.f32.mrb[64].mxu0 }
 0x519   : > { %v3195_v45 = vmul.f32 0.125, %v14035_v17  ;;  %v3162_v42 = vpop.f32.mrb[65].mxu0 }
 0x51a   : > { %v3193_v51 = vmul.f32 0.125, %v3162_v42  ;;  %v14036_v58 = vpop.f32.mrb[66].mxu0 }
 0x51b   : > { %v3165_v62 = vpop.f32.mrb[67].mxu0  ;;  %v18184_v56 = vsel %vm18172_vm1, %v3195_v45, -1e+30  ;;  %v3196_v61 = vmul.f32 0.125, %v14036_v58 }
 0x51c   : > { %v3194_v50 = vmul.f32 0.125, %v3165_v62  ;;  %v3215_v5 = vsel %vm3103_vm0, %v18184_v56, -inf  ;;  %v18194_v54 = vsel %vm18177_vm2, %v3193_v51, -1e+30 }
 0x51d   : > { %3216 = vmax.xlane.f32.xlu0 %v3215_v5  ;;  %v3209_v11 = vsel %vm3103_vm0, %v18194_v54, -inf  ;;  %v18213_v24 = vsel %vm18200_vm4, %v3196_v61, -1e+30 }
 0x51e   : > { %v18198_v6 = vsel %vm18186_vm3, %v3194_v50, -1e+30  ;;  %v3218_v42 = vsel %vm3103_vm0, %v18213_v24, -inf }
 0x51f   : > { %v3212_v47 = vsel %vm3103_vm0, %v18198_v6, -inf }
 0x520   : > { %3213 = vmax.xlane.f32.xlu1 %v3212_v47  ;;  %v14039_v8 = vpop.f32.mrb[68].mxu0 }
 0x521   : > { %3210 = vmax.xlane.f32.xlu0 %v3209_v11  ;;  %v3178_v16 = vpop.f32.mrb[69].mxu0  ;;  %v3199_v58 = vmul.f32 0.125, %v14039_v8 }
 0x522   : > { %v3197_v29 = vmul.f32 0.125, %v3178_v16  ;;  %v14040_v31 = vpop.f32.mrb[70].mxu0 }
 0x523   : > { %v3200_v22 = vmul.f32 0.125, %v14040_v31  ;;  %v3181_v17 = vpop.f32.mrb[71].mxu0  ;;  %v18252_v9 = vsel %vm18240_vm8, %v3199_v58, -1e+30 }
 0x524   : > { %v3198_v45 = vmul.f32 0.125, %v3181_v17  ;;  %v18236_v62 = vsel %vm18219_vm6, %v3197_v29, -1e+30  ;;  %v3227_v37 = vsel %vm3103_vm0, %v18252_v9, -inf }
 0x525   : > { %3219 = vmax.xlane.f32.xlu0 %v3218_v42  ;;  %v18232_v33 = vsel %vm18215_vm5, %v3200_v22, -1e+30  ;;  %v3221_v19 = vsel %vm3103_vm0, %v18236_v62, -inf }
 0x526   : > { %v3230_v50 = vsel %vm3103_vm0, %v18232_v33, -inf  ;;  %v18246_v61 = vsel %vm18226_vm7, %v3198_v45, -1e+30 }
 0x527   : > { %3231 = vmax.xlane.f32.xlu1 %v3230_v50  ;;  %v3224_v47 = vsel %vm3103_vm0, %v18246_v61, -inf }
 0x529   : > { %3222 = vmax.xlane.f32.xlu0 %v3221_v19 }
 0x52b   : > { %3225 = vmax.xlane.f32.xlu1 %v3224_v47 }
 0x52d   : > { %3228 = vmax.xlane.f32.xlu0 %v3227_v37 }
 0x58a   : > { %v14067_v8 = vpop.f32.mrb[40].mxu1 }
 0x58b   : > { %v3464_v11 = vpop.f32.mrb[41].mxu1  ;;  %v3497_v60 = vmul.f32 0.125, %v14067_v8 }
 0x58c   : > { %v3495_v16 = vmul.f32 0.125, %v3464_v11  ;;  %v14068_v29 = vpop.f32.mrb[42].mxu1 }
 0x58d   : > { %v3498_v31 = vmul.f32 0.125, %v14068_v29  ;;  %v3467_v57 = vpop.f32.mrb[43].mxu1  ;;  %v18272_v50 = vsel %vm18172_vm1, %v3497_v60, -1e+30 }
 0x58e   : > { %v3496_v22 = vmul.f32 0.125, %v3467_v57  ;;  %v18260_v17 = vsel %vm18177_vm2, %v3495_v16, -1e+30  ;;  %v3517_v8 = vsel %vm3103_vm0, %v18272_v50, -inf }
 0x58f   : > { %v3511_v45 = vsel %vm3103_vm0, %v18260_v17, -inf  ;;  %v18266_v42 = vsel %vm18200_vm4, %v3498_v31, -1e+30 }
 0x590   : > { %3512 = vmax.xlane.f32.xlu0 %v3511_v45  ;;  %v3520_v58 = vsel %vm3103_vm0, %v18266_v42, -inf  ;;  %v18276_v19 = vsel %vm18186_vm3, %v3496_v22, -1e+30 }
 0x591   : > { %3521 = vmax.xlane.f32.xlu1 %v3520_v58  ;;  %v3514_v31 = vsel %vm3103_vm0, %v18276_v19, -inf }
 0x592   : > { %v14071_v47 = vpop.f32.mrb[44].mxu1 }
 0x593   : > { %v3480_v37 = vpop.f32.mrb[45].mxu1  ;;  %v3501_v11 = vmul.f32 0.125, %v14071_v47 }
 0x594   : > { %v3499_v16 = vmul.f32 0.125, %v3480_v37  ;;  %v14072_v29 = vpop.f32.mrb[46].mxu1  ;;  %3518 = vmax.xlane.f32.xlu0 %v3517_v8 }
 0x595   : > { %v3502_v57 = vmul.f32 0.125, %v14072_v29  ;;  %v3483_v60 = vpop.f32.mrb[47].mxu1  ;;  %3515 = vmax.xlane.f32.xlu1 %v3514_v31  ;;  %v18296_v8 = vsel %vm18240_vm8, %v3501_v11, -1e+30 }
 0x596   : > { %v3500_v45 = vmul.f32 0.125, %v3483_v60  ;;  %v18284_v22 = vsel %vm18219_vm6, %v3499_v16, -1e+30  ;;  %v3529_v29 = vsel %vm3103_vm0, %v18296_v8, -inf }
 0x597   : > { %v3523_v58 = vsel %vm3103_vm0, %v18284_v22, -inf  ;;  %v18290_v47 = vsel %vm18215_vm5, %v3502_v57, -1e+30 }
 0x598   : > { %3524 = vmax.xlane.f32.xlu0 %v3523_v58  ;;  %v3532_v37 = vsel %vm3103_vm0, %v18290_v47, -inf  ;;  %v18300_v16 = vsel %vm18226_vm7, %v3500_v45, -1e+30 }
 0x599   : > { %3533 = vmax.xlane.f32.xlu1 %v3532_v37  ;;  %v3526_v31 = vsel %vm3103_vm0, %v18300_v16, -inf }
 0x59c   : > { %3530 = vmax.xlane.f32.xlu0 %v3529_v29 }
 0x59d   : > { %3527 = vmax.xlane.f32.xlu1 %v3526_v31 }
 0x5aa   : > { %v3217_v57 = vpop.xlane.xlu0 %3216 }
 0x5ab   : > { %v3235_v60 = vsub.f32 %v18184_v56, %v3217_v57 }
 0x5ad   : > { %v3245_v58 = vmul.f32 1.442695, %v3235_v60  ;;  %v3214_v52 = vpop.xlane.xlu1 %3213 }
 0x5ae   : > { %v3211_v11 = vpop.xlane.xlu0 %3210  ;;  %v3234_v45 = vsub.f32 %v18198_v6, %v3214_v52 }
 0x5af   : > { %16094 = vpow2.f32 %v3245_v58  ;;  %v3233_v37 = vsub.f32 %v18194_v54, %v3211_v11 }
 0x5b0   : > { %v3243_v27 = vmul.f32 1.442695, %v3234_v45 }
 0x5b1   : > { %v3241_v21 = vmul.f32 1.442695, %v3233_v37 }
 0x5b2   : > { %v3220_v7 = vpop.xlane.xlu0 %3219 }
 0x5b3   : > { %16096 = vpow2.f32 %v3241_v21  ;;  %v3236_v29 = vsub.f32 %v18213_v24, %v3220_v7 }
 0x5b4   : > { %v3232_v63 = vpop.xlane.xlu1 %3231 }
 0x5b5   : > { %v3247_v1 = vmul.f32 1.442695, %v3236_v29  ;;  %v3240_v31 = vsub.f32 %v18232_v33, %v3232_v63 }
 0x5b6   : > { %v3223_v40 = vpop.xlane.xlu0 %3222 }
 0x5b7   : > { %16098 = vpow2.f32 %v3247_v1  ;;  %v3237_v56 = vsub.f32 %v18236_v62, %v3223_v40  ;;  %v3255_v54 = vmul.f32 1.442695, %v3240_v31 }
 0x5b8   : > { %v3226_v57 = vpop.xlane.xlu1 %3225  ;;  %16100 = vpow2.f32 %v3243_v27 }
 0x5b9   : > { %v18312_v60 = vpop.eup %16094  ;;  %v3238_v52 = vsub.f32 %v18246_v61, %v3226_v57  ;;  %v3249_v24 = vmul.f32 1.442695, %v3237_v56  ;;  %16102 = vpow2.f32 %v3255_v54 }
 0x5ba   : > { %v3229_v6 = vpop.xlane.xlu0 %3228  ;;  %v3263_v7 = vsel %vm3103_vm0, %v18312_v60, 0.0 }
 0x5bb   : > { %v3239_v21 = vsub.f32 %v18252_v9, %v3229_v6  ;;  %3264 = vadd.xlane.f32.xlu0 %v3263_v7  ;;  %v3251_v1 = vmul.f32 1.442695, %v3238_v52 }
 0x5bd   : > { %v18318_v63 = vpop.eup %16096  ;;  %v3253_v40 = vmul.f32 1.442695, %v3239_v21 }
 0x5be   : > { %v3257_v33 = vsel %vm3103_vm0, %v18318_v63, 0.0 }
 0x5bf   : > { %16104 = vpow2.f32 %v3253_v40  ;;  %3258 = vadd.xlane.f32.xlu0 %v3257_v33 }
 0x5c0   : > { %16106 = vpow2.f32 %v3249_v24 }
 0x5c1   : > { %v18322_v27 = vpop.eup %16098  ;;  %16108 = vpow2.f32 %v3251_v1 }
 0x5c2   : > { %v3266_v62 = vsel %vm3103_vm0, %v18322_v27, 0.0  ;;  %v18326_v61 = vpop.eup %16100 }
 0x5c3   : > { %3267 = vadd.xlane.f32.xlu1 %v3266_v62  ;;  %v3260_v9 = vsel %vm3103_vm0, %v18326_v61, 0.0  ;;  %v18330_v58 = vpop.eup %16102 }
 0x5c4   : > { %v3278_v29 = vsel %vm3103_vm0, %v18330_v58, 0.0 }
 0x5c7   : > { %3261 = vadd.xlane.f32.xlu1 %v3260_v9 }
 0x5c9   : > { %v18332_v11 = vpop.eup %16104 }
 0x5ca   : > { %v18334_v37 = vpop.eup %16106  ;;  %v3275_v45 = vsel %vm3103_vm0, %v18332_v11, 0.0 }
 0x5cb   : > { %v18340_v31 = vpop.eup %16108  ;;  %3276 = vadd.xlane.f32.xlu0 %v3275_v45  ;;  %3279 = vadd.xlane.f32.xlu1 %v3278_v29  ;;  %v3269_v56 = vsel %vm3103_vm0, %v18334_v37, 0.0 }
 0x5cc   : > { %v3272_v57 = vsel %vm3103_vm0, %v18340_v31, 0.0 }
 0x5cf   : > { %3270 = vadd.xlane.f32.xlu0 %v3269_v56  ;;  %3273 = vadd.xlane.f32.xlu1 %v3272_v57 }
 0x5e0   : > { %3609 = vrot.lane.b32.xlu1 %v18049_v10, %s16849_s24 }
 0x5e4   : > { %3611 = vrot.lane.b32.xlu1 %v18065_v15, %s16849_s24 }
 0x61d   : > { %v3513_v54 = vpop.xlane.xlu0 %3512 }
 0x61e   : > { %v3522_v52 = vpop.xlane.xlu1 %3521  ;;  %v3535_v7 = vsub.f32 %v18260_v17, %v3513_v54 }
 0x61f   : > { %v3538_v6 = vsub.f32 %v18266_v42, %v3522_v52 }
 0x620   : > { %v3543_v62 = vmul.f32 1.442695, %v3535_v7 }
 0x621   : > { %v3549_v21 = vmul.f32 1.442695, %v3538_v6  ;;  %v3519_v24 = vpop.xlane.xlu0 %3518 }
 0x622   : > { %v3537_v1 = vsub.f32 %v18272_v50, %v3519_v24  ;;  %v3516_v40 = vpop.xlane.xlu1 %3515 }
 0x623   : > { %16110 = vpow2.f32 %v3549_v21  ;;  %v3536_v33 = vsub.f32 %v18276_v19, %v3516_v40 }
 0x624   : > { %v3547_v9 = vmul.f32 1.442695, %v3537_v1 }
 0x625   : > { %v3545_v10 = vmul.f32 1.442695, %v3536_v33  ;;  %v3525_v57 = vpop.xlane.xlu0 %3524 }
 0x626   : > { %16112 = vpow2.f32 %v3547_v9  ;;  %v3534_v54 = vpop.xlane.xlu1 %3533  ;;  %v3539_v40 = vsub.f32 %v18284_v22, %v3525_v57 }
 0x627   : > { %16114 = vpow2.f32 %v3545_v10 }
 0x628   : > { %16116 = vpow2.f32 %v3543_v62 }
 0x629   : > { %v3531_v52 = vpop.xlane.xlu0 %3530 }
 0x62a   : > { %v3528_v7 = vpop.xlane.xlu1 %3527 }
 0x62b   : > { %v3540_v1 = vsub.f32 %v18300_v16, %v3528_v7 }
 0x62d   : > { %v18354_v15 = vpop.eup %16110  ;;  %v3553_v62 = vmul.f32 1.442695, %v3540_v1 }
 0x62e   : > { %v3568_v42 = vsel %vm3103_vm0, %v18354_v15, 0.0 }
 0x62f   : > { %3569 = vadd.xlane.f32.xlu1 %v3568_v42  ;;  %v3541_v42 = vsub.f32 %v18296_v8, %v3531_v52 }
 0x630   : > { %v18358_v17 = vpop.eup %16112 }
 0x631   : > { %v18360_v45 = vpop.eup %16114  ;;  %v3565_v50 = vsel %vm3103_vm0, %v18358_v17, 0.0  ;;  %v3555_v22 = vmul.f32 1.442695, %v3541_v42 }
 0x632   : > { %v18364_v19 = vpop.eup %16116  ;;  %3566 = vadd.xlane.f32.xlu0 %v3565_v50  ;;  %v3562_v29 = vsel %vm3103_vm0, %v18360_v45, 0.0 }
 0x633   : > { %3563 = vadd.xlane.f32.xlu1 %v3562_v29  ;;  %v3559_v56 = vsel %vm3103_vm0, %v18364_v19, 0.0 }
 0x636   : > { %3560 = vadd.xlane.f32.xlu0 %v3559_v56  ;;  %v3542_v56 = vsub.f32 %v18290_v47, %v3534_v54 }
 0x638   : > { %v3557_v52 = vmul.f32 1.442695, %v3542_v56 }
 0x644   : > { %3613 = vrot.lane.b32.xlu1 %v18078_v12, %s16849_s24  ;;  %v3551_v12 = vmul.f32 1.442695, %v3539_v40 }
 0x648   : > { %v3265_v6 = vpop.xlane.xlu0 %3264 }
 0x64c   : > { %3607 = vrot.lane.b32.xlu0 %v18036_v3, %s16849_s24  ;;  %v3259_v21 = vpop.xlane.xlu0 %3258 }
 0x650   : > { %v3268_v24 = vpop.xlane.xlu1 %3267 }
 0x651   : > { %16118 = vrcp.f32 %v3268_v24 }
 0x652   : > { %16120 = vrcp.f32 %v3259_v21 }
 0x653   : > { %16122 = vrcp.f32 %v3265_v6 }
 0x654   : > { %v3262_v33 = vpop.xlane.xlu1 %3261 }
 0x655   : > { %16124 = vrcp.f32 %v3262_v33 }
 0x656   : > { %16126 = vpow2.f32 %v3553_v62 }
 0x658   : > { %v3277_v9 = vpop.xlane.xlu0 %3276  ;;  %v3280_v10 = vpop.xlane.xlu1 %3279 }
 0x659   : > { %16128 = vrcp.f32 %v3277_v9 }
 0x65a   : > { %16130 = vrcp.f32 %v3280_v10 }
 0x65b   : > { %v16119_v3 = vpop.eup %16118  ;;  %16132 = vpow2.f32 %v3551_v12 }
 0x65c   : > { %v3271_v50 = vpop.xlane.xlu0 %3270  ;;  %v3274_v16 = vpop.xlane.xlu1 %3273  ;;  %v3292_v7 = vmul.f32 %v16119_v3, %v18322_v27 }
 0x65d   : > { %v16121_v29 = vpop.eup %16120  ;;  %16134 = vrcp.f32 %v3271_v50 }
 0x65e   : > { %v16123_v57 = vpop.eup %16122  ;;  %16136 = vrcp.f32 %v3274_v16  ;;  %v3289_v21 = vmul.f32 %v16121_v29, %v18318_v63 }
 0x65f   : > { %v16125_v6 = vpop.eup %16124  ;;  %16138 = vpow2.f32 %v3555_v22  ;;  %v3291_v24 = vmul.f32 %v16123_v57, %v18312_v60 }
 0x660   : > { %v3290_v8 = vmul.f32 %v16125_v6, %v18326_v61  ;;  %v18382_v40 = vpop.eup %16126  ;;  %16140 = vpow2.f32 %v3557_v52 }
 0x661   : > { %v3298_v33 = vpack.c.bf16 %v3292_v7, %v3291_v24  ;;  %v3574_v61 = vsel %vm3103_vm0, %v18382_v40, 0.0 }
 0x662   : > { %v3297_v1 = vpack.c.bf16 %v3290_v8, %v3289_v21 }
 0x663   : > { %v16129_v47 = vpop.eup %16128 }
 0x664   : > { %14049 = vmatprep.mubr.msk.bf16.mxu0 %vm3103_vm0, %v3297_v1  ;;  %v16131_v54 = vpop.eup %16130  ;;  %v3295_v12 = vmul.f32 %v16129_v47, %v18332_v11 }
 0x665   : > { %14050 = vmatmul.mubr.msk.bf16.vlgmr.msra.gmra.mrb[72].mxu0 %vm3103_vm0, %v3298_v33  ;;  %v18386_v27 = vpop.eup %16132  ;;  %v3296_v9 = vmul.f32 %v16131_v54, %v18330_v58 }
 0x666   : > { %v3571_v42 = vsel %vm3103_vm0, %v18386_v27, 0.0 }
 0x667   : > { %v16135_v63 = vpop.eup %16134  ;;  %v3300_v16 = vpack.c.bf16 %v3296_v9, %v3295_v12 }
 0x668   : > { %v16137_v62 = vpop.eup %16136  ;;  %3575 = vadd.xlane.f32.xlu1 %v3574_v61  ;;  %v3293_v60 = vmul.f32 %v16135_v63, %v18334_v37 }
 0x669   : > { %v3294_v10 = vmul.f32 %v16137_v62, %v18340_v31  ;;  %v18396_v3 = vpop.eup %16138  ;;  %v3610_v31 = vpop.permute.xlu1 %3609 }
 0x66a   : > { %v3577_v37 = vsel %vm3103_vm0, %v18396_v3, 0.0  ;;  %v18402_v11 = vpop.eup %16140 }
 0x66b   : > { %3572 = vadd.xlane.f32.xlu0 %v3571_v42  ;;  %v3299_v50 = vpack.c.bf16 %v3294_v10, %v3293_v60  ;;  %v3580_v58 = vsel %vm3103_vm0, %v18402_v11, 0.0  ;;  %v3722_v60 = vsel %vm3103_vm0, %v18131_v44, 0 }
 0x66d   : > { %14053 = vmatprep.mubr.msk.bf16.mxu0 %vm3103_vm0, %v3299_v50  ;;  %v3612_v29 = vpop.permute.xlu1 %3611 }
 0x66e   : > { %14054 = vmatmul.mubr.msk.bf16.gmra.mrb[76].mxu0 %vm3103_vm0, %v3300_v16 }
 0x66f   : > { %3578 = vadd.xlane.f32.xlu0 %v3577_v37 }
 0x673   : > { %3581 = vadd.xlane.f32.xlu0 %v3580_v58 }
 0x6bc   : > { %v3570_v56 = vpop.xlane.xlu1 %3569 }
 0x6bf   : > { %v3567_v22 = vpop.xlane.xlu0 %3566 }
 0x6c0   : > { %v3564_v57 = vpop.xlane.xlu1 %3563 }
 0x6c1   : > { %16142 = vrcp.f32 %v3564_v57 }
 0x6c3   : > { %v3561_v6 = vpop.xlane.xlu0 %3560 }
 0x6c4   : > { %16144 = vrcp.f32 %v3561_v6  ;;  %v3614_v47 = vpop.permute.xlu1 %3613 }
 0x6c5   : > { %16146 = vrcp.f32 %v3567_v22 }
 0x6c6   : > { %16148 = vrcp.f32 %v3570_v56 }
 0x6c7   : > { %v3608_v7 = vpop.permute.xlu0 %3607 }
 0x6c8   : > { %14073 = vmatprep.subr.bf16.mxu0 %v3608_v7 }
 0x6c9   : > { %14074 = vmatpush3.bf16.msra.mxu0 %v3608_v7 }
 0x6ca   : > { %14075 = vmatprep.subr.bf16.mxu0 %v3610_v31 }
 0x6cb   : > { %v16143_v21 = vpop.eup %16142 }
 0x6cc   : > { %v3592_v1 = vmul.f32 %v16143_v21, %v18360_v45  ;;  %v3713_v45 = vsel %vm3103_vm0, %v18119_v28, 0 }
 0x6cd   : > { %14076 = vmatpush3.bf16.msra.mxu0 %v3610_v31 }
 0x6ce   : > { %v16145_v8 = vpop.eup %16144  ;;  %14077 = vmatprep.subr.bf16.mxu0 %v3612_v29 }
 0x6cf   : > { %v16147_v52 = vpop.eup %16146  ;;  %v3591_v24 = vmul.f32 %v16145_v8, %v18364_v19 }
 0x6d0   : > { %v16149_v33 = vpop.eup %16148  ;;  %v3593_v63 = vmul.f32 %v16147_v52, %v18358_v17  ;;  %v3716_v17 = vsel %vm3103_vm0, %v18123_v30, 0 }
 0x6d1   : > { %14078 = vmatpush3.bf16.msra.mxu0 %v3612_v29  ;;  %v3599_v54 = vpack.c.bf16 %v3592_v1, %v3591_v24  ;;  %v3594_v61 = vmul.f32 %v16149_v33, %v18354_v15  ;;  %v3719_v15 = vsel %vm3103_vm0, %v18127_v55, 0 }
 0x6d2   : > { %14079 = vmatprep.subr.bf16.mxu0 %v3614_v47 }
 0x6d3   : > { %14081 = vmatprep.mubr.msk.bf16.mxu0 %vm3103_vm0, %v3599_v54  ;;  %v3600_v62 = vpack.c.bf16 %v3594_v61, %v3593_v63 }
 0x6d5   : > { %14080 = vmatpush3.bf16.msra.mxu0 %v3614_v47 }
 0x6d6   : > { %14641 = vmatprep.subr.msk.bf16.mxu0 %vm3103_vm0, %v18119_v28 }
 0x6d8   : > { %14082 = vmatmul.mubr.msk.bf16.vlgmr.msra.gmra.mrb[80].mxu0 %vm3103_vm0, %v3600_v62 }
 0x6de   : > { %14090 = vmatpush3.bf16.xpose.msra.mxu0 %v3713_v45 }
 0x6df   : > { %14642 = vmatprep.subr.msk.bf16.mxu0 %vm3103_vm0, %v18123_v30 }
 0x6e6   : > { %14092 = vmatpush3.bf16.xpose.msra.mxu0 %v3716_v17 }
 0x6e7   : > { %14643 = vmatprep.subr.msk.bf16.mxu0 %vm3103_vm0, %v18127_v55 }
 0x6ee   : > { %14094 = vmatpush3.bf16.xpose.msra.mxu0 %v3719_v15 }
 0x6ef   : > { %14644 = vmatprep.subr.msk.bf16.mxu0 %vm3103_vm0, %v18131_v44 }
 0x6f5   : > { %v3576_v19 = vpop.xlane.xlu1 %3575 }
 0x6f6   : > { %14096 = vmatpush3.bf16.xpose.msra.mxu0 %v3722_v60  ;;  %16150 = vrcp.f32 %v3576_v19 }
 0x6f8   : > { %v3573_v12 = vpop.xlane.xlu0 %3572 }
 0x6f9   : > { %16152 = vrcp.f32 %v3573_v12 }
 0x6fc   : > { %v3579_v9 = vpop.xlane.xlu0 %3578 }
 0x6fd   : > { %16154 = vrcp.f32 %v3579_v9 }
 0x700   : > { %v3582_v10 = vpop.xlane.xlu0 %3581  ;;  %v16151_v42 = vpop.eup %16150 }
 0x701   : > { %16156 = vrcp.f32 %v3582_v10  ;;  %v3596_v37 = vmul.f32 %v16151_v42, %v18382_v40 }
 0x703   : > { %v16153_v50 = vpop.eup %16152 }
 0x704   : > { %v3595_v16 = vmul.f32 %v16153_v50, %v18386_v27 }
 0x706   : > { %v3601_v58 = vpack.c.bf16 %v3596_v37, %v3595_v16 }
 0x707   : > { %v16155_v31 = vpop.eup %16154 }
 0x708   : > { %14085 = vmatprep.mubr.msk.bf16.mxu0 %vm3103_vm0, %v3601_v58  ;;  %v3597_v56 = vmul.f32 %v16155_v31, %v18396_v3 }
 0x70b   : > { %v16157_v29 = vpop.eup %16156 }
 0x70c   : > { %v3598_v22 = vmul.f32 %v16157_v29, %v18402_v11 }
 0x70e   : > { %v3602_v57 = vpack.c.bf16 %v3598_v22, %v3597_v56 }
 0x710   : > { %14086 = vmatmul.mubr.msk.bf16.gmra.mrb[84].mxu0 %vm3103_vm0, %v3602_v57 }
 0x711   : > { %14097 = vmatprep.mubr.msk.bf16.mxu0 %vm3103_vm0, %v18018_v20 }
 0x718   : > { %14098 = vmatmul.mubr.msk.bf16.vlgmr.msra.gmra.mrb[88].mxu0 %vm3103_vm0, %v18024_v36 }
 0x719   : > { %14101 = vmatprep.mubr.msk.bf16.mxu0 %vm3103_vm0, %v18028_v43 }
 0x720   : > { %14102 = vmatmul.mubr.msk.bf16.gmra.mrb[92].mxu0 %vm3103_vm0, %v18032_v23 }
 0x738   : > { %v18442_v40 = vpop.f32.mrb[72].mxu0 }
 0x739   : > { %21162 = vst [vmem:[#allocation45_spill] sm:$0xff] %v18442_v40  ;;  %v18444_v27 = vpop.f32.mrb[73].mxu0 }
 0x73a   : > { %21163 = vst [vmem:[#allocation46_spill] sm:$0xff] %v18444_v27  ;;  %v18446_v3 = vpop.f32.mrb[74].mxu0 }
 0x73b   : > { %21164 = vst [vmem:[#allocation47_spill] sm:$0xff] %v18446_v3  ;;  %v18450_v6 = vpop.f32.mrb[75].mxu0 }
 0x741   : > { %v18454_v21 = vpop.f32.mrb[76].mxu0 }
 0x742   : > { %21165 = vst [vmem:[#allocation48_spill] sm:$0xff] %v18454_v21  ;;  %v18456_v8 = vpop.f32.mrb[77].mxu0 }
 0x743   : > { %21166 = vst [vmem:[#allocation49_spill] sm:$0xff] %v18456_v8  ;;  %v18458_v52 = vpop.f32.mrb[78].mxu0 }
 0x744   : > { %21167 = vst [vmem:[#allocation50_spill] sm:$0xff] %v18458_v52  ;;  %v18462_v1 = vpop.f32.mrb[79].mxu0 }
 0x745   : > { %21168 = vst [vmem:[#allocation51_spill] sm:$0xff] %v18462_v1 }
 0x7ab   : > { %v18466_v47 = vpop.f32.mrb[80].mxu0 }
 0x7ac   : > { %v18468_v54 = vpop.f32.mrb[81].mxu0 }
 0x7ad   : > { %v18470_v63 = vpop.f32.mrb[82].mxu0 }
 0x7ae   : > { %v18474_v62 = vpop.f32.mrb[83].mxu0 }
 0x7e3   : > { %v18478_v17 = vpop.f32.mrb[84].mxu0 }
 0x7e4   : > { %v18480_v15 = vpop.f32.mrb[85].mxu0 }
 0x7e5   : > { %v18482_v19 = vpop.f32.mrb[86].mxu0 }
 0x7e6   : > { %v18486_v12 = vpop.f32.mrb[87].mxu0 }
 0x7eb   : > { %v14099_v10 = vpop.f32.mrb[88].mxu0 }
 0x7ec   : > { %v3758_v42 = vpop.f32.mrb[89].mxu0  ;;  %v3791_v50 = vmul.f32 0.125, %v14099_v10 }
 0x7ed   : > { %v3789_v16 = vmul.f32 0.125, %v3758_v42  ;;  %v14100_v37 = vpop.f32.mrb[90].mxu0 }
 0x7ee   : > { %v3761_v58 = vpop.f32.mrb[91].mxu0  ;;  %v3792_v31 = vmul.f32 0.125, %v14100_v37  ;;  %v3799_v24 = vsel %vm18172_vm1, %v3791_v50, -1e+30 }
 0x7ef   : > { %v3790_v29 = vmul.f32 0.125, %v3761_v58  ;;  %v3797_v56 = vsel %vm18177_vm2, %v3789_v16, -1e+30  ;;  %v3811_v58 = vsel %vm3103_vm0, %v3799_v24, -inf }
 0x7f0   : > { %v3805_v22 = vsel %vm3103_vm0, %v3797_v56, -inf  ;;  %v3800_v42 = vsel %vm18200_vm4, %v3792_v31, -1e+30 }
 0x7f1   : > { %3806 = vmax.xlane.f32.xlu0 %v3805_v22  ;;  %v3798_v57 = vsel %vm18186_vm3, %v3790_v29, -1e+30  ;;  %v3814_v29 = vsel %vm3103_vm0, %v3800_v42, -inf }
 0x7f2   : > { %v3808_v33 = vsel %vm3103_vm0, %v3798_v57, -inf }
 0x7f3   : > { %3809 = vmax.xlane.f32.xlu1 %v3808_v33  ;;  %v14103_v10 = vpop.f32.mrb[92].mxu0 }
 0x7f4   : > { %v3774_v37 = vpop.f32.mrb[93].mxu0  ;;  %v3795_v16 = vmul.f32 0.125, %v14103_v10 }
 0x7f5   : > { %v3793_v11 = vmul.f32 0.125, %v3774_v37  ;;  %3812 = vmax.xlane.f32.xlu0 %v3811_v58  ;;  %v14104_v22 = vpop.f32.mrb[94].mxu0 }
 0x7f6   : > { %v3777_v7 = vpop.f32.mrb[95].mxu0  ;;  %v3796_v60 = vmul.f32 0.125, %v14104_v22  ;;  %v3803_v10 = vsel %vm18240_vm8, %v3795_v16, -1e+30 }
 0x7f7   : > { %v3794_v9 = vmul.f32 0.125, %v3777_v7  ;;  %3815 = vmax.xlane.f32.xlu1 %v3814_v29  ;;  %v3801_v33 = vsel %vm18219_vm6, %v3793_v11, -1e+30  ;;  %v3823_v7 = vsel %vm3103_vm0, %v3803_v10, -inf }
 0x7f8   : > { %v3817_v50 = vsel %vm3103_vm0, %v3801_v33, -inf  ;;  %v3804_v58 = vsel %vm18215_vm5, %v3796_v60, -1e+30 }
 0x7f9   : > { %3818 = vmax.xlane.f32.xlu0 %v3817_v50  ;;  %v3802_v31 = vsel %vm18226_vm7, %v3794_v9, -1e+30  ;;  %v3826_v11 = vsel %vm3103_vm0, %v3804_v58, -inf }
 0x7fa   : > { %v3820_v37 = vsel %vm3103_vm0, %v3802_v31, -inf }
 0x7fb   : > { %3821 = vmax.xlane.f32.xlu1 %v3820_v37 }
 0x7fd   : > { %3824 = vmax.xlane.f32.xlu0 %v3823_v7 }
 0x7ff   : > { %3827 = vmax.xlane.f32.xlu1 %v3826_v11 }
 0x87e   : > { %v3807_v22 = vpop.xlane.xlu0 %3806 }
 0x87f   : > { %v3829_v29 = vsub.f32 %v3797_v56, %v3807_v22 }
 0x880   : > { %v3810_v50 = vpop.xlane.xlu1 %3809 }
 0x881   : > { %v3830_v9 = vsub.f32 %v3798_v57, %v3810_v50  ;;  %v3837_v21 = vmul.f32 1.442695, %v3829_v29 }
 0x882   : > { %v3813_v61 = vpop.xlane.xlu0 %3812 }
 0x883   : > { %v3831_v45 = vsub.f32 %v3799_v24, %v3813_v61  ;;  %v3839_v1 = vmul.f32 1.442695, %v3830_v9 }
 0x884   : > { %v3816_v16 = vpop.xlane.xlu1 %3815 }
 0x885   : > { %v3841_v52 = vmul.f32 1.442695, %v3831_v45  ;;  %v3832_v8 = vsub.f32 %v3800_v42, %v3816_v16 }
 0x886   : > { %v3819_v37 = vpop.xlane.xlu0 %3818 }
 0x887   : > { %16158 = vpow2.f32 %v3841_v52  ;;  %v3843_v60 = vmul.f32 1.442695, %v3832_v8  ;;  %v3833_v7 = vsub.f32 %v3801_v33, %v3819_v37 }
 0x888   : > { %16160 = vpow2.f32 %v3837_v21  ;;  %v3822_v33 = vpop.xlane.xlu1 %3821 }
 0x889   : > { %16162 = vpow2.f32 %v3843_v60  ;;  %v3845_v3 = vmul.f32 1.442695, %v3833_v7  ;;  %v3834_v50 = vsub.f32 %v3802_v31, %v3822_v33 }
 0x88a   : > { %v3825_v40 = vpop.xlane.xlu0 %3824  ;;  %16164 = vpow2.f32 %v3839_v1 }
 0x88b   : > { %v3835_v11 = vsub.f32 %v3803_v10, %v3825_v40  ;;  %v3847_v16 = vmul.f32 1.442695, %v3834_v50 }
 0x88c   : > { %v3828_v10 = vpop.xlane.xlu1 %3827 }
 0x88d   : > { %v3849_v56 = vmul.f32 1.442695, %v3835_v11  ;;  %v3836_v29 = vsub.f32 %v3804_v58, %v3828_v10 }
 0x88f   : > { %16166 = vpow2.f32 %v3849_v56  ;;  %v3851_v9 = vmul.f32 1.442695, %v3836_v29 }
 0x890   : > { %16168 = vpow2.f32 %v3845_v3 }
 0x891   : > { %v16159_v22 = vpop.eup %16158  ;;  %16170 = vpow2.f32 %v3851_v9 }
 0x892   : > { %v16161_v24 = vpop.eup %16160  ;;  %v3859_v61 = vsel %vm3103_vm0, %v16159_v22, 0.0  ;;  %16172 = vpow2.f32 %v3847_v16 }
 0x893   : > { %v16163_v45 = vpop.eup %16162  ;;  %3860 = vadd.xlane.f32.xlu0 %v3859_v61  ;;  %v3853_v21 = vsel %vm3103_vm0, %v16161_v24, 0.0 }
 0x894   : > { %v3862_v57 = vsel %vm3103_vm0, %v16163_v45, 0.0  ;;  %v16165_v52 = vpop.eup %16164 }
 0x895   : > { %3863 = vadd.xlane.f32.xlu1 %v3862_v57  ;;  %v3856_v8 = vsel %vm3103_vm0, %v16165_v52, 0.0 }
 0x897   : > { %3854 = vadd.xlane.f32.xlu0 %v3853_v21 }
 0x899   : > { %v18518_v40 = vpop.eup %16166  ;;  %3857 = vadd.xlane.f32.xlu1 %v3856_v8 }
 0x89a   : > { %v3871_v3 = vsel %vm3103_vm0, %v18518_v40, 0.0  ;;  %v18522_v1 = vpop.eup %16168 }
 0x89b   : > { %3872 = vadd.xlane.f32.xlu0 %v3871_v3  ;;  %v3865_v42 = vsel %vm3103_vm0, %v18522_v1, 0.0 }
 0x89f   : > { %3866 = vadd.xlane.f32.xlu0 %v3865_v42 }
 0x8aa   : > { %3996 = vrot.lane.b32.xlu1 %v18123_v30, %s16849_s24  ;;  %v16171_v30 = vpop.eup %16170 }
 0x8ab   : > { %v16173_v37 = vpop.eup %16172 }
 0x8ae   : > { %3998 = vrot.lane.b32.xlu1 %v18127_v55, %s16849_s24  ;;  %v3874_v55 = vsel %vm3103_vm0, %v16171_v30, 0.0 }
 0x8b5   : > { %3994 = vrot.lane.b32.xlu0 %v18119_v28, %s16849_s24  ;;  %v3868_v28 = vsel %vm3103_vm0, %v16173_v37, 0.0 }
 0x8b9   : > { %3982 = vrot.lane.b32.xlu0 %v18018_v20, %s16849_s24 }
 0x8bd   : > { %3986 = vrot.lane.b32.xlu0 %v18028_v43, %s16849_s24 }
 0x8d2   : > { %3875 = vadd.xlane.f32.xlu1 %v3874_v55 }
 0x8d6   : > { %3869 = vadd.xlane.f32.xlu1 %v3868_v28 }
 0x8e7   : > { %4000 = vrot.lane.b32.xlu1 %v18131_v44, %s16849_s24 }
 0x8eb   : > { %3984 = vrot.lane.b32.xlu1 %v18024_v36, %s16849_s24 }
 0x8ef   : > { %3988 = vrot.lane.b32.xlu1 %v18032_v23, %s16849_s24 }
 0x920   : > { %v3861_v20 = vpop.xlane.xlu0 %3860 }
 0x922   : > { %v3864_v43 = vpop.xlane.xlu1 %3863 }
 0x923   : > { %16174 = vrcp.f32 %v3864_v43 }
 0x924   : > { %v3855_v31 = vpop.xlane.xlu0 %3854 }
 0x925   : > { %16176 = vrcp.f32 %v3855_v31 }
 0x926   : > { %16178 = vrcp.f32 %v3861_v20  ;;  %v3858_v58 = vpop.xlane.xlu1 %3857 }
 0x927   : > { %16180 = vrcp.f32 %v3858_v58 }
 0x928   : > { %v3873_v60 = vpop.xlane.xlu0 %3872 }
 0x92a   : > { %v3997_v10 = vpop.permute.xlu1 %3996 }
 0x92b   : > { %v4018_v29 = vsel %vm3103_vm0, %v3997_v10, 0 }
 0x92c   : > { %v3867_v7 = vpop.xlane.xlu0 %3866 }
 0x92d   : > { %v16175_v11 = vpop.eup %16174 }
 0x92e   : > { %v3888_v21 = vmul.f32 %v16175_v11, %v16163_v45  ;;  %v3999_v45 = vpop.permute.xlu1 %3998 }
 0x92f   : > { %v16177_v56 = vpop.eup %16176 }
 0x930   : > { %v16179_v61 = vpop.eup %16178  ;;  %v3995_v44 = vpop.permute.xlu0 %3994  ;;  %v3885_v36 = vmul.f32 %v16177_v56, %v16161_v24 }
 0x931   : > { %v16181_v57 = vpop.eup %16180  ;;  %14645 = vmatprep.subr.msk.bf16.mxu1 %vm3103_vm0, %v3995_v44  ;;  %v3887_v8 = vmul.f32 %v16179_v61, %v16159_v22  ;;  %v4015_v33 = vsel %vm3103_vm0, %v3995_v44, 0  ;;  %v4021_v22 = vsel %vm3103_vm0, %v3999_v45, 0 }
 0x932   : > { %v3886_v23 = vmul.f32 %v16181_v57, %v16165_v52 }
 0x933   : > { %v3894_v42 = vpack.c.bf16 %v3888_v21, %v3887_v8 }
 0x934   : > { %v3893_v3 = vpack.c.bf16 %v3886_v23, %v3885_v36  ;;  %v3983_v56 = vpop.permute.xlu0 %3982 }
 0x936   : > { %14113 = vmatprep.mubr.msk.bf16.mxu1 %vm3103_vm0, %v3893_v3 }
 0x937   : > { %14114 = vmatmul.mubr.msk.bf16.vlgmr.msra.gmra.mrb[48].mxu1 %vm3103_vm0, %v3894_v42 }
 0x938   : > { %14122 = vmatpush3.bf16.xpose.msra.mxu1 %v4015_v33  ;;  %v3987_v44 = vpop.permute.xlu0 %3986 }
 0x939   : > { %14646 = vmatprep.subr.msk.bf16.mxu1 %vm3103_vm0, %v3997_v10 }
 0x940   : > { %14124 = vmatpush3.bf16.xpose.msra.mxu1 %v4018_v29 }
 0x941   : > { %14647 = vmatprep.subr.msk.bf16.mxu1 %vm3103_vm0, %v3999_v45 }
 0x948   : > { %14126 = vmatpush3.bf16.xpose.msra.mxu1 %v4021_v22 }
 0x95f   : > { %v3876_v24 = vpop.xlane.xlu1 %3875 }
 0x960   : > { %16182 = vrcp.f32 %v3876_v24 }
 0x961   : > { %16184 = vrcp.f32 %v3867_v7 }
 0x962   : > { %16186 = vrcp.f32 %v3873_v60 }
 0x963   : > { %v3870_v52 = vpop.xlane.xlu1 %3869 }
 0x964   : > { %16188 = vrcp.f32 %v3870_v52 }
 0x967   : > { %v4001_v50 = vpop.permute.xlu1 %4000 }
 0x968   : > { %v4024_v9 = vsel %vm3103_vm0, %v4001_v50, 0  ;;  %14648 = vmatprep.subr.msk.bf16.mxu1 %vm3103_vm0, %v4001_v50 }
 0x969   : > { %14128 = vmatpush3.bf16.xpose.msra.mxu1 %v4024_v9 }
 0x96a   : > { %14169 = vmatprep.subr.bf16.mxu1 %v18140_v53  ;;  %v16183_v16 = vpop.eup %16182 }
 0x96b   : > { %v16185_v55 = vpop.eup %16184  ;;  %v3892_v43 = vmul.f32 %v16183_v16, %v16171_v30  ;;  %v3985_v61 = vpop.permute.xlu1 %3984 }
 0x96c   : > { %v16187_v28 = vpop.eup %16186  ;;  %v3889_v31 = vmul.f32 %v16185_v55, %v18522_v1 }
 0x96d   : > { %v3891_v60 = vmul.f32 %v16187_v28, %v18518_v40 }
 0x96e   : > { %v16189_v20 = vpop.eup %16188 }
 0x96f   : > { %v3890_v58 = vmul.f32 %v16189_v20, %v16173_v37  ;;  %v3896_v11 = vpack.c.bf16 %v3892_v43, %v3891_v60  ;;  %v3989_v40 = vpop.permute.xlu1 %3988 }
 0x971   : > { %v3895_v7 = vpack.c.bf16 %v3890_v58, %v3889_v31 }
 0x973   : > { %14117 = vmatprep.mubr.msk.bf16.mxu1 %vm3103_vm0, %v3895_v7 }
 0x974   : > { %14118 = vmatmul.mubr.msk.bf16.gmra.mrb[52].mxu1 %vm3103_vm0, %v3896_v11 }
 0x975   : > { %14129 = vmatprep.mubr.msk.bf16.mxu1 %vm3103_vm0, %v3983_v56 }
 0x97c   : > { %14130 = vmatmul.mubr.msk.bf16.vlgmr.msra.gmra.mrb[56].mxu1 %vm3103_vm0, %v3985_v61 }
 0x97d   : > { %14170 = vmatpush3.bf16.msra.mxu1 %v18140_v53  ;;  %14133 = vmatprep.mubr.msk.bf16.mxu1 %vm3103_vm0, %v3987_v44 }
 0x97e   : > { %14171 = vmatprep.subr.bf16.mxu1 %v18146_v32 }
 0x981   : > { %14172 = vmatpush3.bf16.msra.mxu1 %v18146_v32 }
 0x982   : > { %14173 = vmatprep.subr.bf16.mxu1 %v18153_v49 }
 0x984   : > { %14134 = vmatmul.mubr.msk.bf16.gmra.mrb[60].mxu1 %vm3103_vm0, %v3989_v40 }
 0x985   : > { %14174 = vmatpush3.bf16.msra.mxu1 %v18153_v49 }
 0x986   : > { %14175 = vmatprep.subr.bf16.mxu1 %v18162_v39 }
 0x989   : > { %14176 = vmatpush3.bf16.msra.mxu1 %v18162_v39 }
 0xa0a   : > { %v18570_v1 = vpop.f32.mrb[48].mxu1 }
 0xa0b   : > { %21169 = vst [vmem:[#allocation52_spill] sm:$0xff] %v18570_v1  ;;  %v18572_v30 = vpop.f32.mrb[49].mxu1 }
 0xa0c   : > { %v18574_v37 = vpop.f32.mrb[50].mxu1 }
 0xa0d   : > { %21170 = vst [vmem:[#allocation53_spill] sm:$0xff] %v18574_v37  ;;  %v18578_v21 = vpop.f32.mrb[51].mxu1 }
 0xa47   : > { %v18582_v23 = vpop.f32.mrb[52].mxu1 }
 0xa48   : > { %21171 = vst [vmem:[#allocation54_spill] sm:$0xff] %v18582_v23  ;;  %v18584_v8 = vpop.f32.mrb[53].mxu1 }
 0xa49   : > { %21172 = vst [vmem:[#allocation55_spill] sm:$0xff] %v18584_v8  ;;  %v18586_v3 = vpop.f32.mrb[54].mxu1 }
 0xa4a   : > { %21173 = vst [vmem:[#allocation56_spill] sm:$0xff] %v18586_v3  ;;  %v18590_v33 = vpop.f32.mrb[55].mxu1 }
 0xa4b   : > { %21174 = vst [vmem:[#allocation57_spill] sm:$0xff] %v18590_v33 }
 0xa4f   : > { %v14131_v29 = vpop.f32.mrb[56].mxu1 }
 0xa50   : > { %v4093_v45 = vmul.f32 0.125, %v14131_v29  ;;  %v4060_v22 = vpop.f32.mrb[57].mxu1 }
 0xa51   : > { %v4091_v24 = vmul.f32 0.125, %v4060_v22  ;;  %v14132_v52 = vpop.f32.mrb[58].mxu1 }
 0xa52   : > { %v4063_v50 = vpop.f32.mrb[59].mxu1  ;;  %v4101_v9 = vsel %vm18172_vm1, %v4093_v45, -1e+30  ;;  %v4094_v28 = vmul.f32 0.125, %v14132_v52 }
 0xa53   : > { %v4092_v16 = vmul.f32 0.125, %v4063_v50  ;;  %v4113_v55 = vsel %vm3103_vm0, %v4101_v9, -inf  ;;  %v4099_v20 = vsel %vm18177_vm2, %v4091_v24, -1e+30 }
 0xa54   : > { %4114 = vmax.xlane.f32.xlu0 %v4113_v55  ;;  %v4107_v60 = vsel %vm3103_vm0, %v4099_v20, -inf  ;;  %v4102_v11 = vsel %vm18200_vm4, %v4094_v28, -1e+30 }
 0xa55   : > { %v4100_v43 = vsel %vm18186_vm3, %v4092_v16, -1e+30  ;;  %v4116_v45 = vsel %vm3103_vm0, %v4102_v11, -inf }
 0xa56   : > { %v4110_v31 = vsel %vm3103_vm0, %v4100_v43, -inf }
 0xa57   : > { %4111 = vmax.xlane.f32.xlu1 %v4110_v31  ;;  %v14135_v58 = vpop.f32.mrb[60].mxu1 }
 0xa58   : > { %4108 = vmax.xlane.f32.xlu0 %v4107_v60  ;;  %v4076_v7 = vpop.f32.mrb[61].mxu1  ;;  %v4097_v22 = vmul.f32 0.125, %v14135_v58 }
 0xa59   : > { %v4095_v56 = vmul.f32 0.125, %v4076_v7  ;;  %v14136_v61 = vpop.f32.mrb[62].mxu1 }
 0xa5a   : > { %v4098_v44 = vmul.f32 0.125, %v14136_v61  ;;  %v4079_v40 = vpop.f32.mrb[63].mxu1  ;;  %v4105_v28 = vsel %vm18240_vm8, %v4097_v22, -1e+30 }
 0xa5b   : > { %v4096_v29 = vmul.f32 0.125, %v4079_v40  ;;  %v4103_v52 = vsel %vm18219_vm6, %v4095_v56, -1e+30  ;;  %v4125_v58 = vsel %vm3103_vm0, %v4105_v28, -inf }
 0xa5c   : > { %4117 = vmax.xlane.f32.xlu0 %v4116_v45  ;;  %v4106_v24 = vsel %vm18215_vm5, %v4098_v44, -1e+30  ;;  %v4119_v55 = vsel %vm3103_vm0, %v4103_v52, -inf }
 0xa5d   : > { %v4128_v50 = vsel %vm3103_vm0, %v4106_v24, -inf  ;;  %v4104_v16 = vsel %vm18226_vm7, %v4096_v29, -1e+30 }
 0xa5e   : > { %4129 = vmax.xlane.f32.xlu1 %v4128_v50  ;;  %v4122_v31 = vsel %vm3103_vm0, %v4104_v16, -inf }
 0xa60   : > { %4120 = vmax.xlane.f32.xlu0 %v4119_v55 }
 0xa62   : > { %4123 = vmax.xlane.f32.xlu1 %v4122_v31 }
 0xa64   : > { %4126 = vmax.xlane.f32.xlu0 %v4125_v58 }
 0xa73   : > { %4205 = vrot.lane.b32.xlu1 %v18052_v38, %s16849_s24 }
 0xa77   : > { %4207 = vrot.lane.b32.xlu1 %v18068_v34, %s16849_s24 }
 0xae1   : > { %v4115_v60 = vpop.xlane.xlu0 %4114 }
 0xae2   : > { %v4133_v7 = vsub.f32 %v4101_v9, %v4115_v60 }
 0xae4   : > { %v4143_v56 = vmul.f32 1.442695, %v4133_v7  ;;  %v4112_v61 = vpop.xlane.xlu1 %4111 }
 0xae5   : > { %v4109_v44 = vpop.xlane.xlu0 %4108  ;;  %v4132_v29 = vsub.f32 %v4100_v43, %v4112_v61 }
 0xae6   : > { %16190 = vpow2.f32 %v4143_v56  ;;  %v4131_v40 = vsub.f32 %v4099_v20, %v4109_v44 }
 0xae7   : > { %v4141_v55 = vmul.f32 1.442695, %v4132_v29 }
 0xae8   : > { %v4139_v45 = vmul.f32 1.442695, %v4131_v40 }
 0xae9   : > { %v4118_v22 = vpop.xlane.xlu0 %4117 }
 0xaea   : > { %16192 = vpow2.f32 %v4139_v45  ;;  %v4134_v50 = vsub.f32 %v4102_v11, %v4118_v22 }
 0xaeb   : > { %v4130_v56 = vpop.xlane.xlu1 %4129 }
 0xaec   : > { %v4145_v31 = vmul.f32 1.442695, %v4134_v50  ;;  %v4138_v22 = vsub.f32 %v4106_v24, %v4130_v56 }
 0xaed   : > { %v4121_v7 = vpop.xlane.xlu0 %4120 }
 0xaee   : > { %16194 = vpow2.f32 %v4145_v31  ;;  %v4135_v61 = vsub.f32 %v4103_v52, %v4121_v7  ;;  %v4153_v31 = vmul.f32 1.442695, %v4138_v22 }
 0xaef   : > { %16196 = vpow2.f32 %v4141_v55  ;;  %v4124_v45 = vpop.xlane.xlu1 %4123 }
 0xaf0   : > { %v18622_v58 = vpop.eup %16190  ;;  %v4147_v40 = vmul.f32 1.442695, %v4135_v61  ;;  %v4136_v50 = vsub.f32 %v4104_v16, %v4124_v45 }
 0xaf1   : > { %v4161_v38 = vsel %vm3103_vm0, %v18622_v58, 0.0  ;;  %v4127_v44 = vpop.xlane.xlu0 %4126 }
 0xaf2   : > { %4162 = vadd.xlane.f32.xlu0 %v4161_v38  ;;  %v4137_v29 = vsub.f32 %v4105_v28, %v4127_v44  ;;  %16198 = vpow2.f32 %v4147_v40  ;;  %v4149_v38 = vmul.f32 1.442695, %v4136_v50 }
 0xaf4   : > { %v18626_v34 = vpop.eup %16192  ;;  %v4151_v55 = vmul.f32 1.442695, %v4137_v29 }
 0xaf5   : > { %v4155_v9 = vsel %vm3103_vm0, %v18626_v34, 0.0 }
 0xaf6   : > { %4156 = vadd.xlane.f32.xlu0 %v4155_v9  ;;  %16200 = vpow2.f32 %v4151_v55 }
 0xaf7   : > { %16202 = vpow2.f32 %v4153_v31 }
 0xaf8   : > { %v16195_v20 = vpop.eup %16194  ;;  %16204 = vpow2.f32 %v4149_v38 }
 0xaf9   : > { %v4164_v43 = vsel %vm3103_vm0, %v16195_v20, 0.0  ;;  %v16197_v11 = vpop.eup %16196 }
 0xafa   : > { %4165 = vadd.xlane.f32.xlu1 %v4164_v43  ;;  %v4158_v60 = vsel %vm3103_vm0, %v16197_v11, 0.0 }
 0xafe   : > { %4159 = vadd.xlane.f32.xlu1 %v4158_v60  ;;  %v4206_v60 = vpop.permute.xlu1 %4205 }
 0xb02   : > { %v4208_v56 = vpop.permute.xlu1 %4207 }
 0xb0c   : > { %4203 = vrot.lane.b32.xlu0 %v18039_v25, %s16849_s24  ;;  %v18636_v25 = vpop.eup %16198 }
 0xb0d   : > { %v18640_v9 = vpop.eup %16200 }
 0xb0e   : > { %v18642_v52 = vpop.eup %16202  ;;  %v4173_v24 = vsel %vm3103_vm0, %v18640_v9, 0.0 }
 0xb0f   : > { %4209 = vrot.lane.b32.xlu1 %v18081_v14, %s16849_s24  ;;  %v4167_v14 = vsel %vm3103_vm0, %v18636_v25, 0.0  ;;  %v18646_v16 = vpop.eup %16204  ;;  %v4176_v28 = vsel %vm3103_vm0, %v18642_v52, 0.0 }
 0xb10   : > { %v4170_v43 = vsel %vm3103_vm0, %v18646_v16, 0.0 }
 0xb2b   : > { %4168 = vadd.xlane.f32.xlu0 %v4167_v14 }
 0xb2f   : > { %4174 = vadd.xlane.f32.xlu0 %v4173_v24 }
 0xb33   : > { %4177 = vadd.xlane.f32.xlu0 %v4176_v28  ;;  %4171 = vadd.xlane.f32.xlu1 %v4170_v43 }
 0xb7f   : > { %v4163_v7 = vpop.xlane.xlu0 %4162 }
 0xb83   : > { %v4157_v61 = vpop.xlane.xlu0 %4156 }
 0xb87   : > { %v4204_v44 = vpop.permute.xlu0 %4203  ;;  %v4166_v40 = vpop.xlane.xlu1 %4165 }
 0xb88   : > { %14137 = vmatprep.subr.bf16.mxu0 %v4204_v44  ;;  %16206 = vrcp.f32 %v4166_v40 }
 0xb89   : > { %14138 = vmatpush3.bf16.msra.mxu0 %v4204_v44  ;;  %16208 = vrcp.f32 %v4157_v61 }
 0xb8a   : > { %14139 = vmatprep.subr.bf16.mxu0 %v4206_v60  ;;  %16210 = vrcp.f32 %v4163_v7  ;;  %v4309_v7 = vsel %vm3103_vm0, %v18121_v26, 0 }
 0xb8b   : > { %v4160_v29 = vpop.xlane.xlu1 %4159 }
 0xb8c   : > { %16212 = vrcp.f32 %v4160_v29 }
 0xb8d   : > { %14140 = vmatpush3.bf16.msra.mxu0 %v4206_v60 }
 0xb8e   : > { %14141 = vmatprep.subr.bf16.mxu0 %v4208_v56 }
 0xb8f   : > { %v4210_v45 = vpop.permute.xlu1 %4209 }
 0xb91   : > { %14142 = vmatpush3.bf16.msra.mxu0 %v4208_v56 }
 0xb92   : > { %14143 = vmatprep.subr.bf16.mxu0 %v4210_v45  ;;  %v16207_v22 = vpop.eup %16206 }
 0xb93   : > { %v16209_v50 = vpop.eup %16208  ;;  %v4190_v38 = vmul.f32 %v16207_v22, %v16195_v20  ;;  %v4312_v20 = vsel %vm3103_vm0, %v18125_v59, 0 }
 0xb94   : > { %v16211_v55 = vpop.eup %16210  ;;  %v4187_v14 = vmul.f32 %v16209_v50, %v18626_v34  ;;  %v4318_v34 = vsel %vm3103_vm0, %v18135_v41, 0 }
 0xb95   : > { %14144 = vmatpush3.bf16.msra.mxu0 %v4210_v45  ;;  %v4189_v28 = vmul.f32 %v16211_v55, %v18622_v58  ;;  %v4315_v58 = vsel %vm3103_vm0, %v18129_v35, 0 }
 0xb96   : > { %v16213_v31 = vpop.eup %16212  ;;  %14649 = vmatprep.subr.msk.bf16.mxu0 %vm3103_vm0, %v18121_v26 }
 0xb97   : > { %v4188_v24 = vmul.f32 %v16213_v31, %v16197_v11  ;;  %v4196_v60 = vpack.c.bf16 %v4190_v38, %v4189_v28  ;;  %v21175_v28 = vld [vmem:[#allocation42_spill] sm:$0xff] }
 0xb99   : > { %v4195_v43 = vpack.c.bf16 %v4188_v24, %v4187_v14 }
 0xb9b   : > { %14145 = vmatprep.mubr.msk.bf16.mxu0 %vm3103_vm0, %v4195_v43  ;;  %v21176_v43 = vld [vmem:[#allocation43_spill] sm:$0xff] }
 0xb9c   : > { %14146 = vmatmul.mubr.msk.bf16.vlgmr.msra.gmra.mrb[96].mxu0 %vm3103_vm0, %v4196_v60 }
 0xb9e   : > { %14154 = vmatpush3.bf16.xpose.msra.mxu0 %v4309_v7 }
 0xb9f   : > { %14650 = vmatprep.subr.msk.bf16.mxu0 %vm3103_vm0, %v18125_v59 }
 0xba6   : > { %14156 = vmatpush3.bf16.xpose.msra.mxu0 %v4312_v20 }
 0xba7   : > { %14651 = vmatprep.subr.msk.bf16.mxu0 %vm3103_vm0, %v18129_v35 }
 0xbae   : > { %14158 = vmatpush3.bf16.xpose.msra.mxu0 %v4315_v58 }
 0xbaf   : > { %14652 = vmatprep.subr.msk.bf16.mxu0 %vm3103_vm0, %v18135_v41 }
 0xbb6   : > { %14160 = vmatpush3.bf16.xpose.msra.mxu0 %v4318_v34 }
 0xbb8   : > { %v4169_v11 = vpop.xlane.xlu0 %4168 }
 0xbbc   : > { %v4175_v56 = vpop.xlane.xlu0 %4174 }
 0xbbd   : > { %16214 = vrcp.f32 %v4175_v56 }
 0xbbe   : > { %16216 = vrcp.f32 %v4169_v11 }
 0xbc0   : > { %v4178_v61 = vpop.xlane.xlu0 %4177  ;;  %v4172_v44 = vpop.xlane.xlu1 %4171 }
 0xbc1   : > { %16218 = vrcp.f32 %v4178_v61 }
 0xbc2   : > { %16220 = vrcp.f32 %v4172_v44 }
 0xbc7   : > { %v16215_v40 = vpop.eup %16214 }
 0xbc8   : > { %v16217_v29 = vpop.eup %16216  ;;  %v4193_v50 = vmul.f32 %v16215_v40, %v18640_v9  ;;  %v21177_v9 = vld [vmem:[#allocation44_spill] sm:$0xff] }
 0xbc9   : > { %v4191_v31 = vmul.f32 %v16217_v29, %v18636_v25 }
 0xbcb   : > { %v16219_v45 = vpop.eup %16218 }
 0xbcc   : > { %v16221_v22 = vpop.eup %16220  ;;  %v4194_v55 = vmul.f32 %v16219_v45, %v18642_v52 }
 0xbcd   : > { %v4192_v38 = vmul.f32 %v16221_v22, %v18646_v16 }
 0xbce   : > { %v4198_v14 = vpack.c.bf16 %v4194_v55, %v4193_v50 }
 0xbcf   : > { %v4197_v24 = vpack.c.bf16 %v4192_v38, %v4191_v31 }
 0xbd1   : > { %14149 = vmatprep.mubr.msk.bf16.mxu0 %vm3103_vm0, %v4197_v24 }
 0xbd2   : > { %14150 = vmatmul.mubr.msk.bf16.gmra.mrb[100].mxu0 %vm3103_vm0, %v4198_v14 }
 0xbd3   : > { %14161 = vmatprep.mubr.msk.bf16.mxu0 %vm3103_vm0, %v18042_v46 }
 0xbda   : > { %14162 = vmatmul.mubr.msk.bf16.vlgmr.msra.gmra.mrb[104].mxu0 %vm3103_vm0, %v21175_v28 }
 0xbdb   : > { %14165 = vmatprep.mubr.msk.bf16.mxu0 %vm3103_vm0, %v21176_v43 }
 0xbe2   : > { %14166 = vmatmul.mubr.msk.bf16.gmra.mrb[108].mxu0 %vm3103_vm0, %v21177_v9 }
 0xc6f   : > { %v18686_v25 = vpop.f32.mrb[96].mxu0 }
 0xc70   : > { %v18688_v52 = vpop.f32.mrb[97].mxu0 }
 0xc71   : > { %v18690_v16 = vpop.f32.mrb[98].mxu0 }
 0xc72   : > { %v18694_v7 = vpop.f32.mrb[99].mxu0 }
 0xca5   : > { %v18698_v58 = vpop.f32.mrb[100].mxu0 }
 0xca6   : > { %v18700_v34 = vpop.f32.mrb[101].mxu0 }
 0xca7   : > { %v18702_v11 = vpop.f32.mrb[102].mxu0 }
 0xca8   : > { %v18706_v61 = vpop.f32.mrb[103].mxu0 }
 0xcad   : > { %v14163_v40 = vpop.f32.mrb[104].mxu0 }
 0xcae   : > { %v4354_v29 = vpop.f32.mrb[105].mxu0  ;;  %v4387_v45 = vmul.f32 0.125, %v14163_v40 }
 0xcaf   : > { %v4385_v22 = vmul.f32 0.125, %v4354_v29  ;;  %v14164_v50 = vpop.f32.mrb[106].mxu0 }
 0xcb0   : > { %v4357_v55 = vpop.f32.mrb[107].mxu0  ;;  %v4388_v38 = vmul.f32 0.125, %v14164_v50  ;;  %v4395_v42 = vsel %vm18172_vm1, %v4387_v45, -1e+30 }
 0xcb1   : > { %v4393_v31 = vsel %vm18177_vm2, %v4385_v22, -1e+30  ;;  %v4386_v14 = vmul.f32 0.125, %v4357_v55  ;;  %v4407_v22 = vsel %vm3103_vm0, %v4395_v42, -inf }
 0xcb2   : > { %v4401_v24 = vsel %vm3103_vm0, %v4393_v31, -inf  ;;  %v4396_v40 = vsel %vm18200_vm4, %v4388_v38, -1e+30 }
 0xcb3   : > { %v4394_v10 = vsel %vm18186_vm3, %v4386_v14, -1e+30  ;;  %4402 = vmax.xlane.f32.xlu0 %v4401_v24  ;;  %v4410_v45 = vsel %vm3103_vm0, %v4396_v40, -inf }
 0xcb4   : > { %v4404_v57 = vsel %vm3103_vm0, %v4394_v10, -inf }
 0xcb5   : > { %4405 = vmax.xlane.f32.xlu1 %v4404_v57  ;;  %v14167_v29 = vpop.f32.mrb[108].mxu0 }
 0xcb6   : > { %v4370_v36 = vpop.f32.mrb[109].mxu0  ;;  %v4391_v50 = vmul.f32 0.125, %v14167_v29 }
 0xcb7   : > { %v4389_v55 = vmul.f32 0.125, %v4370_v36  ;;  %4408 = vmax.xlane.f32.xlu0 %v4407_v22  ;;  %v14168_v56 = vpop.f32.mrb[110].mxu0 }
 0xcb8   : > { %v4373_v44 = vpop.f32.mrb[111].mxu0  ;;  %v4392_v24 = vmul.f32 0.125, %v14168_v56  ;;  %v4399_v57 = vsel %vm18240_vm8, %v4391_v50, -1e+30 }
 0xcb9   : > { %v4397_v14 = vsel %vm18219_vm6, %v4389_v55, -1e+30  ;;  %v4390_v60 = vmul.f32 0.125, %v4373_v44  ;;  %4411 = vmax.xlane.f32.xlu1 %v4410_v45  ;;  %v4419_v55 = vsel %vm3103_vm0, %v4399_v57, -inf }
 0xcba   : > { %v4413_v38 = vsel %vm3103_vm0, %v4397_v14, -inf  ;;  %v4400_v22 = vsel %vm18215_vm5, %v4392_v24, -1e+30 }
 0xcbb   : > { %v4398_v29 = vsel %vm18226_vm7, %v4390_v60, -1e+30  ;;  %4414 = vmax.xlane.f32.xlu0 %v4413_v38  ;;  %v4422_v56 = vsel %vm3103_vm0, %v4400_v22, -inf }
 0xcbc   : > { %v4416_v36 = vsel %vm3103_vm0, %v4398_v29, -inf }
 0xcbd   : > { %4417 = vmax.xlane.f32.xlu1 %v4416_v36 }
 0xcbf   : > { %4420 = vmax.xlane.f32.xlu0 %v4419_v55 }
 0xcc1   : > { %4423 = vmax.xlane.f32.xlu1 %v4422_v56 }
 0xd40   : > { %v4403_v44 = vpop.xlane.xlu0 %4402 }
 0xd41   : > { %v4425_v45 = vsub.f32 %v4393_v31, %v4403_v44 }
 0xd42   : > { %v4406_v20 = vpop.xlane.xlu1 %4405 }
 0xd43   : > { %v4426_v23 = vsub.f32 %v4394_v10, %v4406_v20  ;;  %v4433_v60 = vmul.f32 1.442695, %v4425_v45 }
 0xd44   : > { %v4409_v50 = vpop.xlane.xlu0 %4408 }
 0xd45   : > { %v4427_v3 = vsub.f32 %v4395_v42, %v4409_v50  ;;  %v4435_v37 = vmul.f32 1.442695, %v4426_v23 }
 0xd46   : > { %v4412_v38 = vpop.xlane.xlu1 %4411 }
 0xd47   : > { %v4437_v8 = vmul.f32 1.442695, %v4427_v3  ;;  %v4428_v33 = vsub.f32 %v4396_v40, %v4412_v38 }
 0xd48   : > { %v4415_v1 = vpop.xlane.xlu0 %4414 }
 0xd49   : > { %16222 = vpow2.f32 %v4437_v8  ;;  %v4439_v24 = vmul.f32 1.442695, %v4428_v33  ;;  %v4429_v36 = vsub.f32 %v4397_v14, %v4415_v1 }
 0xd4a   : > { %16224 = vpow2.f32 %v4433_v60  ;;  %v4418_v14 = vpop.xlane.xlu1 %4417 }
 0xd4b   : > { %16226 = vpow2.f32 %v4439_v24  ;;  %v4441_v27 = vmul.f32 1.442695, %v4429_v36  ;;  %v4430_v50 = vsub.f32 %v4398_v29, %v4418_v14 }
 0xd4c   : > { %v4421_v55 = vpop.xlane.xlu0 %4420  ;;  %16228 = vpow2.f32 %v4435_v37 }
 0xd4d   : > { %v4431_v56 = vsub.f32 %v4399_v57, %v4421_v55  ;;  %v4443_v38 = vmul.f32 1.442695, %v4430_v50 }
 0xd4e   : > { %v4424_v57 = vpop.xlane.xlu1 %4423 }
 0xd4f   : > { %v4445_v31 = vmul.f32 1.442695, %v4431_v56  ;;  %v4432_v45 = vsub.f32 %v4400_v22, %v4424_v57 }
 0xd51   : > { %16230 = vpow2.f32 %v4445_v31  ;;  %v4447_v60 = vmul.f32 1.442695, %v4432_v45 }
 0xd52   : > { %16232 = vpow2.f32 %v4441_v27 }
 0xd53   : > { %v16223_v44 = vpop.eup %16222  ;;  %16234 = vpow2.f32 %v4447_v60 }
 0xd54   : > { %v16225_v42 = vpop.eup %16224  ;;  %v4455_v10 = vsel %vm3103_vm0, %v16223_v44, 0.0  ;;  %16236 = vpow2.f32 %v4443_v38 }
 0xd55   : > { %v16227_v3 = vpop.eup %16226  ;;  %4456 = vadd.xlane.f32.xlu0 %v4455_v10  ;;  %v4449_v33 = vsel %vm3103_vm0, %v16225_v42, 0.0 }
 0xd56   : > { %v4458_v23 = vsel %vm3103_vm0, %v16227_v3, 0.0  ;;  %v16229_v8 = vpop.eup %16228 }
 0xd57   : > { %4459 = vadd.xlane.f32.xlu1 %v4458_v23  ;;  %v4452_v1 = vsel %vm3103_vm0, %v16229_v8, 0.0 }
 0xd59   : > { %4450 = vadd.xlane.f32.xlu0 %v4449_v33 }
 0xd5b   : > { %v18738_v37 = vpop.eup %16230  ;;  %4453 = vadd.xlane.f32.xlu1 %v4452_v1 }
 0xd5c   : > { %v4467_v27 = vsel %vm3103_vm0, %v18738_v37, 0.0  ;;  %v18742_v20 = vpop.eup %16232 }
 0xd5d   : > { %4468 = vadd.xlane.f32.xlu0 %v4467_v27  ;;  %v4461_v40 = vsel %vm3103_vm0, %v18742_v20, 0.0 }
 0xd61   : > { %4462 = vadd.xlane.f32.xlu0 %v4461_v40 }
 0xd6c   : > { %4592 = vrot.lane.b32.xlu1 %v18125_v59, %s16849_s24  ;;  %v16235_v59 = vpop.eup %16234 }
 0xd6d   : > { %v16237_v24 = vpop.eup %16236 }
 0xd70   : > { %4594 = vrot.lane.b32.xlu1 %v18129_v35, %s16849_s24  ;;  %v4470_v35 = vsel %vm3103_vm0, %v16235_v59, 0.0 }
 0xd77   : > { %4590 = vrot.lane.b32.xlu0 %v18121_v26, %s16849_s24  ;;  %v4464_v26 = vsel %vm3103_vm0, %v16237_v24, 0.0 }
 0xd7b   : > { %4578 = vrot.lane.b32.xlu0 %v18042_v46, %s16849_s24 }
 0xd7f   : > { %4582 = vrot.lane.b32.xlu0 %v21176_v43, %s16849_s24 }
 0xd94   : > { %4471 = vadd.xlane.f32.xlu1 %v4470_v35 }
 0xd98   : > { %4465 = vadd.xlane.f32.xlu1 %v4464_v26 }
 0xda9   : > { %4596 = vrot.lane.b32.xlu1 %v18135_v41, %s16849_s24 }
 0xdad   : > { %4580 = vrot.lane.b32.xlu1 %v21175_v28, %s16849_s24 }
 0xdb1   : > { %4584 = vrot.lane.b32.xlu1 %v21177_v9, %s16849_s24 }
 0xde2   : > { %v4457_v46 = vpop.xlane.xlu0 %4456 }
 0xde4   : > { %v4460_v43 = vpop.xlane.xlu1 %4459 }
 0xde5   : > { %16238 = vrcp.f32 %v4460_v43 }
 0xde6   : > { %v4451_v29 = vpop.xlane.xlu0 %4450 }
 0xde7   : > { %16240 = vrcp.f32 %v4451_v29 }
 0xde8   : > { %16242 = vrcp.f32 %v4457_v46  ;;  %v4454_v22 = vpop.xlane.xlu1 %4453 }
 0xde9   : > { %16244 = vrcp.f32 %v4454_v22 }
 0xdea   : > { %v4469_v36 = vpop.xlane.xlu0 %4468 }
 0xdec   : > { %v4593_v57 = vpop.permute.xlu1 %4592 }
 0xded   : > { %v4614_v45 = vsel %vm3103_vm0, %v4593_v57, 0 }
 0xdee   : > { %v4463_v55 = vpop.xlane.xlu0 %4462 }
 0xdef   : > { %v16239_v56 = vpop.eup %16238 }
 0xdf0   : > { %v4484_v33 = vmul.f32 %v16239_v56, %v16227_v3  ;;  %v4595_v3 = vpop.permute.xlu1 %4594 }
 0xdf1   : > { %v16241_v31 = vpop.eup %16240 }
 0xdf2   : > { %v16243_v10 = vpop.eup %16242  ;;  %v4591_v41 = vpop.permute.xlu0 %4590  ;;  %v4481_v28 = vmul.f32 %v16241_v31, %v16225_v42 }
 0xdf3   : > { %v16245_v23 = vpop.eup %16244  ;;  %14653 = vmatprep.subr.msk.bf16.mxu1 %vm3103_vm0, %v4591_v41  ;;  %v4483_v1 = vmul.f32 %v16243_v10, %v16223_v44  ;;  %v4611_v14 = vsel %vm3103_vm0, %v4591_v41, 0  ;;  %v4617_v44 = vsel %vm3103_vm0, %v4595_v3, 0 }
 0xdf4   : > { %v4482_v9 = vmul.f32 %v16245_v23, %v16229_v8 }
 0xdf5   : > { %v4490_v40 = vpack.c.bf16 %v4484_v33, %v4483_v1 }
 0xdf6   : > { %v4489_v27 = vpack.c.bf16 %v4482_v9, %v4481_v28  ;;  %v4579_v31 = vpop.permute.xlu0 %4578 }
 0xdf8   : > { %14177 = vmatprep.mubr.msk.bf16.mxu1 %vm3103_vm0, %v4489_v27 }
 0xdf9   : > { %14178 = vmatmul.mubr.msk.bf16.vlgmr.msra.gmra.mrb[64].mxu1 %vm3103_vm0, %v4490_v40 }
 0xdfa   : > { %14186 = vmatpush3.bf16.xpose.msra.mxu1 %v4611_v14  ;;  %v4583_v41 = vpop.permute.xlu0 %4582 }
 0xdfb   : > { %14654 = vmatprep.subr.msk.bf16.mxu1 %vm3103_vm0, %v4593_v57 }
 0xe02   : > { %14188 = vmatpush3.bf16.xpose.msra.mxu1 %v4614_v45 }
 0xe03   : > { %14655 = vmatprep.subr.msk.bf16.mxu1 %vm3103_vm0, %v4595_v3 }
 0xe0a   : > { %14190 = vmatpush3.bf16.xpose.msra.mxu1 %v4617_v44 }
 0xe21   : > { %v4472_v42 = vpop.xlane.xlu1 %4471 }
 0xe22   : > { %16246 = vrcp.f32 %v4472_v42 }
 0xe23   : > { %16248 = vrcp.f32 %v4463_v55 }
 0xe24   : > { %16250 = vrcp.f32 %v4469_v36 }
 0xe25   : > { %v4466_v8 = vpop.xlane.xlu1 %4465 }
 0xe26   : > { %16252 = vrcp.f32 %v4466_v8 }
 0xe29   : > { %v4597_v50 = vpop.permute.xlu1 %4596 }
 0xe2a   : > { %v4620_v60 = vsel %vm3103_vm0, %v4597_v50, 0  ;;  %14656 = vmatprep.subr.msk.bf16.mxu1 %vm3103_vm0, %v4597_v50 }
 0xe2b   : > { %14192 = vmatpush3.bf16.xpose.msra.mxu1 %v4620_v60 }
 0xe2c   : > { %v16247_v38 = vpop.eup %16246 }
 0xe2d   : > { %v16249_v35 = vpop.eup %16248  ;;  %v4488_v43 = vmul.f32 %v16247_v38, %v16235_v59  ;;  %v4581_v10 = vpop.permute.xlu1 %4580 }
 0xe2e   : > { %v16251_v26 = vpop.eup %16250  ;;  %v4485_v29 = vmul.f32 %v16249_v35, %v18742_v20 }
 0xe2f   : > { %v4487_v56 = vmul.f32 %v16251_v26, %v18738_v37 }
 0xe30   : > { %v16253_v46 = vpop.eup %16252 }
 0xe31   : > { %v4486_v22 = vmul.f32 %v16253_v46, %v16237_v24  ;;  %v4492_v36 = vpack.c.bf16 %v4488_v43, %v4487_v56  ;;  %v4585_v59 = vpop.permute.xlu1 %4584 }
 0xe33   : > { %v4491_v55 = vpack.c.bf16 %v4486_v22, %v4485_v29 }
 0xe35   : > { %14181 = vmatprep.mubr.msk.bf16.mxu1 %vm3103_vm0, %v4491_v55 }
 0xe36   : > { %14182 = vmatmul.mubr.msk.bf16.gmra.mrb[68].mxu1 %vm3103_vm0, %v4492_v36 }
 0xe37   : > { %14193 = vmatprep.mubr.msk.bf16.mxu1 %vm3103_vm0, %v4579_v31 }
 0xe3e   : > { %14194 = vmatmul.mubr.msk.bf16.vlgmr.msra.gmra.mrb[72].mxu1 %vm3103_vm0, %v4581_v10 }
 0xe3f   : > { %14197 = vmatprep.mubr.msk.bf16.mxu1 %vm3103_vm0, %v4583_v41 }
 0xe46   : > { %14198 = vmatmul.mubr.msk.bf16.gmra.mrb[76].mxu1 %vm3103_vm0, %v4585_v59 }
 0xecc   : > { %v18782_v20 = vpop.f32.mrb[64].mxu1 }
 0xecd   : > { %v18784_v37 = vpop.f32.mrb[65].mxu1 }
 0xece   : > { %v18786_v24 = vpop.f32.mrb[66].mxu1 }
 0xecf   : > { %v4571_v23 = vpack.c.bf16 %v18786_v24, %v18782_v20  ;;  %v18790_v33 = vpop.f32.mrb[67].mxu1  ;;  %v21208_v24 = vld [vmem:[#allocation39_spill] sm:$0xff] }
 0xed0   : > { %v4570_v28 = vpack.c.bf16 %v18790_v33, %v18784_v37  ;;  %v19080_v33 = vld [vmem:[%s17384_s30] sm:$0x3f] }
 0xf09   : > { %v18794_v9 = vpop.f32.mrb[68].mxu1 }
 0xf0a   : > { %v18796_v1 = vpop.f32.mrb[69].mxu1 }
 0xf0b   : > { %v18798_v27 = vpop.f32.mrb[70].mxu1 }
 0xf0c   : > { %v4573_v40 = vpack.c.bf16 %v18798_v27, %v18794_v9  ;;  %v18802_v14 = vpop.f32.mrb[71].mxu1 }
 0xf0d   : > { %v4572_v57 = vpack.c.bf16 %v18802_v14, %v18796_v1  ;;  %v19087_v1 = vld [vmem:[%s17384_s30 + $0x8] sm:$0x3f] }
 0xf11   : > { %v14195_v45 = vpop.f32.mrb[72].mxu1 }
 0xf12   : > { %v4656_v3 = vpop.f32.mrb[73].mxu1  ;;  %v4689_v44 = vmul.f32 0.125, %v14195_v45 }
 0xf13   : > { %v4687_v42 = vmul.f32 0.125, %v4656_v3  ;;  %v14196_v8 = vpop.f32.mrb[74].mxu1 }
 0xf14   : > { %v4659_v50 = vpop.f32.mrb[75].mxu1  ;;  %v4697_v26 = vsel %vm18172_vm1, %v4689_v44, -1e+30  ;;  %v4690_v46 = vmul.f32 0.125, %v14196_v8 }
 0xf15   : > { %v4695_v60 = vsel %vm18177_vm2, %v4687_v42, -1e+30  ;;  %v4688_v38 = vmul.f32 0.125, %v4659_v50  ;;  %v4709_v55 = vsel %vm3103_vm0, %v4697_v26, -inf }
 0xf16   : > { %v4703_v35 = vsel %vm3103_vm0, %v4695_v60, -inf  ;;  %v4698_v0 = vsel %vm18200_vm4, %v4690_v46, -1e+30 }
 0xf17   : > { %v4696_v43 = vsel %vm18186_vm3, %v4688_v38, -1e+30  ;;  %4704 = vmax.xlane.f32.xlu0 %v4703_v35  ;;  %v4712_v2 = vsel %vm3103_vm0, %v4698_v0, -inf }
 0xf18   : > { %v4706_v29 = vsel %vm3103_vm0, %v4696_v43, -inf }
 0xf19   : > { %4707 = vmax.xlane.f32.xlu1 %v4706_v29  ;;  %v14199_v22 = vpop.f32.mrb[76].mxu1 }
 0xf1a   : > { %v4672_v56 = vpop.f32.mrb[77].mxu1  ;;  %v4693_v59 = vmul.f32 0.125, %v14199_v22 }
 0xf1b   : > { %v4691_v36 = vmul.f32 0.125, %v4672_v56  ;;  %4710 = vmax.xlane.f32.xlu0 %v4709_v55  ;;  %v14200_v31 = vpop.f32.mrb[78].mxu1 }
 0xf1c   : > { %v4675_v48 = vpop.f32.mrb[79].mxu1  ;;  %v4694_v10 = vmul.f32 0.125, %v14200_v31  ;;  %v4701_v8 = vsel %vm18240_vm8, %v4693_v59, -1e+30 }
 0xf1d   : > { %v4692_v41 = vmul.f32 0.125, %v4675_v48  ;;  %v4699_v45 = vsel %vm18219_vm6, %v4691_v36, -1e+30  ;;  %v4721_v13 = vsel %vm3103_vm0, %v4701_v8, -inf }
 0xf1e   : > { %v4702_v18 = vsel %vm18215_vm5, %v4694_v10, -1e+30  ;;  %v4715_v42 = vsel %vm3103_vm0, %v4699_v45, -inf }
 0xf1f   : > { %v4700_v3 = vsel %vm18226_vm7, %v4692_v41, -1e+30  ;;  %4713 = vmax.xlane.f32.xlu0 %v4712_v2  ;;  %v4724_v50 = vsel %vm3103_vm0, %v4702_v18, -inf }
 0xf20   : > { %v4718_v44 = vsel %vm3103_vm0, %v4700_v3, -inf }
 0xf21   : > { %4719 = vmax.xlane.f32.xlu1 %v4718_v44 }
 0xf23   : > { %4716 = vmax.xlane.f32.xlu0 %v4715_v42 }
 0xf25   : > { %4725 = vmax.xlane.f32.xlu1 %v4724_v50 }
 0xf27   : > { %4722 = vmax.xlane.f32.xlu0 %v4721_v13 }
 0xf3d   : > { %4799 = vrot.lane.b32.xlu0 %v18140_v53, %s16849_s24 }
 0xfa4   : > { %v4705_v51 = vpop.xlane.xlu0 %4704 }
 0xfa5   : > { %v4727_v38 = vsub.f32 %v4695_v60, %v4705_v51 }
 0xfa6   : > { %v4708_v4 = vpop.xlane.xlu1 %4707 }
 0xfa7   : > { %v4735_v29 = vmul.f32 1.442695, %v4727_v38  ;;  %v4728_v22 = vsub.f32 %v4696_v43, %v4708_v4 }
 0xfa8   : > { %v4711_v35 = vpop.xlane.xlu0 %4710 }
 0xfa9   : > { %v4729_v46 = vsub.f32 %v4697_v26, %v4711_v35  ;;  %v4737_v31 = vmul.f32 1.442695, %v4728_v22 }
 0xfab   : > { %v4739_v56 = vmul.f32 1.442695, %v4729_v46 }
 0xfac   : > { %v4714_v5 = vpop.xlane.xlu0 %4713 }
 0xfad   : > { %16254 = vpow2.f32 %v4739_v56  ;;  %v4730_v55 = vsub.f32 %v4698_v0, %v4714_v5 }
 0xfae   : > { %v4720_v36 = vpop.xlane.xlu1 %4719  ;;  %16256 = vpow2.f32 %v4735_v29 }
 0xfaf   : > { %v4741_v48 = vmul.f32 1.442695, %v4730_v55 }
 0xfb0   : > { %v4717_v10 = vpop.xlane.xlu0 %4716 }
 0xfb1   : > { %16258 = vpow2.f32 %v4741_v48  ;;  %v4731_v41 = vsub.f32 %v4699_v45, %v4717_v10  ;;  %v4732_v45 = vsub.f32 %v4700_v3, %v4720_v36  ;;  %v15166_v36 = vld [vmem:[%s17392_s12 + $0xc8] ss:$12 sps:$4 sm:$0xff]   ;;  %v15168_v10 = vld [vmem:[%s17392_s12 + $0xe0] ss:$12 sps:$4 sm:$0xff]  }
 0xfb2   : > { %16260 = vpow2.f32 %v4737_v31  ;;  %v4726_v53 = vpop.xlane.xlu1 %4725  ;;  %v15167_v48 = vld [vmem:[%s17392_s12 + $0x8] ss:$12 sps:$4 sm:$0xff]   ;;  %13657 = vmatprep.subr.bf16.mxu1 %v15166_v36 }
 0xfb3   : > { %v4743_v26 = vmul.f32 1.442695, %v4731_v41  ;;  %v4734_v44 = vsub.f32 %v4702_v18, %v4726_v53  ;;  %v4745_v4 = vmul.f32 1.442695, %v4732_v45  ;;  %13658 = vmatpush3.bf16.msra.mxu1 %v15167_v48  ;;  %v15169_v41 = vld [vmem:[%s17392_s12 + $0x20] ss:$12 sps:$4 sm:$0xff]  }
 0xfb4   : > { %v4723_v2 = vpop.xlane.xlu0 %4722  ;;  %13659 = vmatprep.subr.bf16.mxu1 %v15168_v10  ;;  %v15170_v53 = vld [vmem:[%s17392_s12 + $0xf8] ss:$12 sps:$4 sm:$0xff]   ;;  %v15180_v45 = vld [vmem:[%s17392_s12 + $0x170] ss:$12 sps:$4 sm:$0xff]  }
 0xfb5   : > { %v4733_v60 = vsub.f32 %v4701_v8, %v4723_v2  ;;  %v4749_v8 = vmul.f32 1.442695, %v4734_v44  ;;  %v15171_v2 = vld [vmem:[%s17392_s12 + $0x38] ss:$12 sps:$4 sm:$0xff]   ;;  %v15174_v44 = vld [vmem:[%s17392_s12 + $0x128] ss:$12 sps:$4 sm:$0xff]  }
 0xfb6   : > { %v21187_v10 = vld [vmem:[#allocation46_spill] sm:$0xff] }
 0xfb7   : > { %v18832_v59 = vpop.eup %16254  ;;  %v4747_v43 = vmul.f32 1.442695, %v4733_v60  ;;  %13660 = vmatpush3.bf16.msra.mxu1 %v15169_v41  ;;  %v15172_v60 = vld [vmem:[%s17392_s12 + $0x110] ss:$12 sps:$4 sm:$0xff]   ;;  %v21188_v41 = vpack.c.bf16 %v18450_v6, %v21187_v10 }
 0xfb8   : > { %v4800_v42 = vpop.permute.xlu0 %4799  ;;  %v4757_v0 = vsel %vm3103_vm0, %v18832_v59, 0.0  ;;  %v18836_v50 = vpop.eup %16256  ;;  %13661 = vmatprep.subr.bf16.mxu1 %v15170_v53  ;;  %v15184_v6 = vld [vmem:[%s17392_s12 + $0x4] ss:$12 sps:$4 sm:$0xff]   ;;  %v21204_v10 = vld [vmem:[#allocation50_spill] sm:$0xff] }
 0xfb9   : > { %16262 = vpow2.f32 %v4747_v43  ;;  %4758 = vadd.xlane.f32.xlu0 %v4757_v0  ;;  %14201 = vmatprep.subr.bf16.mxu0 %v4800_v42  ;;  %v4751_v51 = vsel %vm3103_vm0, %v18836_v50, 0.0  ;;  %v15175_v43 = vld [vmem:[%s17392_s12 + $0x68] ss:$12 sps:$4 sm:$0xff]   ;;  %v15178_v0 = vld [vmem:[%s17392_s12 + $0x158] ss:$12 sps:$4 sm:$0xff]  }
 0xfba   : > { %14202 = vmatpush3.bf16.msra.mxu0 %v4800_v42  ;;  %16264 = vpow2.f32 %v4743_v26  ;;  %v15173_v26 = vld [vmem:[%s17392_s12 + $0x50] ss:$12 sps:$4 sm:$0xff]   ;;  %v15176_v42 = vld [vmem:[%s17392_s12 + $0x140] ss:$12 sps:$4 sm:$0xff]  }
 0xfbb   : > { %v18838_v13 = vpop.eup %16258  ;;  %16266 = vpow2.f32 %v4749_v8  ;;  %13662 = vmatpush3.bf16.msra.mxu1 %v15171_v2 }
 0xfbc   : > { %v4760_v18 = vsel %vm3103_vm0, %v18838_v13, 0.0  ;;  %v18844_v38 = vpop.eup %16260  ;;  %16268 = vpow2.f32 %v4745_v4  ;;  %13663 = vmatprep.subr.bf16.mxu1 %v15172_v60  ;;  %v21189_v60 = vld [vmem:[#allocation53_spill] sm:$0xff] }
 0xfbd   : > { %4752 = vadd.xlane.f32.xlu0 %v4751_v51  ;;  %4761 = vadd.xlane.f32.xlu1 %v4760_v18  ;;  %v4754_v35 = vsel %vm3103_vm0, %v18844_v38, 0.0 }
 0xfbf   : > { %13664 = vmatpush3.bf16.msra.mxu1 %v15173_v26  ;;  %v21190_v26 = vld [vmem:[#allocation52_spill] sm:$0xff] }
 0xfc0   : > { %13665 = vmatprep.subr.bf16.mxu1 %v15174_v44 }
 0xfc1   : > { %4755 = vadd.xlane.f32.xlu1 %v4754_v35 }
 0xfc3   : > { %v18848_v3 = vpop.eup %16262  ;;  %13666 = vmatpush3.bf16.msra.mxu1 %v15175_v43 }
 0xfc4   : > { %v4769_v46 = vsel %vm3103_vm0, %v18848_v3, 0.0  ;;  %v18852_v29 = vpop.eup %16264  ;;  %13667 = vmatprep.subr.bf16.mxu1 %v15176_v42 }
 0xfc5   : > { %4770 = vadd.xlane.f32.xlu1 %v4769_v46  ;;  %v4763_v22 = vsel %vm3103_vm0, %v18852_v29, 0.0  ;;  %v18856_v56 = vpop.eup %16266 }
 0xfc6   : > { %v4772_v5 = vsel %vm3103_vm0, %v18856_v56, 0.0  ;;  %v18860_v55 = vpop.eup %16268 }
 0xfc7   : > { %v4766_v31 = vsel %vm3103_vm0, %v18860_v55, 0.0 }
 0xfc9   : > { %4764 = vadd.xlane.f32.xlu1 %v4763_v22 }
 0xfcd   : > { %4773 = vadd.xlane.f32.xlu1 %v4772_v5 }
 0xfd1   : > { %4767 = vadd.xlane.f32.xlu1 %v4766_v31 }
 0xfd3   : > { %4803 = vrot.lane.b32.xlu0 %v18153_v49, %s16849_s24  ;;  %v21178_v49 = vpack.c.bf16 %v18694_v7, %v18688_v52  ;;  %v15177_v52 = vld [vmem:[%s17392_s12 + $0x80] ss:$12 sps:$4 sm:$0xff]   ;;  %v21180_v7 = vpack.c.bf16 %v18706_v61, %v18700_v34  ;;  %v21183_v34 = vpack.c.bf16 %v18470_v63, %v18466_v47  ;;  %v15181_v61 = vld [vmem:[%s17392_s12 + $0xb0] ss:$12 sps:$4 sm:$0xff]  }
 0xfd4   : > { %13668 = vmatpush3.bf16.msra.mxu1 %v15177_v52 }
 0xfd5   : > { %13669 = vmatprep.subr.bf16.mxu1 %v15178_v0 }
 0xfd7   : > { %4805 = vrot.lane.b32.xlu0 %v18162_v39, %s16849_s24  ;;  %v21179_v39 = vpack.c.bf16 %v18690_v16, %v18686_v25  ;;  %v21181_v25 = vpack.c.bf16 %v18474_v62, %v18468_v54  ;;  %v15179_v16 = vld [vmem:[%s17392_s12 + $0x98] ss:$12 sps:$4 sm:$0xff]   ;;  %v21184_v54 = vpack.c.bf16 %v18486_v12, %v18480_v15  ;;  %v21185_v62 = vpack.c.bf16 %v18482_v19, %v18478_v17 }
 0xfd8   : > { %13670 = vmatpush3.bf16.msra.mxu1 %v15179_v16  ;;  %v21186_v15 = vpack.c.bf16 %v18578_v21, %v18572_v30 }
 0xfd9   : > { %13671 = vmatprep.subr.bf16.mxu1 %v15180_v45 }
 0xfdb   : > { %4908 = vrot.lane.b32.xlu0 %v21178_v49, %s16849_s24  ;;  %v21191_v49 = vpack.c.bf16 %v21189_v60, %v21190_v26  ;;  %v15197_v26 = vld [vmem:[%s17392_s12 + $0x78] ss:$12 sps:$4 sm:$0xff]  }
 0xfdc   : > { %13672 = vmatpush3.bf16.msra.mxu1 %v15181_v61 }
 0xfdf   : > { %4910 = vrot.lane.b32.xlu0 %v21179_v39, %s16849_s24 }
 0xfe2   : > { %4801 = vrot.lane.b32.xlu1 %v18146_v32, %s16849_s24  ;;  %v21182_v32 = vpack.c.bf16 %v18702_v11, %v18698_v58 }
 0xfe3   : > { %4912 = vrot.lane.b32.xlu0 %v21180_v7, %s16849_s24  ;;  %v15182_v7 = vld [vmem:[%s17392_s12] ss:$12 sps:$4 sm:$0xff]  }
 0xfe6   : > { %4896 = vrot.lane.b32.xlu1 %v21181_v25, %s16849_s24 }
 0xfe7   : > { %4914 = vrot.lane.b32.xlu0 %v21182_v32, %s16849_s24  ;;  %v15187_v32 = vld [vmem:[%s17392_s12 + $0x1c] ss:$12 sps:$4 sm:$0xff]  }
 0xfea   : > { %4898 = vrot.lane.b32.xlu1 %v21183_v34, %s16849_s24 }
 0xfee   : > { %4900 = vrot.lane.b32.xlu1 %v21184_v54, %s16849_s24 }
 0xff2   : > { %4902 = vrot.lane.b32.xlu1 %v21185_v62, %s16849_s24  ;;  %v15185_v62 = vld [vmem:[%s17392_s12 + $0x18] ss:$12 sps:$4 sm:$0xff]  }
0x1046   : > { %v4759_v58 = vpop.xlane.xlu0 %4758 }
0x104a   : > { %v4753_v11 = vpop.xlane.xlu0 %4752  ;;  %v4762_v8 = vpop.xlane.xlu1 %4761 }
0x104b   : > { %16270 = vrcp.f32 %v4753_v11  ;;  %v21196_v11 = vld [vmem:[#allocation55_spill] sm:$0xff] }
0x104e   : > { %v4804_v47 = vpop.permute.xlu0 %4803  ;;  %v4756_v63 = vpop.xlane.xlu1 %4755 }
0x104f   : > { %16272 = vrcp.f32 %v4756_v63 }
0x1050   : > { %16274 = vrcp.f32 %v4762_v8 }
0x1051   : > { %16276 = vrcp.f32 %v4759_v58  ;;  %v21195_v58 = vld [vmem:[#allocation57_spill] sm:$0xff] }
0x1052   : > { %v4806_v51 = vpop.permute.xlu0 %4805  ;;  %v4771_v18 = vpop.xlane.xlu1 %4770  ;;  %v21197_v8 = vpack.c.bf16 %v21195_v58, %v21196_v11  ;;  %v15227_v58 = vld [vmem:[%s17392_s12 + $0x168] ss:$12 sps:$4 sm:$0xff]   ;;  %v21207_v11 = vmov 0  }
0x1055   : > { %v16271_v46 = vpop.eup %16270 }
0x1056   : > { %v4909_v4 = vpop.permute.xlu0 %4908  ;;  %v4765_v35 = vpop.xlane.xlu1 %4764  ;;  %v4783_v22 = vmul.f32 %v16271_v46, %v18836_v50 }
0x1057   : > { %v18922_v12 = vsel %vm3103_vm0, %v21186_v15, %v4909_v4  ;;  %16278 = vrcp.f32 %v4765_v35  ;;  %v15188_v4 = vld [vmem:[%s17392_s12 + $0x30] ss:$12 sps:$4 sm:$0xff]   ;;  %v15193_v15 = vld [vmem:[%s17392_s12 + $0x4c] ss:$12 sps:$4 sm:$0xff]  }
0x1058   : > { %5634 = vmatprep.mubr.bf16.mxu1 %v18922_v12 }
0x1059   : > { %v16273_v17 = vpop.eup %16272 }
0x105a   : > { %v4774_v19 = vpop.xlane.xlu1 %4773  ;;  %v4784_v5 = vmul.f32 %v16273_v17, %v18844_v38  ;;  %v4911_v21 = vpop.permute.xlu0 %4910 }
0x105b   : > { %v16275_v48 = vpop.eup %16274  ;;  %v18939_v44 = vsel %vm3103_vm0, %v21191_v49, %v4911_v21  ;;  %v15202_v49 = vld [vmem:[%s17392_s12 + $0x94] ss:$12 sps:$4 sm:$0xff]  }
0x105c   : > { %v4791_v36 = vpack.c.bf16 %v4784_v5, %v4783_v22  ;;  %v16277_v38 = vpop.eup %16276  ;;  %v4786_v39 = vmul.f32 %v16275_v48, %v18838_v13  ;;  %v15191_v5 = vld [vmem:[%s17392_s12 + $0x48] ss:$12 sps:$4 sm:$0xff]   ;;  %v15196_v48 = vld [vmem:[%s17392_s12 + $0x64] ss:$12 sps:$4 sm:$0xff]  }
0x105d   : > { %v4785_v52 = vmul.f32 %v16277_v38, %v18832_v59  ;;  %v21192_v59 = vld [vmem:[#allocation47_spill] sm:$0xff]  ;;  %v15199_v38 = vld [vmem:[%s17392_s12 + $0x7c] ss:$12 sps:$4 sm:$0xff]  }
0x105e   : > { %14209 = vmatprep.mubr.msk.bf16.mxu0 %vm3103_vm0, %v4791_v36  ;;  %v4768_v31 = vpop.xlane.xlu1 %4767  ;;  %v4913_v13 = vpop.permute.xlu0 %4912  ;;  %v21201_v36 = vld [vmem:[#allocation56_spill] sm:$0xff] }
0x105f   : > { %16280 = vrcp.f32 %v4768_v31  ;;  %v4792_v25 = vpack.c.bf16 %v4786_v39, %v4785_v52  ;;  %v21202_v31 = vld [vmem:[#allocation54_spill] sm:$0xff]  ;;  %v15206_v52 = vld [vmem:[%s17392_s12 + $0xc0] ss:$12 sps:$4 sm:$0xff]  }
0x1060   : > { %16282 = vrcp.f32 %v4774_v19  ;;  %v21199_v19 = vld [vmem:[#allocation49_spill] sm:$0xff]  ;;  %v15205_v39 = vld [vmem:[%s17392_s12 + $0xac] ss:$12 sps:$4 sm:$0xff]  }
0x1061   : > { %16284 = vrcp.f32 %v4771_v18  ;;  %v16279_v2 = vpop.eup %16278 }
0x1062   : > { %v4802_v30 = vpop.permute.xlu1 %4801  ;;  %v4787_v0 = vmul.f32 %v16279_v2, %v18852_v29  ;;  %v4915_v17 = vpop.permute.xlu0 %4914 }
0x1063   : > { %14203 = vmatprep.subr.bf16.mxu0 %v4802_v30 }
0x1064   : > { %14204 = vmatpush3.bf16.msra.mxu0 %v4802_v30  ;;  %v21203_v30 = vpack.c.bf16 %v21201_v36, %v21202_v31  ;;  %v15256_v36 = vld [vmem:[%s17392_s12 + $0x214] ss:$12 sps:$4 sm:$0xff]   ;;  %v15257_v31 = vld [vmem:[%s17392_s12 + $0x218] ss:$12 sps:$4 sm:$0xff]  }
0x1065   : > { %14205 = vmatprep.subr.bf16.mxu0 %v4804_v47 }
0x1066   : > { %v4897_v50 = vpop.permute.xlu1 %4896  ;;  %v4958_v21 = vsel %vm3103_vm0, %v21203_v30, %v4915_v17  ;;  %v15248_v17 = vld [vmem:[%s17392_s12 + $0x1e4] ss:$12 sps:$4 sm:$0xff]  }
0x1067   : > { %v18932_v53 = vsel %vm3103_vm0, %v21188_v41, %v4897_v50  ;;  %v21205_v41 = vld [vmem:[#allocation48_spill] sm:$0xff]  ;;  %v15254_v30 = vld [vmem:[%s17392_s12 + $0x210] ss:$12 sps:$4 sm:$0xff]  }
0x1068   : > { %14206 = vmatpush3.bf16.msra.mxu0 %v4804_v47  ;;  %5635 = vmatmul.mubr.bf16.vlgmr.msra.gmra.mrb[80].mxu1 %v18932_v53  ;;  %v18963_v47 = vsel %vm3103_vm0, %v21197_v8, %v4913_v13  ;;  %v21206_v2 = vpack.c.bf16 %v21204_v10, %v21205_v41  ;;  %v15220_v13 = vld [vmem:[%s17392_s12 + $0x124] ss:$12 sps:$4 sm:$0xff]   ;;  %v15230_v8 = vld [vmem:[%s17392_s12 + $0x180] ss:$12 sps:$4 sm:$0xff]  }
0x1069   : > { %v16281_v43 = vpop.eup %16280  ;;  %14207 = vmatprep.subr.bf16.mxu0 %v4806_v51  ;;  %5642 = vmatprep.mubr.bf16.mxu1 %v18939_v44 }
0x106a   : > { %v4788_v42 = vmul.f32 %v16281_v43, %v18860_v55  ;;  %v4899_v16 = vpop.permute.xlu1 %4898  ;;  %v16283_v45 = vpop.eup %16282  ;;  %v21193_v55 = vld [vmem:[#allocation45_spill] sm:$0xff] }
0x106b   : > { %v16285_v61 = vpop.eup %16284  ;;  %v21194_v54 = vpack.c.bf16 %v21192_v59, %v21193_v55  ;;  %v4790_v63 = vmul.f32 %v16283_v45, %v18856_v56  ;;  %v21198_v56 = vld [vmem:[#allocation51_spill] sm:$0xff]  ;;  %v15200_v43 = vld [vmem:[%s17392_s12 + $0x90] ss:$12 sps:$4 sm:$0xff]   ;;  %v15215_v45 = vld [vmem:[%s17392_s12 + $0x108] ss:$12 sps:$4 sm:$0xff]  }
0x106c   : > { %14208 = vmatpush3.bf16.msra.mxu0 %v4806_v51  ;;  %v4793_v34 = vpack.c.bf16 %v4788_v42, %v4787_v0  ;;  %v15190_v51 = vld [vmem:[%s17392_s12 + $0x34] ss:$12 sps:$4 sm:$0xff]   ;;  %v4789_v18 = vmul.f32 %v16285_v61, %v18848_v3  ;;  %v21200_v22 = vpack.c.bf16 %v21198_v56, %v21199_v19  ;;  %v15208_v42 = vld [vmem:[%s17392_s12 + $0xc4] ss:$12 sps:$4 sm:$0xff]   ;;  %v15223_v61 = vld [vmem:[%s17392_s12 + $0x13c] ss:$12 sps:$4 sm:$0xff]  }
0x106d   : > { %5456 = vmatprep.subr.bf16.mxu0 %v15184_v6  ;;  %v18955_v29 = vsel %vm3103_vm0, %v21194_v54, %v4899_v16  ;;  %v15203_v6 = vld [vmem:[%s17392_s12 + $0xa8] ss:$12 sps:$4 sm:$0xff]   ;;  %v15209_v0 = vld [vmem:[%s17392_s12 + $0xd8] ss:$12 sps:$4 sm:$0xff]   ;;  %v15212_v16 = vld [vmem:[%s17392_s12 + $0xf0] ss:$12 sps:$4 sm:$0xff]  }
0x106e   : > { %v4901_v35 = vpop.permute.xlu1 %4900  ;;  %v4794_v46 = vpack.c.bf16 %v4790_v63, %v4789_v18  ;;  %v15221_v59 = vld [vmem:[%s17392_s12 + $0x138] ss:$12 sps:$4 sm:$0xff]   ;;  %v15226_v55 = vld [vmem:[%s17392_s12 + $0x154] ss:$12 sps:$4 sm:$0xff]   ;;  %v15224_v54 = vld [vmem:[%s17392_s12 + $0x150] ss:$12 sps:$4 sm:$0xff]  }
0x106f   : > { %14210 = vmatmul.mubr.msk.bf16.vlgmr.msra.gmra.mrb[112].mxu0 %vm3103_vm0, %v4792_v25  ;;  %v4938_v3 = vsel %vm3103_vm0, %v21200_v22, %v4901_v35  ;;  %v15214_v25 = vld [vmem:[%s17392_s12 + $0xf4] ss:$12 sps:$4 sm:$0xff]   ;;  %v15232_v63 = vld [vmem:[%s17392_s12 + $0x184] ss:$12 sps:$4 sm:$0xff]   ;;  %v15236_v18 = vld [vmem:[%s17392_s12 + $0x19c] ss:$12 sps:$4 sm:$0xff]  }
0x1070   : > { %14213 = vmatprep.mubr.msk.bf16.mxu0 %vm3103_vm0, %v4793_v34  ;;  %5457 = vmatpush1.bf16.msra.mxu0 %v15182_v7  ;;  %v15211_v7 = vld [vmem:[%s17392_s12 + $0xdc] ss:$12 sps:$4 sm:$0xff]   ;;  %v15218_v34 = vld [vmem:[%s17392_s12 + $0x120] ss:$12 sps:$4 sm:$0xff]  }
0x1071   : > { %5643 = vmatmul.mubr.bf16.gmra.mrb[84].mxu1 %v18955_v29  ;;  %5458 = vmatprep.subr.bf16.mxu0 %v15187_v32  ;;  %v15217_v32 = vld [vmem:[%s17392_s12 + $0x10c] ss:$12 sps:$4 sm:$0xff]   ;;  %v15249_v56 = vld [vmem:[%s17392_s12 + $0x1e8] ss:$12 sps:$4 sm:$0xff]  }
0x1072   : > { %5650 = vmatprep.mubr.bf16.mxu1 %v18963_v47  ;;  %v4903_v50 = vpop.permute.xlu1 %4902  ;;  %v15244_v35 = vld [vmem:[%s17392_s12 + $0x1cc] ss:$12 sps:$4 sm:$0xff]   ;;  %v15252_v22 = vld [vmem:[%s17392_s12 + $0x1fc] ss:$12 sps:$4 sm:$0xff]  }
0x1073   : > { %v4942_v60 = vsel %vm3103_vm0, %v21206_v2, %v4903_v50  ;;  %v15246_v19 = vld [vmem:[%s17392_s12 + $0x1e0] ss:$12 sps:$4 sm:$0xff]  }
0x1074   : > { %5459 = vmatpush1.bf16.msra.mxu0 %v15185_v62  ;;  %v15229_v62 = vld [vmem:[%s17392_s12 + $0x16c] ss:$12 sps:$4 sm:$0xff]  }
0x1075   : > { %5460 = vmatprep.subr.bf16.mxu0 %v15190_v51  ;;  %v15233_v51 = vld [vmem:[%s17392_s12 + $0x188] ss:$12 sps:$4 sm:$0xff]  }
0x1076   : > { %14217 = vmatprep.subr.bf16.mxu1 %v15233_v51 }
0x1077   : > { %14214 = vmatmul.mubr.msk.bf16.gmra.mrb[116].mxu0 %vm3103_vm0, %v4794_v46  ;;  %14218 = vmatpush3.bf16.msra.mxu1 %v15233_v51  ;;  %v15245_v46 = vld [vmem:[%s17392_s12 + $0x1d0] ss:$12 sps:$4 sm:$0xff]  }
0x1078   : > { %5461 = vmatpush1.bf16.msra.mxu0 %v15188_v4  ;;  %5488 = vmatprep.mubr.bf16.mxu0 %v18922_v12  ;;  %v15194_v12 = vld [vmem:[%s17392_s12 + $0x60] ss:$12 sps:$4 sm:$0xff]   ;;  %v15238_v4 = vld [vmem:[%s17392_s12 + $0x1b0] ss:$12 sps:$4 sm:$0xff]  }
0x1079   : > { %5651 = vmatmul.mubr.bf16.gmra.mrb[88].mxu1 %v4938_v3  ;;  %5462 = vmatprep.subr.bf16.mxu0 %v15193_v15  ;;  %v15242_v15 = vld [vmem:[%s17392_s12 + $0x1c8] ss:$12 sps:$4 sm:$0xff]  }
0x107a   : > { %5658 = vmatprep.mubr.bf16.mxu1 %v4958_v21 }
0x107c   : > { %5463 = vmatpush1.bf16.msra.mxu0 %v15191_v5  ;;  %v15250_v5 = vld [vmem:[%s17392_s12 + $0x1f8] ss:$12 sps:$4 sm:$0xff]  }
0x107d   : > { %5464 = vmatprep.subr.bf16.mxu0 %v15196_v48  ;;  %v15261_v48 = vld [vmem:[%s17392_s12 + $0x230] ss:$12 sps:$4 sm:$0xff]  }
0x1080   : > { %5465 = vmatpush1.bf16.msra.mxu0 %v15194_v12  ;;  %v15258_v12 = vld [vmem:[%s17392_s12 + $0x228] ss:$12 sps:$4 sm:$0xff]  }
0x1081   : > { %5659 = vmatmul.mubr.bf16.gmra.mrb[92].mxu1 %v4942_v60  ;;  %5466 = vmatprep.subr.bf16.mxu0 %v15199_v38 }
0x1084   : > { %5467 = vmatpush1.bf16.msra.mxu0 %v15197_v26 }
0x1085   : > { %5468 = vmatprep.subr.bf16.mxu0 %v15202_v49 }
0x1088   : > { %5469 = vmatpush1.bf16.msra.mxu0 %v15200_v43 }
0x1089   : > { %5470 = vmatprep.subr.bf16.mxu0 %v15205_v39 }
0x108c   : > { %5471 = vmatpush1.bf16.msra.mxu0 %v15203_v6 }
0x108d   : > { %5472 = vmatprep.subr.bf16.mxu0 %v15208_v42 }
0x1090   : > { %5473 = vmatpush1.bf16.msra.mxu0 %v15206_v52 }
0x1091   : > { %5474 = vmatprep.subr.bf16.mxu0 %v15211_v7 }
0x1094   : > { %5475 = vmatpush1.bf16.msra.mxu0 %v15209_v0 }
0x1095   : > { %5476 = vmatprep.subr.bf16.mxu0 %v15214_v25 }
0x1098   : > { %5477 = vmatpush1.bf16.msra.mxu0 %v15212_v16 }
0x1099   : > { %5478 = vmatprep.subr.bf16.mxu0 %v15217_v32 }
0x109c   : > { %5479 = vmatpush1.bf16.msra.mxu0 %v15215_v45 }
0x109d   : > { %5480 = vmatprep.subr.bf16.mxu0 %v15220_v13 }
0x10a0   : > { %5481 = vmatpush1.bf16.msra.mxu0 %v15218_v34 }
0x10a1   : > { %5482 = vmatprep.subr.bf16.mxu0 %v15223_v61 }
0x10a4   : > { %5483 = vmatpush1.bf16.msra.mxu0 %v15221_v59 }
0x10a5   : > { %5484 = vmatprep.subr.bf16.mxu0 %v15226_v55 }
0x10a8   : > { %5485 = vmatpush1.bf16.msra.mxu0 %v15224_v54 }
0x10a9   : > { %5486 = vmatprep.subr.bf16.mxu0 %v15229_v62 }
0x10ac   : > { %5487 = vmatpush1.bf16.msra.mxu0 %v15227_v58 }
0x10ad   : > { %5529 = vmatprep.subr.bf16.mxu0 %v15232_v63 }
0x10af   : > { %5489 = vmatmul.mubr.bf16.vlgmr.msra.gmra.mrb[120].mxu0 %v18932_v53  ;;  %v15237_v53 = vld [vmem:[%s17392_s12 + $0x1a0] ss:$12 sps:$4 sm:$0xff]  }
0x10b0   : > { %5498 = vmatprep.mubr.bf16.mxu0 %v18939_v44  ;;  %5530 = vmatpush1.bf16.msra.mxu0 %v15230_v8  ;;  %v15234_v44 = vld [vmem:[%s17392_s12 + $0x198] ss:$12 sps:$4 sm:$0xff]  }
0x10b1   : > { %5531 = vmatprep.subr.bf16.mxu0 %v15236_v18  ;;  %14219 = vmatprep.subr.bf16.mxu1 %v15237_v53 }
0x10b2   : > { %14220 = vmatpush3.bf16.msra.mxu1 %v15237_v53 }
0x10b4   : > { %5532 = vmatpush1.bf16.msra.mxu0 %v15234_v44 }
0x10b7   : > { %5499 = vmatmul.mubr.bf16.gmra.mrb[124].mxu0 %v18955_v29  ;;  %v15240_v29 = vld [vmem:[%s17392_s12 + $0x1b4] ss:$12 sps:$4 sm:$0xff]  }
0x10b8   : > { %5508 = vmatprep.mubr.bf16.mxu0 %v18963_v47  ;;  %v15241_v47 = vld [vmem:[%s17392_s12 + $0x1b8] ss:$12 sps:$4 sm:$0xff]   ;;  %5533 = vmatprep.subr.bf16.mxu0 %v15240_v29 }
0x10b9   : > { %14221 = vmatprep.subr.bf16.mxu1 %v15241_v47  ;;  %5534 = vmatpush1.bf16.msra.mxu0 %v15238_v4 }
0x10ba   : > { %14222 = vmatpush3.bf16.msra.mxu1 %v15241_v47  ;;  %5535 = vmatprep.subr.bf16.mxu0 %v15244_v35 }
0x10bb   : > { %14223 = vmatprep.subr.bf16.mxu1 %v15245_v46 }
0x10bd   : > { %5536 = vmatpush1.bf16.msra.mxu0 %v15242_v15 }
0x10be   : > { %14224 = vmatpush3.bf16.msra.mxu1 %v15245_v46  ;;  %5537 = vmatprep.subr.bf16.mxu0 %v15248_v17 }
0x10bf   : > { %5509 = vmatmul.mubr.bf16.gmra.mrb[128].mxu0 %v4938_v3  ;;  %14225 = vmatprep.subr.bf16.mxu1 %v15249_v56  ;;  %v15253_v3 = vld [vmem:[%s17392_s12 + $0x200] ss:$12 sps:$4 sm:$0xff]  }
0x10c0   : > { %5518 = vmatprep.mubr.bf16.mxu0 %v4958_v21  ;;  %v15260_v21 = vld [vmem:[%s17392_s12 + $0x22c] ss:$12 sps:$4 sm:$0xff]  }
0x10c1   : > { %5538 = vmatpush1.bf16.msra.mxu0 %v15246_v19 }
0x10c2   : > { %14226 = vmatpush3.bf16.msra.mxu1 %v15249_v56  ;;  %5539 = vmatprep.subr.bf16.mxu0 %v15252_v22 }
0x10c3   : > { %14227 = vmatprep.subr.bf16.mxu1 %v15253_v3 }
0x10c5   : > { %5540 = vmatpush1.bf16.msra.mxu0 %v15250_v5 }
0x10c6   : > { %14228 = vmatpush3.bf16.msra.mxu1 %v15253_v3  ;;  %5541 = vmatprep.subr.bf16.mxu0 %v15256_v36  ;;  %v16323_v3 = vld [vmem:[#allocation2 + $0x8] sm:$0xff] }
0x10c7   : > { %5519 = vmatmul.mubr.bf16.gmra.mrb[132].mxu0 %v4942_v60  ;;  %14229 = vmatprep.subr.bf16.mxu1 %v15257_v31 }
0x10c8   : > { %5561 = vmatprep.mubr.bf16.mxu0 %v21207_v11 }
0x10c9   : > { %5542 = vmatpush1.bf16.msra.mxu0 %v15254_v30 }
0x10ca   : > { %14230 = vmatpush3.bf16.msra.mxu1 %v15257_v31  ;;  %5543 = vmatprep.subr.bf16.mxu0 %v15260_v21 }
0x10cb   : > { %14231 = vmatprep.subr.bf16.mxu1 %v15261_v48 }
0x10cd   : > { %5544 = vmatpush1.bf16.msra.mxu0 %v15258_v12 }
0x10ce   : > { %14232 = vmatpush3.bf16.msra.mxu1 %v15261_v48  ;;  %v19097_v48 = vld [vmem:[%s17384_s30 + $0x10] sm:$0x3f] }
0x113b   : > { %v13673_v50 = vpop.f32.mrb[80].mxu1 }
0x113c   : > { %v13674_v38 = vpop.f32.mrb[81].mxu1 }
0x113d   : > { %v19039_v10 = vadd.f32 %v13674_v38, %v13673_v50  ;;  %v13676_v41 = vpop.f32.mrb[82].mxu1  ;;  %v16325_v50 = vld [vmem:[#allocation2 + $0x18] sm:$0xff] }
0x113e   : > { %v13677_v2 = vpop.f32.mrb[83].mxu1 }
0x113f   : > { %v19041_v60 = vadd.f32 %v13677_v2, %v13676_v41 }
0x1142   : > { %v14211_v26 = vpop.f32.mrb[112].mxu0 }
0x1143   : > { %v4857_v49 = vpop.f32.mrb[113].mxu0 }
0x1144   : > { %v13679_v43 = vpop.f32.mrb[84].mxu1  ;;  %v14212_v39 = vpop.f32.mrb[114].mxu0 }
0x1145   : > { %v4889_v6 = vpack.c.bf16 %v14212_v39, %v14211_v26  ;;  %v13680_v42 = vpop.f32.mrb[85].mxu1  ;;  %v4860_v52 = vpop.f32.mrb[115].mxu0 }
0x1146   : > { %v13681_v7 = vadd.f32 %v13680_v42, %v13679_v43  ;;  %v4888_v0 = vpack.c.bf16 %v4860_v52, %v4857_v49  ;;  %v13682_v25 = vpop.f32.mrb[86].mxu1  ;;  %v16326_v43 = vld [vmem:[#allocation2 + $0x20] sm:$0xff] }
0x1147   : > { %v13683_v16 = vpop.f32.mrb[87].mxu1  ;;  %4922 = vrot.lane.b32.xlu1 %v4889_v6, %s16849_s24 }
0x1148   : > { %v19044_v32 = vadd.f32 %v13683_v16, %v13682_v25  ;;  %4920 = vrot.lane.b32.xlu0 %v4888_v0, %s16849_s24 }
0x114a   : > { %v14215_v45 = vpop.f32.mrb[116].mxu0 }
0x114b   : > { %v4873_v13 = vpop.f32.mrb[117].mxu0 }
0x114c   : > { %v13685_v34 = vpop.f32.mrb[88].mxu1  ;;  %v14216_v61 = vpop.f32.mrb[118].mxu0 }
0x114d   : > { %v4891_v59 = vpack.c.bf16 %v14216_v61, %v14215_v45  ;;  %v13686_v55 = vpop.f32.mrb[89].mxu1  ;;  %v4876_v54 = vpop.f32.mrb[119].mxu0 }
0x114e   : > { %v19047_v62 = vadd.f32 %v13686_v55, %v13685_v34  ;;  %v4890_v58 = vpack.c.bf16 %v4876_v54, %v4873_v13  ;;  %v13688_v8 = vpop.f32.mrb[90].mxu1  ;;  %v16328_v13 = vld [vmem:[#allocation2 + $0x28] sm:$0xff]  ;;  %v16329_v55 = vld [vmem:[#allocation2 + $0x30] sm:$0xff] }
0x114f   : > { %v13689_v63 = vpop.f32.mrb[91].mxu1  ;;  %4926 = vrot.lane.b32.xlu1 %v4891_v59, %s16849_s24 }
0x1150   : > { %v19050_v51 = vadd.f32 %v13689_v63, %v13688_v8  ;;  %4924 = vrot.lane.b32.xlu0 %v4890_v58, %s16849_s24  ;;  %v16330_v63 = vld [vmem:[#allocation2 + $0x40] sm:$0xff] }
0x1154   : > { %v13691_v18 = vpop.f32.mrb[92].mxu1 }
0x1155   : > { %v13692_v53 = vpop.f32.mrb[93].mxu1 }
0x1156   : > { %v19053_v44 = vadd.f32 %v13692_v53, %v13691_v18  ;;  %v13694_v29 = vpop.f32.mrb[94].mxu1  ;;  %v16331_v53 = vld [vmem:[#allocation2 + $0x38] sm:$0xff] }
0x1157   : > { %v13695_v47 = vpop.f32.mrb[95].mxu1 }
0x1158   : > { %v19055_v4 = vadd.f32 %v13695_v47, %v13694_v29 }
0x11b9   : > { %v4923_v35 = vpop.permute.xlu1 %4922 }
0x11ba   : > { %v4921_v46 = vpop.permute.xlu0 %4920  ;;  %v4966_v17 = vsel %vm3103_vm0, %v4571_v23, %v4923_v35  ;;  %v19077_v23 = vsub.s32 2, %v21208_v24 }
0x11bb   : > { %v4962_v15 = vsel %vm3103_vm0, %v4570_v28, %v4921_v46 }
0x11bc   : > { %5562 = vmatmul.mubr.bf16.vlgmr.msra.gmra.mrb[120].mxu0 %v4962_v15  ;;  %14233 = vmatprep.mubr.bf16.mxu1 %v4962_v15  ;;  %v19084_v28 = vrot.slane %v19080_v33, %v19077_v23  ;;  %v19091_v27 = vrot.slane %v19087_v1, %v19077_v23  ;;  %v19101_v12 = vrot.slane %v19097_v48, %v19077_v23 }
0x11bd   : > { %14234 = vmatmul.mubr.bf16.vlgmr.msra.gmra.mrb[96].mxu1 %v4966_v17  ;;  %5571 = vmatprep.mubr.bf16.mxu0 %v21207_v11 }
0x11c1   : > { %v4927_v56 = vpop.permute.xlu1 %4926 }
0x11c2   : > { %v4925_v19 = vpop.permute.xlu0 %4924  ;;  %v4974_v20 = vsel %vm3103_vm0, %v4573_v40, %v4927_v56  ;;  %v16322_v40 = vld [vmem:[#allocation2] sm:$0xff] }
0x11c3   : > { %v4970_v37 = vsel %vm3103_vm0, %v4572_v57, %v4925_v19 }
0x11c4   : > { %5572 = vmatmul.mubr.bf16.gmra.mrb[124].mxu0 %v4966_v17  ;;  %14237 = vmatprep.mubr.bf16.mxu1 %v4970_v37  ;;  %v16332_v17 = vld [vmem:[#allocation2 + $0x48] sm:$0xff] }
0x11c5   : > { %14238 = vmatmul.mubr.bf16.gmra.mrb[100].mxu1 %v4974_v20  ;;  %5581 = vmatprep.mubr.bf16.mxu0 %v21207_v11 }
0x11cc   : > { %5582 = vmatmul.mubr.bf16.gmra.mrb[128].mxu0 %v4970_v37 }
0x11cd   : > { %5591 = vmatprep.mubr.bf16.mxu0 %v21207_v11 }
0x11d4   : > { %5592 = vmatmul.mubr.bf16.gmra.mrb[132].mxu0 %v4974_v20 }
0x128f   : > { %v5563_v9 = vpop.f32.mrb[120].mxu0 }
0x1290   : > { %v5732_v14 = vadd.f32 %v16322_v40, %v5563_v9  ;;  %v5565_v57 = vpop.f32.mrb[121].mxu0  ;;  %v14235_v22 = vpop.f32.mrb[96].mxu1 }
0x1291   : > { %v5733_v5 = vadd.f32 %v16323_v3, %v5565_v57  ;;  %v5710_v36 = vadd.f32 %v14235_v22, %v13681_v7  ;;  %v5567_v31 = vpop.f32.mrb[122].mxu0  ;;  %v5701_v30 = vpop.f32.mrb[97].mxu1  ;;  %v16327_v7 = vld [vmem:[#allocation2 + $0x10] sm:$0xff] }
0x1292   : > { %v19094_v21 = vadd.f32 %v19084_v28, %v5732_v14  ;;  %v5735_v38 = vadd.f32 %v16325_v50, %v5567_v31  ;;  %v5702_v41 = vadd.f32 %v19039_v10, %v5701_v30  ;;  %v5569_v2 = vpop.f32.mrb[123].mxu0  ;;  %v14236_v26 = vpop.f32.mrb[98].mxu1  ;;  %v16333_v14 = vld [vmem:[#allocation2 + $0x50] sm:$0xff] }
0x1293   : > { %v19105_v49 = vadd.f32 %v19091_v27, %v5733_v5  ;;  %v5736_v39 = vadd.f32 %v16326_v43, %v5569_v2  ;;  %v5713_v6 = vadd.f32 %v14236_v26, %v19044_v32  ;;  %v5704_v42 = vpop.f32.mrb[99].mxu1  ;;  %v5740_v18 = vadd.f32 %v16330_v63, %v5710_v36  ;;  %v16334_v36 = vld [vmem:[#allocation2 + $0x58] sm:$0xff]  ;;  %v16335_v2 = vld [vmem:[#allocation2 + $0x60] sm:$0xff] }
0x1294   : > { %v19109_v52 = vadd.f32 %v19084_v28, %v5735_v38  ;;  %v5734_v0 = vadd.f32 %v16327_v7, %v5702_v41  ;;  %v5705_v25 = vadd.f32 %v19041_v60, %v5704_v42  ;;  %v16337_v42 = vld [vmem:[#allocation2 + $0x68] sm:$0xff] }
0x1295   : > { %v19113_v16 = vadd.f32 %v19091_v27, %v5736_v39  ;;  %v5792_v10 = vadd.f32 %v19105_v49, %v19094_v21  ;;  %v5743_v31 = vadd.f32 %v16334_v36, %v5713_v6  ;;  %v16336_v39 = vld [vmem:[#allocation2 + $0x70] sm:$0xff] }
0x1296   : > { %v19118_v45 = vadd.f32 %v19101_v12, %v5734_v0  ;;  %v5737_v34 = vadd.f32 %v16328_v13, %v5705_v25 }
0x1297   : > { %v5573_v32 = vpop.f32.mrb[124].mxu0  ;;  %v5796_v61 = vadd.f32 %v19113_v16, %v19109_v52  ;;  %v19152_v43 = vadd.f32 %v19101_v12, %v5743_v31  ;;  %v16344_v31 = vld [vmem:[#allocation2 + $0xa8] sm:$0xff] }
0x1298   : > { %v19123_v59 = vadd.f32 %v19101_v12, %v5737_v34  ;;  %v5738_v60 = vadd.f32 %v16329_v55, %v5573_v32  ;;  %v5575_v54 = vpop.f32.mrb[125].mxu0  ;;  %v14239_v58 = vpop.f32.mrb[100].mxu1  ;;  %v5793_v8 = vadd.f32 %v5792_v10, %v19118_v45  ;;  %v16338_v10 = vld [vmem:[#allocation2 + $0x78] sm:$0xff]  ;;  %v16339_v32 = vld [vmem:[#allocation2 + $0x88] sm:$0xff] }
0x1299   : > { %v5739_v29 = vadd.f32 %v16331_v53, %v5575_v54  ;;  %v5726_v47 = vadd.f32 %v14239_v58, %v19053_v44  ;;  %v5577_v35 = vpop.f32.mrb[126].mxu0  ;;  %v5717_v46 = vpop.f32.mrb[101].mxu1 }
0x129a   : > { %v19128_v15 = vadd.f32 %v19084_v28, %v5738_v60  ;;  %v5741_v56 = vadd.f32 %v16332_v17, %v5577_v35  ;;  %v5718_v19 = vadd.f32 %v19047_v62, %v5717_v46  ;;  %5794 = vadd.xlane.f32.xlu0 %v5793_v8  ;;  %v5579_v37 = vpop.f32.mrb[127].mxu0  ;;  %v14240_v20 = vpop.f32.mrb[102].mxu1  ;;  %v5797_v9 = vadd.f32 %v5796_v61, %v19123_v59  ;;  %v16340_v60 = vld [vmem:[#allocation2 + $0x80] sm:$0xff] }
0x129b   : > { %v19133_v40 = vadd.f32 %v19091_v27, %v5739_v29  ;;  %v5742_v57 = vadd.f32 %v16333_v14, %v5579_v37  ;;  %v5729_v44 = vadd.f32 %v14240_v20, %v19055_v4  ;;  %v5720_v22 = vpop.f32.mrb[103].mxu1  ;;  %v19141_v62 = vadd.f32 %v19101_v12, %v5740_v18  ;;  %v16342_v20 = vld [vmem:[#allocation2 + $0xa0] sm:$0xff]  ;;  %v16343_v14 = vld [vmem:[#allocation2 + $0x98] sm:$0xff] }
0x129c   : > { %21209 = vst [vmem:[#allocation42_spill] sm:$0xff] %v19128_v15  ;;  %v19137_v3 = vadd.f32 %v19084_v28, %v5741_v56  ;;  %v5721_v5 = vadd.f32 %v19050_v51, %v5720_v22  ;;  %5798 = vadd.xlane.f32.xlu1 %v5797_v9  ;;  %v5746_v6 = vadd.f32 %v16336_v39, %v5718_v19  ;;  %v16341_v56 = vld [vmem:[#allocation2 + $0x90] sm:$0xff] }
0x129d   : > { %21210 = vst [vmem:[#allocation43_spill] sm:$0xff] %v19133_v40  ;;  %v19144_v30 = vadd.f32 %v19091_v27, %v5742_v57  ;;  %v5800_v50 = vadd.f32 %v19133_v40, %v19128_v15  ;;  %v5752_v9 = vadd.f32 %v16342_v20, %v5726_v47  ;;  %v16346_v47 = vld [vmem:[#allocation2 + $0xb0] sm:$0xff]  ;;  %v15291_v20 = vld [vmem:[%s17398_s3 + $0x18c] ss:$48 sps:$4 sm:$0xff]  }
0x129e   : > { %21211 = vst [vmem:[#allocation44_spill] sm:$0xff] %v19137_v3  ;;  %v5749_v61 = vadd.f32 %v16339_v32, %v5721_v5  ;;  %v19165_v63 = vadd.f32 %v19101_v12, %v5746_v6  ;;  %v15270_v32 = vld [vmem:[%s17398_s3 + $0x64] ss:$48 sps:$4 sm:$0xff]  }
0x129f   : > { %21212 = vst [vmem:[#allocation46_spill] sm:$0xff] %v19144_v30  ;;  %v5583_v38 = vpop.f32.mrb[128].mxu0  ;;  %v5801_v4 = vadd.f32 %v5800_v50, %v19141_v62  ;;  %v5804_v41 = vadd.f32 %v19144_v30, %v19137_v3  ;;  %v19189_v39 = vadd.f32 %v19101_v12, %v5752_v9  ;;  %v15286_v9 = vld [vmem:[%s17398_s3 + $0x180] ss:$48 sps:$4 sm:$0xff]  }
0x12a0   : > { %v5744_v51 = vadd.f32 %v16335_v2, %v5583_v38  ;;  %v5585_v26 = vpop.f32.mrb[129].mxu0  ;;  %v19173_v29 = vadd.f32 %v19101_v12, %v5749_v61  ;;  %v15268_v61 = vld [vmem:[%s17398_s3 + $0x60] ss:$48 sps:$4 sm:$0xff]  }
0x12a1   : > { %v5745_v7 = vadd.f32 %v16337_v42, %v5585_v26  ;;  %5802 = vadd.xlane.f32.xlu0 %v5801_v4  ;;  %v5587_v0 = vpop.f32.mrb[130].mxu0  ;;  %v5805_v58 = vadd.f32 %v5804_v41, %v19152_v43  ;;  %v16345_v4 = vld [vmem:[#allocation2 + $0xb8] sm:$0xff] }
0x12a2   : > { %v19155_v25 = vadd.f32 %v19084_v28, %v5744_v51  ;;  %v5747_v13 = vadd.f32 %v16338_v10, %v5587_v0  ;;  %v5589_v34 = vpop.f32.mrb[131].mxu0  ;;  %v5755_v41 = vadd.f32 %v16345_v4, %v5729_v44  ;;  %v15264_v10 = vld [vmem:[%s17398_s3 + $0x4] ss:$48 sps:$4 sm:$0xff]   ;;  %v15298_v4 = vld [vmem:[%s17398_s3 + $0x240] ss:$48 sps:$4 sm:$0xff]  }
0x12a3   : > { %v19158_v55 = vadd.f32 %v19091_v27, %v5745_v7  ;;  %v5748_v54 = vadd.f32 %v16340_v60, %v5589_v34  ;;  %v15267_v34 = vld [vmem:[%s17398_s3 + $0xc] ss:$48 sps:$4 sm:$0xff]   ;;  %7836 = vmatprep.subr.bf16.mxu1 %v15264_v10  ;;  %v15271_v60 = vld [vmem:[%s17398_s3 + $0x68] ss:$48 sps:$4 sm:$0xff]  }
0x12a4   : > { %21213 = vst [vmem:[#allocation53_spill] sm:$0xff] %v19155_v25  ;;  %v19162_v8 = vadd.f32 %v19084_v28, %v5747_v13  ;;  %v19197_v42 = vadd.f32 %v19101_v12, %v5755_v41  ;;  %v15265_v13 = vld [vmem:[%s17398_s3 + $0x8] ss:$48 sps:$4 sm:$0xff]   ;;  %v15273_v12 = vld [vmem:[%s17398_s3 + $0x6c] ss:$48 sps:$4 sm:$0xff]   ;;  %7982 = vmatprep.subr.bf16.mxu0 %v15267_v34 }
0x12a5   : > { %21214 = vst [vmem:[#allocation52_spill] sm:$0xff] %v19158_v55  ;;  %v19168_v18 = vadd.f32 %v19091_v27, %v5748_v54  ;;  %5806 = vadd.xlane.f32.xlu0 %v5805_v58  ;;  %v5808_v53 = vadd.f32 %v19158_v55, %v19155_v25  ;;  %7983 = vmatpush1.bf16.msra.mxu0 %v15265_v13  ;;  %v15276_v54 = vld [vmem:[%s17398_s3 + $0xc4] ss:$48 sps:$4 sm:$0xff]   ;;  %v15279_v58 = vld [vmem:[%s17398_s3 + $0xcc] ss:$48 sps:$4 sm:$0xff]  }
0x12a6   : > { %21215 = vst [vmem:[#allocation47_spill] sm:$0xff] %v19162_v8  ;;  %7984 = vmatprep.subr.bf16.mxu0 %v15273_v12  ;;  %v15301_v41 = vld [vmem:[%s17398_s3 + $0x248] ss:$48 sps:$4 sm:$0xff]   ;;  %v15318_v13 = vld [vmem:[%s17398_s3 + $0x364] ss:$48 sps:$4 sm:$0xff]  }
0x12a7   : > { %21216 = vst [vmem:[#allocation45_spill] sm:$0xff] %v19168_v18  ;;  %v5593_v35 = vpop.f32.mrb[132].mxu0  ;;  %v5809_v46 = vadd.f32 %v5808_v53, %v19165_v63  ;;  %v5812_v17 = vadd.f32 %v19168_v18, %v19162_v8  ;;  %v15274_v53 = vld [vmem:[%s17398_s3 + $0xc0] ss:$48 sps:$4 sm:$0xff]   ;;  %v15313_v10 = vld [vmem:[%s17398_s3 + $0x308] ss:$48 sps:$4 sm:$0xff]  }
0x12a8   : > { %v5750_v19 = vadd.f32 %v16341_v56, %v5593_v35  ;;  %v5595_v37 = vpop.f32.mrb[133].mxu0  ;;  %v15277_v35 = vld [vmem:[%s17398_s3 + $0xc8] ss:$48 sps:$4 sm:$0xff]   ;;  %v15280_v56 = vld [vmem:[%s17398_s3 + $0x120] ss:$48 sps:$4 sm:$0xff]  }
0x12a9   : > { %v5751_v57 = vadd.f32 %v16343_v14, %v5595_v37  ;;  %5810 = vadd.xlane.f32.xlu0 %v5809_v46  ;;  %v5597_v22 = vpop.f32.mrb[134].mxu0  ;;  %v5813_v5 = vadd.f32 %v5812_v17, %v19173_v29  ;;  %7985 = vmatpush1.bf16.msra.mxu0 %v15271_v60  ;;  %v15282_v46 = vld [vmem:[%s17398_s3 + $0x124] ss:$48 sps:$4 sm:$0xff]   ;;  %v15285_v17 = vld [vmem:[%s17398_s3 + $0x12c] ss:$48 sps:$4 sm:$0xff]  }
0x12aa   : > { %v19180_v36 = vadd.f32 %v19084_v28, %v5750_v19  ;;  %v5753_v50 = vadd.f32 %v16344_v31, %v5597_v22  ;;  %v5599_v38 = vpop.f32.mrb[135].mxu0  ;;  %7986 = vmatprep.subr.bf16.mxu0 %v15279_v58  ;;  %v15283_v19 = vld [vmem:[%s17398_s3 + $0x128] ss:$48 sps:$4 sm:$0xff]   ;;  %v15288_v37 = vld [vmem:[%s17398_s3 + $0x184] ss:$48 sps:$4 sm:$0xff]  }
0x12ab   : > { %v19183_v2 = vadd.f32 %v19091_v27, %v5751_v57  ;;  %v5754_v51 = vadd.f32 %v16346_v47, %v5599_v38  ;;  %5814 = vadd.xlane.f32.xlu1 %v5813_v5  ;;  %v15289_v14 = vld [vmem:[%s17398_s3 + $0x188] ss:$48 sps:$4 sm:$0xff]   ;;  %v15294_v57 = vld [vmem:[%s17398_s3 + $0x1e4] ss:$48 sps:$4 sm:$0xff]   ;;  %v15297_v22 = vld [vmem:[%s17398_s3 + $0x1ec] ss:$48 sps:$4 sm:$0xff]  }
0x12ac   : > { %21217 = vst [vmem:[#allocation57_spill] sm:$0xff] %v19180_v36  ;;  %v19186_v26 = vadd.f32 %v19084_v28, %v5753_v50  ;;  %v15292_v5 = vld [vmem:[%s17398_s3 + $0x1e0] ss:$48 sps:$4 sm:$0xff]   ;;  %v15295_v31 = vld [vmem:[%s17398_s3 + $0x1e8] ss:$48 sps:$4 sm:$0xff]  }
0x12ad   : > { %21218 = vst [vmem:[#allocation55_spill] sm:$0xff] %v19183_v2  ;;  %v19192_v6 = vadd.f32 %v19091_v27, %v5754_v51  ;;  %v5816_v44 = vadd.f32 %v19183_v2, %v19180_v36  ;;  %v15262_v27 = vld [vmem:[%s17398_s3] ss:$48 sps:$4 sm:$0xff]   ;;  %7987 = vmatpush1.bf16.msra.mxu0 %v15277_v35  ;;  %v15300_v50 = vld [vmem:[%s17398_s3 + $0x244] ss:$48 sps:$4 sm:$0xff]  }
0x12ae   : > { %21219 = vst [vmem:[#allocation51_spill] sm:$0xff] %v19186_v26  ;;  %7837 = vmatpush1.bf16.msra.mxu1 %v15262_v27  ;;  %7988 = vmatprep.subr.bf16.mxu0 %v15285_v17  ;;  %v15303_v38 = vld [vmem:[%s17398_s3 + $0x24c] ss:$48 sps:$4 sm:$0xff]   ;;  %v15306_v47 = vld [vmem:[%s17398_s3 + $0x2a4] ss:$48 sps:$4 sm:$0xff]  }
0x12af   : > { %21220 = vst [vmem:[#allocation49_spill] sm:$0xff] %v19192_v6  ;;  %v5817_v7 = vadd.f32 %v5816_v44, %v19189_v39  ;;  %v5820_v28 = vadd.f32 %v19192_v6, %v19186_v26  ;;  %7838 = vmatprep.subr.bf16.mxu1 %v15270_v32  ;;  %v15309_v51 = vld [vmem:[%s17398_s3 + $0x2ac] ss:$48 sps:$4 sm:$0xff]   ;;  %v15304_v44 = vld [vmem:[%s17398_s3 + $0x2a0] ss:$48 sps:$4 sm:$0xff]  }
0x12b0   : > { %v15310_v27 = vld [vmem:[%s17398_s3 + $0x300] ss:$48 sps:$4 sm:$0xff]   ;;  %v15321_v34 = vld [vmem:[%s17398_s3 + $0x36c] ss:$48 sps:$4 sm:$0xff]   ;;  %v15319_v12 = vld [vmem:[%s17398_s3 + $0x368] ss:$48 sps:$4 sm:$0xff]  }
0x12b1   : > { %5818 = vadd.xlane.f32.xlu0 %v5817_v7  ;;  %v5821_v0 = vadd.f32 %v5820_v28, %v19197_v42  ;;  %7989 = vmatpush1.bf16.msra.mxu0 %v15283_v19  ;;  %v15307_v7 = vld [vmem:[%s17398_s3 + $0x2a8] ss:$48 sps:$4 sm:$0xff]   ;;  %v15312_v28 = vld [vmem:[%s17398_s3 + $0x304] ss:$48 sps:$4 sm:$0xff]   ;;  %v15316_v32 = vld [vmem:[%s17398_s3 + $0x360] ss:$48 sps:$4 sm:$0xff]  }
0x12b2   : > { %7839 = vmatpush1.bf16.msra.mxu1 %v15268_v61  ;;  %7990 = vmatprep.subr.bf16.mxu0 %v15291_v20 }
0x12b3   : > { %5822 = vadd.xlane.f32.xlu1 %v5821_v0  ;;  %7840 = vmatprep.subr.bf16.mxu1 %v15276_v54  ;;  %v15315_v0 = vld [vmem:[%s17398_s3 + $0x30c] ss:$48 sps:$4 sm:$0xff]  }
0x12b5   : > { %7991 = vmatpush1.bf16.msra.mxu0 %v15289_v14 }
0x12b6   : > { %7841 = vmatpush1.bf16.msra.mxu1 %v15274_v53  ;;  %7992 = vmatprep.subr.bf16.mxu0 %v15297_v22 }
0x12b7   : > { %7842 = vmatprep.subr.bf16.mxu1 %v15282_v46 }
0x12b9   : > { %7993 = vmatpush1.bf16.msra.mxu0 %v15295_v31 }
0x12ba   : > { %7843 = vmatpush1.bf16.msra.mxu1 %v15280_v56  ;;  %7994 = vmatprep.subr.bf16.mxu0 %v15303_v38 }
0x12bb   : > { %7844 = vmatprep.subr.bf16.mxu1 %v15288_v37 }
0x12bd   : > { %7995 = vmatpush1.bf16.msra.mxu0 %v15301_v41 }
0x12be   : > { %7845 = vmatpush1.bf16.msra.mxu1 %v15286_v9  ;;  %7996 = vmatprep.subr.bf16.mxu0 %v15309_v51 }
0x12bf   : > { %7846 = vmatprep.subr.bf16.mxu1 %v15294_v57 }
0x12c1   : > { %7997 = vmatpush1.bf16.msra.mxu0 %v15307_v7 }
0x12c2   : > { %7847 = vmatpush1.bf16.msra.mxu1 %v15292_v5  ;;  %7998 = vmatprep.subr.bf16.mxu0 %v15315_v0 }
0x12c3   : > { %7848 = vmatprep.subr.bf16.mxu1 %v15300_v50 }
0x12c5   : > { %7999 = vmatpush1.bf16.msra.mxu0 %v15313_v10 }
0x12c6   : > { %7849 = vmatpush1.bf16.msra.mxu1 %v15298_v4  ;;  %8000 = vmatprep.subr.bf16.mxu0 %v15321_v34 }
0x12c7   : > { %7850 = vmatprep.subr.bf16.mxu1 %v15306_v47 }
0x12c9   : > { %8001 = vmatpush1.bf16.msra.mxu0 %v15319_v12 }
0x12ca   : > { %7851 = vmatpush1.bf16.msra.mxu1 %v15304_v44 }
0x12cb   : > { %7852 = vmatprep.subr.bf16.mxu1 %v15312_v28 }
0x12ce   : > { %7853 = vmatpush1.bf16.msra.mxu1 %v15310_v27 }
0x12cf   : > { %7854 = vmatprep.subr.bf16.mxu1 %v15318_v13 }
0x12d2   : > { %7855 = vmatpush1.bf16.msra.mxu1 %v15316_v32 }
0x1327   : > { %v5795_v61 = vpop.xlane.xlu0 %5794 }
0x1328   : > { %v5824_v60 = vmul.f32 0.0026041667, %v5795_v61 }
0x1329   : > { %v5799_v54 = vpop.xlane.xlu1 %5798 }
0x132a   : > { %v19244_v58 = vsub.f32 %v19094_v21, %v5824_v60  ;;  %v19247_v53 = vsub.f32 %v19105_v49, %v5824_v60  ;;  %v19250_v35 = vsub.f32 %v19118_v45, %v5824_v60  ;;  %v5825_v46 = vmul.f32 0.0026041667, %v5799_v54 }
0x132c   : > { %v5856_v17 = vmul.f32 %v19244_v58, %v19244_v58  ;;  %v5857_v56 = vmul.f32 %v19247_v53, %v19247_v53  ;;  %v19257_v19 = vsub.f32 %v19109_v52, %v5825_v46  ;;  %v19260_v37 = vsub.f32 %v19113_v16, %v5825_v46 }
0x132d   : > { %v19263_v20 = vsub.f32 %v19123_v59, %v5825_v46  ;;  %v5858_v22 = vmul.f32 %v19250_v35, %v19250_v35 }
0x132e   : > { %v5859_v9 = vmul.f32 %v19257_v19, %v19257_v19  ;;  %v5860_v14 = vmul.f32 %v19260_v37, %v19260_v37  ;;  %v5803_v57 = vpop.xlane.xlu0 %5802  ;;  %v5880_v5 = vadd.f32 %v5857_v56, %v5856_v17 }
0x132f   : > { %v5826_v31 = vmul.f32 0.0026041667, %v5803_v57  ;;  %v5861_v38 = vmul.f32 %v19263_v20, %v19263_v20 }
0x1330   : > { %v5881_v50 = vadd.f32 %v5880_v5, %v5858_v22  ;;  %v5884_v4 = vadd.f32 %v5860_v14, %v5859_v9 }
0x1331   : > { %v19274_v41 = vsub.f32 %v19128_v15, %v5826_v31  ;;  %v19277_v47 = vsub.f32 %v19133_v40, %v5826_v31  ;;  %v19280_v51 = vsub.f32 %v19141_v62, %v5826_v31  ;;  %v15375_v40 = vld [vmem:[%s17398_s3 + $0x6cc] ss:$48 sps:$4 sm:$0xff]  }
0x1332   : > { %v5807_v44 = vpop.xlane.xlu0 %5806  ;;  %5882 = vadd.xlane.f32.xlu0 %v5881_v50  ;;  %v5885_v7 = vadd.f32 %v5884_v4, %v5861_v38 }
0x1333   : > { %v5862_v28 = vmul.f32 %v19274_v41, %v19274_v41  ;;  %v5863_v0 = vmul.f32 %v19277_v47, %v19277_v47  ;;  %v5827_v27 = vmul.f32 0.0026041667, %v5807_v44  ;;  %v5864_v34 = vmul.f32 %v19280_v51, %v19280_v51 }
0x1334   : > { %5886 = vadd.xlane.f32.xlu1 %v5885_v7 }
0x1335   : > { %v19287_v10 = vsub.f32 %v19137_v3, %v5827_v27  ;;  %v19290_v13 = vsub.f32 %v19144_v30, %v5827_v27  ;;  %v5888_v32 = vadd.f32 %v5863_v0, %v5862_v28  ;;  %v19295_v12 = vsub.f32 %v19152_v43, %v5827_v27  ;;  %v15361_v30 = vld [vmem:[%s17398_s3 + $0x608] ss:$48 sps:$4 sm:$0xff]  }
0x1336   : > { %v5811_v61 = vpop.xlane.xlu0 %5810 }
0x1337   : > { %v5865_v60 = vmul.f32 %v19287_v10, %v19287_v10  ;;  %v5866_v54 = vmul.f32 %v19290_v13, %v19290_v13  ;;  %v5828_v46 = vmul.f32 0.0026041667, %v5811_v61  ;;  %v5889_v17 = vadd.f32 %v5888_v32, %v5864_v34 }
0x1338   : > { %v5815_v56 = vpop.xlane.xlu1 %5814  ;;  %v5867_v5 = vmul.f32 %v19295_v12, %v19295_v12 }
0x1339   : > { %v19302_v9 = vsub.f32 %v19155_v25, %v5828_v46  ;;  %v19305_v14 = vsub.f32 %v19158_v55, %v5828_v46  ;;  %v19308_v57 = vsub.f32 %v19165_v63, %v5828_v46  ;;  %v5829_v22 = vmul.f32 0.0026041667, %v5815_v56  ;;  %5890 = vadd.xlane.f32.xlu0 %v5889_v17 }
0x133a   : > { %v5892_v31 = vadd.f32 %v5866_v54, %v5865_v60 }
0x133b   : > { %v5868_v50 = vmul.f32 %v19302_v9, %v19302_v9  ;;  %v5869_v38 = vmul.f32 %v19305_v14, %v19305_v14  ;;  %v19317_v4 = vsub.f32 %v19162_v8, %v5829_v22  ;;  %v19320_v44 = vsub.f32 %v19168_v18, %v5829_v22  ;;  %v15333_v18 = vld [vmem:[%s17398_s3 + $0x42c] ss:$48 sps:$4 sm:$0xff]  }
0x133c   : > { %v19323_v7 = vsub.f32 %v19173_v29, %v5829_v22  ;;  %v5893_v28 = vadd.f32 %v5892_v31, %v5867_v5  ;;  %v5870_v34 = vmul.f32 %v19308_v57, %v19308_v57 }
0x133d   : > { %v5871_v0 = vmul.f32 %v19317_v4, %v19317_v4  ;;  %v5872_v27 = vmul.f32 %v19320_v44, %v19320_v44  ;;  %v5896_v32 = vadd.f32 %v5869_v38, %v5868_v50 }
0x133e   : > { %5894 = vadd.xlane.f32.xlu1 %v5893_v28  ;;  %v5819_v61 = vpop.xlane.xlu0 %5818  ;;  %v5873_v56 = vmul.f32 %v19323_v7, %v19323_v7 }
0x133f   : > { %v5830_v60 = vmul.f32 0.0026041667, %v5819_v61  ;;  %v5897_v54 = vadd.f32 %v5896_v32, %v5870_v34  ;;  %v5900_v46 = vadd.f32 %v5872_v27, %v5871_v0 }
0x1340   : > { %v5823_v17 = vpop.xlane.xlu1 %5822 }
0x1341   : > { %v19334_v22 = vsub.f32 %v19180_v36, %v5830_v60  ;;  %v19337_v5 = vsub.f32 %v19183_v2, %v5830_v60  ;;  %v19340_v31 = vsub.f32 %v19189_v39, %v5830_v60  ;;  %v5831_v50 = vmul.f32 0.0026041667, %v5823_v17  ;;  %5898 = vadd.xlane.f32.xlu0 %v5897_v54  ;;  %v15322_v17 = vld [vmem:[%s17398_s3 + $0x3c0] ss:$48 sps:$4 sm:$0xff]   ;;  %v15327_v2 = vld [vmem:[%s17398_s3 + $0x3cc] ss:$48 sps:$4 sm:$0xff]  }
0x1342   : > { %v5901_v38 = vadd.f32 %v5900_v46, %v5873_v56  ;;  %v15324_v56 = vld [vmem:[%s17398_s3 + $0x3c4] ss:$48 sps:$4 sm:$0xff]   ;;  %8002 = vmatprep.subr.bf16.mxu0 %v15327_v2  ;;  %v15337_v2 = vld [vmem:[%s17398_s3 + $0x488] ss:$48 sps:$4 sm:$0xff]  }
0x1343   : > { %v5874_v28 = vmul.f32 %v19334_v22, %v19334_v22  ;;  %v5875_v0 = vmul.f32 %v19337_v5, %v19337_v5  ;;  %v19347_v27 = vsub.f32 %v19186_v26, %v5831_v50  ;;  %v19350_v34 = vsub.f32 %v19192_v6, %v5831_v50  ;;  %v15325_v6 = vld [vmem:[%s17398_s3 + $0x3c8] ss:$48 sps:$4 sm:$0xff]   ;;  %v15330_v36 = vld [vmem:[%s17398_s3 + $0x424] ss:$48 sps:$4 sm:$0xff]   ;;  %7856 = vmatprep.subr.bf16.mxu1 %v15324_v56 }
0x1344   : > { %v19353_v32 = vsub.f32 %v19197_v42, %v5831_v50  ;;  %5902 = vadd.xlane.f32.xlu1 %v5901_v38  ;;  %v5876_v54 = vmul.f32 %v19340_v31, %v19340_v31  ;;  %7857 = vmatpush1.bf16.msra.mxu1 %v15322_v17  ;;  %v15346_v17 = vld [vmem:[%s17398_s3 + $0x540] ss:$48 sps:$4 sm:$0xff]   ;;  %v15348_v56 = vld [vmem:[%s17398_s3 + $0x544] ss:$48 sps:$4 sm:$0xff]  }
0x1345   : > { %v5877_v61 = vmul.f32 %v19347_v27, %v19347_v27  ;;  %v5878_v60 = vmul.f32 %v19350_v34, %v19350_v34  ;;  %v5904_v46 = vadd.f32 %v5875_v0, %v5874_v28  ;;  %8003 = vmatpush1.bf16.msra.mxu0 %v15325_v6  ;;  %v15328_v0 = vld [vmem:[%s17398_s3 + $0x420] ss:$48 sps:$4 sm:$0xff]   ;;  %7858 = vmatprep.subr.bf16.mxu1 %v15330_v36  ;;  %v15342_v6 = vld [vmem:[%s17398_s3 + $0x4e4] ss:$48 sps:$4 sm:$0xff]  }
0x1346   : > { %v5879_v50 = vmul.f32 %v19353_v32, %v19353_v32  ;;  %8004 = vmatprep.subr.bf16.mxu0 %v15333_v18  ;;  %v15340_v36 = vld [vmem:[%s17398_s3 + $0x4e0] ss:$48 sps:$4 sm:$0xff]   ;;  %v15343_v18 = vld [vmem:[%s17398_s3 + $0x4e8] ss:$48 sps:$4 sm:$0xff]  }
0x1347   : > { %v5905_v26 = vadd.f32 %v5904_v46, %v5876_v54  ;;  %v5908_v38 = vadd.f32 %v5878_v60, %v5877_v61  ;;  %v15331_v54 = vld [vmem:[%s17398_s3 + $0x428] ss:$48 sps:$4 sm:$0xff]   ;;  %v15336_v61 = vld [vmem:[%s17398_s3 + $0x484] ss:$48 sps:$4 sm:$0xff]   ;;  %v15339_v60 = vld [vmem:[%s17398_s3 + $0x48c] ss:$48 sps:$4 sm:$0xff]  }
0x1348   : > { %7859 = vmatpush1.bf16.msra.mxu1 %v15328_v0  ;;  %v15345_v46 = vld [vmem:[%s17398_s3 + $0x4ec] ss:$48 sps:$4 sm:$0xff]  }
0x1349   : > { %5906 = vadd.xlane.f32.xlu0 %v5905_v26  ;;  %v5909_v28 = vadd.f32 %v5908_v38, %v5879_v50  ;;  %8005 = vmatpush1.bf16.msra.mxu0 %v15331_v54  ;;  %v15334_v26 = vld [vmem:[%s17398_s3 + $0x480] ss:$48 sps:$4 sm:$0xff]   ;;  %v15349_v50 = vld [vmem:[%s17398_s3 + $0x548] ss:$48 sps:$4 sm:$0xff]   ;;  %v15351_v38 = vld [vmem:[%s17398_s3 + $0x54c] ss:$48 sps:$4 sm:$0xff]  }
0x134a   : > { %7860 = vmatprep.subr.bf16.mxu1 %v15336_v61  ;;  %8006 = vmatprep.subr.bf16.mxu0 %v15339_v60  ;;  %v15357_v0 = vld [vmem:[%s17398_s3 + $0x5ac] ss:$48 sps:$4 sm:$0xff]   ;;  %v15352_v54 = vld [vmem:[%s17398_s3 + $0x5a0] ss:$48 sps:$4 sm:$0xff]   ;;  %v15355_v61 = vld [vmem:[%s17398_s3 + $0x5a8] ss:$48 sps:$4 sm:$0xff]  }
0x134b   : > { %5910 = vadd.xlane.f32.xlu1 %v5909_v28  ;;  %v15354_v28 = vld [vmem:[%s17398_s3 + $0x5a4] ss:$48 sps:$4 sm:$0xff]  }
0x134c   : > { %7861 = vmatpush1.bf16.msra.mxu1 %v15334_v26  ;;  %v15360_v60 = vld [vmem:[%s17398_s3 + $0x604] ss:$48 sps:$4 sm:$0xff]   ;;  %v15363_v26 = vld [vmem:[%s17398_s3 + $0x60c] ss:$48 sps:$4 sm:$0xff]  }
0x134d   : > { %8007 = vmatpush1.bf16.msra.mxu0 %v15337_v2  ;;  %7862 = vmatprep.subr.bf16.mxu1 %v15342_v6 }
0x134e   : > { %8008 = vmatprep.subr.bf16.mxu0 %v15345_v46 }
0x1350   : > { %7863 = vmatpush1.bf16.msra.mxu1 %v15340_v36 }
0x1351   : > { %8009 = vmatpush1.bf16.msra.mxu0 %v15343_v18  ;;  %7864 = vmatprep.subr.bf16.mxu1 %v15348_v56 }
0x1352   : > { %8010 = vmatprep.subr.bf16.mxu0 %v15351_v38 }
0x1354   : > { %7865 = vmatpush1.bf16.msra.mxu1 %v15346_v17 }
0x1355   : > { %8011 = vmatpush1.bf16.msra.mxu0 %v15349_v50  ;;  %7866 = vmatprep.subr.bf16.mxu1 %v15354_v28  ;;  %v19390_v28 = vsub.s32 3, %v21208_v24 }
0x1356   : > { %8012 = vmatprep.subr.bf16.mxu0 %v15357_v0 }
0x1358   : > { %7867 = vmatpush1.bf16.msra.mxu1 %v15352_v54 }
0x1359   : > { %8013 = vmatpush1.bf16.msra.mxu0 %v15355_v61  ;;  %7909 = vmatprep.subr.bf16.mxu1 %v15360_v60  ;;  %v19393_v61 = vsub.s32 4, %v21208_v24  ;;  %v19397_v60 = vrot.slane %v19087_v1, %v19390_v28 }
0x135a   : > { %8055 = vmatprep.subr.bf16.mxu0 %v15363_v26 }
0x13bf   : > { %v5883_v2 = vpop.xlane.xlu0 %5882 }
0x13c0   : > { %v5912_v6 = vmul.f32 0.0026041667, %v5883_v2 }
0x13c1   : > { %v5887_v46 = vpop.xlane.xlu1 %5886 }
0x13c2   : > { %v5920_v36 = vadd.f32 1e-05, %v5912_v6  ;;  %v5913_v18 = vmul.f32 0.0026041667, %v5887_v46  ;;  %v19403_v46 = vrot.slane %v19080_v33, %v19390_v28 }
0x13c4   : > { %16286 = vrsqrt.f32 %v5920_v36  ;;  %v5921_v56 = vadd.f32 1e-05, %v5913_v18 }
0x13c6   : > { %16288 = vrsqrt.f32 %v5921_v56  ;;  %v5891_v17 = vpop.xlane.xlu0 %5890 }
0x13c7   : > { %v5914_v50 = vmul.f32 0.0026041667, %v5891_v17 }
0x13c9   : > { %v5922_v38 = vadd.f32 1e-05, %v5914_v50  ;;  %v19413_v50 = vrot.slane %v19087_v1, %v19393_v61 }
0x13cb   : > { %16290 = vrsqrt.f32 %v5922_v38  ;;  %v5895_v0 = vpop.xlane.xlu1 %5894  ;;  %v19417_v38 = vrot.slane %v19080_v33, %v19393_v61 }
0x13cc   : > { %v5915_v54 = vmul.f32 0.0026041667, %v5895_v0 }
0x13ce   : > { %v19399_v26 = vpop.eup %16286  ;;  %v5923_v2 = vadd.f32 1e-05, %v5915_v54  ;;  %v5899_v6 = vpop.xlane.xlu0 %5898 }
0x13cf   : > { %v5916_v36 = vmul.f32 0.0026041667, %v5899_v6  ;;  %v5937_v18 = vmul.f32 %v19399_v26, %v19247_v53  ;;  %v5936_v56 = vmul.f32 %v19399_v26, %v19244_v58 }
0x13d0   : > { %v19409_v17 = vpop.eup %16288  ;;  %16292 = vrsqrt.f32 %v5923_v2 }
0x13d1   : > { %v5924_v0 = vadd.f32 1e-05, %v5916_v36  ;;  %v5903_v54 = vpop.xlane.xlu1 %5902  ;;  %v5940_v6 = vmul.f32 %v19409_v17, %v19260_v37  ;;  %v5973_v53 = vmul.f32 %v19397_v60, %v5937_v18  ;;  %v5939_v58 = vmul.f32 %v19409_v17, %v19257_v19 }
0x13d2   : > { %v5917_v8 = vmul.f32 0.0026041667, %v5903_v54  ;;  %v5972_v2 = vmul.f32 %v19403_v46, %v5936_v56 }
0x13d3   : > { %16294 = vrsqrt.f32 %v5924_v0  ;;  %v5976_v1 = vmul.f32 %v19397_v60, %v5940_v6  ;;  %v5975_v33 = vmul.f32 %v19403_v46, %v5939_v58  ;;  %v6009_v37 = vadd.f32 %v19413_v50, %v5973_v53  ;;  %v15358_v53 = vld [vmem:[%s17398_s3 + $0x600] ss:$48 sps:$4 sm:$0xff]  }
0x13d4   : > { %v5925_v36 = vadd.f32 1e-05, %v5917_v8  ;;  %v6008_v19 = vadd.f32 %v19417_v38, %v5972_v2  ;;  %v15366_v2 = vld [vmem:[%s17398_s3 + $0x664] ss:$48 sps:$4 sm:$0xff]  }
0x13d5   : > { %v19427_v55 = vpop.eup %16290  ;;  %v6012_v18 = vadd.f32 %v19413_v50, %v5976_v1  ;;  %v6011_v56 = vadd.f32 %v19417_v38, %v5975_v33  ;;  %v15369_v33 = vld [vmem:[%s17398_s3 + $0x66c] ss:$48 sps:$4 sm:$0xff]  }
0x13d6   : > { %16296 = vrsqrt.f32 %v5925_v36  ;;  %v5907_v0 = vpop.xlane.xlu0 %5906  ;;  %v5943_v54 = vmul.f32 %v19427_v55, %v19277_v47  ;;  %v5942_v8 = vmul.f32 %v19427_v55, %v19274_v41 }
0x13d7   : > { %v5918_v6 = vmul.f32 0.0026041667, %v5907_v0  ;;  %v19437_v58 = vpack.c.bf16 %v6012_v18, %v6009_v37  ;;  %v19439_v25 = vpack.c.bf16 %v6011_v56, %v6008_v19  ;;  %v15364_v19 = vld [vmem:[%s17398_s3 + $0x660] ss:$48 sps:$4 sm:$0xff]   ;;  %v15367_v56 = vld [vmem:[%s17398_s3 + $0x668] ss:$48 sps:$4 sm:$0xff]  }
0x13d8   : > { %v5911_v1 = vpop.xlane.xlu1 %5910  ;;  %v5979_v47 = vmul.f32 %v19397_v60, %v5943_v54  ;;  %v5978_v37 = vmul.f32 %v19403_v46, %v5942_v8 }
0x13d9   : > { %v5926_v36 = vadd.f32 1e-05, %v5918_v6  ;;  %v5919_v3 = vmul.f32 0.0026041667, %v5911_v1  ;;  %7868 = vmatprep.mubr.bf16.mxu1 %v19437_v58  ;;  %8014 = vmatprep.mubr.bf16.mxu0 %v19437_v58  ;;  %v15372_v1 = vld [vmem:[%s17398_s3 + $0x6c4] ss:$48 sps:$4 sm:$0xff]  }
0x13da   : > { %v19447_v41 = vpop.eup %16292  ;;  %7869 = vmatmul.mubr.bf16.vlgmr.msra.gmra.mrb[104].mxu1 %v19439_v25  ;;  %8015 = vmatmul.mubr.bf16.vlgmr.msra.gmra.mrb[136].mxu0 %v19439_v25  ;;  %v6015_v54 = vadd.f32 %v19413_v50, %v5979_v47 }
0x13db   : > { %16298 = vrsqrt.f32 %v5926_v36  ;;  %v5927_v18 = vadd.f32 1e-05, %v5919_v3  ;;  %7910 = vmatpush1.bf16.msra.mxu1 %v15358_v53  ;;  %8056 = vmatpush1.bf16.msra.mxu0 %v15361_v30  ;;  %v5946_v0 = vmul.f32 %v19447_v41, %v19290_v13  ;;  %v5945_v6 = vmul.f32 %v19447_v41, %v19287_v10 }
0x13dc   : > { %7911 = vmatprep.subr.bf16.mxu1 %v15366_v2  ;;  %8057 = vmatprep.subr.bf16.mxu0 %v15369_v33  ;;  %v6014_v13 = vadd.f32 %v19417_v38, %v5978_v37  ;;  %v15373_v37 = vld [vmem:[%s17398_s3 + $0x6c8] ss:$48 sps:$4 sm:$0xff]  }
0x13dd   : > { %v19461_v15 = vpop.eup %16294  ;;  %16300 = vrsqrt.f32 %v5927_v18  ;;  %v5982_v3 = vmul.f32 %v19397_v60, %v5946_v0  ;;  %v5981_v30 = vmul.f32 %v19403_v46, %v5945_v6  ;;  %v15381_v0 = vld [vmem:[%s17398_s3 + $0x72c] ss:$48 sps:$4 sm:$0xff]  }
0x13de   : > { %v5949_v10 = vmul.f32 %v19461_v15, %v19305_v14  ;;  %v5948_v2 = vmul.f32 %v19461_v15, %v19302_v9  ;;  %v15370_v14 = vld [vmem:[%s17398_s3 + $0x6c0] ss:$48 sps:$4 sm:$0xff]  }
0x13df   : > { %7912 = vmatpush1.bf16.msra.mxu1 %v15364_v19  ;;  %8058 = vmatpush1.bf16.msra.mxu0 %v15367_v56  ;;  %v6018_v8 = vadd.f32 %v19413_v50, %v5982_v3  ;;  %v6017_v53 = vadd.f32 %v19417_v38, %v5981_v30  ;;  %v15378_v56 = vld [vmem:[%s17398_s3 + $0x724] ss:$48 sps:$4 sm:$0xff]   ;;  %v15379_v3 = vld [vmem:[%s17398_s3 + $0x728] ss:$48 sps:$4 sm:$0xff]  }
0x13e0   : > { %v19473_v33 = vpop.eup %16296  ;;  %7913 = vmatprep.subr.bf16.mxu1 %v15372_v1  ;;  %8059 = vmatprep.subr.bf16.mxu0 %v15375_v40  ;;  %v5985_v36 = vmul.f32 %v19397_v60, %v5949_v10  ;;  %v5984_v6 = vmul.f32 %v19403_v46, %v5948_v2  ;;  %v15384_v2 = vld [vmem:[%s17398_s3 + $0x784] ss:$48 sps:$4 sm:$0xff]  }
0x13e1   : > { %v19476_v47 = vpack.c.bf16 %v6018_v8, %v6015_v54  ;;  %v19480_v18 = vpack.c.bf16 %v6017_v53, %v6014_v13  ;;  %v5952_v19 = vmul.f32 %v19473_v33, %v19320_v44  ;;  %v5951_v9 = vmul.f32 %v19473_v33, %v19317_v4  ;;  %v15376_v4 = vld [vmem:[%s17398_s3 + $0x720] ss:$48 sps:$4 sm:$0xff]  }
0x13e2   : > { %v6021_v30 = vadd.f32 %v19413_v50, %v5985_v36  ;;  %v6020_v36 = vadd.f32 %v19417_v38, %v5984_v6  ;;  %v15393_v6 = vld [vmem:[%s17398_s3 + $0x7ec] ss:$48 sps:$4 sm:$0xff]  }
0x13e3   : > { %7878 = vmatprep.mubr.bf16.mxu1 %v19476_v47  ;;  %8024 = vmatprep.mubr.bf16.mxu0 %v19476_v47  ;;  %v5988_v40 = vmul.f32 %v19397_v60, %v5952_v19  ;;  %v5987_v1 = vmul.f32 %v19403_v46, %v5951_v9 }
0x13e4   : > { %7879 = vmatmul.mubr.bf16.gmra.mrb[108].mxu1 %v19480_v18  ;;  %8025 = vmatmul.mubr.bf16.gmra.mrb[140].mxu0 %v19480_v18 }
0x13e5   : > { %v19495_v44 = vpop.eup %16298  ;;  %7914 = vmatpush1.bf16.msra.mxu1 %v15370_v14  ;;  %8060 = vmatpush1.bf16.msra.mxu0 %v15373_v37  ;;  %v6024_v54 = vadd.f32 %v19413_v50, %v5988_v40  ;;  %v6023_v13 = vadd.f32 %v19417_v38, %v5987_v1  ;;  %v15387_v14 = vld [vmem:[%s17398_s3 + $0x78c] ss:$48 sps:$4 sm:$0xff]  }
0x13e6   : > { %7915 = vmatprep.subr.bf16.mxu1 %v15378_v56  ;;  %8061 = vmatprep.subr.bf16.mxu0 %v15381_v0  ;;  %v5955_v10 = vmul.f32 %v19495_v44, %v19337_v5  ;;  %v5954_v9 = vmul.f32 %v19495_v44, %v19334_v22  ;;  %v15382_v56 = vld [vmem:[%s17398_s3 + $0x780] ss:$48 sps:$4 sm:$0xff]   ;;  %v15385_v0 = vld [vmem:[%s17398_s3 + $0x788] ss:$48 sps:$4 sm:$0xff]  }
0x13e7   : > { %v19504_v8 = vpop.eup %16300  ;;  %v19506_v53 = vpack.c.bf16 %v6024_v54, %v6021_v30  ;;  %v19522_v40 = vpack.c.bf16 %v6023_v13, %v6020_v36  ;;  %v15388_v30 = vld [vmem:[%s17398_s3 + $0x7e0] ss:$48 sps:$4 sm:$0xff]   ;;  %v15396_v13 = vld [vmem:[%s17398_s3 + $0x844] ss:$48 sps:$4 sm:$0xff]   ;;  %v19549_v36 = vrot.slane %v19097_v48, %v19390_v28 }
0x13e8   : > { %v5958_v37 = vmul.f32 %v19504_v8, %v19350_v34  ;;  %v5991_v19 = vmul.f32 %v19397_v60, %v5955_v10  ;;  %v5957_v5 = vmul.f32 %v19504_v8, %v19347_v27  ;;  %v15390_v34 = vld [vmem:[%s17398_s3 + $0x7e4] ss:$48 sps:$4 sm:$0xff]   ;;  %v15399_v10 = vld [vmem:[%s17398_s3 + $0x84c] ss:$48 sps:$4 sm:$0xff]  }
0x13e9   : > { %7916 = vmatpush1.bf16.msra.mxu1 %v15376_v4  ;;  %8062 = vmatpush1.bf16.msra.mxu0 %v15379_v3  ;;  %v5990_v3 = vmul.f32 %v19403_v46, %v5954_v9  ;;  %v19563_v9 = vrot.slane %v19097_v48, %v19393_v61 }
0x13ea   : > { %7888 = vmatprep.mubr.bf16.mxu1 %v19506_v53  ;;  %8034 = vmatprep.mubr.bf16.mxu0 %v19506_v53  ;;  %v5994_v1 = vmul.f32 %v19397_v60, %v5958_v37  ;;  %v5993_v22 = vmul.f32 %v19403_v46, %v5957_v5  ;;  %v6027_v27 = vadd.f32 %v19413_v50, %v5991_v19  ;;  %v15391_v60 = vld [vmem:[%s17398_s3 + $0x7e8] ss:$48 sps:$4 sm:$0xff]   ;;  %v15394_v37 = vld [vmem:[%s17398_s3 + $0x840] ss:$48 sps:$4 sm:$0xff]  }
0x13eb   : > { %7917 = vmatprep.subr.bf16.mxu1 %v15384_v2  ;;  %8063 = vmatprep.subr.bf16.mxu0 %v15387_v14  ;;  %v6026_v46 = vadd.f32 %v19417_v38, %v5990_v3  ;;  %v5938_v14 = vmul.f32 %v19399_v26, %v19250_v35  ;;  %v15397_v19 = vld [vmem:[%s17398_s3 + $0x848] ss:$48 sps:$4 sm:$0xff]   ;;  %v15400_v5 = vld [vmem:[%s17398_s3 + $0x8a0] ss:$48 sps:$4 sm:$0xff]   ;;  %v15417_v3 = vld [vmem:[%s17398_s3 + $0x7c] ss:$48 sps:$4 sm:$0xff]  }
0x13ec   : > { %7889 = vmatmul.mubr.bf16.gmra.mrb[112].mxu1 %v19522_v40  ;;  %8035 = vmatmul.mubr.bf16.gmra.mrb[144].mxu0 %v19522_v40  ;;  %v6030_v4 = vadd.f32 %v19413_v50, %v5994_v1  ;;  %v6029_v2 = vadd.f32 %v19417_v38, %v5993_v22  ;;  %v5941_v50 = vmul.f32 %v19409_v17, %v19263_v20  ;;  %v15402_v17 = vld [vmem:[%s17398_s3 + $0x8a4] ss:$48 sps:$4 sm:$0xff]   ;;  %v15405_v38 = vld [vmem:[%s17398_s3 + $0x8ac] ss:$48 sps:$4 sm:$0xff]  }
0x13ed   : > { %7918 = vmatpush1.bf16.msra.mxu1 %v15382_v56  ;;  %8064 = vmatpush1.bf16.msra.mxu0 %v15385_v0  ;;  %v5974_v26 = vmul.f32 %v19549_v36, %v5938_v14  ;;  %v15403_v56 = vld [vmem:[%s17398_s3 + $0x8a8] ss:$48 sps:$4 sm:$0xff]   ;;  %v15408_v0 = vld [vmem:[%s17398_s3 + $0x14] ss:$48 sps:$4 sm:$0xff]   ;;  %v5947_v1 = vmul.f32 %v19447_v41, %v19295_v12  ;;  %v5944_v22 = vmul.f32 %v19427_v55, %v19280_v51  ;;  %v15412_v51 = vld [vmem:[%s17398_s3 + $0x70] ss:$48 sps:$4 sm:$0xff]  }
0x13ee   : > { %7919 = vmatprep.subr.bf16.mxu1 %v15390_v34  ;;  %8065 = vmatprep.subr.bf16.mxu0 %v15393_v6  ;;  %v19535_v54 = vpack.c.bf16 %v6030_v4, %v6027_v27  ;;  %v19553_v20 = vpack.c.bf16 %v6029_v2, %v6026_v46  ;;  %v5977_v35 = vmul.f32 %v19549_v36, %v5941_v50  ;;  %v15411_v34 = vld [vmem:[%s17398_s3 + $0x1c] ss:$48 sps:$4 sm:$0xff]   ;;  %v15406_v27 = vld [vmem:[%s17398_s3 + $0x10] ss:$48 sps:$4 sm:$0xff]   ;;  %v15409_v4 = vld [vmem:[%s17398_s3 + $0x18] ss:$48 sps:$4 sm:$0xff]  }
0x13ef   : > { %v6010_v48 = vadd.f32 %v19563_v9, %v5974_v26  ;;  %v15414_v41 = vld [vmem:[%s17398_s3 + $0x74] ss:$48 sps:$4 sm:$0xff]   ;;  %v5980_v55 = vmul.f32 %v19549_v36, %v5944_v22  ;;  %v5953_v50 = vmul.f32 %v19473_v33, %v19323_v7  ;;  %v5950_v14 = vmul.f32 %v19461_v15, %v19308_v57  ;;  %v15424_v57 = vld [vmem:[%s17398_s3 + $0x130] ss:$48 sps:$4 sm:$0xff]   ;;  %v15441_v22 = vld [vmem:[%s17398_s3 + $0x1fc] ss:$48 sps:$4 sm:$0xff]  }
0x13f0   : > { %7898 = vmatprep.mubr.bf16.mxu1 %v19535_v54  ;;  %8044 = vmatprep.mubr.bf16.mxu0 %v19535_v54  ;;  %v6013_v6 = vadd.f32 %v19563_v9, %v5977_v35  ;;  %v15426_v33 = vld [vmem:[%s17398_s3 + $0x134] ss:$48 sps:$4 sm:$0xff]   ;;  %v15427_v35 = vld [vmem:[%s17398_s3 + $0x138] ss:$48 sps:$4 sm:$0xff]  }
0x13f1   : > { %7920 = vmatpush1.bf16.msra.mxu1 %v15388_v30  ;;  %8066 = vmatpush1.bf16.msra.mxu0 %v15391_v60  ;;  %v5983_v30 = vmul.f32 %v19549_v36, %v5947_v1  ;;  %v15415_v60 = vld [vmem:[%s17398_s3 + $0x78] ss:$48 sps:$4 sm:$0xff]   ;;  %v6016_v46 = vadd.f32 %v19563_v9, %v5980_v55  ;;  %v5986_v15 = vmul.f32 %v19549_v36, %v5950_v14  ;;  %v15432_v26 = vld [vmem:[%s17398_s3 + $0x194] ss:$48 sps:$4 sm:$0xff]   ;;  %v15430_v1 = vld [vmem:[%s17398_s3 + $0x190] ss:$48 sps:$4 sm:$0xff]  }
0x13f2   : > { %7921 = vmatprep.subr.bf16.mxu1 %v15396_v13  ;;  %8067 = vmatprep.subr.bf16.mxu0 %v15399_v10  ;;  %v19579_v12 = vpack.c.bf16 %v6013_v6, %v6010_v48  ;;  %v15420_v13 = vld [vmem:[%s17398_s3 + $0xd4] ss:$48 sps:$4 sm:$0xff]   ;;  %v15423_v10 = vld [vmem:[%s17398_s3 + $0xdc] ss:$48 sps:$4 sm:$0xff]   ;;  %v5956_v6 = vmul.f32 %v19495_v44, %v19340_v31  ;;  %v15433_v48 = vld [vmem:[%s17398_s3 + $0x198] ss:$48 sps:$4 sm:$0xff]  }
0x13f3   : > { %v6019_v2 = vadd.f32 %v19563_v9, %v5983_v30  ;;  %v15436_v44 = vld [vmem:[%s17398_s3 + $0x1f0] ss:$48 sps:$4 sm:$0xff]  }
0x13f4   : > { %7899 = vmatmul.mubr.bf16.gmra.mrb[116].mxu1 %v19553_v20  ;;  %8045 = vmatmul.mubr.bf16.gmra.mrb[148].mxu0 %v19553_v20  ;;  %v5992_v31 = vmul.f32 %v19549_v36, %v5956_v6  ;;  %v15442_v55 = vld [vmem:[%s17398_s3 + $0x250] ss:$48 sps:$4 sm:$0xff]   ;;  %v15480_v6 = vld [vmem:[%s17398_s3 + $0x494] ss:$48 sps:$4 sm:$0xff]  }
0x13f5   : > { %7922 = vmatpush1.bf16.msra.mxu1 %v15394_v37  ;;  %8068 = vmatpush1.bf16.msra.mxu0 %v15397_v19  ;;  %v15418_v37 = vld [vmem:[%s17398_s3 + $0xd0] ss:$48 sps:$4 sm:$0xff]   ;;  %v15421_v19 = vld [vmem:[%s17398_s3 + $0xd8] ss:$48 sps:$4 sm:$0xff]   ;;  %v19601_v7 = vpack.c.bf16 %v6019_v2, %v6016_v46  ;;  %v15459_v46 = vld [vmem:[%s17398_s3 + $0x31c] ss:$48 sps:$4 sm:$0xff]  }
0x13f6   : > { %7923 = vmatprep.subr.bf16.mxu1 %v15402_v17  ;;  %8069 = vmatprep.subr.bf16.mxu0 %v15405_v38  ;;  %v15429_v17 = vld [vmem:[%s17398_s3 + $0x13c] ss:$48 sps:$4 sm:$0xff]   ;;  %v5989_v38 = vmul.f32 %v19549_v36, %v5953_v50  ;;  %v15451_v2 = vld [vmem:[%s17398_s3 + $0x2b8] ss:$48 sps:$4 sm:$0xff]   ;;  %v15456_v50 = vld [vmem:[%s17398_s3 + $0x314] ss:$48 sps:$4 sm:$0xff]  }
0x13f7   : > { %7941 = vmatprep.mubr.bf16.mxu1 %v21207_v11  ;;  %8087 = vmatprep.mubr.bf16.mxu0 %v21207_v11  ;;  %v15454_v14 = vld [vmem:[%s17398_s3 + $0x310] ss:$48 sps:$4 sm:$0xff]  }
0x13f9   : > { %7924 = vmatpush1.bf16.msra.mxu1 %v15400_v5  ;;  %8070 = vmatpush1.bf16.msra.mxu0 %v15403_v56  ;;  %v15435_v5 = vld [vmem:[%s17398_s3 + $0x19c] ss:$48 sps:$4 sm:$0xff]   ;;  %v6025_v56 = vadd.f32 %v19563_v9, %v5989_v38  ;;  %v15463_v38 = vld [vmem:[%s17398_s3 + $0x378] ss:$48 sps:$4 sm:$0xff]  }
0x13fa   : > { %8128 = vmatprep.subr.bf16.mxu1 %v15408_v0  ;;  %8274 = vmatprep.subr.bf16.mxu0 %v15411_v34  ;;  %v5959_v0 = vmul.f32 %v19504_v8, %v19353_v32  ;;  %v6022_v34 = vadd.f32 %v19563_v9, %v5986_v15  ;;  %v15438_v8 = vld [vmem:[%s17398_s3 + $0x1f4] ss:$48 sps:$4 sm:$0xff]  }
0x13fb   : > { %v15468_v15 = vld [vmem:[%s17398_s3 + $0x3d4] ss:$48 sps:$4 sm:$0xff]  }
0x13fc   : > { %7942 = vmatmul.mubr.bf16.vlgmr.msra.gmra.mrb[104].mxu1 %v19579_v12  ;;  %8088 = vmatmul.mubr.bf16.vlgmr.msra.gmra.mrb[136].mxu0 %v19579_v12  ;;  %v19623_v32 = vpack.c.bf16 %v6025_v56, %v6022_v34  ;;  %v15477_v56 = vld [vmem:[%s17398_s3 + $0x43c] ss:$48 sps:$4 sm:$0xff]   ;;  %v15475_v34 = vld [vmem:[%s17398_s3 + $0x438] ss:$48 sps:$4 sm:$0xff]  }
0x13fd   : > { %8129 = vmatpush1.bf16.msra.mxu1 %v15406_v27  ;;  %8275 = vmatpush1.bf16.msra.mxu0 %v15409_v4  ;;  %v5995_v27 = vmul.f32 %v19549_v36, %v5959_v0  ;;  %v15439_v4 = vld [vmem:[%s17398_s3 + $0x1f8] ss:$48 sps:$4 sm:$0xff]   ;;  %v6028_v36 = vadd.f32 %v19563_v9, %v5992_v31  ;;  %v15472_v0 = vld [vmem:[%s17398_s3 + $0x430] ss:$48 sps:$4 sm:$0xff]  }
0x13fe   : > { %8130 = vmatprep.subr.bf16.mxu1 %v15414_v41  ;;  %8276 = vmatprep.subr.bf16.mxu0 %v15417_v3  ;;  %v15444_v41 = vld [vmem:[%s17398_s3 + $0x254] ss:$48 sps:$4 sm:$0xff]   ;;  %v15447_v3 = vld [vmem:[%s17398_s3 + $0x25c] ss:$48 sps:$4 sm:$0xff]   ;;  %v15484_v31 = vld [vmem:[%s17398_s3 + $0x4f0] ss:$48 sps:$4 sm:$0xff]  }
0x13ff   : > { %7951 = vmatprep.mubr.bf16.mxu1 %v21207_v11  ;;  %8097 = vmatprep.mubr.bf16.mxu0 %v21207_v11  ;;  %v6031_v30 = vadd.f32 %v19563_v9, %v5995_v27  ;;  %v15448_v9 = vld [vmem:[%s17398_s3 + $0x2b0] ss:$48 sps:$4 sm:$0xff]   ;;  %v15489_v27 = vld [vmem:[%s17398_s3 + $0x4fc] ss:$48 sps:$4 sm:$0xff]  }
0x1401   : > { %8131 = vmatpush1.bf16.msra.mxu1 %v15412_v51  ;;  %8277 = vmatpush1.bf16.msra.mxu0 %v15415_v60  ;;  %v15445_v51 = vld [vmem:[%s17398_s3 + $0x258] ss:$48 sps:$4 sm:$0xff]   ;;  %v19641_v60 = vpack.c.bf16 %v6031_v30, %v6028_v36  ;;  %v15498_v36 = vld [vmem:[%s17398_s3 + $0x5b4] ss:$48 sps:$4 sm:$0xff]  }
0x1402   : > { %8132 = vmatprep.subr.bf16.mxu1 %v15420_v13  ;;  %8278 = vmatprep.subr.bf16.mxu0 %v15423_v10  ;;  %v15450_v13 = vld [vmem:[%s17398_s3 + $0x2b4] ss:$48 sps:$4 sm:$0xff]   ;;  %v15453_v10 = vld [vmem:[%s17398_s3 + $0x2bc] ss:$48 sps:$4 sm:$0xff]   ;;  %v15493_v30 = vld [vmem:[%s17398_s3 + $0x558] ss:$48 sps:$4 sm:$0xff]  }
0x1404   : > { %7952 = vmatmul.mubr.bf16.gmra.mrb[108].mxu1 %v19601_v7  ;;  %8098 = vmatmul.mubr.bf16.gmra.mrb[140].mxu0 %v19601_v7 }
0x1405   : > { %8133 = vmatpush1.bf16.msra.mxu1 %v15418_v37  ;;  %8279 = vmatpush1.bf16.msra.mxu0 %v15421_v19  ;;  %v15457_v37 = vld [vmem:[%s17398_s3 + $0x318] ss:$48 sps:$4 sm:$0xff]   ;;  %v15462_v19 = vld [vmem:[%s17398_s3 + $0x374] ss:$48 sps:$4 sm:$0xff]  }
0x1406   : > { %8134 = vmatprep.subr.bf16.mxu1 %v15426_v33  ;;  %8280 = vmatprep.subr.bf16.mxu0 %v15429_v17  ;;  %v15465_v33 = vld [vmem:[%s17398_s3 + $0x37c] ss:$48 sps:$4 sm:$0xff]   ;;  %v15460_v17 = vld [vmem:[%s17398_s3 + $0x370] ss:$48 sps:$4 sm:$0xff]  }
0x1407   : > { %7961 = vmatprep.mubr.bf16.mxu1 %v21207_v11  ;;  %8107 = vmatprep.mubr.bf16.mxu0 %v21207_v11 }
0x1409   : > { %8135 = vmatpush1.bf16.msra.mxu1 %v15424_v57  ;;  %8281 = vmatpush1.bf16.msra.mxu0 %v15427_v35  ;;  %v15471_v57 = vld [vmem:[%s17398_s3 + $0x3dc] ss:$48 sps:$4 sm:$0xff]   ;;  %v15466_v35 = vld [vmem:[%s17398_s3 + $0x3d0] ss:$48 sps:$4 sm:$0xff]  }
0x140a   : > { %8136 = vmatprep.subr.bf16.mxu1 %v15432_v26  ;;  %8282 = vmatprep.subr.bf16.mxu0 %v15435_v5  ;;  %v15469_v26 = vld [vmem:[%s17398_s3 + $0x3d8] ss:$48 sps:$4 sm:$0xff]   ;;  %v15474_v5 = vld [vmem:[%s17398_s3 + $0x434] ss:$48 sps:$4 sm:$0xff]  }
0x140c   : > { %7962 = vmatmul.mubr.bf16.gmra.mrb[112].mxu1 %v19623_v32  ;;  %8108 = vmatmul.mubr.bf16.gmra.mrb[144].mxu0 %v19623_v32 }
0x140d   : > { %8137 = vmatpush1.bf16.msra.mxu1 %v15430_v1  ;;  %8283 = vmatpush1.bf16.msra.mxu0 %v15433_v48  ;;  %v15483_v1 = vld [vmem:[%s17398_s3 + $0x49c] ss:$48 sps:$4 sm:$0xff]   ;;  %v15478_v48 = vld [vmem:[%s17398_s3 + $0x490] ss:$48 sps:$4 sm:$0xff]  }
0x140e   : > { %8138 = vmatprep.subr.bf16.mxu1 %v15438_v8  ;;  %8284 = vmatprep.subr.bf16.mxu0 %v15441_v22  ;;  %v15481_v8 = vld [vmem:[%s17398_s3 + $0x498] ss:$48 sps:$4 sm:$0xff]   ;;  %v15486_v22 = vld [vmem:[%s17398_s3 + $0x4f4] ss:$48 sps:$4 sm:$0xff]  }
0x140f   : > { %7971 = vmatprep.mubr.bf16.mxu1 %v21207_v11  ;;  %8117 = vmatprep.mubr.bf16.mxu0 %v21207_v11 }
0x1411   : > { %8139 = vmatpush1.bf16.msra.mxu1 %v15436_v44  ;;  %8285 = vmatpush1.bf16.msra.mxu0 %v15439_v4  ;;  %v15487_v44 = vld [vmem:[%s17398_s3 + $0x4f8] ss:$48 sps:$4 sm:$0xff]   ;;  %v15492_v4 = vld [vmem:[%s17398_s3 + $0x554] ss:$48 sps:$4 sm:$0xff]  }
0x1412   : > { %8140 = vmatprep.subr.bf16.mxu1 %v15444_v41  ;;  %8286 = vmatprep.subr.bf16.mxu0 %v15447_v3  ;;  %v15495_v41 = vld [vmem:[%s17398_s3 + $0x55c] ss:$48 sps:$4 sm:$0xff]   ;;  %v15490_v3 = vld [vmem:[%s17398_s3 + $0x550] ss:$48 sps:$4 sm:$0xff]  }
0x1414   : > { %7972 = vmatmul.mubr.bf16.gmra.mrb[116].mxu1 %v19641_v60  ;;  %8118 = vmatmul.mubr.bf16.gmra.mrb[148].mxu0 %v19641_v60 }
0x1415   : > { %8141 = vmatpush1.bf16.msra.mxu1 %v15442_v55  ;;  %8287 = vmatpush1.bf16.msra.mxu0 %v15445_v51  ;;  %v15501_v55 = vld [vmem:[%s17398_s3 + $0x5bc] ss:$48 sps:$4 sm:$0xff]   ;;  %v15496_v51 = vld [vmem:[%s17398_s3 + $0x5b0] ss:$48 sps:$4 sm:$0xff]  }
0x1416   : > { %8160 = vmatprep.mubr.bf16.mxu1 %v19437_v58  ;;  %8306 = vmatprep.mubr.bf16.mxu0 %v19437_v58 }
0x1417   : > { %8142 = vmatprep.subr.bf16.mxu1 %v15450_v13  ;;  %8288 = vmatprep.subr.bf16.mxu0 %v15453_v10  ;;  %v15499_v13 = vld [vmem:[%s17398_s3 + $0x5b8] ss:$48 sps:$4 sm:$0xff]   ;;  %v15504_v10 = vld [vmem:[%s17398_s3 + $0x614] ss:$48 sps:$4 sm:$0xff]  }
0x1419   : > { %8143 = vmatpush1.bf16.msra.mxu1 %v15448_v9  ;;  %8289 = vmatpush1.bf16.msra.mxu0 %v15451_v2  ;;  %v15507_v9 = vld [vmem:[%s17398_s3 + $0x61c] ss:$48 sps:$4 sm:$0xff]   ;;  %v15502_v2 = vld [vmem:[%s17398_s3 + $0x610] ss:$48 sps:$4 sm:$0xff]  }
0x141a   : > { %8144 = vmatprep.subr.bf16.mxu1 %v15456_v50  ;;  %8290 = vmatprep.subr.bf16.mxu0 %v15459_v46  ;;  %v15505_v50 = vld [vmem:[%s17398_s3 + $0x618] ss:$48 sps:$4 sm:$0xff]   ;;  %v15510_v46 = vld [vmem:[%s17398_s3 + $0x674] ss:$48 sps:$4 sm:$0xff]  }
0x141d   : > { %8145 = vmatpush1.bf16.msra.mxu1 %v15454_v14  ;;  %8291 = vmatpush1.bf16.msra.mxu0 %v15457_v37  ;;  %v15513_v14 = vld [vmem:[%s17398_s3 + $0x67c] ss:$48 sps:$4 sm:$0xff]   ;;  %v15508_v37 = vld [vmem:[%s17398_s3 + $0x670] ss:$48 sps:$4 sm:$0xff]  }
0x141e   : > { %8146 = vmatprep.subr.bf16.mxu1 %v15462_v19  ;;  %8292 = vmatprep.subr.bf16.mxu0 %v15465_v33  ;;  %v15511_v19 = vld [vmem:[%s17398_s3 + $0x678] ss:$48 sps:$4 sm:$0xff]   ;;  %v15516_v33 = vld [vmem:[%s17398_s3 + $0x6d4] ss:$48 sps:$4 sm:$0xff]  }
0x1421   : > { %8147 = vmatpush1.bf16.msra.mxu1 %v15460_v17  ;;  %8293 = vmatpush1.bf16.msra.mxu0 %v15463_v38  ;;  %v15519_v17 = vld [vmem:[%s17398_s3 + $0x6dc] ss:$48 sps:$4 sm:$0xff]   ;;  %v15514_v38 = vld [vmem:[%s17398_s3 + $0x6d0] ss:$48 sps:$4 sm:$0xff]  }
0x1422   : > { %8148 = vmatprep.subr.bf16.mxu1 %v15468_v15  ;;  %8294 = vmatprep.subr.bf16.mxu0 %v15471_v57  ;;  %v15517_v15 = vld [vmem:[%s17398_s3 + $0x6d8] ss:$48 sps:$4 sm:$0xff]   ;;  %v15522_v57 = vld [vmem:[%s17398_s3 + $0x734] ss:$48 sps:$4 sm:$0xff]  }
0x1425   : > { %8149 = vmatpush1.bf16.msra.mxu1 %v15466_v35  ;;  %8295 = vmatpush1.bf16.msra.mxu0 %v15469_v26  ;;  %v15525_v35 = vld [vmem:[%s17398_s3 + $0x73c] ss:$48 sps:$4 sm:$0xff]   ;;  %v15520_v26 = vld [vmem:[%s17398_s3 + $0x730] ss:$48 sps:$4 sm:$0xff]  }
0x1426   : > { %8150 = vmatprep.subr.bf16.mxu1 %v15474_v5  ;;  %8296 = vmatprep.subr.bf16.mxu0 %v15477_v56  ;;  %v15523_v5 = vld [vmem:[%s17398_s3 + $0x738] ss:$48 sps:$4 sm:$0xff]   ;;  %v15528_v56 = vld [vmem:[%s17398_s3 + $0x794] ss:$48 sps:$4 sm:$0xff]  }
0x1429   : > { %8151 = vmatpush1.bf16.msra.mxu1 %v15472_v0  ;;  %8297 = vmatpush1.bf16.msra.mxu0 %v15475_v34  ;;  %v15531_v0 = vld [vmem:[%s17398_s3 + $0x79c] ss:$48 sps:$4 sm:$0xff]   ;;  %v15526_v34 = vld [vmem:[%s17398_s3 + $0x790] ss:$48 sps:$4 sm:$0xff]  }
0x142a   : > { %8152 = vmatprep.subr.bf16.mxu1 %v15480_v6  ;;  %8298 = vmatprep.subr.bf16.mxu0 %v15483_v1  ;;  %v15529_v6 = vld [vmem:[%s17398_s3 + $0x798] ss:$48 sps:$4 sm:$0xff]   ;;  %v15534_v1 = vld [vmem:[%s17398_s3 + $0x7f4] ss:$48 sps:$4 sm:$0xff]  }
0x142d   : > { %8153 = vmatpush1.bf16.msra.mxu1 %v15478_v48  ;;  %8299 = vmatpush1.bf16.msra.mxu0 %v15481_v8  ;;  %v15537_v48 = vld [vmem:[%s17398_s3 + $0x7fc] ss:$48 sps:$4 sm:$0xff]   ;;  %v15532_v8 = vld [vmem:[%s17398_s3 + $0x7f0] ss:$48 sps:$4 sm:$0xff]  }
0x142e   : > { %8154 = vmatprep.subr.bf16.mxu1 %v15486_v22  ;;  %8300 = vmatprep.subr.bf16.mxu0 %v15489_v27  ;;  %v15535_v22 = vld [vmem:[%s17398_s3 + $0x7f8] ss:$48 sps:$4 sm:$0xff]   ;;  %v15540_v27 = vld [vmem:[%s17398_s3 + $0x854] ss:$48 sps:$4 sm:$0xff]  }
0x1431   : > { %8155 = vmatpush1.bf16.msra.mxu1 %v15484_v31  ;;  %8301 = vmatpush1.bf16.msra.mxu0 %v15487_v44  ;;  %v15543_v31 = vld [vmem:[%s17398_s3 + $0x85c] ss:$48 sps:$4 sm:$0xff]   ;;  %v15538_v44 = vld [vmem:[%s17398_s3 + $0x850] ss:$48 sps:$4 sm:$0xff]  }
0x1432   : > { %8156 = vmatprep.subr.bf16.mxu1 %v15492_v4  ;;  %8302 = vmatprep.subr.bf16.mxu0 %v15495_v41  ;;  %v15541_v4 = vld [vmem:[%s17398_s3 + $0x858] ss:$48 sps:$4 sm:$0xff]   ;;  %v15546_v41 = vld [vmem:[%s17398_s3 + $0x8b4] ss:$48 sps:$4 sm:$0xff]  }
0x1435   : > { %8157 = vmatpush1.bf16.msra.mxu1 %v15490_v3  ;;  %8303 = vmatpush1.bf16.msra.mxu0 %v15493_v30  ;;  %v15549_v3 = vld [vmem:[%s17398_s3 + $0x8bc] ss:$48 sps:$4 sm:$0xff]   ;;  %v15544_v30 = vld [vmem:[%s17398_s3 + $0x8b0] ss:$48 sps:$4 sm:$0xff]  }
0x1436   : > { %8158 = vmatprep.subr.bf16.mxu1 %v15498_v36  ;;  %8304 = vmatprep.subr.bf16.mxu0 %v15501_v55  ;;  %v15547_v36 = vld [vmem:[%s17398_s3 + $0x8b8] ss:$48 sps:$4 sm:$0xff]   ;;  %v15552_v55 = vld [vmem:[%s17398_s3 + $0x24] ss:$48 sps:$4 sm:$0xff]  }
0x1439   : > { %8159 = vmatpush1.bf16.msra.mxu1 %v15496_v51  ;;  %8305 = vmatpush1.bf16.msra.mxu0 %v15499_v13  ;;  %v15555_v51 = vld [vmem:[%s17398_s3 + $0x2c] ss:$48 sps:$4 sm:$0xff]   ;;  %v15550_v13 = vld [vmem:[%s17398_s3 + $0x20] ss:$48 sps:$4 sm:$0xff]  }
0x143a   : > { %8201 = vmatprep.subr.bf16.mxu1 %v15504_v10  ;;  %8347 = vmatprep.subr.bf16.mxu0 %v15507_v9  ;;  %v15553_v10 = vld [vmem:[%s17398_s3 + $0x28] ss:$48 sps:$4 sm:$0xff]   ;;  %v15558_v9 = vld [vmem:[%s17398_s3 + $0x84] ss:$48 sps:$4 sm:$0xff]  }
0x143c   : > { %8161 = vmatmul.mubr.bf16.vlgmr.msra.gmra.mrb[120].mxu1 %v19439_v25  ;;  %8307 = vmatmul.mubr.bf16.vlgmr.msra.gmra.mrb[152].mxu0 %v19439_v25 }
0x143d   : > { %8170 = vmatprep.mubr.bf16.mxu1 %v19476_v47  ;;  %8202 = vmatpush1.bf16.msra.mxu1 %v15502_v2  ;;  %v15561_v2 = vld [vmem:[%s17398_s3 + $0x8c] ss:$48 sps:$4 sm:$0xff]  }
0x143e   : > { %8316 = vmatprep.mubr.bf16.mxu0 %v19476_v47  ;;  %8348 = vmatpush1.bf16.msra.mxu0 %v15505_v50  ;;  %v15556_v50 = vld [vmem:[%s17398_s3 + $0x80] ss:$48 sps:$4 sm:$0xff]  }
0x143f   : > { %8203 = vmatprep.subr.bf16.mxu1 %v15510_v46  ;;  %8349 = vmatprep.subr.bf16.mxu0 %v15513_v14  ;;  %v15559_v46 = vld [vmem:[%s17398_s3 + $0x88] ss:$48 sps:$4 sm:$0xff]   ;;  %v15564_v14 = vld [vmem:[%s17398_s3 + $0xe4] ss:$48 sps:$4 sm:$0xff]  }
0x1441   : > { %8204 = vmatpush1.bf16.msra.mxu1 %v15508_v37  ;;  %v15567_v37 = vld [vmem:[%s17398_s3 + $0xec] ss:$48 sps:$4 sm:$0xff]  }
0x1442   : > { %8350 = vmatpush1.bf16.msra.mxu0 %v15511_v19  ;;  %8205 = vmatprep.subr.bf16.mxu1 %v15516_v33  ;;  %v15562_v19 = vld [vmem:[%s17398_s3 + $0xe0] ss:$48 sps:$4 sm:$0xff]   ;;  %v15565_v33 = vld [vmem:[%s17398_s3 + $0xe8] ss:$48 sps:$4 sm:$0xff]  }
0x1443   : > { %8351 = vmatprep.subr.bf16.mxu0 %v15519_v17  ;;  %v15570_v17 = vld [vmem:[%s17398_s3 + $0x144] ss:$48 sps:$4 sm:$0xff]  }
0x1444   : > { %8171 = vmatmul.mubr.bf16.gmra.mrb[124].mxu1 %v19480_v18  ;;  %8317 = vmatmul.mubr.bf16.gmra.mrb[156].mxu0 %v19480_v18 }
0x1445   : > { %8180 = vmatprep.mubr.bf16.mxu1 %v19506_v53  ;;  %8206 = vmatpush1.bf16.msra.mxu1 %v15514_v38  ;;  %v15573_v38 = vld [vmem:[%s17398_s3 + $0x14c] ss:$48 sps:$4 sm:$0xff]  }
0x1446   : > { %8326 = vmatprep.mubr.bf16.mxu0 %v19506_v53  ;;  %8352 = vmatpush1.bf16.msra.mxu0 %v15517_v15  ;;  %v15568_v15 = vld [vmem:[%s17398_s3 + $0x140] ss:$48 sps:$4 sm:$0xff]  }
0x1447   : > { %8207 = vmatprep.subr.bf16.mxu1 %v15522_v57  ;;  %8353 = vmatprep.subr.bf16.mxu0 %v15525_v35  ;;  %v15571_v57 = vld [vmem:[%s17398_s3 + $0x148] ss:$48 sps:$4 sm:$0xff]   ;;  %v15576_v35 = vld [vmem:[%s17398_s3 + $0x1a4] ss:$48 sps:$4 sm:$0xff]  }
0x1449   : > { %8208 = vmatpush1.bf16.msra.mxu1 %v15520_v26  ;;  %v15579_v26 = vld [vmem:[%s17398_s3 + $0x1ac] ss:$48 sps:$4 sm:$0xff]  }
0x144a   : > { %8354 = vmatpush1.bf16.msra.mxu0 %v15523_v5  ;;  %8209 = vmatprep.subr.bf16.mxu1 %v15528_v56  ;;  %v15574_v5 = vld [vmem:[%s17398_s3 + $0x1a0] ss:$48 sps:$4 sm:$0xff]   ;;  %v15577_v56 = vld [vmem:[%s17398_s3 + $0x1a8] ss:$48 sps:$4 sm:$0xff]  }
0x144b   : > { %8355 = vmatprep.subr.bf16.mxu0 %v15531_v0  ;;  %v15582_v0 = vld [vmem:[%s17398_s3 + $0x204] ss:$48 sps:$4 sm:$0xff]  }
0x144c   : > { %8181 = vmatmul.mubr.bf16.gmra.mrb[128].mxu1 %v19522_v40  ;;  %8327 = vmatmul.mubr.bf16.gmra.mrb[160].mxu0 %v19522_v40 }
0x144d   : > { %8190 = vmatprep.mubr.bf16.mxu1 %v19535_v54  ;;  %8210 = vmatpush1.bf16.msra.mxu1 %v15526_v34  ;;  %v15585_v34 = vld [vmem:[%s17398_s3 + $0x20c] ss:$48 sps:$4 sm:$0xff]  }
0x144e   : > { %8336 = vmatprep.mubr.bf16.mxu0 %v19535_v54  ;;  %8356 = vmatpush1.bf16.msra.mxu0 %v15529_v6  ;;  %v15580_v6 = vld [vmem:[%s17398_s3 + $0x200] ss:$48 sps:$4 sm:$0xff]  }
0x144f   : > { %8211 = vmatprep.subr.bf16.mxu1 %v15534_v1  ;;  %8357 = vmatprep.subr.bf16.mxu0 %v15537_v48  ;;  %v15583_v1 = vld [vmem:[%s17398_s3 + $0x208] ss:$48 sps:$4 sm:$0xff]   ;;  %v15588_v48 = vld [vmem:[%s17398_s3 + $0x264] ss:$48 sps:$4 sm:$0xff]  }
0x1451   : > { %8212 = vmatpush1.bf16.msra.mxu1 %v15532_v8  ;;  %v15591_v8 = vld [vmem:[%s17398_s3 + $0x26c] ss:$48 sps:$4 sm:$0xff]  }
0x1452   : > { %8358 = vmatpush1.bf16.msra.mxu0 %v15535_v22  ;;  %8213 = vmatprep.subr.bf16.mxu1 %v15540_v27  ;;  %v15586_v22 = vld [vmem:[%s17398_s3 + $0x260] ss:$48 sps:$4 sm:$0xff]   ;;  %v15589_v27 = vld [vmem:[%s17398_s3 + $0x268] ss:$48 sps:$4 sm:$0xff]  }
0x1453   : > { %8359 = vmatprep.subr.bf16.mxu0 %v15543_v31  ;;  %v15594_v31 = vld [vmem:[%s17398_s3 + $0x2c4] ss:$48 sps:$4 sm:$0xff]  }
0x1454   : > { %8191 = vmatmul.mubr.bf16.gmra.mrb[132].mxu1 %v19553_v20  ;;  %8337 = vmatmul.mubr.bf16.gmra.mrb[164].mxu0 %v19553_v20 }
0x1455   : > { %8214 = vmatpush1.bf16.msra.mxu1 %v15538_v44  ;;  %8233 = vmatprep.mubr.bf16.mxu1 %v21207_v11  ;;  %v15597_v44 = vld [vmem:[%s17398_s3 + $0x2cc] ss:$48 sps:$4 sm:$0xff]  }
0x1456   : > { %8360 = vmatpush1.bf16.msra.mxu0 %v15541_v4  ;;  %8215 = vmatprep.subr.bf16.mxu1 %v15546_v41  ;;  %v15592_v4 = vld [vmem:[%s17398_s3 + $0x2c0] ss:$48 sps:$4 sm:$0xff]   ;;  %v15595_v41 = vld [vmem:[%s17398_s3 + $0x2c8] ss:$48 sps:$4 sm:$0xff]  }
0x1457   : > { %8361 = vmatprep.subr.bf16.mxu0 %v15549_v3  ;;  %8379 = vmatprep.mubr.bf16.mxu0 %v21207_v11  ;;  %v15600_v3 = vld [vmem:[%s17398_s3 + $0x324] ss:$48 sps:$4 sm:$0xff]  }
0x1459   : > { %8216 = vmatpush1.bf16.msra.mxu1 %v15544_v30  ;;  %v15603_v30 = vld [vmem:[%s17398_s3 + $0x32c] ss:$48 sps:$4 sm:$0xff]  }
0x145a   : > { %8362 = vmatpush1.bf16.msra.mxu0 %v15547_v36  ;;  %8420 = vmatprep.subr.bf16.mxu1 %v15552_v55  ;;  %v15598_v36 = vld [vmem:[%s17398_s3 + $0x320] ss:$48 sps:$4 sm:$0xff]   ;;  %v15601_v55 = vld [vmem:[%s17398_s3 + $0x328] ss:$48 sps:$4 sm:$0xff]  }
0x145b   : > { %8566 = vmatprep.subr.bf16.mxu0 %v15555_v51  ;;  %v15606_v51 = vld [vmem:[%s17398_s3 + $0x384] ss:$48 sps:$4 sm:$0xff]  }
0x145c   : > { %8234 = vmatmul.mubr.bf16.vlgmr.msra.gmra.mrb[120].mxu1 %v19579_v12 }
0x145d   : > { %8380 = vmatmul.mubr.bf16.vlgmr.msra.gmra.mrb[152].mxu0 %v19579_v12  ;;  %8421 = vmatpush1.bf16.msra.mxu1 %v15550_v13  ;;  %v15609_v13 = vld [vmem:[%s17398_s3 + $0x38c] ss:$48 sps:$4 sm:$0xff]  }
0x145e   : > { %8567 = vmatpush1.bf16.msra.mxu0 %v15553_v10  ;;  %8422 = vmatprep.subr.bf16.mxu1 %v15558_v9  ;;  %v15607_v10 = vld [vmem:[%s17398_s3 + $0x388] ss:$48 sps:$4 sm:$0xff]   ;;  %v15612_v9 = vld [vmem:[%s17398_s3 + $0x3e4] ss:$48 sps:$4 sm:$0xff]  }
0x145f   : > { %8568 = vmatprep.subr.bf16.mxu0 %v15561_v2  ;;  %8243 = vmatprep.mubr.bf16.mxu1 %v21207_v11  ;;  %v15615_v2 = vld [vmem:[%s17398_s3 + $0x3ec] ss:$48 sps:$4 sm:$0xff]  }
0x1460   : > { %8389 = vmatprep.mubr.bf16.mxu0 %v21207_v11 }
0x1461   : > { %8423 = vmatpush1.bf16.msra.mxu1 %v15556_v50  ;;  %v15610_v50 = vld [vmem:[%s17398_s3 + $0x3e0] ss:$48 sps:$4 sm:$0xff]  }
0x1462   : > { %8569 = vmatpush1.bf16.msra.mxu0 %v15559_v46  ;;  %8424 = vmatprep.subr.bf16.mxu1 %v15564_v14  ;;  %v15613_v46 = vld [vmem:[%s17398_s3 + $0x3e8] ss:$48 sps:$4 sm:$0xff]   ;;  %v15618_v14 = vld [vmem:[%s17398_s3 + $0x444] ss:$48 sps:$4 sm:$0xff]  }
0x1463   : > { %8570 = vmatprep.subr.bf16.mxu0 %v15567_v37  ;;  %v15621_v37 = vld [vmem:[%s17398_s3 + $0x44c] ss:$48 sps:$4 sm:$0xff]  }
0x1464   : > { %8244 = vmatmul.mubr.bf16.gmra.mrb[124].mxu1 %v19601_v7 }
0x1465   : > { %8390 = vmatmul.mubr.bf16.gmra.mrb[156].mxu0 %v19601_v7  ;;  %8425 = vmatpush1.bf16.msra.mxu1 %v15562_v19  ;;  %v15616_v19 = vld [vmem:[%s17398_s3 + $0x440] ss:$48 sps:$4 sm:$0xff]  }
0x1466   : > { %8571 = vmatpush1.bf16.msra.mxu0 %v15565_v33  ;;  %8426 = vmatprep.subr.bf16.mxu1 %v15570_v17  ;;  %v15619_v33 = vld [vmem:[%s17398_s3 + $0x448] ss:$48 sps:$4 sm:$0xff]   ;;  %v15624_v17 = vld [vmem:[%s17398_s3 + $0x4a4] ss:$48 sps:$4 sm:$0xff]  }
0x1467   : > { %8572 = vmatprep.subr.bf16.mxu0 %v15573_v38  ;;  %8253 = vmatprep.mubr.bf16.mxu1 %v21207_v11  ;;  %v15627_v38 = vld [vmem:[%s17398_s3 + $0x4ac] ss:$48 sps:$4 sm:$0xff]  }
0x1468   : > { %8399 = vmatprep.mubr.bf16.mxu0 %v21207_v11 }
0x1469   : > { %8427 = vmatpush1.bf16.msra.mxu1 %v15568_v15  ;;  %v15622_v15 = vld [vmem:[%s17398_s3 + $0x4a0] ss:$48 sps:$4 sm:$0xff]  }
0x146a   : > { %8573 = vmatpush1.bf16.msra.mxu0 %v15571_v57  ;;  %8428 = vmatprep.subr.bf16.mxu1 %v15576_v35  ;;  %v15625_v57 = vld [vmem:[%s17398_s3 + $0x4a8] ss:$48 sps:$4 sm:$0xff]   ;;  %v15630_v35 = vld [vmem:[%s17398_s3 + $0x504] ss:$48 sps:$4 sm:$0xff]  }
0x146b   : > { %8574 = vmatprep.subr.bf16.mxu0 %v15579_v26  ;;  %v15633_v26 = vld [vmem:[%s17398_s3 + $0x50c] ss:$48 sps:$4 sm:$0xff]  }
0x146c   : > { %8254 = vmatmul.mubr.bf16.gmra.mrb[128].mxu1 %v19623_v32 }
0x146d   : > { %8400 = vmatmul.mubr.bf16.gmra.mrb[160].mxu0 %v19623_v32  ;;  %8429 = vmatpush1.bf16.msra.mxu1 %v15574_v5  ;;  %v15628_v5 = vld [vmem:[%s17398_s3 + $0x500] ss:$48 sps:$4 sm:$0xff]  }
0x146e   : > { %8575 = vmatpush1.bf16.msra.mxu0 %v15577_v56  ;;  %8430 = vmatprep.subr.bf16.mxu1 %v15582_v0  ;;  %v15631_v56 = vld [vmem:[%s17398_s3 + $0x508] ss:$48 sps:$4 sm:$0xff]   ;;  %v15636_v0 = vld [vmem:[%s17398_s3 + $0x564] ss:$48 sps:$4 sm:$0xff]  }
0x146f   : > { %8576 = vmatprep.subr.bf16.mxu0 %v15585_v34  ;;  %8263 = vmatprep.mubr.bf16.mxu1 %v21207_v11  ;;  %v15639_v34 = vld [vmem:[%s17398_s3 + $0x56c] ss:$48 sps:$4 sm:$0xff]  }
0x1470   : > { %8409 = vmatprep.mubr.bf16.mxu0 %v21207_v11 }
0x1471   : > { %8431 = vmatpush1.bf16.msra.mxu1 %v15580_v6  ;;  %v15634_v6 = vld [vmem:[%s17398_s3 + $0x560] ss:$48 sps:$4 sm:$0xff]  }
0x1472   : > { %8577 = vmatpush1.bf16.msra.mxu0 %v15583_v1  ;;  %8432 = vmatprep.subr.bf16.mxu1 %v15588_v48  ;;  %v15637_v1 = vld [vmem:[%s17398_s3 + $0x568] ss:$48 sps:$4 sm:$0xff]   ;;  %v15642_v48 = vld [vmem:[%s17398_s3 + $0x5c4] ss:$48 sps:$4 sm:$0xff]  }
0x1473   : > { %8578 = vmatprep.subr.bf16.mxu0 %v15591_v8  ;;  %v15645_v8 = vld [vmem:[%s17398_s3 + $0x5cc] ss:$48 sps:$4 sm:$0xff]  }
0x1474   : > { %8264 = vmatmul.mubr.bf16.gmra.mrb[132].mxu1 %v19641_v60 }
0x1475   : > { %8410 = vmatmul.mubr.bf16.gmra.mrb[164].mxu0 %v19641_v60  ;;  %8433 = vmatpush1.bf16.msra.mxu1 %v15586_v22  ;;  %v15640_v22 = vld [vmem:[%s17398_s3 + $0x5c0] ss:$48 sps:$4 sm:$0xff]  }
0x1476   : > { %8452 = vmatprep.mubr.bf16.mxu1 %v19437_v58  ;;  %8579 = vmatpush1.bf16.msra.mxu0 %v15589_v27  ;;  %v15643_v27 = vld [vmem:[%s17398_s3 + $0x5c8] ss:$48 sps:$4 sm:$0xff]  }
0x1477   : > { %8598 = vmatprep.mubr.bf16.mxu0 %v19437_v58  ;;  %8434 = vmatprep.subr.bf16.mxu1 %v15594_v31  ;;  %v15604_v58 = vld [vmem:[%s17398_s3 + $0x380] ss:$48 sps:$4 sm:$0xff]   ;;  %v15648_v31 = vld [vmem:[%s17398_s3 + $0x624] ss:$48 sps:$4 sm:$0xff]  }
0x1478   : > { %8580 = vmatprep.subr.bf16.mxu0 %v15597_v44  ;;  %v15651_v44 = vld [vmem:[%s17398_s3 + $0x62c] ss:$48 sps:$4 sm:$0xff]  }
0x1479   : > { %8435 = vmatpush1.bf16.msra.mxu1 %v15592_v4  ;;  %v15646_v4 = vld [vmem:[%s17398_s3 + $0x620] ss:$48 sps:$4 sm:$0xff]  }
0x147a   : > { %8581 = vmatpush1.bf16.msra.mxu0 %v15595_v41  ;;  %8436 = vmatprep.subr.bf16.mxu1 %v15600_v3  ;;  %v15649_v41 = vld [vmem:[%s17398_s3 + $0x628] ss:$48 sps:$4 sm:$0xff]   ;;  %v15654_v3 = vld [vmem:[%s17398_s3 + $0x684] ss:$48 sps:$4 sm:$0xff]  }
0x147b   : > { %8582 = vmatprep.subr.bf16.mxu0 %v15603_v30  ;;  %v15657_v30 = vld [vmem:[%s17398_s3 + $0x68c] ss:$48 sps:$4 sm:$0xff]  }
0x147d   : > { %8437 = vmatpush1.bf16.msra.mxu1 %v15598_v36  ;;  %v15652_v36 = vld [vmem:[%s17398_s3 + $0x680] ss:$48 sps:$4 sm:$0xff]  }
0x147e   : > { %8583 = vmatpush1.bf16.msra.mxu0 %v15601_v55  ;;  %8438 = vmatprep.subr.bf16.mxu1 %v15606_v51  ;;  %v15655_v55 = vld [vmem:[%s17398_s3 + $0x688] ss:$48 sps:$4 sm:$0xff]   ;;  %v15660_v51 = vld [vmem:[%s17398_s3 + $0x6e4] ss:$48 sps:$4 sm:$0xff]  }
0x147f   : > { %8584 = vmatprep.subr.bf16.mxu0 %v15609_v13  ;;  %v15663_v13 = vld [vmem:[%s17398_s3 + $0x6ec] ss:$48 sps:$4 sm:$0xff]  }
0x1481   : > { %8439 = vmatpush1.bf16.msra.mxu1 %v15604_v58  ;;  %v15658_v58 = vld [vmem:[%s17398_s3 + $0x6e0] ss:$48 sps:$4 sm:$0xff]  }
0x1482   : > { %8585 = vmatpush1.bf16.msra.mxu0 %v15607_v10  ;;  %8440 = vmatprep.subr.bf16.mxu1 %v15612_v9  ;;  %v15666_v10 = vld [vmem:[%s17398_s3 + $0x744] ss:$48 sps:$4 sm:$0xff]   ;;  %v15664_v9 = vld [vmem:[%s17398_s3 + $0x740] ss:$48 sps:$4 sm:$0xff]  }
0x1483   : > { %8586 = vmatprep.subr.bf16.mxu0 %v15615_v2  ;;  %v15667_v2 = vld [vmem:[%s17398_s3 + $0x748] ss:$48 sps:$4 sm:$0xff]  }
0x1485   : > { %8441 = vmatpush1.bf16.msra.mxu1 %v15610_v50  ;;  %v15672_v50 = vld [vmem:[%s17398_s3 + $0x7a4] ss:$48 sps:$4 sm:$0xff]  }
0x1486   : > { %8587 = vmatpush1.bf16.msra.mxu0 %v15613_v46  ;;  %8442 = vmatprep.subr.bf16.mxu1 %v15618_v14  ;;  %v15675_v46 = vld [vmem:[%s17398_s3 + $0x7ac] ss:$48 sps:$4 sm:$0xff]   ;;  %v15670_v14 = vld [vmem:[%s17398_s3 + $0x7a0] ss:$48 sps:$4 sm:$0xff]  }
0x1487   : > { %8588 = vmatprep.subr.bf16.mxu0 %v15621_v37  ;;  %v15678_v37 = vld [vmem:[%s17398_s3 + $0x804] ss:$48 sps:$4 sm:$0xff]  }
0x1489   : > { %8443 = vmatpush1.bf16.msra.mxu1 %v15616_v19  ;;  %v15676_v19 = vld [vmem:[%s17398_s3 + $0x800] ss:$48 sps:$4 sm:$0xff]  }
0x148a   : > { %8589 = vmatpush1.bf16.msra.mxu0 %v15619_v33  ;;  %8444 = vmatprep.subr.bf16.mxu1 %v15624_v17  ;;  %v15679_v33 = vld [vmem:[%s17398_s3 + $0x808] ss:$48 sps:$4 sm:$0xff]   ;;  %v15684_v17 = vld [vmem:[%s17398_s3 + $0x864] ss:$48 sps:$4 sm:$0xff]  }
0x148b   : > { %8590 = vmatprep.subr.bf16.mxu0 %v15627_v38  ;;  %v15687_v38 = vld [vmem:[%s17398_s3 + $0x86c] ss:$48 sps:$4 sm:$0xff]  }
0x148d   : > { %8445 = vmatpush1.bf16.msra.mxu1 %v15622_v15  ;;  %v15682_v15 = vld [vmem:[%s17398_s3 + $0x860] ss:$48 sps:$4 sm:$0xff]  }
0x148e   : > { %8591 = vmatpush1.bf16.msra.mxu0 %v15625_v57  ;;  %8446 = vmatprep.subr.bf16.mxu1 %v15630_v35  ;;  %v15690_v57 = vld [vmem:[%s17398_s3 + $0x8c4] ss:$48 sps:$4 sm:$0xff]   ;;  %v15688_v35 = vld [vmem:[%s17398_s3 + $0x8c0] ss:$48 sps:$4 sm:$0xff]  }
0x148f   : > { %8592 = vmatprep.subr.bf16.mxu0 %v15633_v26  ;;  %v15691_v26 = vld [vmem:[%s17398_s3 + $0x8c8] ss:$48 sps:$4 sm:$0xff]  }
0x1491   : > { %8447 = vmatpush1.bf16.msra.mxu1 %v15628_v5  ;;  %v15696_v5 = vld [vmem:[%s17406_s11 + $0x4] ss:$12 sps:$4 sm:$0xff]  }
0x1492   : > { %8593 = vmatpush1.bf16.msra.mxu0 %v15631_v56  ;;  %8448 = vmatprep.subr.bf16.mxu1 %v15636_v0  ;;  %v15697_v56 = vld [vmem:[%s17406_s11 + $0xc8] ss:$12 sps:$4 sm:$0xff]   ;;  %v15694_v0 = vld [vmem:[%s17406_s11] ss:$12 sps:$4 sm:$0xff]  }
0x1493   : > { %8594 = vmatprep.subr.bf16.mxu0 %v15639_v34  ;;  %v15701_v34 = vld [vmem:[%s17406_s11 + $0x1c] ss:$12 sps:$4 sm:$0xff]  }
0x1495   : > { %8449 = vmatpush1.bf16.msra.mxu1 %v15634_v6  ;;  %v15702_v6 = vld [vmem:[%s17406_s11 + $0xe0] ss:$12 sps:$4 sm:$0xff]  }
0x1496   : > { %8595 = vmatpush1.bf16.msra.mxu0 %v15637_v1  ;;  %8450 = vmatprep.subr.bf16.mxu1 %v15642_v48  ;;  %v15699_v1 = vld [vmem:[%s17406_s11 + $0x18] ss:$12 sps:$4 sm:$0xff]   ;;  %v15703_v48 = vld [vmem:[%s17406_s11 + $0x20] ss:$12 sps:$4 sm:$0xff]  }
0x1497   : > { %8596 = vmatprep.subr.bf16.mxu0 %v15645_v8  ;;  %v15706_v8 = vld [vmem:[%s17406_s11 + $0x34] ss:$12 sps:$4 sm:$0xff]  }
0x1499   : > { %8451 = vmatpush1.bf16.msra.mxu1 %v15640_v22  ;;  %v15707_v22 = vld [vmem:[%s17406_s11 + $0xf8] ss:$12 sps:$4 sm:$0xff]  }
0x149a   : > { %8597 = vmatpush1.bf16.msra.mxu0 %v15643_v27  ;;  %8493 = vmatprep.subr.bf16.mxu1 %v15648_v31  ;;  %v15704_v27 = vld [vmem:[%s17406_s11 + $0x30] ss:$12 sps:$4 sm:$0xff]   ;;  %v15711_v31 = vld [vmem:[%s17406_s11 + $0x4c] ss:$12 sps:$4 sm:$0xff]  }
0x149b   : > { %8639 = vmatprep.subr.bf16.mxu0 %v15651_v44  ;;  %v15712_v44 = vld [vmem:[%s17406_s11 + $0x110] ss:$12 sps:$4 sm:$0xff]  }
0x149c   : > { %8453 = vmatmul.mubr.bf16.vlgmr.msra.gmra.mrb[136].mxu1 %v19439_v25 }
0x149d   : > { %8599 = vmatmul.mubr.bf16.vlgmr.msra.gmra.mrb[168].mxu0 %v19439_v25  ;;  %8462 = vmatprep.mubr.bf16.mxu1 %v19476_v47  ;;  %v15661_v25 = vld [vmem:[%s17398_s3 + $0x6e8] ss:$48 sps:$4 sm:$0xff]  }
0x149e   : > { %8494 = vmatpush1.bf16.msra.mxu1 %v15646_v4  ;;  %8608 = vmatprep.mubr.bf16.mxu0 %v19476_v47  ;;  %v15669_v47 = vld [vmem:[%s17398_s3 + $0x74c] ss:$48 sps:$4 sm:$0xff]  }
0x149f   : > { %8640 = vmatpush1.bf16.msra.mxu0 %v15649_v41  ;;  %8495 = vmatprep.subr.bf16.mxu1 %v15654_v3  ;;  %v15709_v4 = vld [vmem:[%s17406_s11 + $0x48] ss:$12 sps:$4 sm:$0xff]   ;;  %v15713_v41 = vld [vmem:[%s17406_s11 + $0x50] ss:$12 sps:$4 sm:$0xff]  }
0x14a0   : > { %8641 = vmatprep.subr.bf16.mxu0 %v15657_v30  ;;  %v15716_v3 = vld [vmem:[%s17406_s11 + $0x64] ss:$12 sps:$4 sm:$0xff]   ;;  %v15717_v30 = vld [vmem:[%s17406_s11 + $0x128] ss:$12 sps:$4 sm:$0xff]  }
0x14a2   : > { %8496 = vmatpush1.bf16.msra.mxu1 %v15652_v36  ;;  %v19886_v36 = vld [vmem:[%s17400_s27] sm:$0xff] }
0x14a3   : > { %8642 = vmatpush1.bf16.msra.mxu0 %v15655_v55  ;;  %8497 = vmatprep.subr.bf16.mxu1 %v15660_v51  ;;  %v15718_v55 = vld [vmem:[%s17406_s11 + $0x68] ss:$12 sps:$4 sm:$0xff]  }
0x14a4   : > { %8463 = vmatmul.mubr.bf16.gmra.mrb[140].mxu1 %v19480_v18  ;;  %8643 = vmatprep.subr.bf16.mxu0 %v15663_v13  ;;  %v15721_v51 = vld [vmem:[%s17406_s11 + $0x7c] ss:$12 sps:$4 sm:$0xff]   ;;  %v21221_v13 = vld [vmem:[#allocation40_spill] sm:$0xff] }
0x14a5   : > { %8609 = vmatmul.mubr.bf16.gmra.mrb[172].mxu0 %v19480_v18  ;;  %8472 = vmatprep.mubr.bf16.mxu1 %v19506_v53  ;;  %v15673_v18 = vld [vmem:[%s17398_s3 + $0x7a8] ss:$48 sps:$4 sm:$0xff]  }
0x14a6   : > { %8498 = vmatpush1.bf16.msra.mxu1 %v15658_v58  ;;  %8618 = vmatprep.mubr.bf16.mxu0 %v19506_v53  ;;  %v15681_v53 = vld [vmem:[%s17398_s3 + $0x80c] ss:$48 sps:$4 sm:$0xff]   ;;  %v19893_v58 = vrot.slane %v19886_v36, %v21221_v13 }
0x14a7   : > { %8644 = vmatpush1.bf16.msra.mxu0 %v15661_v25  ;;  %8499 = vmatprep.subr.bf16.mxu1 %v15666_v10  ;;  %v19897_v25 = vrot.slane %v19886_v36, %v19077_v23  ;;  %v15722_v10 = vld [vmem:[%s17406_s11 + $0x140] ss:$12 sps:$4 sm:$0xff]  }
0x14a8   : > { %8645 = vmatprep.subr.bf16.mxu0 %v15669_v47  ;;  %v21222_v47 = vld [vmem:[#allocation41_spill] sm:$0xff] }
0x14aa   : > { %8500 = vmatpush1.bf16.msra.mxu1 %v15664_v9  ;;  %v19903_v9 = vrot.slane %v19886_v36, %v21222_v47 }
0x14ab   : > { %8646 = vmatpush1.bf16.msra.mxu0 %v15667_v2  ;;  %8501 = vmatprep.subr.bf16.mxu1 %v15672_v50  ;;  %v19907_v2 = vrot.slane %v19886_v36, %v19390_v28  ;;  %v15719_v50 = vld [vmem:[%s17406_s11 + $0x78] ss:$12 sps:$4 sm:$0xff]  }
0x14ac   : > { %8473 = vmatmul.mubr.bf16.gmra.mrb[144].mxu1 %v19522_v40  ;;  %8647 = vmatprep.subr.bf16.mxu0 %v15675_v46 }
0x14ad   : > { %8619 = vmatmul.mubr.bf16.gmra.mrb[176].mxu0 %v19522_v40  ;;  %8482 = vmatprep.mubr.bf16.mxu1 %v19535_v54  ;;  %v15685_v40 = vld [vmem:[%s17398_s3 + $0x868] ss:$48 sps:$4 sm:$0xff]  }
0x14ae   : > { %8502 = vmatpush1.bf16.msra.mxu1 %v15670_v14  ;;  %8628 = vmatprep.mubr.bf16.mxu0 %v19535_v54  ;;  %v15693_v54 = vld [vmem:[%s17398_s3 + $0x8cc] ss:$48 sps:$4 sm:$0xff]  }
0x14af   : > { %8648 = vmatpush1.bf16.msra.mxu0 %v15673_v18  ;;  %8503 = vmatprep.subr.bf16.mxu1 %v15678_v37  ;;  %v15723_v18 = vld [vmem:[%s17406_s11 + $0x80] ss:$12 sps:$4 sm:$0xff]  }
0x14b0   : > { %8649 = vmatprep.subr.bf16.mxu0 %v15681_v53  ;;  %v15726_v37 = vld [vmem:[%s17406_s11 + $0x94] ss:$12 sps:$4 sm:$0xff]  }
0x14b2   : > { %8504 = vmatpush1.bf16.msra.mxu1 %v15676_v19 }
0x14b3   : > { %8650 = vmatpush1.bf16.msra.mxu0 %v15679_v33  ;;  %8505 = vmatprep.subr.bf16.mxu1 %v15684_v17 }
0x14b4   : > { %8483 = vmatmul.mubr.bf16.gmra.mrb[148].mxu1 %v19553_v20  ;;  %8651 = vmatprep.subr.bf16.mxu0 %v15687_v38  ;;  %v15727_v38 = vld [vmem:[%s17406_s11 + $0x158] ss:$12 sps:$4 sm:$0xff]  }
0x14b5   : > { %8629 = vmatmul.mubr.bf16.gmra.mrb[180].mxu0 %v19553_v20  ;;  %8525 = vmatprep.mubr.bf16.mxu1 %v21207_v11  ;;  %v15698_v20 = vld [vmem:[%s17406_s11 + $0x8] ss:$12 sps:$4 sm:$0xff]  }
0x14b6   : > { %8506 = vmatpush1.bf16.msra.mxu1 %v15682_v15  ;;  %8671 = vmatprep.mubr.bf16.mxu0 %v21207_v11 }
0x14b7   : > { %8652 = vmatpush1.bf16.msra.mxu0 %v15685_v40  ;;  %8507 = vmatprep.subr.bf16.mxu1 %v15690_v57 }
0x14b8   : > { %8653 = vmatprep.subr.bf16.mxu0 %v15693_v54 }
0x14ba   : > { %8508 = vmatpush1.bf16.msra.mxu1 %v15688_v35 }
0x14bb   : > { %8654 = vmatpush1.bf16.msra.mxu0 %v15691_v26  ;;  %10788 = vmatprep.subr.bf16.mxu1 %v15696_v5 }
0x14bc   : > { %13709 = vmatprep.subr.bf16.mxu0 %v15697_v56  ;;  %v15724_v56 = vld [vmem:[%s17406_s11 + $0x90] ss:$12 sps:$4 sm:$0xff]  }
0x14bd   : > { %8526 = vmatmul.mubr.bf16.vlgmr.msra.gmra.mrb[136].mxu1 %v19579_v12 }
0x14be   : > { %8672 = vmatmul.mubr.bf16.vlgmr.msra.gmra.mrb[168].mxu0 %v19579_v12  ;;  %10789 = vmatpush1.bf16.msra.mxu1 %v15694_v0  ;;  %v15708_v12 = vld [vmem:[%s17406_s11 + $0x38] ss:$12 sps:$4 sm:$0xff]  }
0x14bf   : > { %13710 = vmatpush3.bf16.msra.mxu0 %v15698_v20  ;;  %10790 = vmatprep.subr.bf16.mxu1 %v15701_v34  ;;  %v15728_v34 = vld [vmem:[%s17406_s11 + $0x98] ss:$12 sps:$4 sm:$0xff]  }
0x14c0   : > { %13711 = vmatprep.subr.bf16.mxu0 %v15702_v6  ;;  %8535 = vmatprep.mubr.bf16.mxu1 %v21207_v11  ;;  %v15731_v6 = vld [vmem:[%s17406_s11 + $0xac] ss:$12 sps:$4 sm:$0xff]  }
0x14c1   : > { %8681 = vmatprep.mubr.bf16.mxu0 %v21207_v11 }
0x14c2   : > { %10791 = vmatpush1.bf16.msra.mxu1 %v15699_v1 }
0x14c3   : > { %13712 = vmatpush3.bf16.msra.mxu0 %v15703_v48  ;;  %10792 = vmatprep.subr.bf16.mxu1 %v15706_v8 }
0x14c4   : > { %13713 = vmatprep.subr.bf16.mxu0 %v15707_v22  ;;  %v15732_v22 = vld [vmem:[%s17406_s11 + $0x170] ss:$12 sps:$4 sm:$0xff]  }
0x14c5   : > { %8536 = vmatmul.mubr.bf16.gmra.mrb[140].mxu1 %v19601_v7 }
0x14c6   : > { %8682 = vmatmul.mubr.bf16.gmra.mrb[172].mxu0 %v19601_v7  ;;  %10793 = vmatpush1.bf16.msra.mxu1 %v15704_v27  ;;  %v15714_v7 = vld [vmem:[%s17406_s11 + $0x60] ss:$12 sps:$4 sm:$0xff]  }
0x14c7   : > { %13714 = vmatpush3.bf16.msra.mxu0 %v15708_v12  ;;  %10794 = vmatprep.subr.bf16.mxu1 %v15711_v31 }
0x14c8   : > { %13715 = vmatprep.subr.bf16.mxu0 %v15712_v44  ;;  %8545 = vmatprep.mubr.bf16.mxu1 %v21207_v11 }
0x14c9   : > { %8691 = vmatprep.mubr.bf16.mxu0 %v21207_v11 }
0x14ca   : > { %10795 = vmatpush1.bf16.msra.mxu1 %v15709_v4 }
0x14cb   : > { %13716 = vmatpush3.bf16.msra.mxu0 %v15713_v41  ;;  %10796 = vmatprep.subr.bf16.mxu1 %v15716_v3  ;;  %v15729_v3 = vld [vmem:[%s17406_s11 + $0xa8] ss:$12 sps:$4 sm:$0xff]  }
0x14cc   : > { %13717 = vmatprep.subr.bf16.mxu0 %v15717_v30 }
0x14cd   : > { %8546 = vmatmul.mubr.bf16.gmra.mrb[144].mxu1 %v19623_v32 }
0x14ce   : > { %8692 = vmatmul.mubr.bf16.gmra.mrb[176].mxu0 %v19623_v32  ;;  %10797 = vmatpush1.bf16.msra.mxu1 %v15714_v7 }
0x14cf   : > { %13718 = vmatpush3.bf16.msra.mxu0 %v15718_v55  ;;  %v7943_v46 = vpop.f32.mrb[104].mxu1  ;;  %v8089_v14 = vpop.f32.mrb[136].mxu0  ;;  %10798 = vmatprep.subr.bf16.mxu1 %v15721_v51 }
0x14d0   : > { %v14281_v53 = vadd.f32 %v7943_v46, %v19893_v58  ;;  %v14297_v19 = vadd.f32 %v8089_v14, %v19897_v25  ;;  %13719 = vmatprep.subr.bf16.mxu0 %v15722_v10  ;;  %v7945_v33 = vpop.f32.mrb[105].mxu1  ;;  %v8091_v17 = vpop.f32.mrb[137].mxu0  ;;  %8555 = vmatprep.mubr.bf16.mxu1 %v21207_v11  ;;  %v15733_v10 = vld [vmem:[%s17406_s11 + $0xb0] ss:$12 sps:$4 sm:$0xff]  }
0x14d1   : > { %v14282_v32 = vadd.f32 %v7945_v33, %v19903_v9  ;;  %v14298_v15 = vadd.f32 %v8091_v17, %v19907_v2  ;;  %v7947_v40 = vpop.f32.mrb[106].mxu1  ;;  %v8093_v57 = vpop.f32.mrb[138].mxu0  ;;  %8701 = vmatprep.mubr.bf16.mxu0 %v21207_v11 }
0x14d2   : > { %10799 = vmatpush1.bf16.msra.mxu1 %v15719_v50  ;;  %v14283_v54 = vadd.f32 %v7947_v40, %v19893_v58  ;;  %v14299_v35 = vadd.f32 %v8093_v57, %v19897_v25  ;;  %v7949_v26 = vpop.f32.mrb[107].mxu1  ;;  %v8095_v5 = vpop.f32.mrb[139].mxu0  ;;  %v8712_v1 = vmax.f32 %v14281_v53, 0.0  ;;  %v8714_v11 = vmax.f32 %v14297_v19, 0.0  ;;  %v15736_v50 = vld [vmem:[%s17406_s11 + $0xc4] ss:$12 sps:$4 sm:$0xff]  }
0x14d3   : > { %13720 = vmatpush3.bf16.msra.mxu0 %v15723_v18  ;;  %v14284_v0 = vadd.f32 %v7949_v26, %v19903_v9  ;;  %v14300_v20 = vadd.f32 %v8095_v5, %v19907_v2  ;;  %10800 = vmatprep.subr.bf16.mxu1 %v15726_v37  ;;  %v8713_v27 = vmax.f32 %v14282_v32, 0.0  ;;  %v8715_v12 = vmax.f32 %v14298_v15, 0.0  ;;  %v15737_v37 = vld [vmem:[%s17406_s11 + $0x248] ss:$12 sps:$4 sm:$0xff]   ;;  %v15734_v57 = vld [vmem:[%s17406_s11 + $0xc0] ss:$12 sps:$4 sm:$0xff]  }
0x14d4   : > { %v8724_v48 = vmax.f32 %v14283_v54, 0.0  ;;  %v8726_v8 = vmax.f32 %v14299_v35, 0.0  ;;  %13721 = vmatprep.subr.bf16.mxu0 %v15727_v38  ;;  %v15738_v26 = vld [vmem:[%s17406_s11 + $0x188] ss:$12 sps:$4 sm:$0xff]  }
0x14d5   : > { %v8725_v31 = vmax.f32 %v14284_v0, 0.0  ;;  %v8727_v44 = vmax.f32 %v14300_v20, 0.0  ;;  %8556 = vmatmul.mubr.bf16.gmra.mrb[148].mxu1 %v19641_v60  ;;  %v15741_v5 = vld [vmem:[%s17406_s11 + $0xdc] ss:$12 sps:$4 sm:$0xff]  }
0x14d6   : > { %v19929_v4 = vpack.c.bf16 %v8724_v48, %v8712_v1  ;;  %v19931_v41 = vpack.c.bf16 %v8726_v8, %v8714_v11  ;;  %8702 = vmatmul.mubr.bf16.gmra.mrb[180].mxu0 %v19641_v60  ;;  %10801 = vmatpush1.bf16.msra.mxu1 %v15724_v56 }
0x14d7   : > { %v8809_v30 = vpack.c.bf16 %v8725_v31, %v8713_v27  ;;  %v19935_v7 = vpack.c.bf16 %v8727_v44, %v8715_v12  ;;  %13722 = vmatpush3.bf16.msra.mxu0 %v15728_v34  ;;  %v7953_v55 = vpop.f32.mrb[108].mxu1  ;;  %v8099_v51 = vpop.f32.mrb[140].mxu0  ;;  %10802 = vmatprep.subr.bf16.mxu1 %v15731_v6  ;;  %v15742_v6 = vld [vmem:[%s17406_s11 + $0x260] ss:$12 sps:$4 sm:$0xff]   ;;  %v15739_v12 = vld [vmem:[%s17406_s11 + $0xd8] ss:$12 sps:$4 sm:$0xff]  }
0x14d8   : > { %v14285_v46 = vadd.f32 %v7953_v55, %v19893_v58  ;;  %v14301_v14 = vadd.f32 %v8099_v51, %v19897_v25  ;;  %13723 = vmatprep.subr.bf16.mxu0 %v15732_v22  ;;  %v7955_v18 = vpop.f32.mrb[109].mxu1  ;;  %v8101_v60 = vpop.f32.mrb[141].mxu0  ;;  %v15743_v55 = vld [vmem:[%s17406_s11 + $0x1a0] ss:$12 sps:$4 sm:$0xff]  }
0x14d9   : > { %v14286_v53 = vadd.f32 %v7955_v18, %v19903_v9  ;;  %v14302_v19 = vadd.f32 %v8101_v60, %v19907_v2  ;;  %v7957_v33 = vpop.f32.mrb[110].mxu1  ;;  %v8103_v17 = vpop.f32.mrb[142].mxu0  ;;  %10820 = vmatprep.mubr.bf16.mxu1 %v8809_v30  ;;  %11258 = vmatprep.mubr.bf16.mxu0 %v8809_v30  ;;  %v15746_v51 = vld [vmem:[%s17406_s11 + $0xf4] ss:$12 sps:$4 sm:$0xff]   ;;  %v15747_v18 = vld [vmem:[%s17406_s11 + $0x278] ss:$12 sps:$4 sm:$0xff]  }
0x14da   : > { %10803 = vmatpush1.bf16.msra.mxu1 %v15729_v3  ;;  %v14287_v38 = vadd.f32 %v7957_v33, %v19893_v58  ;;  %v14303_v32 = vadd.f32 %v8103_v17, %v19897_v25  ;;  %v7959_v15 = vpop.f32.mrb[111].mxu1  ;;  %v8105_v40 = vpop.f32.mrb[143].mxu0  ;;  %v8736_v56 = vmax.f32 %v14285_v46, 0.0  ;;  %v8738_v0 = vmax.f32 %v14301_v14, 0.0 }
0x14db   : > { %13724 = vmatpush3.bf16.msra.mxu0 %v15733_v10  ;;  %v14288_v54 = vadd.f32 %v7959_v15, %v19903_v9  ;;  %v14304_v35 = vadd.f32 %v8105_v40, %v19907_v2  ;;  %10804 = vmatprep.subr.bf16.mxu1 %v15736_v50  ;;  %v8737_v1 = vmax.f32 %v14286_v53, 0.0  ;;  %v8739_v11 = vmax.f32 %v14302_v19, 0.0  ;;  %v15744_v15 = vld [vmem:[%s17406_s11 + $0xf0] ss:$12 sps:$4 sm:$0xff]  }
0x14dc   : > { %v8748_v20 = vmax.f32 %v14287_v38, 0.0  ;;  %v8750_v34 = vmax.f32 %v14303_v32, 0.0  ;;  %13749 = vmatprep.subr.bf16.mxu0 %v15737_v37 }
0x14dd   : > { %v8749_v48 = vmax.f32 %v14288_v54, 0.0  ;;  %v8751_v8 = vmax.f32 %v14304_v35, 0.0  ;;  %v15748_v54 = vld [vmem:[%s17406_s11 + $0x1b8] ss:$12 sps:$4 sm:$0xff]  }
0x14de   : > { %v19952_v22 = vpack.c.bf16 %v8748_v20, %v8736_v56  ;;  %v19954_v27 = vpack.c.bf16 %v8750_v34, %v8738_v0  ;;  %11259 = vmatmul.mubr.bf16.vlgmr.msra.gmra.mrb[184].mxu0 %v19929_v4  ;;  %10805 = vmatpush1.bf16.msra.mxu1 %v15734_v57  ;;  %v15751_v35 = vld [vmem:[%s17406_s11 + $0x10c] ss:$12 sps:$4 sm:$0xff]   ;;  %v15752_v20 = vld [vmem:[%s17406_s11 + $0x290] ss:$12 sps:$4 sm:$0xff]  }
0x14df   : > { %v19958_v31 = vpack.c.bf16 %v8749_v48, %v8737_v1  ;;  %v19960_v44 = vpack.c.bf16 %v8751_v8, %v8739_v11  ;;  %13750 = vmatpush3.bf16.msra.mxu0 %v15738_v26  ;;  %v7963_v3 = vpop.f32.mrb[112].mxu1  ;;  %v8109_v30 = vpop.f32.mrb[144].mxu0  ;;  %10806 = vmatprep.subr.bf16.mxu1 %v15741_v5 }
0x14e0   : > { %v14289_v10 = vadd.f32 %v7963_v3, %v19893_v58  ;;  %v14305_v50 = vadd.f32 %v8109_v30, %v19897_v25  ;;  %13751 = vmatprep.subr.bf16.mxu0 %v15742_v6  ;;  %v7965_v46 = vpop.f32.mrb[113].mxu1  ;;  %v8111_v14 = vpop.f32.mrb[145].mxu0 }
0x14e1   : > { %v14290_v60 = vadd.f32 %v7965_v46, %v19903_v9  ;;  %v14306_v37 = vadd.f32 %v8111_v14, %v19907_v2  ;;  %v7967_v53 = vpop.f32.mrb[114].mxu1  ;;  %v8113_v19 = vpop.f32.mrb[146].mxu0  ;;  %11266 = vmatprep.mubr.bf16.mxu0 %v19958_v31 }
0x14e2   : > { %10807 = vmatpush1.bf16.msra.mxu1 %v15739_v12  ;;  %v14291_v33 = vadd.f32 %v7967_v53, %v19893_v58  ;;  %v14307_v17 = vadd.f32 %v8113_v19, %v19897_v25  ;;  %v7969_v38 = vpop.f32.mrb[115].mxu1  ;;  %v8115_v32 = vpop.f32.mrb[147].mxu0  ;;  %v8760_v26 = vmax.f32 %v14289_v10, 0.0  ;;  %v8762_v5 = vmax.f32 %v14305_v50, 0.0  ;;  %v15749_v12 = vld [vmem:[%s17406_s11 + $0x108] ss:$12 sps:$4 sm:$0xff]  }
0x14e3   : > { %13752 = vmatpush3.bf16.msra.mxu0 %v15743_v55  ;;  %v14292_v40 = vadd.f32 %v7969_v38, %v19903_v9  ;;  %v14308_v57 = vadd.f32 %v8115_v32, %v19907_v2  ;;  %10808 = vmatprep.subr.bf16.mxu1 %v15746_v51  ;;  %v8761_v34 = vmax.f32 %v14290_v60, 0.0  ;;  %v8763_v6 = vmax.f32 %v14306_v37, 0.0  ;;  %v15753_v10 = vld [vmem:[%s17406_s11 + $0x1d0] ss:$12 sps:$4 sm:$0xff]   ;;  %v15757_v37 = vld [vmem:[%s17406_s11 + $0x2a8] ss:$12 sps:$4 sm:$0xff]  }
0x14e4   : > { %v8772_v56 = vmax.f32 %v14291_v33, 0.0  ;;  %v8774_v0 = vmax.f32 %v14307_v17, 0.0  ;;  %13753 = vmatprep.subr.bf16.mxu0 %v15747_v18  ;;  %v15756_v50 = vld [vmem:[%s17406_s11 + $0x124] ss:$12 sps:$4 sm:$0xff]  }
0x14e5   : > { %v8773_v1 = vmax.f32 %v14292_v40, 0.0  ;;  %v8775_v11 = vmax.f32 %v14308_v57, 0.0  ;;  %v15754_v57 = vld [vmem:[%s17406_s11 + $0x120] ss:$12 sps:$4 sm:$0xff]  }
0x14e6   : > { %v19978_v48 = vpack.c.bf16 %v8772_v56, %v8760_v26  ;;  %v19980_v8 = vpack.c.bf16 %v8774_v0, %v8762_v5  ;;  %11267 = vmatmul.mubr.bf16.gmra.mrb[188].mxu0 %v19952_v22  ;;  %10809 = vmatpush1.bf16.msra.mxu1 %v15744_v15  ;;  %v15758_v26 = vld [vmem:[%s17406_s11 + $0x1e8] ss:$12 sps:$4 sm:$0xff]  }
0x14e7   : > { %v19984_v3 = vpack.c.bf16 %v8773_v1, %v8761_v34  ;;  %v19986_v30 = vpack.c.bf16 %v8775_v11, %v8763_v6  ;;  %13754 = vmatpush3.bf16.msra.mxu0 %v15748_v54  ;;  %v7973_v55 = vpop.f32.mrb[116].mxu1  ;;  %v8119_v51 = vpop.f32.mrb[148].mxu0  ;;  %10810 = vmatprep.subr.bf16.mxu1 %v15751_v35  ;;  %v15761_v5 = vld [vmem:[%s17406_s11 + $0x13c] ss:$12 sps:$4 sm:$0xff]  }
0x14e8   : > { %v14293_v46 = vadd.f32 %v7973_v55, %v19893_v58  ;;  %v14309_v14 = vadd.f32 %v8119_v51, %v19897_v25  ;;  %13755 = vmatprep.subr.bf16.mxu0 %v15752_v20  ;;  %v7975_v18 = vpop.f32.mrb[117].mxu1  ;;  %v8121_v60 = vpop.f32.mrb[149].mxu0 }
0x14e9   : > { %v14294_v53 = vadd.f32 %v7975_v18, %v19903_v9  ;;  %v14310_v19 = vadd.f32 %v8121_v60, %v19907_v2  ;;  %v7977_v33 = vpop.f32.mrb[118].mxu1  ;;  %v8123_v17 = vpop.f32.mrb[150].mxu0  ;;  %11274 = vmatprep.mubr.bf16.mxu0 %v19984_v3  ;;  %v15768_v18 = vld [vmem:[%s17406_s11 + $0x218] ss:$12 sps:$4 sm:$0xff]  }
0x14ea   : > { %10811 = vmatpush1.bf16.msra.mxu1 %v15749_v12  ;;  %v14295_v38 = vadd.f32 %v7977_v33, %v19893_v58  ;;  %v14311_v32 = vadd.f32 %v8123_v17, %v19897_v25  ;;  %v7979_v15 = vpop.f32.mrb[119].mxu1  ;;  %v8125_v40 = vpop.f32.mrb[151].mxu0  ;;  %v8784_v56 = vmax.f32 %v14293_v46, 0.0  ;;  %v8786_v0 = vmax.f32 %v14309_v14, 0.0  ;;  %v15762_v58 = vld [vmem:[%s17406_s11 + $0x2c0] ss:$12 sps:$4 sm:$0xff]  }
0x14eb   : > { %13756 = vmatpush3.bf16.msra.mxu0 %v15753_v10  ;;  %v14296_v54 = vadd.f32 %v7979_v15, %v19903_v9  ;;  %v14312_v35 = vadd.f32 %v8125_v40, %v19907_v2  ;;  %10812 = vmatprep.subr.bf16.mxu1 %v15756_v50  ;;  %v8785_v25 = vmax.f32 %v14294_v53, 0.0  ;;  %v8787_v6 = vmax.f32 %v14310_v19, 0.0  ;;  %v15759_v12 = vld [vmem:[%s17406_s11 + $0x138] ss:$12 sps:$4 sm:$0xff]   ;;  %v15763_v10 = vld [vmem:[%s17406_s11 + $0x200] ss:$12 sps:$4 sm:$0xff]  }
0x14ec   : > { %v8796_v20 = vmax.f32 %v14295_v38, 0.0  ;;  %v8798_v34 = vmax.f32 %v14311_v32, 0.0  ;;  %13757 = vmatprep.subr.bf16.mxu0 %v15757_v37  ;;  %v15766_v50 = vld [vmem:[%s17406_s11 + $0x154] ss:$12 sps:$4 sm:$0xff]   ;;  %v15767_v46 = vld [vmem:[%s17406_s11 + $0x2d8] ss:$12 sps:$4 sm:$0xff]  }
0x14ed   : > { %v8797_v1 = vmax.f32 %v14296_v54, 0.0  ;;  %v8799_v11 = vmax.f32 %v14312_v35, 0.0  ;;  %v15764_v14 = vld [vmem:[%s17406_s11 + $0x150] ss:$12 sps:$4 sm:$0xff]   ;;  %v15771_v60 = vld [vmem:[%s17406_s11 + $0x16c] ss:$12 sps:$4 sm:$0xff]  }
0x14ee   : > { %v20004_v9 = vpack.c.bf16 %v8796_v20, %v8784_v56  ;;  %v20006_v2 = vpack.c.bf16 %v8798_v34, %v8786_v0  ;;  %11275 = vmatmul.mubr.bf16.gmra.mrb[192].mxu0 %v19978_v48  ;;  %10813 = vmatpush1.bf16.msra.mxu1 %v15754_v57  ;;  %v15772_v37 = vld [vmem:[%s17406_s11 + $0x2f0] ss:$12 sps:$4 sm:$0xff]   ;;  %v15769_v53 = vld [vmem:[%s17406_s11 + $0x168] ss:$12 sps:$4 sm:$0xff]   ;;  %v15774_v38 = vld [vmem:[%s17406_s11 + $0x180] ss:$12 sps:$4 sm:$0xff]  }
0x14ef   : > { %v20010_v55 = vpack.c.bf16 %v8797_v1, %v8785_v25  ;;  %v20012_v51 = vpack.c.bf16 %v8799_v11, %v8787_v6  ;;  %13758 = vmatpush3.bf16.msra.mxu0 %v15758_v26  ;;  %10814 = vmatprep.subr.bf16.mxu1 %v15761_v5  ;;  %v15773_v19 = vld [vmem:[%s17406_s11 + $0x230] ss:$12 sps:$4 sm:$0xff]   ;;  %v15798_v17 = vld [vmem:[%s17406_s11 + $0x3c8] ss:$12 sps:$4 sm:$0xff]   ;;  %v15803_v40 = vld [vmem:[%s17406_s11 + $0x3e0] ss:$12 sps:$4 sm:$0xff]  }
0x14f0   : > { %13759 = vmatprep.subr.bf16.mxu0 %v15762_v58  ;;  %v15776_v33 = vld [vmem:[%s17406_s11 + $0x184] ss:$12 sps:$4 sm:$0xff]   ;;  %v15779_v32 = vld [vmem:[%s17406_s11 + $0x19c] ss:$12 sps:$4 sm:$0xff]   ;;  %v15782_v54 = vld [vmem:[%s17406_s11 + $0x1b4] ss:$12 sps:$4 sm:$0xff]  }
0x14f1   : > { %11282 = vmatprep.mubr.bf16.mxu0 %v20010_v55  ;;  %v15799_v15 = vld [vmem:[%s17406_s11 + $0x308] ss:$12 sps:$4 sm:$0xff]   ;;  %v15777_v57 = vld [vmem:[%s17406_s11 + $0x198] ss:$12 sps:$4 sm:$0xff]   ;;  %v15804_v35 = vld [vmem:[%s17406_s11 + $0x320] ss:$12 sps:$4 sm:$0xff]  }
0x14f2   : > { %10815 = vmatpush1.bf16.msra.mxu1 %v15759_v12  ;;  %v15808_v26 = vld [vmem:[%s17406_s11 + $0x3f8] ss:$12 sps:$4 sm:$0xff]   ;;  %v15813_v56 = vld [vmem:[%s17406_s11 + $0x410] ss:$12 sps:$4 sm:$0xff]   ;;  %v15783_v0 = vld [vmem:[%s17406_s11 + $0x1c8] ss:$12 sps:$4 sm:$0xff]  }
0x14f3   : > { %13760 = vmatpush3.bf16.msra.mxu0 %v15763_v10  ;;  %10816 = vmatprep.subr.bf16.mxu1 %v15766_v50  ;;  %v15785_v5 = vld [vmem:[%s17406_s11 + $0x1cc] ss:$12 sps:$4 sm:$0xff]   ;;  %v15788_v20 = vld [vmem:[%s17406_s11 + $0x1e4] ss:$12 sps:$4 sm:$0xff]   ;;  %v15791_v25 = vld [vmem:[%s17406_s11 + $0x1fc] ss:$12 sps:$4 sm:$0xff]  }
0x14f4   : > { %13761 = vmatprep.subr.bf16.mxu0 %v15767_v46  ;;  %v15814_v34 = vld [vmem:[%s17406_s11 + $0x350] ss:$12 sps:$4 sm:$0xff]   ;;  %v15786_v58 = vld [vmem:[%s17406_s11 + $0x1e0] ss:$12 sps:$4 sm:$0xff]   ;;  %v15789_v1 = vld [vmem:[%s17406_s11 + $0x1f8] ss:$12 sps:$4 sm:$0xff]  }
0x14f5   : > { %v15823_v6 = vld [vmem:[%s17406_s11 + $0x440] ss:$12 sps:$4 sm:$0xff]   ;;  %v15792_v10 = vld [vmem:[%s17406_s11 + $0x210] ss:$12 sps:$4 sm:$0xff]  }
0x14f6   : > { %11283 = vmatmul.mubr.bf16.gmra.mrb[196].mxu0 %v20004_v9  ;;  %10817 = vmatpush1.bf16.msra.mxu1 %v15764_v14  ;;  %v15794_v11 = vld [vmem:[%s17406_s11 + $0x214] ss:$12 sps:$4 sm:$0xff]   ;;  %v15797_v50 = vld [vmem:[%s17406_s11 + $0x22c] ss:$12 sps:$4 sm:$0xff]   ;;  %v15833_v46 = vld [vmem:[%s17406_s11 + $0x470] ss:$12 sps:$4 sm:$0xff]  }
0x14f7   : > { %13762 = vmatpush3.bf16.msra.mxu0 %v15768_v18  ;;  %11323 = vmatprep.mubr.bf16.mxu0 %v19935_v7  ;;  %v15824_v12 = vld [vmem:[%s17406_s11 + $0x380] ss:$12 sps:$4 sm:$0xff]   ;;  %v15795_v14 = vld [vmem:[%s17406_s11 + $0x228] ss:$12 sps:$4 sm:$0xff]   ;;  %v15802_v18 = vld [vmem:[%s17406_s11 + $0x244] ss:$12 sps:$4 sm:$0xff]  }
0x14f8   : > { %10818 = vmatprep.subr.bf16.mxu1 %v15771_v60  ;;  %13763 = vmatprep.subr.bf16.mxu0 %v15772_v37  ;;  %v15834_v60 = vld [vmem:[%s17406_s11 + $0x3b0] ss:$12 sps:$4 sm:$0xff]   ;;  %v15838_v37 = vld [vmem:[%s17406_s11 + $0x548] ss:$12 sps:$4 sm:$0xff]  }
0x14fa   : > { %10819 = vmatpush1.bf16.msra.mxu1 %v15769_v53  ;;  %v15807_v53 = vld [vmem:[%s17406_s11 + $0x25c] ss:$12 sps:$4 sm:$0xff]  }
0x14fb   : > { %13764 = vmatpush3.bf16.msra.mxu0 %v15773_v19  ;;  %10861 = vmatprep.subr.bf16.mxu1 %v15776_v33  ;;  %v15812_v19 = vld [vmem:[%s17406_s11 + $0x274] ss:$12 sps:$4 sm:$0xff]   ;;  %v15810_v33 = vld [vmem:[%s17406_s11 + $0x270] ss:$12 sps:$4 sm:$0xff]  }
0x14fc   : > { %13789 = vmatprep.subr.bf16.mxu0 %v15798_v17  ;;  %v15817_v17 = vld [vmem:[%s17406_s11 + $0x28c] ss:$12 sps:$4 sm:$0xff]  }
0x14fd   : > { %10821 = vmatmul.mubr.bf16.vlgmr.msra.gmra.mrb[152].mxu1 %v19929_v4  ;;  %v15780_v4 = vld [vmem:[%s17406_s11 + $0x1b0] ss:$12 sps:$4 sm:$0xff]  }
0x14fe   : > { %11324 = vmatmul.mubr.bf16.vlgmr.msra.gmra.mrb[200].mxu0 %v19931_v41  ;;  %10830 = vmatprep.mubr.bf16.mxu1 %v19958_v31  ;;  %v15809_v31 = vld [vmem:[%s17406_s11 + $0x338] ss:$12 sps:$4 sm:$0xff]  }
0x14ff   : > { %10862 = vmatpush1.bf16.msra.mxu1 %v15774_v38  ;;  %11331 = vmatprep.mubr.bf16.mxu0 %v19960_v44  ;;  %v15815_v38 = vld [vmem:[%s17406_s11 + $0x288] ss:$12 sps:$4 sm:$0xff]  }
0x1500   : > { %10863 = vmatprep.subr.bf16.mxu1 %v15779_v32  ;;  %13790 = vmatpush3.bf16.msra.mxu0 %v15799_v15  ;;  %v15822_v32 = vld [vmem:[%s17406_s11 + $0x2a4] ss:$12 sps:$4 sm:$0xff]   ;;  %v6362_v15 = vsub.s32 6, %v21208_v24 }
0x1501   : > { %13791 = vmatprep.subr.bf16.mxu0 %v15803_v40  ;;  %v20085_v40 = vsub.s32 5, %v21208_v24 }
0x1503   : > { %10864 = vmatpush1.bf16.msra.mxu1 %v15777_v57  ;;  %v6366_v57 = vsub.s32 7, %v21208_v24 }
0x1504   : > { %10865 = vmatprep.subr.bf16.mxu1 %v15782_v54  ;;  %13792 = vmatpush3.bf16.msra.mxu0 %v15804_v35  ;;  %v15820_v54 = vld [vmem:[%s17406_s11 + $0x2a0] ss:$12 sps:$4 sm:$0xff]   ;;  %v20091_v35 = vrot.slane %v19886_v36, %v19393_v61 }
0x1505   : > { %10831 = vmatmul.mubr.bf16.gmra.mrb[156].mxu1 %v19952_v22  ;;  %13793 = vmatprep.subr.bf16.mxu0 %v15808_v26  ;;  %v15818_v22 = vld [vmem:[%s17406_s11 + $0x428] ss:$12 sps:$4 sm:$0xff]  }
0x1506   : > { %11332 = vmatmul.mubr.bf16.gmra.mrb[204].mxu0 %v19954_v27  ;;  %10840 = vmatprep.mubr.bf16.mxu1 %v19984_v3  ;;  %v15819_v3 = vld [vmem:[%s17406_s11 + $0x368] ss:$12 sps:$4 sm:$0xff]  }
0x1507   : > { %10866 = vmatpush1.bf16.msra.mxu1 %v15780_v4  ;;  %11339 = vmatprep.mubr.bf16.mxu0 %v19986_v30  ;;  %v15827_v26 = vld [vmem:[%s17406_s11 + $0x2bc] ss:$12 sps:$4 sm:$0xff]   ;;  %v20095_v4 = vrot.slane %v19886_v36, %v6362_v15 }
0x1508   : > { %10867 = vmatprep.subr.bf16.mxu1 %v15785_v5  ;;  %13794 = vmatpush3.bf16.msra.mxu0 %v15809_v31  ;;  %v20099_v5 = vrot.slane %v19886_v36, %v20085_v40  ;;  %v20102_v31 = vrot.slane %v19886_v36, %v6366_v57  ;;  %v15835_v57 = vld [vmem:[%s17406_s11 + $0x2e8] ss:$12 sps:$4 sm:$0xff]  }
0x1509   : > { %13795 = vmatprep.subr.bf16.mxu0 %v15813_v56  ;;  %v15825_v56 = vld [vmem:[%s17406_s11 + $0x2b8] ss:$12 sps:$4 sm:$0xff]  }
0x150b   : > { %10868 = vmatpush1.bf16.msra.mxu1 %v15783_v0 }
0x150c   : > { %10869 = vmatprep.subr.bf16.mxu1 %v15788_v20  ;;  %13796 = vmatpush3.bf16.msra.mxu0 %v15814_v34 }
0x150d   : > { %10841 = vmatmul.mubr.bf16.gmra.mrb[160].mxu1 %v19978_v48  ;;  %13797 = vmatprep.subr.bf16.mxu0 %v15818_v22  ;;  %v15828_v48 = vld [vmem:[%s17406_s11 + $0x458] ss:$12 sps:$4 sm:$0xff]   ;;  %v15832_v22 = vld [vmem:[%s17406_s11 + $0x2d4] ss:$12 sps:$4 sm:$0xff]  }
0x150e   : > { %11340 = vmatmul.mubr.bf16.gmra.mrb[208].mxu0 %v19980_v8  ;;  %10850 = vmatprep.mubr.bf16.mxu1 %v20010_v55  ;;  %v15829_v55 = vld [vmem:[%s17406_s11 + $0x398] ss:$12 sps:$4 sm:$0xff]  }
0x150f   : > { %10870 = vmatpush1.bf16.msra.mxu1 %v15786_v58  ;;  %11347 = vmatprep.mubr.bf16.mxu0 %v20012_v51 }
0x1510   : > { %10871 = vmatprep.subr.bf16.mxu1 %v15791_v25  ;;  %13798 = vmatpush3.bf16.msra.mxu0 %v15819_v3 }
0x1511   : > { %13799 = vmatprep.subr.bf16.mxu0 %v15823_v6 }
0x1513   : > { %10872 = vmatpush1.bf16.msra.mxu1 %v15789_v1 }
0x1514   : > { %10873 = vmatprep.subr.bf16.mxu1 %v15794_v11  ;;  %13800 = vmatpush3.bf16.msra.mxu0 %v15824_v12 }
0x1515   : > { %10851 = vmatmul.mubr.bf16.gmra.mrb[164].mxu1 %v20004_v9  ;;  %13801 = vmatprep.subr.bf16.mxu0 %v15828_v48  ;;  %v15800_v9 = vld [vmem:[%s17406_s11 + $0x240] ss:$12 sps:$4 sm:$0xff]  }
0x1516   : > { %11348 = vmatmul.mubr.bf16.gmra.mrb[212].mxu0 %v20006_v2  ;;  %10893 = vmatprep.mubr.bf16.mxu1 %v19935_v7  ;;  %v15805_v7 = vld [vmem:[%s17406_s11 + $0x258] ss:$12 sps:$4 sm:$0xff]  }
0x1517   : > { %10874 = vmatpush1.bf16.msra.mxu1 %v15792_v10 }
0x1518   : > { %10875 = vmatprep.subr.bf16.mxu1 %v15797_v50  ;;  %13802 = vmatpush3.bf16.msra.mxu0 %v15829_v55  ;;  %v15830_v55 = vld [vmem:[%s17406_s11 + $0x2d0] ss:$12 sps:$4 sm:$0xff]  }
0x1519   : > { %13803 = vmatprep.subr.bf16.mxu0 %v15833_v46 }
0x151b   : > { %10876 = vmatpush1.bf16.msra.mxu1 %v15795_v14 }
0x151c   : > { %10877 = vmatprep.subr.bf16.mxu1 %v15802_v18  ;;  %13804 = vmatpush3.bf16.msra.mxu0 %v15834_v60  ;;  %v15837_v60 = vld [vmem:[%s17406_s11 + $0x2ec] ss:$12 sps:$4 sm:$0xff]  }
0x151d   : > { %13829 = vmatprep.subr.bf16.mxu0 %v15838_v37 }
0x151f   : > { %10878 = vmatpush1.bf16.msra.mxu1 %v15800_v9 }
0x1520   : > { %10879 = vmatprep.subr.bf16.mxu1 %v15807_v53 }
0x1523   : > { %10880 = vmatpush1.bf16.msra.mxu1 %v15805_v7 }
0x1524   : > { %10881 = vmatprep.subr.bf16.mxu1 %v15812_v19 }
0x1527   : > { %10882 = vmatpush1.bf16.msra.mxu1 %v15810_v33 }
0x1528   : > { %10883 = vmatprep.subr.bf16.mxu1 %v15817_v17 }
0x152b   : > { %10884 = vmatpush1.bf16.msra.mxu1 %v15815_v38 }
0x152c   : > { %10885 = vmatprep.subr.bf16.mxu1 %v15822_v32 }
0x152f   : > { %10886 = vmatpush1.bf16.msra.mxu1 %v15820_v54  ;;  %v8235_v24 = vpop.f32.mrb[120].mxu1  ;;  %v15839_v54 = vld [vmem:[%s17406_s11 + $0x488] ss:$12 sps:$4 sm:$0xff]  }
0x1530   : > { %v14313_v0 = vadd.f32 %v8235_v24, %v20091_v35  ;;  %v8381_v20 = vpop.f32.mrb[152].mxu0  ;;  %v8237_v34 = vpop.f32.mrb[121].mxu1  ;;  %10887 = vmatprep.subr.bf16.mxu1 %v15827_v26 }
0x1531   : > { %v14329_v58 = vadd.f32 %v8381_v20, %v20095_v4  ;;  %v14314_v25 = vadd.f32 %v8237_v34, %v20099_v5  ;;  %v8383_v3 = vpop.f32.mrb[153].mxu0  ;;  %v8239_v6 = vpop.f32.mrb[122].mxu1  ;;  %v15842_v20 = vld [vmem:[%s17406_s11 + $0x304] ss:$12 sps:$4 sm:$0xff]   ;;  %v15843_v34 = vld [vmem:[%s17406_s11 + $0x560] ss:$12 sps:$4 sm:$0xff]  }
0x1532   : > { %v14330_v36 = vadd.f32 %v8383_v3, %v20102_v31  ;;  %v14315_v1 = vadd.f32 %v8239_v6, %v20091_v35  ;;  %v8385_v11 = vpop.f32.mrb[154].mxu0  ;;  %v8241_v12 = vpop.f32.mrb[123].mxu1  ;;  %v8716_v46 = vmax.f32 %v14313_v0, 0.0 }
0x1533   : > { %v14331_v48 = vadd.f32 %v8385_v11, %v20095_v4  ;;  %10888 = vmatpush1.bf16.msra.mxu1 %v15825_v56  ;;  %v14316_v10 = vadd.f32 %v8241_v12, %v20099_v5  ;;  %v8387_v50 = vpop.f32.mrb[155].mxu0  ;;  %v8718_v37 = vmax.f32 %v14329_v58, 0.0  ;;  %v8717_v9 = vmax.f32 %v14314_v25, 0.0 }
0x1534   : > { %v8728_v14 = vmax.f32 %v14315_v1, 0.0  ;;  %v14332_v18 = vadd.f32 %v8387_v50, %v20102_v31  ;;  %10889 = vmatprep.subr.bf16.mxu1 %v15832_v22  ;;  %v8719_v19 = vmax.f32 %v14330_v36, 0.0  ;;  %v15840_v50 = vld [vmem:[%s17406_s11 + $0x300] ss:$12 sps:$4 sm:$0xff]  }
0x1535   : > { %v8730_v53 = vmax.f32 %v14331_v48, 0.0  ;;  %v8729_v7 = vmax.f32 %v14316_v10, 0.0 }
0x1536   : > { %v20116_v33 = vpack.c.bf16 %v8728_v14, %v8716_v46  ;;  %v8731_v17 = vmax.f32 %v14332_v18, 0.0  ;;  %v15844_v18 = vld [vmem:[%s17406_s11 + $0x4a0] ss:$12 sps:$4 sm:$0xff]  }
0x1537   : > { %v20118_v38 = vpack.c.bf16 %v8730_v53, %v8718_v37  ;;  %v20120_v32 = vpack.c.bf16 %v8729_v7, %v8717_v9  ;;  %10890 = vmatpush1.bf16.msra.mxu1 %v15830_v55  ;;  %v8245_v15 = vpop.f32.mrb[124].mxu1 }
0x1538   : > { %v20124_v26 = vpack.c.bf16 %v8731_v17, %v8719_v19  ;;  %v14317_v24 = vadd.f32 %v8245_v15, %v20091_v35  ;;  %v8391_v56 = vpop.f32.mrb[156].mxu0  ;;  %v8247_v0 = vpop.f32.mrb[125].mxu1  ;;  %10891 = vmatprep.subr.bf16.mxu1 %v15837_v60  ;;  %v15847_v60 = vld [vmem:[%s17406_s11 + $0x31c] ss:$12 sps:$4 sm:$0xff]   ;;  %v15848_v19 = vld [vmem:[%s17406_s11 + $0x578] ss:$12 sps:$4 sm:$0xff]  }
0x1539   : > { %v14333_v22 = vadd.f32 %v8391_v56, %v20095_v4  ;;  %v14318_v58 = vadd.f32 %v8247_v0, %v20099_v5  ;;  %v8393_v25 = vpop.f32.mrb[157].mxu0  ;;  %v8249_v3 = vpop.f32.mrb[126].mxu1  ;;  %11388 = vmatprep.mubr.bf16.mxu0 %v20120_v32  ;;  %v15845_v0 = vld [vmem:[%s17406_s11 + $0x318] ss:$12 sps:$4 sm:$0xff]  }
0x153a   : > { %v14334_v6 = vadd.f32 %v8393_v25, %v20102_v31  ;;  %v14319_v36 = vadd.f32 %v8249_v3, %v20091_v35  ;;  %v8395_v1 = vpop.f32.mrb[158].mxu0  ;;  %v8251_v11 = vpop.f32.mrb[127].mxu1  ;;  %11389 = vmatmul.mubr.bf16.vlgmr.msra.gmra.mrb[216].mxu0 %v20116_v33  ;;  %v8740_v55 = vmax.f32 %v14317_v24, 0.0  ;;  %v15849_v25 = vld [vmem:[%s17406_s11 + $0x4b8] ss:$12 sps:$4 sm:$0xff]  }
0x153b   : > { %v14335_v12 = vadd.f32 %v8395_v1, %v20095_v4  ;;  %10892 = vmatpush1.bf16.msra.mxu1 %v15835_v57  ;;  %v14320_v48 = vadd.f32 %v8251_v11, %v20099_v5  ;;  %v8397_v10 = vpop.f32.mrb[159].mxu0  ;;  %13830 = vmatpush3.bf16.msra.mxu0 %v15839_v54  ;;  %v8742_v37 = vmax.f32 %v14333_v22, 0.0  ;;  %v8741_v9 = vmax.f32 %v14318_v58, 0.0  ;;  %v15853_v1 = vld [vmem:[%s17406_s11 + $0x590] ss:$12 sps:$4 sm:$0xff]  }
0x153c   : > { %v8752_v46 = vmax.f32 %v14319_v36, 0.0  ;;  %v14336_v14 = vadd.f32 %v8397_v10, %v20102_v31  ;;  %10934 = vmatprep.subr.bf16.mxu1 %v15842_v20  ;;  %13831 = vmatprep.subr.bf16.mxu0 %v15843_v34  ;;  %v8743_v17 = vmax.f32 %v14334_v6, 0.0 }
0x153d   : > { %v8754_v53 = vmax.f32 %v14335_v12, 0.0  ;;  %v8753_v7 = vmax.f32 %v14320_v48, 0.0 }
0x153e   : > { %v20142_v15 = vpack.c.bf16 %v8752_v46, %v8740_v55  ;;  %v8755_v57 = vmax.f32 %v14336_v14, 0.0  ;;  %10894 = vmatmul.mubr.bf16.vlgmr.msra.gmra.mrb[152].mxu1 %v19931_v41  ;;  %v15852_v41 = vld [vmem:[%s17406_s11 + $0x334] ss:$12 sps:$4 sm:$0xff]   ;;  %v15850_v14 = vld [vmem:[%s17406_s11 + $0x330] ss:$12 sps:$4 sm:$0xff]  }
0x153f   : > { %v20145_v54 = vpack.c.bf16 %v8754_v53, %v8742_v37  ;;  %v20147_v24 = vpack.c.bf16 %v8753_v7, %v8741_v9  ;;  %10903 = vmatprep.mubr.bf16.mxu1 %v19960_v44  ;;  %10935 = vmatpush1.bf16.msra.mxu1 %v15840_v50  ;;  %v8255_v56 = vpop.f32.mrb[128].mxu1  ;;  %v15854_v9 = vld [vmem:[%s17406_s11 + $0x4d0] ss:$12 sps:$4 sm:$0xff]   ;;  %v15857_v53 = vld [vmem:[%s17406_s11 + $0x34c] ss:$12 sps:$4 sm:$0xff]  }
0x1540   : > { %v20151_v20 = vpack.c.bf16 %v8755_v57, %v8743_v17  ;;  %v14321_v34 = vadd.f32 %v8255_v56, %v20091_v35  ;;  %v8401_v22 = vpop.f32.mrb[160].mxu0  ;;  %13832 = vmatpush3.bf16.msra.mxu0 %v15844_v18  ;;  %v8257_v58 = vpop.f32.mrb[129].mxu1  ;;  %10936 = vmatprep.subr.bf16.mxu1 %v15847_v60  ;;  %v15858_v56 = vld [vmem:[%s17406_s11 + $0x5a8] ss:$12 sps:$4 sm:$0xff]  }
0x1541   : > { %v14337_v3 = vadd.f32 %v8401_v22, %v20095_v4  ;;  %v14322_v6 = vadd.f32 %v8257_v58, %v20099_v5  ;;  %v8403_v44 = vpop.f32.mrb[161].mxu0  ;;  %v8259_v36 = vpop.f32.mrb[130].mxu1  ;;  %11396 = vmatprep.mubr.bf16.mxu0 %v20147_v24  ;;  %13833 = vmatprep.subr.bf16.mxu0 %v15848_v19 }
0x1542   : > { %v14338_v11 = vadd.f32 %v8403_v44, %v20102_v31  ;;  %v14323_v12 = vadd.f32 %v8259_v36, %v20091_v35  ;;  %v8405_v48 = vpop.f32.mrb[162].mxu0  ;;  %v8261_v10 = vpop.f32.mrb[131].mxu1  ;;  %11397 = vmatmul.mubr.bf16.gmra.mrb[220].mxu0 %v20142_v15  ;;  %v8764_v18 = vmax.f32 %v14321_v34, 0.0 }
0x1543   : > { %v14339_v50 = vadd.f32 %v8405_v48, %v20095_v4  ;;  %10937 = vmatpush1.bf16.msra.mxu1 %v15845_v0  ;;  %v14324_v55 = vadd.f32 %v8261_v10, %v20099_v5  ;;  %v8407_v46 = vpop.f32.mrb[163].mxu0  ;;  %v8766_v7 = vmax.f32 %v14337_v3, 0.0  ;;  %v8765_v19 = vmax.f32 %v14322_v6, 0.0  ;;  %v15855_v3 = vld [vmem:[%s17406_s11 + $0x348] ss:$12 sps:$4 sm:$0xff]  }
0x1544   : > { %v8776_v60 = vmax.f32 %v14323_v12, 0.0  ;;  %v14340_v37 = vadd.f32 %v8407_v46, %v20102_v31  ;;  %13834 = vmatpush3.bf16.msra.mxu0 %v15849_v25  ;;  %10938 = vmatprep.subr.bf16.mxu1 %v15852_v41  ;;  %v8767_v0 = vmax.f32 %v14338_v11, 0.0  ;;  %v15859_v11 = vld [vmem:[%s17406_s11 + $0x4e8] ss:$12 sps:$4 sm:$0xff]  }
0x1545   : > { %v8778_v17 = vmax.f32 %v14339_v50, 0.0  ;;  %v8777_v57 = vmax.f32 %v14324_v55, 0.0  ;;  %13835 = vmatprep.subr.bf16.mxu0 %v15853_v1  ;;  %v15863_v50 = vld [vmem:[%s17406_s11 + $0x5c0] ss:$12 sps:$4 sm:$0xff]  }
0x1546   : > { %v20170_v22 = vpack.c.bf16 %v8776_v60, %v8764_v18  ;;  %v8779_v34 = vmax.f32 %v14340_v37, 0.0  ;;  %10904 = vmatmul.mubr.bf16.gmra.mrb[156].mxu1 %v19954_v27  ;;  %v15862_v27 = vld [vmem:[%s17406_s11 + $0x364] ss:$12 sps:$4 sm:$0xff]  }
0x1547   : > { %v20173_v58 = vpack.c.bf16 %v8778_v17, %v8766_v7  ;;  %v20175_v25 = vpack.c.bf16 %v8777_v57, %v8765_v19  ;;  %10913 = vmatprep.mubr.bf16.mxu1 %v19986_v30  ;;  %10939 = vmatpush1.bf16.msra.mxu1 %v15850_v14  ;;  %v8265_v41 = vpop.f32.mrb[132].mxu1  ;;  %v15864_v57 = vld [vmem:[%s17406_s11 + $0x500] ss:$12 sps:$4 sm:$0xff]  }
0x1548   : > { %v20179_v6 = vpack.c.bf16 %v8779_v34, %v8767_v0  ;;  %v14325_v44 = vadd.f32 %v8265_v41, %v20091_v35  ;;  %v8411_v36 = vpop.f32.mrb[164].mxu0  ;;  %13836 = vmatpush3.bf16.msra.mxu0 %v15854_v9  ;;  %v8267_v1 = vpop.f32.mrb[133].mxu1  ;;  %10940 = vmatprep.subr.bf16.mxu1 %v15857_v53  ;;  %v15860_v53 = vld [vmem:[%s17406_s11 + $0x360] ss:$12 sps:$4 sm:$0xff]   ;;  %v15868_v41 = vld [vmem:[%s17406_s11 + $0x5d8] ss:$12 sps:$4 sm:$0xff]  }
0x1549   : > { %v14341_v12 = vadd.f32 %v8411_v36, %v20095_v4  ;;  %v14326_v48 = vadd.f32 %v8267_v1, %v20099_v5  ;;  %v8413_v30 = vpop.f32.mrb[165].mxu0  ;;  %v8269_v10 = vpop.f32.mrb[134].mxu1  ;;  %11404 = vmatprep.mubr.bf16.mxu0 %v20175_v25  ;;  %13837 = vmatprep.subr.bf16.mxu0 %v15858_v56  ;;  %v15865_v1 = vld [vmem:[%s17406_s11 + $0x378] ss:$12 sps:$4 sm:$0xff]  }
0x154a   : > { %v14342_v55 = vadd.f32 %v8413_v30, %v20102_v31  ;;  %v14327_v46 = vadd.f32 %v8269_v10, %v20091_v35  ;;  %v8415_v14 = vpop.f32.mrb[166].mxu0  ;;  %v8271_v18 = vpop.f32.mrb[135].mxu1  ;;  %11405 = vmatmul.mubr.bf16.gmra.mrb[224].mxu0 %v20170_v22  ;;  %v8788_v7 = vmax.f32 %v14325_v44, 0.0  ;;  %v15867_v35 = vld [vmem:[%s17406_s11 + $0x37c] ss:$12 sps:$4 sm:$0xff]  }
0x154b   : > { %v14343_v60 = vadd.f32 %v8415_v14, %v20095_v4  ;;  %10941 = vmatpush1.bf16.msra.mxu1 %v15855_v3  ;;  %v14328_v37 = vadd.f32 %v8271_v18, %v20099_v5  ;;  %v8417_v9 = vpop.f32.mrb[167].mxu0  ;;  %v8790_v56 = vmax.f32 %v14341_v12, 0.0  ;;  %v8789_v0 = vmax.f32 %v14326_v48, 0.0  ;;  %v15872_v12 = vld [vmem:[%s17406_s11 + $0x394] ss:$12 sps:$4 sm:$0xff]  }
0x154c   : > { %v8800_v19 = vmax.f32 %v14327_v46, 0.0  ;;  %v14344_v17 = vadd.f32 %v8417_v9, %v20102_v31  ;;  %13838 = vmatpush3.bf16.msra.mxu0 %v15859_v11  ;;  %10942 = vmatprep.subr.bf16.mxu1 %v15862_v27  ;;  %v8791_v5 = vmax.f32 %v14342_v55, 0.0  ;;  %v15869_v27 = vld [vmem:[%s17406_s11 + $0x518] ss:$12 sps:$4 sm:$0xff]   ;;  %v15874_v48 = vld [vmem:[%s17406_s11 + $0x530] ss:$12 sps:$4 sm:$0xff]  }
0x154d   : > { %v8802_v34 = vmax.f32 %v14343_v60, 0.0  ;;  %v8801_v4 = vmax.f32 %v14328_v37, 0.0  ;;  %13839 = vmatprep.subr.bf16.mxu0 %v15863_v50  ;;  %v15877_v30 = vld [vmem:[%s17406_s11 + $0x3ac] ss:$12 sps:$4 sm:$0xff]   ;;  %v15902_v10 = vld [vmem:[%s17406_s11 + $0x6c8] ss:$12 sps:$4 sm:$0xff]  }
0x154e   : > { %v20198_v3 = vpack.c.bf16 %v8800_v19, %v8788_v7  ;;  %v8803_v44 = vmax.f32 %v14344_v17, 0.0  ;;  %10914 = vmatmul.mubr.bf16.gmra.mrb[160].mxu1 %v19980_v8  ;;  %v15873_v8 = vld [vmem:[%s17406_s11 + $0x5f0] ss:$12 sps:$4 sm:$0xff]   ;;  %v15875_v50 = vld [vmem:[%s17406_s11 + $0x3a8] ss:$12 sps:$4 sm:$0xff]  }
0x154f   : > { %v20201_v31 = vpack.c.bf16 %v8802_v34, %v8790_v56  ;;  %v20203_v36 = vpack.c.bf16 %v8801_v4, %v8789_v0  ;;  %10923 = vmatprep.mubr.bf16.mxu1 %v20012_v51  ;;  %10943 = vmatpush1.bf16.msra.mxu1 %v15860_v53  ;;  %v15870_v51 = vld [vmem:[%s17406_s11 + $0x390] ss:$12 sps:$4 sm:$0xff]   ;;  %v15903_v46 = vld [vmem:[%s17406_s11 + $0x608] ss:$12 sps:$4 sm:$0xff]   ;;  %v15907_v14 = vld [vmem:[%s17406_s11 + $0x6e0] ss:$12 sps:$4 sm:$0xff]  }
0x1550   : > { %v20207_v11 = vpack.c.bf16 %v8803_v44, %v8791_v5  ;;  %13840 = vmatpush3.bf16.msra.mxu0 %v15864_v57  ;;  %10944 = vmatprep.subr.bf16.mxu1 %v15867_v35  ;;  %v15880_v55 = vld [vmem:[%s17406_s11 + $0x3c4] ss:$12 sps:$4 sm:$0xff]   ;;  %v15908_v18 = vld [vmem:[%s17406_s11 + $0x620] ss:$12 sps:$4 sm:$0xff]   ;;  %v15922_v35 = vld [vmem:[%s17406_s11 + $0x728] ss:$12 sps:$4 sm:$0xff]  }
0x1551   : > { %11412 = vmatprep.mubr.bf16.mxu0 %v20203_v36  ;;  %13841 = vmatprep.subr.bf16.mxu0 %v15868_v41  ;;  %v15912_v60 = vld [vmem:[%s17406_s11 + $0x6f8] ss:$12 sps:$4 sm:$0xff]   ;;  %v15886_v9 = vld [vmem:[%s17406_s11 + $0x3f4] ss:$12 sps:$4 sm:$0xff]   ;;  %v15917_v7 = vld [vmem:[%s17406_s11 + $0x710] ss:$12 sps:$4 sm:$0xff]  }
0x1552   : > { %11413 = vmatmul.mubr.bf16.gmra.mrb[228].mxu0 %v20198_v3  ;;  %v15881_v37 = vld [vmem:[%s17406_s11 + $0x3d8] ss:$12 sps:$4 sm:$0xff]   ;;  %v15884_v19 = vld [vmem:[%s17406_s11 + $0x3f0] ss:$12 sps:$4 sm:$0xff]   ;;  %v15887_v56 = vld [vmem:[%s17406_s11 + $0x408] ss:$12 sps:$4 sm:$0xff]  }
0x1553   : > { %10945 = vmatpush1.bf16.msra.mxu1 %v15865_v1  ;;  %11453 = vmatprep.mubr.bf16.mxu0 %v20124_v26  ;;  %v15913_v53 = vld [vmem:[%s17406_s11 + $0x638] ss:$12 sps:$4 sm:$0xff]   ;;  %v15918_v57 = vld [vmem:[%s17406_s11 + $0x650] ss:$12 sps:$4 sm:$0xff]   ;;  %v15923_v34 = vld [vmem:[%s17406_s11 + $0x668] ss:$12 sps:$4 sm:$0xff]  }
0x1554   : > { %13842 = vmatpush3.bf16.msra.mxu0 %v15869_v27  ;;  %10946 = vmatprep.subr.bf16.mxu1 %v15872_v12  ;;  %v15889_v17 = vld [vmem:[%s17406_s11 + $0x40c] ss:$12 sps:$4 sm:$0xff]   ;;  %v15892_v0 = vld [vmem:[%s17406_s11 + $0x424] ss:$12 sps:$4 sm:$0xff]   ;;  %v15895_v5 = vld [vmem:[%s17406_s11 + $0x43c] ss:$12 sps:$4 sm:$0xff]  }
0x1555   : > { %13843 = vmatprep.subr.bf16.mxu0 %v15873_v8  ;;  %v15927_v4 = vld [vmem:[%s17406_s11 + $0x740] ss:$12 sps:$4 sm:$0xff]   ;;  %v15932_v1 = vld [vmem:[%s17406_s11 + $0x758] ss:$12 sps:$4 sm:$0xff]  }
0x1556   : > { %10924 = vmatmul.mubr.bf16.gmra.mrb[164].mxu1 %v20006_v2  ;;  %v15878_v2 = vld [vmem:[%s17406_s11 + $0x3c0] ss:$12 sps:$4 sm:$0xff]   ;;  %v15893_v27 = vld [vmem:[%s17406_s11 + $0x438] ss:$12 sps:$4 sm:$0xff]  }
0x1557   : > { %10947 = vmatpush1.bf16.msra.mxu1 %v15870_v51  ;;  %10966 = vmatprep.mubr.bf16.mxu1 %v20120_v32  ;;  %v15883_v32 = vld [vmem:[%s17406_s11 + $0x3dc] ss:$12 sps:$4 sm:$0xff]   ;;  %v15890_v41 = vld [vmem:[%s17406_s11 + $0x420] ss:$12 sps:$4 sm:$0xff]   ;;  %v15933_v8 = vld [vmem:[%s17406_s11 + $0x698] ss:$12 sps:$4 sm:$0xff]  }
0x1558   : > { %13844 = vmatpush3.bf16.msra.mxu0 %v15874_v48  ;;  %10948 = vmatprep.subr.bf16.mxu1 %v15877_v30  ;;  %v15928_v44 = vld [vmem:[%s17406_s11 + $0x680] ss:$12 sps:$4 sm:$0xff]   ;;  %v15937_v51 = vld [vmem:[%s17406_s11 + $0x770] ss:$12 sps:$4 sm:$0xff]  }
0x1559   : > { %13869 = vmatprep.subr.bf16.mxu0 %v15902_v10  ;;  %v15898_v12 = vld [vmem:[%s17406_s11 + $0x454] ss:$12 sps:$4 sm:$0xff]   ;;  %v15896_v48 = vld [vmem:[%s17406_s11 + $0x450] ss:$12 sps:$4 sm:$0xff]   ;;  %v15901_v30 = vld [vmem:[%s17406_s11 + $0x46c] ss:$12 sps:$4 sm:$0xff]  }
0x155a   : > { %v15938_v10 = vld [vmem:[%s17406_s11 + $0x6b0] ss:$12 sps:$4 sm:$0xff]  }
0x155b   : > { %10949 = vmatpush1.bf16.msra.mxu1 %v15875_v50  ;;  %11454 = vmatmul.mubr.bf16.vlgmr.msra.gmra.mrb[232].mxu0 %v20118_v38  ;;  %v15942_v50 = vld [vmem:[%s17406_s11 + $0x848] ss:$12 sps:$4 sm:$0xff]  }
0x155c   : > { %11461 = vmatprep.mubr.bf16.mxu0 %v20151_v20  ;;  %10950 = vmatprep.subr.bf16.mxu1 %v15880_v55  ;;  %v15899_v55 = vld [vmem:[%s17406_s11 + $0x468] ss:$12 sps:$4 sm:$0xff]  }
0x155d   : > { %13870 = vmatpush3.bf16.msra.mxu0 %v15903_v46  ;;  %v15906_v46 = vld [vmem:[%s17406_s11 + $0x484] ss:$12 sps:$4 sm:$0xff]  }
0x155e   : > { %13871 = vmatprep.subr.bf16.mxu0 %v15907_v14  ;;  %v15904_v14 = vld [vmem:[%s17406_s11 + $0x480] ss:$12 sps:$4 sm:$0xff]  }
0x155f   : > { %10951 = vmatpush1.bf16.msra.mxu1 %v15878_v2  ;;  %v15911_v2 = vld [vmem:[%s17406_s11 + $0x49c] ss:$12 sps:$4 sm:$0xff]  }
0x1560   : > { %10952 = vmatprep.subr.bf16.mxu1 %v15883_v32  ;;  %v15909_v32 = vld [vmem:[%s17406_s11 + $0x498] ss:$12 sps:$4 sm:$0xff]  }
0x1561   : > { %13872 = vmatpush3.bf16.msra.mxu0 %v15908_v18  ;;  %v15916_v18 = vld [vmem:[%s17406_s11 + $0x4b4] ss:$12 sps:$4 sm:$0xff]  }
0x1562   : > { %13873 = vmatprep.subr.bf16.mxu0 %v15912_v60  ;;  %v15914_v60 = vld [vmem:[%s17406_s11 + $0x4b0] ss:$12 sps:$4 sm:$0xff]  }
0x1563   : > { %10953 = vmatpush1.bf16.msra.mxu1 %v15881_v37  ;;  %11462 = vmatmul.mubr.bf16.gmra.mrb[236].mxu0 %v20145_v54  ;;  %v15921_v37 = vld [vmem:[%s17406_s11 + $0x4cc] ss:$12 sps:$4 sm:$0xff]  }
0x1564   : > { %11469 = vmatprep.mubr.bf16.mxu0 %v20179_v6  ;;  %10954 = vmatprep.subr.bf16.mxu1 %v15886_v9  ;;  %v15926_v9 = vld [vmem:[%s17406_s11 + $0x4e4] ss:$12 sps:$4 sm:$0xff]  }
0x1565   : > { %13874 = vmatpush3.bf16.msra.mxu0 %v15913_v53  ;;  %v15924_v53 = vld [vmem:[%s17406_s11 + $0x4e0] ss:$12 sps:$4 sm:$0xff]  }
0x1566   : > { %13875 = vmatprep.subr.bf16.mxu0 %v15917_v7  ;;  %v15931_v7 = vld [vmem:[%s17406_s11 + $0x4fc] ss:$12 sps:$4 sm:$0xff]  }
0x1567   : > { %10955 = vmatpush1.bf16.msra.mxu1 %v15884_v19 }
0x1568   : > { %10956 = vmatprep.subr.bf16.mxu1 %v15889_v17 }
0x1569   : > { %13876 = vmatpush3.bf16.msra.mxu0 %v15918_v57  ;;  %v15929_v57 = vld [vmem:[%s17406_s11 + $0x4f8] ss:$12 sps:$4 sm:$0xff]  }
0x156a   : > { %13877 = vmatprep.subr.bf16.mxu0 %v15922_v35 }
0x156b   : > { %10957 = vmatpush1.bf16.msra.mxu1 %v15887_v56  ;;  %11470 = vmatmul.mubr.bf16.gmra.mrb[240].mxu0 %v20173_v58 }
0x156c   : > { %11477 = vmatprep.mubr.bf16.mxu0 %v20207_v11  ;;  %10958 = vmatprep.subr.bf16.mxu1 %v15892_v0 }
0x156d   : > { %13878 = vmatpush3.bf16.msra.mxu0 %v15923_v34 }
0x156e   : > { %13879 = vmatprep.subr.bf16.mxu0 %v15927_v4 }
0x156f   : > { %10959 = vmatpush1.bf16.msra.mxu1 %v15890_v41 }
0x1570   : > { %10960 = vmatprep.subr.bf16.mxu1 %v15895_v5 }
0x1571   : > { %13880 = vmatpush3.bf16.msra.mxu0 %v15928_v44 }
0x1572   : > { %13881 = vmatprep.subr.bf16.mxu0 %v15932_v1 }
0x1573   : > { %10961 = vmatpush1.bf16.msra.mxu1 %v15893_v27  ;;  %11478 = vmatmul.mubr.bf16.gmra.mrb[244].mxu0 %v20201_v31  ;;  %v15934_v27 = vld [vmem:[%s17406_s11 + $0x510] ss:$12 sps:$4 sm:$0xff]  }
0x1574   : > { %10962 = vmatprep.subr.bf16.mxu1 %v15898_v12 }
0x1575   : > { %13882 = vmatpush3.bf16.msra.mxu0 %v15933_v8 }
0x1576   : > { %13883 = vmatprep.subr.bf16.mxu0 %v15937_v51 }
0x1577   : > { %10963 = vmatpush1.bf16.msra.mxu1 %v15896_v48  ;;  %v15941_v48 = vld [vmem:[%s17406_s11 + $0x52c] ss:$12 sps:$4 sm:$0xff]  }
0x1578   : > { %10964 = vmatprep.subr.bf16.mxu1 %v15901_v30 }
0x1579   : > { %13884 = vmatpush3.bf16.msra.mxu0 %v15938_v10 }
0x157a   : > { %13909 = vmatprep.subr.bf16.mxu0 %v15942_v50 }
0x157b   : > { %10965 = vmatpush1.bf16.msra.mxu1 %v15899_v55 }
0x157c   : > { %11007 = vmatprep.subr.bf16.mxu1 %v15906_v46 }
0x157e   : > { %10967 = vmatmul.mubr.bf16.vlgmr.msra.gmra.mrb[152].mxu1 %v20116_v33  ;;  %v15919_v33 = vld [vmem:[%s17406_s11 + $0x4c8] ss:$12 sps:$4 sm:$0xff]  }
0x157f   : > { %10976 = vmatprep.mubr.bf16.mxu1 %v20147_v24  ;;  %11008 = vmatpush1.bf16.msra.mxu1 %v15904_v14  ;;  %v6333_v24 = vld [vmem:[%s17400_s27 + $0x8] sm:$0xf] }
0x1580   : > { %11009 = vmatprep.subr.bf16.mxu1 %v15911_v2  ;;  %v20278_v19 = vrot.slane %v6333_v24, %v21221_v13  ;;  %v20289_v17 = vrot.slane %v6333_v24, %v19390_v28  ;;  %v15936_v13 = vld [vmem:[%s17406_s11 + $0x514] ss:$12 sps:$4 sm:$0xff]  }
0x1583   : > { %11010 = vmatpush1.bf16.msra.mxu1 %v15909_v32 }
0x1584   : > { %11011 = vmatprep.subr.bf16.mxu1 %v15916_v18 }
0x1586   : > { %10977 = vmatmul.mubr.bf16.gmra.mrb[156].mxu1 %v20142_v15  ;;  %v20282_v15 = vrot.slane %v6333_v24, %v19077_v23 }
0x1587   : > { %10986 = vmatprep.mubr.bf16.mxu1 %v20175_v25  ;;  %11012 = vmatpush1.bf16.msra.mxu1 %v15914_v60  ;;  %v20285_v25 = vrot.slane %v6333_v24, %v21222_v47 }
0x1588   : > { %11013 = vmatprep.subr.bf16.mxu1 %v15921_v37  ;;  %v15939_v37 = vld [vmem:[%s17406_s11 + $0x528] ss:$12 sps:$4 sm:$0xff]  }
0x158b   : > { %11014 = vmatpush1.bf16.msra.mxu1 %v15919_v33 }
0x158c   : > { %11015 = vmatprep.subr.bf16.mxu1 %v15926_v9 }
0x158e   : > { %10987 = vmatmul.mubr.bf16.gmra.mrb[160].mxu1 %v20170_v22 }
0x158f   : > { %10996 = vmatprep.mubr.bf16.mxu1 %v20203_v36  ;;  %11016 = vmatpush1.bf16.msra.mxu1 %v15924_v53  ;;  %v15943_v53 = vld [vmem:[%s17406_s11 + $0x788] ss:$12 sps:$4 sm:$0xff]  }
0x1590   : > { %v8527_v35 = vpop.f32.mrb[136].mxu1  ;;  %11017 = vmatprep.subr.bf16.mxu1 %v15931_v7  ;;  %v15946_v7 = vld [vmem:[%s17406_s11 + $0x544] ss:$12 sps:$4 sm:$0xff]  }
0x1591   : > { %v14345_v56 = vadd.f32 %v8527_v35, %v20278_v19  ;;  %v8673_v22 = vpop.f32.mrb[168].mxu0  ;;  %v8529_v0 = vpop.f32.mrb[137].mxu1 }
0x1592   : > { %v14361_v34 = vadd.f32 %v8673_v22, %v20282_v15  ;;  %v14346_v47 = vadd.f32 %v8529_v0, %v20285_v25  ;;  %v8675_v4 = vpop.f32.mrb[169].mxu0  ;;  %v8531_v36 = vpop.f32.mrb[138].mxu1 }
0x1593   : > { %v14362_v41 = vadd.f32 %v8675_v4, %v20289_v17  ;;  %v14347_v5 = vadd.f32 %v8531_v36, %v20278_v19  ;;  %v8677_v44 = vpop.f32.mrb[170].mxu0  ;;  %11018 = vmatpush1.bf16.msra.mxu1 %v15929_v57  ;;  %v8533_v1 = vpop.f32.mrb[139].mxu1  ;;  %v8720_v30 = vmax.f32 %v14345_v56, 0.0  ;;  %v15947_v56 = vld [vmem:[%s17406_s11 + $0x860] ss:$12 sps:$4 sm:$0xff]  }
0x1594   : > { %v14363_v12 = vadd.f32 %v8677_v44, %v20282_v15  ;;  %v14348_v8 = vadd.f32 %v8533_v1, %v20285_v25  ;;  %v8679_v51 = vpop.f32.mrb[171].mxu0  ;;  %11019 = vmatprep.subr.bf16.mxu1 %v15936_v13  ;;  %v8722_v55 = vmax.f32 %v14361_v34, 0.0  ;;  %v8721_v46 = vmax.f32 %v14346_v47, 0.0 }
0x1595   : > { %v8732_v10 = vmax.f32 %v14347_v5, 0.0  ;;  %v14364_v50 = vadd.f32 %v8679_v51, %v20289_v17  ;;  %v8723_v32 = vmax.f32 %v14362_v41, 0.0  ;;  %v15944_v5 = vld [vmem:[%s17406_s11 + $0x540] ss:$12 sps:$4 sm:$0xff]  }
0x1596   : > { %v8734_v14 = vmax.f32 %v14363_v12, 0.0  ;;  %v8733_v2 = vmax.f32 %v14348_v8, 0.0  ;;  %10997 = vmatmul.mubr.bf16.gmra.mrb[164].mxu1 %v20198_v3  ;;  %v15948_v12 = vld [vmem:[%s17406_s11 + $0x7a0] ss:$12 sps:$4 sm:$0xff]   ;;  %v15951_v8 = vld [vmem:[%s17406_s11 + $0x55c] ss:$12 sps:$4 sm:$0xff]  }
0x1597   : > { %v20304_v18 = vpack.c.bf16 %v8732_v10, %v8720_v30  ;;  %v8735_v60 = vmax.f32 %v14364_v50, 0.0  ;;  %11020 = vmatpush1.bf16.msra.mxu1 %v15934_v27  ;;  %11039 = vmatprep.mubr.bf16.mxu1 %v20124_v26  ;;  %v15952_v10 = vld [vmem:[%s17406_s11 + $0x878] ss:$12 sps:$4 sm:$0xff]  }
0x1598   : > { %v20308_v33 = vpack.c.bf16 %v8734_v14, %v8722_v55  ;;  %v20310_v9 = vpack.c.bf16 %v8733_v2, %v8721_v46  ;;  %v8537_v24 = vpop.f32.mrb[140].mxu1  ;;  %11021 = vmatprep.subr.bf16.mxu1 %v15941_v48 }
0x1599   : > { %v20314_v57 = vpack.c.bf16 %v8735_v60, %v8723_v32  ;;  %v14349_v3 = vadd.f32 %v8537_v24, %v20278_v19  ;;  %v8683_v35 = vpop.f32.mrb[172].mxu0  ;;  %v8539_v13 = vpop.f32.mrb[141].mxu1 }
0x159a   : > { %v14365_v22 = vadd.f32 %v8683_v35, %v20282_v15  ;;  %v14350_v26 = vadd.f32 %v8539_v13, %v20285_v25  ;;  %v8685_v0 = vpop.f32.mrb[173].mxu0  ;;  %v8541_v34 = vpop.f32.mrb[142].mxu1  ;;  %11518 = vmatprep.mubr.bf16.mxu0 %v20310_v9  ;;  %v15956_v35 = vld [vmem:[%s17406_s11 + $0x574] ss:$12 sps:$4 sm:$0xff]  }
0x159b   : > { %v14366_v47 = vadd.f32 %v8685_v0, %v20289_v17  ;;  %v14351_v4 = vadd.f32 %v8541_v34, %v20278_v19  ;;  %v8687_v36 = vpop.f32.mrb[174].mxu0  ;;  %11022 = vmatpush1.bf16.msra.mxu1 %v15939_v37  ;;  %v8543_v41 = vpop.f32.mrb[143].mxu1  ;;  %11519 = vmatmul.mubr.bf16.vlgmr.msra.gmra.mrb[248].mxu0 %v20304_v18  ;;  %v8744_v51 = vmax.f32 %v14349_v3, 0.0  ;;  %v15949_v37 = vld [vmem:[%s17406_s11 + $0x558] ss:$12 sps:$4 sm:$0xff]  }
0x159c   : > { %v14367_v44 = vadd.f32 %v8687_v36, %v20282_v15  ;;  %v14352_v1 = vadd.f32 %v8543_v41, %v20285_v25  ;;  %v8689_v27 = vpop.f32.mrb[175].mxu0  ;;  %13910 = vmatpush3.bf16.msra.mxu0 %v15943_v53  ;;  %11023 = vmatprep.subr.bf16.mxu1 %v15946_v7  ;;  %v8746_v50 = vmax.f32 %v14365_v22, 0.0  ;;  %v8745_v55 = vmax.f32 %v14350_v26, 0.0  ;;  %v15953_v3 = vld [vmem:[%s17406_s11 + $0x7b8] ss:$12 sps:$4 sm:$0xff]  }
0x159d   : > { %v8756_v48 = vmax.f32 %v14351_v4, 0.0  ;;  %v14368_v30 = vadd.f32 %v8689_v27, %v20289_v17  ;;  %13911 = vmatprep.subr.bf16.mxu0 %v15947_v56  ;;  %v8747_v2 = vmax.f32 %v14366_v47, 0.0  ;;  %v15957_v0 = vld [vmem:[%s17406_s11 + $0x890] ss:$12 sps:$4 sm:$0xff]  }
0x159e   : > { %v8758_v46 = vmax.f32 %v14367_v44, 0.0  ;;  %v8757_v14 = vmax.f32 %v14352_v1, 0.0  ;;  %v15954_v27 = vld [vmem:[%s17406_s11 + $0x570] ss:$12 sps:$4 sm:$0xff]  }
0x159f   : > { %v20331_v32 = vpack.c.bf16 %v8756_v48, %v8744_v51  ;;  %v8759_v60 = vmax.f32 %v14368_v30, 0.0  ;;  %11024 = vmatpush1.bf16.msra.mxu1 %v15944_v5  ;;  %v15958_v48 = vld [vmem:[%s17406_s11 + $0x7d0] ss:$12 sps:$4 sm:$0xff]   ;;  %v15961_v30 = vld [vmem:[%s17406_s11 + $0x58c] ss:$12 sps:$4 sm:$0xff]  }
0x15a0   : > { %v20334_v24 = vpack.c.bf16 %v8758_v46, %v8746_v50  ;;  %v20336_v53 = vpack.c.bf16 %v8757_v14, %v8745_v55  ;;  %v8547_v7 = vpop.f32.mrb[144].mxu1  ;;  %13912 = vmatpush3.bf16.msra.mxu0 %v15948_v12  ;;  %11025 = vmatprep.subr.bf16.mxu1 %v15951_v8  ;;  %v15962_v46 = vld [vmem:[%s17406_s11 + $0x8a8] ss:$12 sps:$4 sm:$0xff]  }
0x15a1   : > { %v20340_v13 = vpack.c.bf16 %v8759_v60, %v8747_v2  ;;  %v14353_v56 = vadd.f32 %v8547_v7, %v20278_v19  ;;  %v8693_v22 = vpop.f32.mrb[176].mxu0  ;;  %v8549_v26 = vpop.f32.mrb[145].mxu1  ;;  %13913 = vmatprep.subr.bf16.mxu0 %v15952_v10 }
0x15a2   : > { %v14369_v34 = vadd.f32 %v8693_v22, %v20282_v15  ;;  %v14354_v47 = vadd.f32 %v8549_v26, %v20285_v25  ;;  %v8695_v4 = vpop.f32.mrb[177].mxu0  ;;  %v8551_v36 = vpop.f32.mrb[146].mxu1  ;;  %11526 = vmatprep.mubr.bf16.mxu0 %v20336_v53 }
0x15a3   : > { %v14370_v41 = vadd.f32 %v8695_v4, %v20289_v17  ;;  %v14355_v5 = vadd.f32 %v8551_v36, %v20278_v19  ;;  %v8697_v44 = vpop.f32.mrb[178].mxu0  ;;  %11026 = vmatpush1.bf16.msra.mxu1 %v15949_v37  ;;  %v8553_v1 = vpop.f32.mrb[147].mxu1  ;;  %11527 = vmatmul.mubr.bf16.gmra.mrb[252].mxu0 %v20331_v32  ;;  %v8768_v10 = vmax.f32 %v14353_v56, 0.0  ;;  %v15966_v36 = vld [vmem:[%s17406_s11 + $0x5a4] ss:$12 sps:$4 sm:$0xff]  }
0x15a4   : > { %v14371_v12 = vadd.f32 %v8697_v44, %v20282_v15  ;;  %v14356_v8 = vadd.f32 %v8553_v1, %v20285_v25  ;;  %v8699_v51 = vpop.f32.mrb[179].mxu0  ;;  %13914 = vmatpush3.bf16.msra.mxu0 %v15953_v3  ;;  %11027 = vmatprep.subr.bf16.mxu1 %v15956_v35  ;;  %v8770_v14 = vmax.f32 %v14369_v34, 0.0  ;;  %v8769_v2 = vmax.f32 %v14354_v47, 0.0  ;;  %v15959_v35 = vld [vmem:[%s17406_s11 + $0x588] ss:$12 sps:$4 sm:$0xff]  }
0x15a5   : > { %v8780_v50 = vmax.f32 %v14355_v5, 0.0  ;;  %v14372_v55 = vadd.f32 %v8699_v51, %v20289_v17  ;;  %13915 = vmatprep.subr.bf16.mxu0 %v15957_v0  ;;  %v8771_v7 = vmax.f32 %v14370_v41, 0.0  ;;  %v15963_v0 = vld [vmem:[%s17406_s11 + $0x7e8] ss:$12 sps:$4 sm:$0xff]   ;;  %v15967_v44 = vld [vmem:[%s17406_s11 + $0x8c0] ss:$12 sps:$4 sm:$0xff]  }
0x15a6   : > { %v8782_v60 = vmax.f32 %v14371_v12, 0.0  ;;  %v8781_v37 = vmax.f32 %v14356_v8, 0.0 }
0x15a7   : > { %v20357_v22 = vpack.c.bf16 %v8780_v50, %v8768_v10  ;;  %v8783_v3 = vmax.f32 %v14372_v55, 0.0  ;;  %11028 = vmatpush1.bf16.msra.mxu1 %v15954_v27  ;;  %v15964_v50 = vld [vmem:[%s17406_s11 + $0x5a0] ss:$12 sps:$4 sm:$0xff]  }
0x15a8   : > { %v20360_v26 = vpack.c.bf16 %v8782_v60, %v8770_v14  ;;  %v20362_v56 = vpack.c.bf16 %v8781_v37, %v8769_v2  ;;  %v8557_v4 = vpop.f32.mrb[148].mxu1  ;;  %13916 = vmatpush3.bf16.msra.mxu0 %v15958_v48  ;;  %11029 = vmatprep.subr.bf16.mxu1 %v15961_v30  ;;  %v15968_v2 = vld [vmem:[%s17406_s11 + $0x800] ss:$12 sps:$4 sm:$0xff]   ;;  %v15971_v60 = vld [vmem:[%s17406_s11 + $0x5bc] ss:$12 sps:$4 sm:$0xff]  }
0x15a9   : > { %v20366_v34 = vpack.c.bf16 %v8783_v3, %v8771_v7  ;;  %v14357_v47 = vadd.f32 %v8557_v4, %v20278_v19  ;;  %v8703_v41 = vpop.f32.mrb[180].mxu0  ;;  %v8559_v5 = vpop.f32.mrb[149].mxu1  ;;  %13917 = vmatprep.subr.bf16.mxu0 %v15962_v46  ;;  %v15972_v3 = vld [vmem:[%s17406_s11 + $0x8d8] ss:$12 sps:$4 sm:$0xff]  }
0x15aa   : > { %v14373_v1 = vadd.f32 %v8703_v41, %v20282_v15  ;;  %v14358_v27 = vadd.f32 %v8559_v5, %v20285_v25  ;;  %v8705_v12 = vpop.f32.mrb[181].mxu0  ;;  %v8561_v8 = vpop.f32.mrb[150].mxu1  ;;  %11534 = vmatprep.mubr.bf16.mxu0 %v20362_v56 }
0x15ab   : > { %v14374_v51 = vadd.f32 %v8705_v12, %v20289_v17  ;;  %v14359_v48 = vadd.f32 %v8561_v8, %v20278_v19  ;;  %v8707_v30 = vpop.f32.mrb[182].mxu0  ;;  %11030 = vmatpush1.bf16.msra.mxu1 %v15959_v35  ;;  %v8563_v10 = vpop.f32.mrb[151].mxu1  ;;  %11535 = vmatmul.mubr.bf16.gmra.mrb[0].mxu0 %v20357_v22  ;;  %v8792_v37 = vmax.f32 %v14357_v47, 0.0  ;;  %v15977_v8 = vld [vmem:[%s17406_s11 + $0x8f0] ss:$12 sps:$4 sm:$0xff]  }
0x15ac   : > { %v14375_v55 = vadd.f32 %v8707_v30, %v20282_v15  ;;  %v14360_v46 = vadd.f32 %v8563_v10, %v20285_v25  ;;  %v8709_v14 = vpop.f32.mrb[183].mxu0  ;;  %13918 = vmatpush3.bf16.msra.mxu0 %v15963_v0  ;;  %11031 = vmatprep.subr.bf16.mxu1 %v15966_v36  ;;  %v8794_v35 = vmax.f32 %v14373_v1, 0.0  ;;  %v8793_v4 = vmax.f32 %v14358_v27, 0.0  ;;  %v15969_v36 = vld [vmem:[%s17406_s11 + $0x5b8] ss:$12 sps:$4 sm:$0xff]  }
0x15ad   : > { %v8804_v7 = vmax.f32 %v14359_v48, 0.0  ;;  %v14376_v19 = vadd.f32 %v8709_v14, %v20289_v17  ;;  %13919 = vmatprep.subr.bf16.mxu0 %v15967_v44  ;;  %v8795_v25 = vmax.f32 %v14374_v51, 0.0  ;;  %v15973_v17 = vld [vmem:[%s17406_s11 + $0x818] ss:$12 sps:$4 sm:$0xff]   ;;  %v15976_v27 = vld [vmem:[%s17406_s11 + $0x5d4] ss:$12 sps:$4 sm:$0xff]  }
0x15ae   : > { %v8806_v41 = vmax.f32 %v14375_v55, 0.0  ;;  %v8805_v15 = vmax.f32 %v14360_v46, 0.0  ;;  %v15974_v10 = vld [vmem:[%s17406_s11 + $0x5d0] ss:$12 sps:$4 sm:$0xff]   ;;  %v15981_v46 = vld [vmem:[%s17406_s11 + $0x5ec] ss:$12 sps:$4 sm:$0xff]  }
0x15af   : > { %v20383_v5 = vpack.c.bf16 %v8804_v7, %v8792_v37  ;;  %v8807_v0 = vmax.f32 %v14376_v19, 0.0  ;;  %11032 = vmatpush1.bf16.msra.mxu1 %v15964_v50  ;;  %v15978_v55 = vld [vmem:[%s17406_s11 + $0x830] ss:$12 sps:$4 sm:$0xff]  }
0x15b0   : > { %v20386_v12 = vpack.c.bf16 %v8806_v41, %v8794_v35  ;;  %v20388_v47 = vpack.c.bf16 %v8805_v15, %v8793_v4  ;;  %13920 = vmatpush3.bf16.msra.mxu0 %v15968_v2  ;;  %11033 = vmatprep.subr.bf16.mxu1 %v15971_v60  ;;  %v15979_v2 = vld [vmem:[%s17406_s11 + $0x5e8] ss:$12 sps:$4 sm:$0xff]   ;;  %v15984_v60 = vld [vmem:[%s17406_s11 + $0x604] ss:$12 sps:$4 sm:$0xff]   ;;  %v15982_v35 = vld [vmem:[%s17406_s11 + $0x600] ss:$12 sps:$4 sm:$0xff]  }
0x15b1   : > { %v20391_v44 = vpack.c.bf16 %v8807_v0, %v8795_v25  ;;  %v13725_v1 = vpop.f32.mrb[184].mxu0  ;;  %13921 = vmatprep.subr.bf16.mxu0 %v15972_v3  ;;  %v15987_v41 = vld [vmem:[%s17406_s11 + $0x61c] ss:$12 sps:$4 sm:$0xff]   ;;  %v15985_v25 = vld [vmem:[%s17406_s11 + $0x618] ss:$12 sps:$4 sm:$0xff]  }
0x15b2   : > { %v13726_v51 = vpop.f32.mrb[185].mxu0  ;;  %11542 = vmatprep.mubr.bf16.mxu0 %v20388_v47  ;;  %v15990_v0 = vld [vmem:[%s17406_s11 + $0x634] ss:$12 sps:$4 sm:$0xff]  }
0x15b3   : > { %v20396_v48 = vadd.f32 %v13726_v51, %v13725_v1  ;;  %11034 = vmatpush1.bf16.msra.mxu1 %v15969_v36  ;;  %v13728_v30 = vpop.f32.mrb[186].mxu0  ;;  %11543 = vmatmul.mubr.bf16.gmra.mrb[4].mxu0 %v20383_v5 }
0x15b4   : > { %v13729_v50 = vpop.f32.mrb[187].mxu0  ;;  %13922 = vmatpush3.bf16.msra.mxu0 %v15973_v17  ;;  %11583 = vmatprep.mubr.bf16.mxu0 %v20314_v57 }
0x15b5   : > { %v20403_v14 = vadd.f32 %v13729_v50, %v13728_v30  ;;  %11035 = vmatprep.subr.bf16.mxu1 %v15976_v27  ;;  %13923 = vmatprep.subr.bf16.mxu0 %v15977_v8  ;;  %v15988_v8 = vld [vmem:[%s17406_s11 + $0x630] ss:$12 sps:$4 sm:$0xff]   ;;  %v15991_v30 = vld [vmem:[%s17406_s11 + $0x648] ss:$12 sps:$4 sm:$0xff]  }
0x15b7   : > { %11036 = vmatpush1.bf16.msra.mxu1 %v15974_v10  ;;  %v15996_v10 = vld [vmem:[%s17406_s11 + $0x664] ss:$12 sps:$4 sm:$0xff]  }
0x15b8   : > { %13924 = vmatpush3.bf16.msra.mxu0 %v15978_v55  ;;  %11037 = vmatprep.subr.bf16.mxu1 %v15981_v46 }
0x15b9   : > { %v13731_v37 = vpop.f32.mrb[188].mxu0 }
0x15ba   : > { %v13732_v7 = vpop.f32.mrb[189].mxu0 }
0x15bb   : > { %v20407_v19 = vadd.f32 %v13732_v7, %v13731_v37  ;;  %11038 = vmatpush1.bf16.msra.mxu1 %v15979_v2  ;;  %v13734_v3 = vpop.f32.mrb[190].mxu0  ;;  %11584 = vmatmul.mubr.bf16.vlgmr.msra.gmra.mrb[8].mxu0 %v20308_v33  ;;  %v16347_v7 = vld [vmem:[%s17384_s30 + $0x10] sm:$0x3f] }
0x15bc   : > { %v13735_v4 = vpop.f32.mrb[191].mxu0  ;;  %11591 = vmatprep.mubr.bf16.mxu0 %v20340_v13  ;;  %11080 = vmatprep.subr.bf16.mxu1 %v15984_v60  ;;  %v15994_v60 = vld [vmem:[%s17406_s11 + $0x660] ss:$12 sps:$4 sm:$0xff]  }
0x15bd   : > { %v20413_v15 = vadd.f32 %v13735_v4, %v13734_v3  ;;  %v20442_v3 = vrot.slane %v16347_v7, %v20085_v40  ;;  %v16002_v4 = vld [vmem:[%s17406_s11 + $0x694] ss:$12 sps:$4 sm:$0xff]  }
0x15be   : > { %11040 = vmatmul.mubr.bf16.vlgmr.msra.gmra.mrb[152].mxu1 %v20118_v38  ;;  %v15993_v38 = vld [vmem:[%s17406_s11 + $0x64c] ss:$12 sps:$4 sm:$0xff]  }
0x15bf   : > { %11049 = vmatprep.mubr.bf16.mxu1 %v20151_v20  ;;  %11081 = vmatpush1.bf16.msra.mxu1 %v15982_v35  ;;  %v15997_v35 = vld [vmem:[%s17406_s11 + $0x678] ss:$12 sps:$4 sm:$0xff]  }
0x15c0   : > { %11082 = vmatprep.subr.bf16.mxu1 %v15987_v41 }
0x15c1   : > { %v13737_v36 = vpop.f32.mrb[192].mxu0 }
0x15c2   : > { %v13738_v17 = vpop.f32.mrb[193].mxu0 }
0x15c3   : > { %v20419_v1 = vadd.f32 %v13738_v17, %v13737_v36  ;;  %11083 = vmatpush1.bf16.msra.mxu1 %v15985_v25  ;;  %v13740_v27 = vpop.f32.mrb[194].mxu0  ;;  %11592 = vmatmul.mubr.bf16.gmra.mrb[12].mxu0 %v20334_v24  ;;  %v16000_v17 = vld [vmem:[%s17406_s11 + $0x690] ss:$12 sps:$4 sm:$0xff]  }
0x15c4   : > { %v13741_v51 = vpop.f32.mrb[195].mxu0  ;;  %11599 = vmatprep.mubr.bf16.mxu0 %v20366_v34  ;;  %11084 = vmatprep.subr.bf16.mxu1 %v15990_v0  ;;  %v11261_v0 = vadd.f32 %v20396_v48, %v20442_v3 }
0x15c5   : > { %v20425_v20 = vadd.f32 %v13741_v51, %v13740_v27 }
0x15c6   : > { %11050 = vmatmul.mubr.bf16.gmra.mrb[156].mxu1 %v20145_v54 }
0x15c7   : > { %11059 = vmatprep.mubr.bf16.mxu1 %v20179_v6  ;;  %11085 = vmatpush1.bf16.msra.mxu1 %v15988_v8  ;;  %v15999_v6 = vld [vmem:[%s17406_s11 + $0x67c] ss:$12 sps:$4 sm:$0xff]   ;;  %v11264_v8 = vadd.f32 %v20403_v14, %v20442_v3  ;;  %v11269_v14 = vadd.f32 %v20407_v19, %v20442_v3  ;;  %v16014_v19 = vld [vmem:[%s17406_s11 + $0x6f4] ss:$12 sps:$4 sm:$0xff]  }
0x15c8   : > { %11086 = vmatprep.subr.bf16.mxu1 %v15993_v38 }
0x15c9   : > { %v13743_v50 = vpop.f32.mrb[196].mxu0 }
0x15ca   : > { %v13744_v55 = vpop.f32.mrb[197].mxu0 }
0x15cb   : > { %v20431_v46 = vadd.f32 %v13744_v55, %v13743_v50  ;;  %11087 = vmatpush1.bf16.msra.mxu1 %v15991_v30  ;;  %v13746_v2 = vpop.f32.mrb[198].mxu0  ;;  %11600 = vmatmul.mubr.bf16.gmra.mrb[16].mxu0 %v20360_v26  ;;  %v16003_v30 = vld [vmem:[%s17406_s11 + $0x6a8] ss:$12 sps:$4 sm:$0xff]  }
0x15cc   : > { %v13747_v54 = vpop.f32.mrb[199].mxu0  ;;  %11607 = vmatprep.mubr.bf16.mxu0 %v20391_v44  ;;  %11088 = vmatprep.subr.bf16.mxu1 %v15996_v10  ;;  %v16008_v10 = vld [vmem:[%s17406_s11 + $0x6c4] ss:$12 sps:$4 sm:$0xff]  }
0x15cd   : > { %v20437_v37 = vadd.f32 %v13747_v54, %v13746_v2 }
0x15ce   : > { %11060 = vmatmul.mubr.bf16.gmra.mrb[160].mxu1 %v20173_v58 }
0x15cf   : > { %11069 = vmatprep.mubr.bf16.mxu1 %v20207_v11  ;;  %11089 = vmatpush1.bf16.msra.mxu1 %v15994_v60  ;;  %v16005_v11 = vld [vmem:[%s17406_s11 + $0x6ac] ss:$12 sps:$4 sm:$0xff]  }
0x15d0   : > { %11090 = vmatprep.subr.bf16.mxu1 %v15999_v6  ;;  %v16011_v6 = vld [vmem:[%s17406_s11 + $0x6dc] ss:$12 sps:$4 sm:$0xff]  }
0x15d1   : > { %v13765_v41 = vpop.f32.mrb[200].mxu0 }
0x15d2   : > { %v13766_v25 = vpop.f32.mrb[201].mxu0 }
0x15d3   : > { %v13767_v36 = vadd.f32 %v13766_v25, %v13765_v41  ;;  %11091 = vmatpush1.bf16.msra.mxu1 %v15997_v35  ;;  %v13768_v58 = vpop.f32.mrb[202].mxu0  ;;  %11608 = vmatmul.mubr.bf16.gmra.mrb[20].mxu0 %v20386_v12  ;;  %v16009_v41 = vld [vmem:[%s17406_s11 + $0x6d8] ss:$12 sps:$4 sm:$0xff]  }
0x15d4   : > { %v13769_v27 = vpop.f32.mrb[203].mxu0  ;;  %11092 = vmatprep.subr.bf16.mxu1 %v16002_v4 }
0x15d5   : > { %v20454_v51 = vadd.f32 %v13767_v36, %v11261_v0  ;;  %v13770_v38 = vadd.f32 %v13769_v27, %v13768_v58  ;;  %v11277_v36 = vadd.f32 %v20419_v1, %v20442_v3  ;;  %v16020_v1 = vld [vmem:[%s17406_s11 + $0x724] ss:$12 sps:$4 sm:$0xff]  }
0x15d6   : > { %11070 = vmatmul.mubr.bf16.gmra.mrb[164].mxu1 %v20201_v31  ;;  %v16006_v31 = vld [vmem:[%s17406_s11 + $0x6c0] ss:$12 sps:$4 sm:$0xff]  }
0x15d7   : > { %v20457_v48 = vadd.f32 %v13770_v38, %v11264_v8  ;;  %11093 = vmatpush1.bf16.msra.mxu1 %v16000_v17  ;;  %11112 = vmatprep.mubr.bf16.mxu1 %v20310_v9  ;;  %v11272_v9 = vadd.f32 %v20413_v15, %v20442_v3  ;;  %v16012_v17 = vld [vmem:[%s17406_s11 + $0x6f0] ss:$12 sps:$4 sm:$0xff]   ;;  %v11280_v8 = vadd.f32 %v20425_v20, %v20442_v3 }
0x15d8   : > { %11094 = vmatprep.subr.bf16.mxu1 %v16005_v11  ;;  %v16017_v11 = vld [vmem:[%s17406_s11 + $0x70c] ss:$12 sps:$4 sm:$0xff]  }
0x15d9   : > { %v13771_v50 = vpop.f32.mrb[204].mxu0 }
0x15da   : > { %v13772_v55 = vpop.f32.mrb[205].mxu0 }
0x15db   : > { %v13773_v2 = vadd.f32 %v13772_v55, %v13771_v50  ;;  %11095 = vmatpush1.bf16.msra.mxu1 %v16003_v30  ;;  %v13774_v60 = vpop.f32.mrb[206].mxu0  ;;  %v16015_v50 = vld [vmem:[%s17406_s11 + $0x708] ss:$12 sps:$4 sm:$0xff]  }
0x15dc   : > { %v13775_v54 = vpop.f32.mrb[207].mxu0  ;;  %11096 = vmatprep.subr.bf16.mxu1 %v16008_v10 }
0x15dd   : > { %v20468_v7 = vadd.f32 %v13773_v2, %v11269_v14  ;;  %v13776_v35 = vadd.f32 %v13775_v54, %v13774_v60  ;;  %v11285_v2 = vadd.f32 %v20431_v46, %v20442_v3  ;;  %v16021_v46 = vld [vmem:[%s17406_s11 + $0x738] ss:$12 sps:$4 sm:$0xff]  }
0x15df   : > { %v20470_v4 = vadd.f32 %v13776_v35, %v11272_v9  ;;  %11097 = vmatpush1.bf16.msra.mxu1 %v16006_v31  ;;  %v16018_v31 = vld [vmem:[%s17406_s11 + $0x720] ss:$12 sps:$4 sm:$0xff]   ;;  %v11288_v9 = vadd.f32 %v20437_v37, %v20442_v3  ;;  %v16027_v37 = vld [vmem:[%s17406_s11 + $0x768] ss:$12 sps:$4 sm:$0xff]   ;;  %v16032_v3 = vld [vmem:[%s17406_s11 + $0x784] ss:$12 sps:$4 sm:$0xff]  }
0x15e0   : > { %11098 = vmatprep.subr.bf16.mxu1 %v16011_v6  ;;  %v16023_v6 = vld [vmem:[%s17406_s11 + $0x73c] ss:$12 sps:$4 sm:$0xff]  }
0x15e1   : > { %v13777_v25 = vpop.f32.mrb[208].mxu0 }
0x15e2   : > { %v13778_v0 = vpop.f32.mrb[209].mxu0 }
0x15e3   : > { %v13779_v58 = vadd.f32 %v13778_v0, %v13777_v25  ;;  %11099 = vmatpush1.bf16.msra.mxu1 %v16009_v41  ;;  %v13780_v15 = vpop.f32.mrb[210].mxu0  ;;  %v16026_v25 = vld [vmem:[%s17406_s11 + $0x754] ss:$12 sps:$4 sm:$0xff]   ;;  %v16024_v0 = vld [vmem:[%s17406_s11 + $0x750] ss:$12 sps:$4 sm:$0xff]  }
0x15e4   : > { %v13781_v27 = vpop.f32.mrb[211].mxu0  ;;  %11100 = vmatprep.subr.bf16.mxu1 %v16014_v19 }
0x15e5   : > { %v20480_v38 = vadd.f32 %v13779_v58, %v11277_v36  ;;  %v13782_v30 = vadd.f32 %v13781_v27, %v13780_v15  ;;  %v16029_v36 = vld [vmem:[%s17406_s11 + $0x76c] ss:$12 sps:$4 sm:$0xff]   ;;  %v16035_v15 = vld [vmem:[%s17406_s11 + $0x79c] ss:$12 sps:$4 sm:$0xff]   ;;  %v16038_v27 = vld [vmem:[%s17406_s11 + $0x7b4] ss:$12 sps:$4 sm:$0xff]  }
0x15e6   : > { %v16030_v58 = vld [vmem:[%s17406_s11 + $0x780] ss:$12 sps:$4 sm:$0xff]  }
0x15e7   : > { %v20482_v10 = vadd.f32 %v13782_v30, %v11280_v8  ;;  %11101 = vmatpush1.bf16.msra.mxu1 %v16012_v17  ;;  %v16033_v17 = vld [vmem:[%s17406_s11 + $0x798] ss:$12 sps:$4 sm:$0xff]   ;;  %v16039_v30 = vld [vmem:[%s17406_s11 + $0x7c8] ss:$12 sps:$4 sm:$0xff]  }
0x15e8   : > { %11102 = vmatprep.subr.bf16.mxu1 %v16017_v11  ;;  %v16036_v11 = vld [vmem:[%s17406_s11 + $0x7b0] ss:$12 sps:$4 sm:$0xff]   ;;  %v16041_v8 = vld [vmem:[%s17406_s11 + $0x7cc] ss:$12 sps:$4 sm:$0xff]  }
0x15e9   : > { %v13783_v55 = vpop.f32.mrb[212].mxu0 }
0x15ea   : > { %v13784_v14 = vpop.f32.mrb[213].mxu0 }
0x15eb   : > { %v13785_v60 = vadd.f32 %v13784_v14, %v13783_v55  ;;  %11103 = vmatpush1.bf16.msra.mxu1 %v16015_v50  ;;  %v13786_v20 = vpop.f32.mrb[214].mxu0  ;;  %v16047_v50 = vld [vmem:[%s17406_s11 + $0x7fc] ss:$12 sps:$4 sm:$0xff]   ;;  %v16045_v14 = vld [vmem:[%s17406_s11 + $0x7f8] ss:$12 sps:$4 sm:$0xff]  }
0x15ec   : > { %v13787_v54 = vpop.f32.mrb[215].mxu0  ;;  %11104 = vmatprep.subr.bf16.mxu1 %v16020_v1 }
0x15ed   : > { %v20492_v35 = vadd.f32 %v13785_v60, %v11285_v2  ;;  %v13788_v41 = vadd.f32 %v13787_v54, %v13786_v20  ;;  %v16050_v60 = vld [vmem:[%s17406_s11 + $0x814] ss:$12 sps:$4 sm:$0xff]  }
0x15ef   : > { %v20494_v19 = vadd.f32 %v13788_v41, %v11288_v9  ;;  %11105 = vmatpush1.bf16.msra.mxu1 %v16018_v31 }
0x15f0   : > { %11106 = vmatprep.subr.bf16.mxu1 %v16023_v6 }
0x15f3   : > { %11107 = vmatpush1.bf16.msra.mxu1 %v16021_v46  ;;  %v16051_v46 = vld [vmem:[%s17406_s11 + $0x828] ss:$12 sps:$4 sm:$0xff]  }
0x15f4   : > { %11108 = vmatprep.subr.bf16.mxu1 %v16026_v25  ;;  %v16056_v25 = vld [vmem:[%s17406_s11 + $0x844] ss:$12 sps:$4 sm:$0xff]  }
0x15f7   : > { %11109 = vmatpush1.bf16.msra.mxu1 %v16024_v0 }
0x15f8   : > { %11110 = vmatprep.subr.bf16.mxu1 %v16029_v36 }
0x15fb   : > { %11111 = vmatpush1.bf16.msra.mxu1 %v16027_v37 }
0x15fc   : > { %11153 = vmatprep.subr.bf16.mxu1 %v16032_v3 }
0x15fe   : > { %11113 = vmatmul.mubr.bf16.vlgmr.msra.gmra.mrb[152].mxu1 %v20304_v18  ;;  %v16044_v18 = vld [vmem:[%s17406_s11 + $0x7e4] ss:$12 sps:$4 sm:$0xff]  }
0x15ff   : > { %11122 = vmatprep.mubr.bf16.mxu1 %v20336_v53  ;;  %11154 = vmatpush1.bf16.msra.mxu1 %v16030_v58  ;;  %v16042_v53 = vld [vmem:[%s17406_s11 + $0x7e0] ss:$12 sps:$4 sm:$0xff]  }
0x1600   : > { %11155 = vmatprep.subr.bf16.mxu1 %v16035_v15 }
0x1603   : > { %11156 = vmatpush1.bf16.msra.mxu1 %v16033_v17 }
0x1604   : > { %11157 = vmatprep.subr.bf16.mxu1 %v16038_v27  ;;  %v16057_v27 = vld [vmem:[%s17406_s11 + $0x858] ss:$12 sps:$4 sm:$0xff]  }
0x1606   : > { %11123 = vmatmul.mubr.bf16.gmra.mrb[156].mxu1 %v20331_v32 }
0x1607   : > { %11132 = vmatprep.mubr.bf16.mxu1 %v20362_v56  ;;  %11158 = vmatpush1.bf16.msra.mxu1 %v16036_v11  ;;  %v16062_v11 = vld [vmem:[%s17406_s11 + $0x874] ss:$12 sps:$4 sm:$0xff]  }
0x1608   : > { %11159 = vmatprep.subr.bf16.mxu1 %v16041_v8 }
0x160b   : > { %11160 = vmatpush1.bf16.msra.mxu1 %v16039_v30 }
0x160c   : > { %11161 = vmatprep.subr.bf16.mxu1 %v16044_v18  ;;  %v16060_v18 = vld [vmem:[%s17406_s11 + $0x870] ss:$12 sps:$4 sm:$0xff]  }
0x160d   : > { %v13805_v1 = vpop.f32.mrb[216].mxu0 }
0x160e   : > { %11133 = vmatmul.mubr.bf16.gmra.mrb[160].mxu1 %v20357_v22  ;;  %v13806_v55 = vpop.f32.mrb[217].mxu0  ;;  %v16048_v22 = vld [vmem:[%s17406_s11 + $0x810] ss:$12 sps:$4 sm:$0xff]  }
0x160f   : > { %11142 = vmatprep.mubr.bf16.mxu1 %v20388_v47  ;;  %11162 = vmatpush1.bf16.msra.mxu1 %v16042_v53  ;;  %v13807_v32 = vadd.f32 %v13806_v55, %v13805_v1  ;;  %v13808_v56 = vpop.f32.mrb[218].mxu0  ;;  %v16053_v47 = vld [vmem:[%s17406_s11 + $0x82c] ss:$12 sps:$4 sm:$0xff]  }
0x1610   : > { %11163 = vmatprep.subr.bf16.mxu1 %v16047_v50  ;;  %v13809_v2 = vpop.f32.mrb[219].mxu0  ;;  %v16065_v53 = vld [vmem:[%s17406_s11 + $0x88c] ss:$12 sps:$4 sm:$0xff]  }
0x1611   : > { %v20521_v20 = vadd.f32 %v13807_v32, %v20454_v51  ;;  %v13810_v31 = vadd.f32 %v13809_v2, %v13808_v56  ;;  %v16063_v56 = vld [vmem:[%s17406_s11 + $0x888] ss:$12 sps:$4 sm:$0xff]  }
0x1613   : > { %v20524_v54 = vadd.f32 %v13810_v31, %v20457_v48  ;;  %11164 = vmatpush1.bf16.msra.mxu1 %v16045_v14  ;;  %v16066_v31 = vld [vmem:[%s17406_s11 + $0x8a0] ss:$12 sps:$4 sm:$0xff]  }
0x1614   : > { %11165 = vmatprep.subr.bf16.mxu1 %v16050_v60 }
0x1615   : > { %v13811_v6 = vpop.f32.mrb[220].mxu0 }
0x1616   : > { %11143 = vmatmul.mubr.bf16.gmra.mrb[164].mxu1 %v20383_v5  ;;  %v13812_v9 = vpop.f32.mrb[221].mxu0  ;;  %v16054_v5 = vld [vmem:[%s17406_s11 + $0x840] ss:$12 sps:$4 sm:$0xff]  }
0x1617   : > { %11166 = vmatpush1.bf16.msra.mxu1 %v16048_v22  ;;  %11185 = vmatprep.mubr.bf16.mxu1 %v20314_v57  ;;  %v13813_v51 = vadd.f32 %v13812_v9, %v13811_v6  ;;  %v13814_v41 = vpop.f32.mrb[222].mxu0  ;;  %v16059_v57 = vld [vmem:[%s17406_s11 + $0x85c] ss:$12 sps:$4 sm:$0xff]   ;;  %v16069_v9 = vld [vmem:[%s17406_s11 + $0x8b8] ss:$12 sps:$4 sm:$0xff]  }
0x1618   : > { %11167 = vmatprep.subr.bf16.mxu1 %v16053_v47  ;;  %v13815_v48 = vpop.f32.mrb[223].mxu0  ;;  %v16071_v22 = vld [vmem:[%s17406_s11 + $0x8bc] ss:$12 sps:$4 sm:$0xff]  }
0x1619   : > { %v20533_v0 = vadd.f32 %v13813_v51, %v20468_v7  ;;  %v13816_v36 = vadd.f32 %v13815_v48, %v13814_v41 }
0x161b   : > { %v20536_v37 = vadd.f32 %v13816_v36, %v20470_v4  ;;  %11168 = vmatpush1.bf16.msra.mxu1 %v16051_v46  ;;  %v16074_v46 = vld [vmem:[%s17406_s11 + $0x8d4] ss:$12 sps:$4 sm:$0xff]  }
0x161c   : > { %11169 = vmatprep.subr.bf16.mxu1 %v16056_v25 }
0x161d   : > { %v13817_v3 = vpop.f32.mrb[224].mxu0 }
0x161e   : > { %v13818_v58 = vpop.f32.mrb[225].mxu0 }
0x161f   : > { %11170 = vmatpush1.bf16.msra.mxu1 %v16054_v5  ;;  %v13819_v15 = vadd.f32 %v13818_v58, %v13817_v3  ;;  %v13820_v17 = vpop.f32.mrb[226].mxu0  ;;  %v16077_v5 = vld [vmem:[%s17406_s11 + $0x8ec] ss:$12 sps:$4 sm:$0xff]   ;;  %v16075_v58 = vld [vmem:[%s17406_s11 + $0x8e8] ss:$12 sps:$4 sm:$0xff]  }
0x1620   : > { %11171 = vmatprep.subr.bf16.mxu1 %v16059_v57  ;;  %v13821_v7 = vpop.f32.mrb[227].mxu0 }
0x1621   : > { %v11407_v4 = vadd.f32 %v13819_v15, %v20480_v38  ;;  %v13822_v8 = vadd.f32 %v13821_v7, %v13820_v17  ;;  %v16068_v38 = vld [vmem:[%s17406_s11 + $0x8a4] ss:$12 sps:$4 sm:$0xff]  }
0x1623   : > { %v11410_v30 = vadd.f32 %v13822_v8, %v20482_v10  ;;  %11172 = vmatpush1.bf16.msra.mxu1 %v16057_v27 }
0x1624   : > { %11173 = vmatprep.subr.bf16.mxu1 %v16062_v11 }
0x1625   : > { %v13823_v50 = vpop.f32.mrb[228].mxu0 }
0x1626   : > { %v13824_v1 = vpop.f32.mrb[229].mxu0 }
0x1627   : > { %11174 = vmatpush1.bf16.msra.mxu1 %v16060_v18  ;;  %v13825_v55 = vadd.f32 %v13824_v1, %v13823_v50  ;;  %v13826_v32 = vpop.f32.mrb[230].mxu0 }
0x1628   : > { %11175 = vmatprep.subr.bf16.mxu1 %v16065_v53  ;;  %v13827_v14 = vpop.f32.mrb[231].mxu0 }
0x1629   : > { %v11415_v2 = vadd.f32 %v13825_v55, %v20492_v35  ;;  %v13828_v10 = vadd.f32 %v13827_v14, %v13826_v32 }
0x162b   : > { %v11418_v60 = vadd.f32 %v13828_v10, %v20494_v19  ;;  %11176 = vmatpush1.bf16.msra.mxu1 %v16063_v56  ;;  %v16072_v19 = vld [vmem:[%s17406_s11 + $0x8d0] ss:$12 sps:$4 sm:$0xff]  }
0x162c   : > { %11177 = vmatprep.subr.bf16.mxu1 %v16068_v38 }
0x162e   : > { %v13845_v47 = vpop.f32.mrb[232].mxu0 }
0x162f   : > { %11178 = vmatpush1.bf16.msra.mxu1 %v16066_v31  ;;  %v13846_v6 = vpop.f32.mrb[233].mxu0 }
0x1630   : > { %v13847_v51 = vadd.f32 %v13846_v6, %v13845_v47  ;;  %v13848_v41 = vpop.f32.mrb[234].mxu0  ;;  %11179 = vmatprep.subr.bf16.mxu1 %v16071_v22 }
0x1631   : > { %v13849_v48 = vpop.f32.mrb[235].mxu0 }
0x1632   : > { %v11456_v35 = vadd.f32 %v13847_v51, %v20521_v20  ;;  %v13850_v25 = vadd.f32 %v13849_v48, %v13848_v41 }
0x1633   : > { %11180 = vmatpush1.bf16.msra.mxu1 %v16069_v9 }
0x1634   : > { %v11459_v36 = vadd.f32 %v13850_v25, %v20524_v54  ;;  %11181 = vmatprep.subr.bf16.mxu1 %v16074_v46 }
0x1636   : > { %v13851_v57 = vpop.f32.mrb[236].mxu0 }
0x1637   : > { %11182 = vmatpush1.bf16.msra.mxu1 %v16072_v19  ;;  %v13852_v3 = vpop.f32.mrb[237].mxu0 }
0x1638   : > { %v13853_v15 = vadd.f32 %v13852_v3, %v13851_v57  ;;  %v13854_v17 = vpop.f32.mrb[238].mxu0  ;;  %11183 = vmatprep.subr.bf16.mxu1 %v16077_v5 }
0x1639   : > { %v13855_v27 = vpop.f32.mrb[239].mxu0 }
0x163a   : > { %v11464_v7 = vadd.f32 %v13853_v15, %v20533_v0  ;;  %v13856_v11 = vadd.f32 %v13855_v27, %v13854_v17 }
0x163b   : > { %11184 = vmatpush1.bf16.msra.mxu1 %v16075_v58 }
0x163c   : > { %v11467_v20 = vadd.f32 %v13856_v11, %v20536_v37 }
0x163e   : > { %11186 = vmatmul.mubr.bf16.vlgmr.msra.gmra.mrb[152].mxu1 %v20308_v33  ;;  %v13857_v8 = vpop.f32.mrb[240].mxu0 }
0x163f   : > { %11195 = vmatprep.mubr.bf16.mxu1 %v20340_v13  ;;  %v13858_v54 = vpop.f32.mrb[241].mxu0 }
0x1640   : > { %v13859_v18 = vadd.f32 %v13858_v54, %v13857_v8  ;;  %v13860_v53 = vpop.f32.mrb[242].mxu0 }
0x1641   : > { %v13861_v50 = vpop.f32.mrb[243].mxu0 }
0x1642   : > { %v11472_v1 = vadd.f32 %v13859_v18, %v11407_v4  ;;  %v13862_v55 = vadd.f32 %v13861_v50, %v13860_v53 }
0x1644   : > { %v11475_v32 = vadd.f32 %v13862_v55, %v11410_v30 }
0x1646   : > { %11196 = vmatmul.mubr.bf16.gmra.mrb[156].mxu1 %v20334_v24  ;;  %v13863_v56 = vpop.f32.mrb[244].mxu0 }
0x1647   : > { %11205 = vmatprep.mubr.bf16.mxu1 %v20366_v34  ;;  %v13864_v0 = vpop.f32.mrb[245].mxu0 }
0x1648   : > { %v13865_v14 = vadd.f32 %v13864_v0, %v13863_v56  ;;  %v13866_v37 = vpop.f32.mrb[246].mxu0 }
0x1649   : > { %v13867_v38 = vpop.f32.mrb[247].mxu0 }
0x164a   : > { %v11480_v33 = vadd.f32 %v13865_v14, %v11415_v2  ;;  %v13868_v10 = vadd.f32 %v13867_v38, %v13866_v37 }
0x164c   : > { %v11483_v31 = vadd.f32 %v13868_v10, %v11418_v60 }
0x164e   : > { %11206 = vmatmul.mubr.bf16.gmra.mrb[160].mxu1 %v20360_v26 }
0x164f   : > { %11215 = vmatprep.mubr.bf16.mxu1 %v20391_v44 }
0x1656   : > { %11216 = vmatmul.mubr.bf16.gmra.mrb[164].mxu1 %v20386_v12 }
0x166e   : > { %v13885_v13 = vpop.f32.mrb[248].mxu0 }
0x166f   : > { %v13886_v4 = vpop.f32.mrb[249].mxu0 }
0x1670   : > { %v13887_v30 = vadd.f32 %v13886_v4, %v13885_v13  ;;  %v13888_v24 = vpop.f32.mrb[250].mxu0 }
0x1671   : > { %v13889_v22 = vpop.f32.mrb[251].mxu0 }
0x1672   : > { %v11521_v47 = vadd.f32 %v13887_v30, %v11456_v35  ;;  %v13890_v34 = vadd.f32 %v13889_v22, %v13888_v24 }
0x1674   : > { %v11524_v6 = vadd.f32 %v13890_v34, %v11459_v36 }
0x1676   : > { %v13891_v9 = vpop.f32.mrb[252].mxu0 }
0x1677   : > { %v13892_v51 = vpop.f32.mrb[253].mxu0 }
0x1678   : > { %v13893_v41 = vadd.f32 %v13892_v51, %v13891_v9  ;;  %v13894_v2 = vpop.f32.mrb[254].mxu0 }
0x1679   : > { %v13895_v46 = vpop.f32.mrb[255].mxu0 }
0x167a   : > { %v11529_v60 = vadd.f32 %v13893_v41, %v11464_v7  ;;  %v13896_v48 = vadd.f32 %v13895_v46, %v13894_v2 }
0x167c   : > { %v11532_v26 = vadd.f32 %v13896_v48, %v11467_v20 }
0x167e   : > { %v13897_v25 = vpop.f32.mrb[0].mxu0 }
0x167f   : > { %v13898_v44 = vpop.f32.mrb[1].mxu0 }
0x1680   : > { %v13899_v19 = vadd.f32 %v13898_v44, %v13897_v25  ;;  %v13900_v12 = vpop.f32.mrb[2].mxu0 }
0x1681   : > { %v13901_v5 = vpop.f32.mrb[3].mxu0 }
0x1682   : > { %v11537_v57 = vadd.f32 %v13899_v19, %v11472_v1  ;;  %v13902_v3 = vadd.f32 %v13901_v5, %v13900_v12  ;;  %v16349_v5 = vld [vmem:[%s17384_s30 + $0x8] sm:$0x3f] }
0x1684   : > { %v11540_v58 = vadd.f32 %v13902_v3, %v11475_v32 }
0x1686   : > { %v13903_v15 = vpop.f32.mrb[4].mxu0 }
0x1687   : > { %v13904_v35 = vpop.f32.mrb[5].mxu0 }
0x1688   : > { %v13905_v17 = vadd.f32 %v13904_v35, %v13903_v15  ;;  %v13906_v36 = vpop.f32.mrb[6].mxu0 }
0x1689   : > { %v13907_v27 = vpop.f32.mrb[7].mxu0 }
0x168a   : > { %v11545_v11 = vadd.f32 %v13905_v17, %v11480_v33  ;;  %v13908_v8 = vadd.f32 %v13907_v27, %v13906_v36 }
0x168c   : > { %v11548_v54 = vadd.f32 %v13908_v8, %v11483_v31 }
0x168e   : > { %v13925_v18 = vpop.f32.mrb[8].mxu0 }
0x168f   : > { %v13926_v7 = vpop.f32.mrb[9].mxu0 }
0x1690   : > { %v13927_v53 = vadd.f32 %v13926_v7, %v13925_v18  ;;  %v13928_v20 = vpop.f32.mrb[10].mxu0 }
0x1691   : > { %v13929_v50 = vpop.f32.mrb[11].mxu0 }
0x1692   : > { %v11586_v55 = vadd.f32 %v13927_v53, %v11521_v47  ;;  %v13930_v56 = vadd.f32 %v13929_v50, %v13928_v20  ;;  %v21223_v20 = vld [vmem:[#allocation42_spill] sm:$0xff] }
0x1694   : > { %v20569_v0 = vadd.f32 %v11586_v55, %v19118_v45  ;;  %v11589_v1 = vadd.f32 %v13930_v56, %v11524_v6  ;;  %v21224_v56 = vld [vmem:[#allocation43_spill] sm:$0xff] }
0x1696   : > { %11642 = vst [vmem:[#allocation2 + $0x10] sm:$0xff] %v20569_v0  ;;  %v20573_v32 = vadd.f32 %v11589_v1, %v19123_v59  ;;  %v13931_v14 = vpop.f32.mrb[12].mxu0 }
0x1697   : > { %v13932_v37 = vpop.f32.mrb[13].mxu0 }
0x1698   : > { %11645 = vst [vmem:[#allocation2 + $0x28] sm:$0xff] %v20573_v32  ;;  %v13933_v38 = vadd.f32 %v13932_v37, %v13931_v14  ;;  %v13934_v33 = vpop.f32.mrb[14].mxu0 }
0x1699   : > { %v13935_v10 = vpop.f32.mrb[15].mxu0 }
0x169a   : > { %v11594_v31 = vadd.f32 %v13933_v38, %v11529_v60  ;;  %v13936_v13 = vadd.f32 %v13935_v10, %v13934_v33  ;;  %v21226_v38 = vld [vmem:[#allocation46_spill] sm:$0xff] }
0x169c   : > { %v20577_v4 = vadd.f32 %v11594_v31, %v19141_v62  ;;  %v11597_v45 = vadd.f32 %v13936_v13, %v11532_v26 }
0x169e   : > { %11648 = vst [vmem:[#allocation2 + $0x40] sm:$0xff] %v20577_v4  ;;  %v20581_v30 = vadd.f32 %v11597_v45, %v19152_v43  ;;  %v13937_v59 = vpop.f32.mrb[16].mxu0 }
0x169f   : > { %v13938_v24 = vpop.f32.mrb[17].mxu0 }
0x16a0   : > { %11651 = vst [vmem:[#allocation2 + $0x58] sm:$0xff] %v20581_v30  ;;  %v13939_v22 = vadd.f32 %v13938_v24, %v13937_v59  ;;  %v13940_v47 = vpop.f32.mrb[18].mxu0  ;;  %v21227_v24 = vld [vmem:[#allocation53_spill] sm:$0xff] }
0x16a1   : > { %v13941_v34 = vpop.f32.mrb[19].mxu0 }
0x16a2   : > { %v11602_v6 = vadd.f32 %v13939_v22, %v11537_v57  ;;  %v13942_v9 = vadd.f32 %v13941_v34, %v13940_v47  ;;  %v9247_v57 = vrot.slane %v16349_v5, %v20085_v40  ;;  %v21231_v5 = vld [vmem:[#allocation57_spill] sm:$0xff] }
0x16a4   : > { %v20585_v51 = vadd.f32 %v11602_v6, %v19165_v63  ;;  %v11605_v62 = vadd.f32 %v13942_v9, %v11540_v58  ;;  %v21228_v6 = vld [vmem:[#allocation52_spill] sm:$0xff] }
0x16a6   : > { %11654 = vst [vmem:[#allocation2 + $0x70] sm:$0xff] %v20585_v51  ;;  %v20589_v41 = vadd.f32 %v11605_v62, %v19173_v29  ;;  %v13943_v43 = vpop.f32.mrb[20].mxu0  ;;  %v16348_v29 = vld [vmem:[%s17384_s30] sm:$0x3f] }
0x16a7   : > { %v13944_v2 = vpop.f32.mrb[21].mxu0  ;;  %v9243_v12 = vrot.slane %v16348_v29, %v20085_v40 }
0x16a8   : > { %11657 = vst [vmem:[#allocation2 + $0x88] sm:$0xff] %v20589_v41  ;;  %v13945_v46 = vadd.f32 %v13944_v2, %v13943_v43  ;;  %v13946_v60 = vpop.f32.mrb[22].mxu0  ;;  %v21229_v43 = vld [vmem:[#allocation47_spill] sm:$0xff] }
0x16a9   : > { %v13947_v48 = vpop.f32.mrb[23].mxu0 }
0x16aa   : > { %v11610_v26 = vadd.f32 %v13945_v46, %v11545_v11  ;;  %v13948_v25 = vadd.f32 %v13947_v48, %v13946_v60  ;;  %v21230_v46 = vld [vmem:[#allocation45_spill] sm:$0xff] }
0x16ac   : > { %v20593_v63 = vadd.f32 %v11610_v26, %v19189_v39  ;;  %v11613_v44 = vadd.f32 %v13948_v25, %v11548_v54 }
0x16ae   : > { %11660 = vst [vmem:[#allocation2 + $0xa0] sm:$0xff] %v20593_v63  ;;  %v20597_v19 = vadd.f32 %v11613_v44, %v19197_v42 }
0x16b0   : > { %11663 = vst [vmem:[#allocation2 + $0xb8] sm:$0xff] %v20597_v19 }
0x1711   : > { %v11187_v3 = vpop.f32.mrb[152].mxu1 }
0x1712   : > { %v14377_v58 = vadd.f32 %v11187_v3, %v9243_v12  ;;  %v11189_v15 = vpop.f32.mrb[153].mxu1 }
0x1713   : > { %v14378_v35 = vadd.f32 %v11189_v15, %v9247_v57  ;;  %v11191_v39 = vpop.f32.mrb[154].mxu1 }
0x1714   : > { %v20605_v17 = vadd.f32 %v14377_v58, %v19094_v21  ;;  %v14379_v36 = vadd.f32 %v11191_v39, %v9243_v12  ;;  %v11193_v27 = vpop.f32.mrb[155].mxu1 }
0x1715   : > { %v20608_v42 = vadd.f32 %v14378_v35, %v19105_v49  ;;  %v14380_v11 = vadd.f32 %v11193_v27, %v9247_v57  ;;  %v21232_v35 = vld [vmem:[#allocation55_spill] sm:$0xff] }
0x1716   : > { %11640 = vst [vmem:[#allocation2] sm:$0xff] %v20605_v17  ;;  %v20612_v8 = vadd.f32 %v14379_v36, %v19109_v52  ;;  %v21233_v27 = vld [vmem:[#allocation51_spill] sm:$0xff] }
0x1717   : > { %11641 = vst [vmem:[#allocation2 + $0x8] sm:$0xff] %v20608_v42  ;;  %v20616_v54 = vadd.f32 %v14380_v11, %v19113_v16  ;;  %v21225_v16 = vld [vmem:[#allocation44_spill] sm:$0xff] }
0x1718   : > { %11643 = vst [vmem:[#allocation2 + $0x18] sm:$0xff] %v20612_v8 }
0x1719   : > { %11644 = vst [vmem:[#allocation2 + $0x20] sm:$0xff] %v20616_v54  ;;  %v11197_v21 = vpop.f32.mrb[156].mxu1 }
0x171a   : > { %v14381_v18 = vadd.f32 %v11197_v21, %v9243_v12  ;;  %v11199_v7 = vpop.f32.mrb[157].mxu1  ;;  %v21234_v21 = vld [vmem:[#allocation49_spill] sm:$0xff] }
0x171b   : > { %v14382_v49 = vadd.f32 %v11199_v7, %v9247_v57  ;;  %v11201_v53 = vpop.f32.mrb[158].mxu1  ;;  %v11673_v7 = vadd.f32 (!%p13477_p6), %v20616_v54, %v20612_v8 }
0x171c   : > { %v20621_v50 = vadd.f32 %v14381_v18, %v21223_v20  ;;  %v14383_v55 = vadd.f32 %v11201_v53, %v9243_v12  ;;  %v11203_v52 = vpop.f32.mrb[159].mxu1 }
0x171d   : > { %v20624_v1 = vadd.f32 %v14382_v49, %v21224_v56  ;;  %v14384_v14 = vadd.f32 %v11203_v52, %v9247_v57  ;;  %v11674_v52 = vadd.f32 (!%p13477_p6), %v11673_v7, %v20573_v32 }
0x171e   : > { %11646 = vst [vmem:[#allocation2 + $0x30] sm:$0xff] %v20621_v50  ;;  %v20628_v37 = vadd.f32 %v14383_v55, %v21225_v16 }
0x171f   : > { %11647 = vst [vmem:[#allocation2 + $0x38] sm:$0xff] %v20624_v1  ;;  %v20632_v33 = vadd.f32 %v14384_v14, %v21226_v38 }
0x1720   : > { %11649 = vst [vmem:[#allocation2 + $0x48] sm:$0xff] %v20628_v37 }
0x1721   : > { %11650 = vst [vmem:[#allocation2 + $0x50] sm:$0xff] %v20632_v33  ;;  %v11207_v10 = vpop.f32.mrb[160].mxu1  ;;  %v11681_v49 = vadd.f32 (!%p13477_p6), %v20632_v33, %v20628_v37 }
0x1722   : > { %v14385_v31 = vadd.f32 %v11207_v10, %v9243_v12  ;;  %v11209_v13 = vpop.f32.mrb[161].mxu1 }
0x1723   : > { %v14386_v45 = vadd.f32 %v11209_v13, %v9247_v57  ;;  %v11211_v59 = vpop.f32.mrb[162].mxu1  ;;  %v11682_v56 = vadd.f32 (!%p13477_p6), %v11681_v49, %v20581_v30 }
0x1724   : > { %v20637_v22 = vadd.f32 %v14385_v31, %v21227_v24  ;;  %v14387_v47 = vadd.f32 %v11211_v59, %v9243_v12  ;;  %v11213_v34 = vpop.f32.mrb[163].mxu1  ;;  %v16350_v59 = vld [vmem:[#allocation17 + $0x40] sm:$0xff] (!%p13477_p6)  }
0x1725   : > { %v20640_v9 = vadd.f32 %v14386_v45, %v21228_v6  ;;  %v14388_v62 = vadd.f32 %v11213_v34, %v9247_v57  ;;  %v16351_v24 = vld [vmem:[#allocation17] sm:$0xff] (!%p13477_p6)   ;;  %13949 = vmatprep.subr.bf16.mxu0 (!%p13477_p6), %v16350_v59 }
0x1726   : > { %11652 = vst [vmem:[#allocation2 + $0x60] sm:$0xff] %v20637_v22  ;;  %v20644_v2 = vadd.f32 %v14387_v47, %v21229_v43  ;;  %v16352_v47 = vld [vmem:[#allocation17 + $0x80] sm:$0xff] (!%p13477_p6)   ;;  %13950 = vmatpush3.bf16.msra.mxu0 (!%p13477_p6), %v16351_v24 }
0x1727   : > { %11653 = vst [vmem:[#allocation2 + $0x68] sm:$0xff] %v20640_v9  ;;  %v20648_v60 = vadd.f32 %v14388_v62, %v21230_v46  ;;  %v11685_v55 = vadd.f32 (!%p13477_p6), %v20640_v9, %v20637_v22  ;;  %14241 = vmatprep.subr.bf16.mxu1 (!%p13477_p6), %v16352_v47 }
0x1728   : > { %11655 = vst [vmem:[#allocation2 + $0x78] sm:$0xff] %v20644_v2  ;;  %14242 = vmatpush3.bf16.msra.mxu1 (!%p13477_p6), %v16352_v47 }
0x1729   : > { %11656 = vst [vmem:[#allocation2 + $0x80] sm:$0xff] %v20648_v60  ;;  %v11217_v48 = vpop.f32.mrb[164].mxu1  ;;  %v11689_v14 = vadd.f32 (!%p13477_p6), %v20648_v60, %v20644_v2  ;;  %v11686_v38 = vadd.f32 (!%p13477_p6), %v11685_v55, %v20585_v51 }
0x172a   : > { %v14389_v26 = vadd.f32 %v11217_v48, %v9243_v12  ;;  %v11219_v25 = vpop.f32.mrb[165].mxu1 }
0x172b   : > { %v14390_v44 = vadd.f32 %v11219_v25, %v9247_v57  ;;  %v11221_v29 = vpop.f32.mrb[166].mxu1  ;;  %11667 = sbr.rel (%p13477_p6) target bundleno = 6504 (0x1968), region = 108  ;;  %v11690_v10 = vadd.f32 (!%p13477_p6), %v11689_v14, %v20589_v41 }
0x172c   : > { %v20653_v3 = vadd.f32 %v14389_v26, %v21231_v5  ;;  %v14391_v58 = vadd.f32 %v11221_v29, %v9243_v12  ;;  %v11223_v15 = vpop.f32.mrb[167].mxu1  ;;  %v11669_v12 = vadd.f32 (!%p13477_p6), %v20608_v42, %v20605_v17 }
0x172d   : > { %v20656_v39 = vadd.f32 %v14390_v44, %v21232_v35  ;;  %v14392_v36 = vadd.f32 %v11223_v15, %v9247_v57  ;;  %v11677_v57 = vadd.f32 (!%p13477_p6), %v20624_v1, %v20621_v50 }
0x172e   : > { %11658 = vst [vmem:[#allocation2 + $0x90] sm:$0xff] %v20653_v3  ;;  %v20660_v11 = vadd.f32 %v14391_v58, %v21233_v27  ;;  %v11670_v53 = vadd.f32 (!%p13477_p6), %v11669_v12, %v20569_v0 }
0x172f   : > { %11659 = vst [vmem:[#allocation2 + $0x98] sm:$0xff] %v20656_v39  ;;  %v20664_v18 = vadd.f32 %v14392_v36, %v21234_v21  ;;  %v11678_v20 = vadd.f32 (!%p13477_p6), %v11677_v57, %v20577_v4  ;;  %v11693_v16 = vadd.f32 (!%p13477_p6), %v20656_v39, %v20653_v3 }
0x1730   : > { %11661 = vst [vmem:[#allocation2 + $0xa8] sm:$0xff] %v20660_v11  ;;  %11671 = vadd.xlane.f32.xlu0 (!%p13477_p6), %v11670_v53 }
0x1731   : > { %11662 = vst [vmem:[#allocation2 + $0xb0] sm:$0xff] %v20664_v18  ;;  %11679 = vadd.xlane.f32.xlu1 (!%p13477_p6), %v11678_v20  ;;  %v11697_v31 = vadd.f32 (!%p13477_p6), %v20664_v18, %v20660_v11  ;;  %v11694_v13 = vadd.f32 (!%p13477_p6), %v11693_v16, %v20593_v63 }
0x1733   : > { %v11698_v45 = vadd.f32 %v11697_v31, %v20597_v19 }
0x1734   : > { %11675 = vadd.xlane.f32.xlu0 %v11674_v52 }
0x1735   : > { %11683 = vadd.xlane.f32.xlu1 %v11682_v56 }
0x1738   : > { %11687 = vadd.xlane.f32.xlu0 %v11686_v38 }
0x1739   : > { %11691 = vadd.xlane.f32.xlu1 %v11690_v10 }
0x173c   : > { %11695 = vadd.xlane.f32.xlu0 %v11694_v13 }
0x173d   : > { %11699 = vadd.xlane.f32.xlu1 %v11698_v45 }
0x17bd   : > { %v11672_v34 = vpop.xlane.xlu0 %11671 }
0x17be   : > { %v11680_v6 = vpop.xlane.xlu1 %11679  ;;  %v11701_v62 = vmul.f32 0.0026041667, %v11672_v34 }
0x17bf   : > { %v11703_v43 = vmul.f32 0.0026041667, %v11680_v6 }
0x17c0   : > { %v20694_v46 = vsub.f32 %v20605_v17, %v11701_v62  ;;  %v20697_v48 = vsub.f32 %v20608_v42, %v11701_v62  ;;  %v20700_v26 = vsub.f32 %v20569_v0, %v11701_v62 }
0x17c1   : > { %v20703_v25 = vsub.f32 %v20621_v50, %v11703_v43  ;;  %v20706_v44 = vsub.f32 %v20624_v1, %v11703_v43  ;;  %v20709_v29 = vsub.f32 %v20577_v4, %v11703_v43  ;;  %v11676_v5 = vpop.xlane.xlu0 %11675 }
0x17c2   : > { %v11684_v58 = vpop.xlane.xlu1 %11683  ;;  %v11702_v15 = vmul.f32 0.0026041667, %v11676_v5  ;;  %v11733_v42 = vmul.f32 %v20694_v46, %v20694_v46  ;;  %v11734_v0 = vmul.f32 %v20697_v48, %v20697_v48  ;;  %v11735_v50 = vmul.f32 %v20700_v26, %v20700_v26 }
0x17c3   : > { %v11704_v17 = vmul.f32 0.0026041667, %v11684_v58  ;;  %v11739_v1 = vmul.f32 %v20703_v25, %v20703_v25  ;;  %v11740_v4 = vmul.f32 %v20706_v44, %v20706_v44  ;;  %v11741_v35 = vmul.f32 %v20709_v29, %v20709_v29 }
0x17c4   : > { %v20724_v36 = vsub.f32 %v20612_v8, %v11702_v15  ;;  %v20727_v27 = vsub.f32 %v20616_v54, %v11702_v15  ;;  %v20730_v21 = vsub.f32 %v20573_v32, %v11702_v15  ;;  %v11757_v53 = vadd.f32 %v11734_v0, %v11733_v42 }
0x17c5   : > { %v20733_v12 = vsub.f32 %v20628_v37, %v11704_v17  ;;  %v20736_v57 = vsub.f32 %v20632_v33, %v11704_v17  ;;  %v20739_v7 = vsub.f32 %v20581_v30, %v11704_v17  ;;  %v11688_v49 = vpop.xlane.xlu0 %11687  ;;  %v11765_v8 = vadd.f32 %v11740_v4, %v11739_v1 }
0x17c6   : > { %v11692_v20 = vpop.xlane.xlu1 %11691  ;;  %v11705_v55 = vmul.f32 0.0026041667, %v11688_v49  ;;  %v11736_v54 = vmul.f32 %v20724_v36, %v20724_v36  ;;  %v11737_v32 = vmul.f32 %v20727_v27, %v20727_v27  ;;  %v11758_v37 = vadd.f32 %v11757_v53, %v11735_v50 }
0x17c7   : > { %v11706_v52 = vmul.f32 0.0026041667, %v11692_v20  ;;  %v11766_v56 = vadd.f32 %v11765_v8, %v11741_v35  ;;  %v11738_v33 = vmul.f32 %v20730_v21, %v20730_v21  ;;  %v11742_v30 = vmul.f32 %v20733_v12, %v20733_v12 }
0x17c8   : > { %v20750_v14 = vsub.f32 %v20637_v22, %v11705_v55  ;;  %v20753_v16 = vsub.f32 %v20640_v9, %v11705_v55  ;;  %v20756_v38 = vsub.f32 %v20585_v51, %v11705_v55  ;;  %11759 = vadd.xlane.f32.xlu0 %v11758_v37  ;;  %v11761_v59 = vadd.f32 %v11737_v32, %v11736_v54  ;;  %v16353_v54 = vld [vmem:[#allocation17 + $0x48] sm:$0xff]  }
0x17c9   : > { %v20759_v10 = vsub.f32 %v20644_v2, %v11706_v52  ;;  %v20762_v31 = vsub.f32 %v20648_v60, %v11706_v52  ;;  %v20765_v13 = vsub.f32 %v20589_v41, %v11706_v52  ;;  %v11696_v45 = vpop.xlane.xlu0 %11695  ;;  %v11743_v9 = vmul.f32 %v20736_v57, %v20736_v57  ;;  %v16354_v32 = vld [vmem:[#allocation17 + $0x8] sm:$0xff]   ;;  %13951 = vmatprep.subr.bf16.mxu0 %v16353_v54 }
0x17ca   : > { %v11700_v22 = vpop.xlane.xlu1 %11699  ;;  %v11707_v24 = vmul.f32 0.0026041667, %v11696_v45  ;;  %v11744_v51 = vmul.f32 %v20739_v7, %v20739_v7  ;;  %v11745_v2 = vmul.f32 %v20750_v14, %v20750_v14  ;;  %v11762_v34 = vadd.f32 %v11761_v59, %v11738_v33  ;;  %13952 = vmatpush3.bf16.msra.mxu0 %v16354_v32  ;;  %v16355_v37 = vld [vmem:[#allocation17 + $0x88] sm:$0xff]   ;;  %v16357_v33 = vld [vmem:[#allocation17 + $0x10] sm:$0xff]   ;;  %v16359_v45 = vld [vmem:[#allocation17 + $0x58] sm:$0xff]  }
0x17cb   : > { %v11708_v47 = vmul.f32 0.0026041667, %v11700_v22  ;;  %v11769_v60 = vadd.f32 %v11743_v9, %v11742_v30  ;;  %v11746_v41 = vmul.f32 %v20753_v16, %v20753_v16  ;;  %v11747_v6 = vmul.f32 %v20756_v38, %v20756_v38  ;;  %14243 = vmatprep.subr.bf16.mxu1 %v16355_v37  ;;  %v16358_v30 = vld [vmem:[#allocation17 + $0x90] sm:$0xff]   ;;  %v16360_v59 = vld [vmem:[#allocation17 + $0x18] sm:$0xff]   ;;  %v16362_v9 = vld [vmem:[#allocation17 + $0x60] sm:$0xff]  }
0x17cc   : > { %v20778_v62 = vsub.f32 %v20653_v3, %v11707_v24  ;;  %v20781_v43 = vsub.f32 %v20656_v39, %v11707_v24  ;;  %v20784_v5 = vsub.f32 %v20593_v63, %v11707_v24  ;;  %11767 = vadd.xlane.f32.xlu0 %v11766_v56  ;;  %11763 = vadd.xlane.f32.xlu1 %v11762_v34  ;;  %v16356_v56 = vld [vmem:[#allocation17 + $0x50] sm:$0xff]   ;;  %v16361_v22 = vld [vmem:[#allocation17 + $0x98] sm:$0xff]   ;;  %v16363_v24 = vld [vmem:[#allocation17 + $0x20] sm:$0xff]  }
0x17cd   : > { %v20787_v58 = vsub.f32 %v20660_v11, %v11708_v47  ;;  %v20790_v15 = vsub.f32 %v20664_v18, %v11708_v47  ;;  %v20793_v17 = vsub.f32 %v20597_v19, %v11708_v47  ;;  %v11770_v42 = vadd.f32 %v11769_v60, %v11744_v51  ;;  %13953 = vmatprep.subr.bf16.mxu0 %v16356_v56  ;;  %v16364_v47 = vld [vmem:[#allocation17 + $0xa0] sm:$0xff]   ;;  %v16365_v51 = vld [vmem:[#allocation17 + $0x68] sm:$0xff]   ;;  %v16368_v60 = vld [vmem:[#allocation17 + $0x70] sm:$0xff]  }
0x17ce   : > { %v11773_v3 = vadd.f32 %v11746_v41, %v11745_v2  ;;  %v11748_v39 = vmul.f32 %v20759_v10, %v20759_v10  ;;  %v11749_v63 = vmul.f32 %v20762_v31, %v20762_v31  ;;  %v11750_v11 = vmul.f32 %v20765_v13, %v20765_v13  ;;  %14244 = vmatpush3.bf16.msra.mxu1 %v16355_v37  ;;  %v16366_v2 = vld [vmem:[#allocation17 + $0x28] sm:$0xff]   ;;  %v16369_v41 = vld [vmem:[#allocation17 + $0x30] sm:$0xff]  }
0x17cf   : > { %v11751_v0 = vmul.f32 %v20778_v62, %v20778_v62  ;;  %v11752_v18 = vmul.f32 %v20781_v43, %v20781_v43  ;;  %v11753_v19 = vmul.f32 %v20784_v5, %v20784_v5  ;;  %v11754_v50 = vmul.f32 %v20787_v58, %v20787_v58  ;;  %13954 = vmatpush3.bf16.msra.mxu0 %v16357_v33  ;;  %v16367_v34 = vld [vmem:[#allocation17 + $0xa8] sm:$0xff]  }
0x17d0   : > { %v11774_v1 = vadd.f32 %v11773_v3, %v11747_v6  ;;  %v11777_v4 = vadd.f32 %v11749_v63, %v11748_v39  ;;  %v11755_v35 = vmul.f32 %v20790_v15, %v20790_v15  ;;  %11771 = vadd.xlane.f32.xlu1 %v11770_v42  ;;  %v11756_v53 = vmul.f32 %v20793_v17, %v20793_v17  ;;  %v16370_v6 = vld [vmem:[#allocation17 + $0xb0] sm:$0xff]   ;;  %v16371_v42 = vld [vmem:[#allocation17 + $0x78] sm:$0xff]  }
0x17d1   : > { %v11781_v49 = vadd.f32 %v11752_v18, %v11751_v0  ;;  %14245 = vmatprep.subr.bf16.mxu1 %v16358_v30  ;;  %13955 = vmatprep.subr.bf16.mxu0 %v16359_v45  ;;  %v16372_v3 = vld [vmem:[#allocation17 + $0x38] sm:$0xff]   ;;  %v21236_v37 = vld [vmem:[#allocation40_spill] sm:$0xff] }
0x17d2   : > { %11775 = vadd.xlane.f32.xlu0 %v11774_v1  ;;  %v11778_v20 = vadd.f32 %v11777_v4, %v11750_v11  ;;  %v11785_v8 = vadd.f32 %v11755_v35, %v11754_v50  ;;  %14246 = vmatpush3.bf16.msra.mxu1 %v16358_v30  ;;  %v16373_v39 = vld [vmem:[#allocation17 + $0xb8] sm:$0xff]  }
0x17d3   : > { %v11782_v55 = vadd.f32 %v11781_v49, %v11753_v19  ;;  %13956 = vmatpush3.bf16.msra.mxu0 %v16360_v59  ;;  %14247 = vmatprep.subr.bf16.mxu1 %v16361_v22  ;;  %v11668_v4 = vld [vmem:[#allocation15] sm:$0x3f] }
0x17d4   : > { %11779 = vadd.xlane.f32.xlu1 %v11778_v20  ;;  %v11786_v52 = vadd.f32 %v11785_v8, %v11756_v53  ;;  %13957 = vmatprep.subr.bf16.mxu0 %v16362_v9  ;;  %v11849_v54 = vrot.slane %v11668_v4, %v19393_v61  ;;  %v11841_v56 = vrot.slane %v11668_v4, %v21236_v37 }
0x17d5   : > { %v11896_v9 = vrot.slane %v11668_v4, %v19390_v28  ;;  %v11900_v61 = vrot.slane %v11668_v4, %v20085_v40 }
0x17d6   : > { %11783 = vadd.xlane.f32.xlu0 %v11782_v55  ;;  %14248 = vmatpush3.bf16.msra.mxu1 %v16361_v22  ;;  %v11845_v55 = vrot.slane %v11668_v4, %v19077_v23  ;;  %v20821_v23 = vrot.slane %v11849_v54, %v21236_v37 }
0x17d7   : > { %13958 = vmatpush3.bf16.msra.mxu0 %v16363_v24  ;;  %14249 = vmatprep.subr.bf16.mxu1 %v16364_v47 }
0x17d8   : > { %11787 = vadd.xlane.f32.xlu1 %v11786_v52  ;;  %13959 = vmatprep.subr.bf16.mxu0 %v16365_v51  ;;  %v20817_v22 = vrot.slane %v11845_v55, %v21236_v37 }
0x17da   : > { %14250 = vmatpush3.bf16.msra.mxu1 %v16364_v47 }
0x17db   : > { %13960 = vmatpush3.bf16.msra.mxu0 %v16366_v2  ;;  %14251 = vmatprep.subr.bf16.mxu1 %v16367_v34  ;;  %v20825_v2 = vrot.slane %v11841_v56, %v21236_v37 }
0x17dc   : > { %13961 = vmatprep.subr.bf16.mxu0 %v16368_v60 }
0x17de   : > { %14252 = vmatpush3.bf16.msra.mxu1 %v16367_v34  ;;  %v21237_v34 = vld [vmem:[#allocation41_spill] sm:$0xff] }
0x17df   : > { %13962 = vmatpush3.bf16.msra.mxu0 %v16369_v41  ;;  %14253 = vmatprep.subr.bf16.mxu1 %v16370_v6  ;;  %v11892_v60 = vrot.slane %v11668_v4, %v21237_v34 }
0x17e0   : > { %13963 = vmatprep.subr.bf16.mxu0 %v16371_v42 }
0x17e2   : > { %14254 = vmatpush3.bf16.msra.mxu1 %v16370_v6 }
0x17e3   : > { %13964 = vmatpush3.bf16.msra.mxu0 %v16372_v3  ;;  %14255 = vmatprep.subr.bf16.mxu1 %v16373_v39 }
0x17e6   : > { %14256 = vmatpush3.bf16.msra.mxu1 %v16373_v39 }
0x1855   : > { %v11760_v63 = vpop.xlane.xlu0 %11759 }
0x1856   : > { %v11789_v11 = vmul.f32 0.0026041667, %v11760_v63  ;;  %v20832_v63 = vrot.slane %v11896_v9, %v21237_v34 }
0x1858   : > { %v11797_v0 = vadd.f32 1e-05, %v11789_v11 }
0x1859   : > { %v11764_v18 = vpop.xlane.xlu1 %11763  ;;  %v11768_v19 = vpop.xlane.xlu0 %11767 }
0x185a   : > { %16374 = vrsqrt.f32 %v11797_v0  ;;  %v11790_v50 = vmul.f32 0.0026041667, %v11764_v18  ;;  %v11791_v1 = vmul.f32 0.0026041667, %v11768_v19  ;;  %v20837_v0 = vrot.slane %v11900_v61, %v21237_v34 }
0x185c   : > { %v11798_v35 = vadd.f32 1e-05, %v11790_v50  ;;  %v11799_v49 = vadd.f32 1e-05, %v11791_v1 }
0x185d   : > { %v11772_v53 = vpop.xlane.xlu1 %11771 }
0x185e   : > { %16376 = vrsqrt.f32 %v11798_v35  ;;  %v11792_v20 = vmul.f32 0.0026041667, %v11772_v53 }
0x185f   : > { %v11776_v8 = vpop.xlane.xlu0 %11775  ;;  %16378 = vrsqrt.f32 %v11799_v49 }
0x1860   : > { %v11793_v52 = vmul.f32 0.0026041667, %v11776_v8  ;;  %v11800_v32 = vadd.f32 1e-05, %v11792_v20 }
0x1861   : > { %v11780_v30 = vpop.xlane.xlu1 %11779 }
0x1862   : > { %v11801_v33 = vadd.f32 1e-05, %v11793_v52  ;;  %16380 = vrsqrt.f32 %v11800_v32  ;;  %v11794_v45 = vmul.f32 0.0026041667, %v11780_v30 }
0x1863   : > { %v11784_v59 = vpop.xlane.xlu0 %11783 }
0x1864   : > { %16382 = vrsqrt.f32 %v11801_v33  ;;  %v11795_v24 = vmul.f32 0.0026041667, %v11784_v59  ;;  %v16375_v47 = vpop.eup %16374  ;;  %v11802_v51 = vadd.f32 1e-05, %v11794_v45 }
0x1865   : > { %v11788_v6 = vpop.xlane.xlu1 %11787  ;;  %v11814_v42 = vmul.f32 %v16375_v47, %v20697_v48  ;;  %v11815_v28 = vmul.f32 %v16375_v47, %v20700_v26  ;;  %v11813_v3 = vmul.f32 %v16375_v47, %v20694_v46  ;;  %v20841_v26 = vrot.slane %v11892_v60, %v21237_v34 }
0x1866   : > { %v11803_v41 = vadd.f32 1e-05, %v11795_v24  ;;  %16384 = vrsqrt.f32 %v11802_v51  ;;  %v11796_v39 = vmul.f32 0.0026041667, %v11788_v6 }
0x1867   : > { %v11866_v40 = vmul.f32 %v20817_v22, %v11814_v42  ;;  %v11867_v11 = vmul.f32 %v20821_v23, %v11815_v28  ;;  %v11865_v48 = vmul.f32 %v20825_v2, %v11813_v3 }
0x1868   : > { %16386 = vrsqrt.f32 %v11803_v41  ;;  %v16377_v18 = vpop.eup %16376  ;;  %v11804_v19 = vadd.f32 1e-05, %v11796_v39 }
0x1869   : > { %v16379_v46 = vpop.eup %16378  ;;  %v11817_v50 = vmul.f32 %v16377_v18, %v20727_v27  ;;  %v11818_v1 = vmul.f32 %v16377_v18, %v20730_v21  ;;  %v11917_v4 = vadd.f32 %v20832_v63, %v11866_v40  ;;  %v11816_v35 = vmul.f32 %v16377_v18, %v20724_v36 }
0x186a   : > { %16388 = vrsqrt.f32 %v11804_v19  ;;  %v11820_v49 = vmul.f32 %v16379_v46, %v20706_v44  ;;  %v11918_v8 = vadd.f32 %v20837_v0, %v11867_v11  ;;  %v11821_v55 = vmul.f32 %v16379_v46, %v20709_v29 }
0x186b   : > { %v11869_v53 = vmul.f32 %v20817_v22, %v11817_v50  ;;  %v11870_v20 = vmul.f32 %v20821_v23, %v11818_v1  ;;  %v11868_v27 = vmul.f32 %v20825_v2, %v11816_v35  ;;  %v11916_v21 = vadd.f32 %v20841_v26, %v11865_v48 }
0x186c   : > { %v16381_v52 = vpop.eup %16380  ;;  %v11872_v54 = vmul.f32 %v20817_v22, %v11820_v49  ;;  %v11819_v32 = vmul.f32 %v16379_v46, %v20703_v25  ;;  %v11873_v45 = vmul.f32 %v20821_v23, %v11821_v55 }
0x186d   : > { %v11920_v44 = vadd.f32 %v20832_v63, %v11869_v53  ;;  %v11921_v37 = vadd.f32 %v20837_v0, %v11870_v20  ;;  %v11823_v56 = vmul.f32 %v16381_v52, %v20736_v57  ;;  %v11824_v33 = vmul.f32 %v16381_v52, %v20739_v7 }
0x186e   : > { %v16383_v36 = vpop.eup %16382  ;;  %v11919_v29 = vadd.f32 %v20841_v26, %v11868_v27  ;;  %v11923_v30 = vadd.f32 %v20832_v63, %v11872_v54  ;;  %v11924_v57 = vadd.f32 %v20837_v0, %v11873_v45  ;;  %v11822_v34 = vmul.f32 %v16381_v52, %v20733_v12 }
0x186f   : > { %v11827_v59 = vmul.f32 %v16383_v36, %v20756_v38  ;;  %v11941_v9 = vpack.c.bf16 %v11920_v44, %v11917_v4  ;;  %v11942_v24 = vpack.c.bf16 %v11921_v37, %v11918_v8  ;;  %v11875_v25 = vmul.f32 %v20817_v22, %v11823_v56 }
0x1870   : > { %v11876_v61 = vmul.f32 %v20821_v23, %v11824_v33  ;;  %v16385_v47 = vpop.eup %16384  ;;  %v11940_v51 = vpack.c.bf16 %v11919_v29, %v11916_v21  ;;  %v11871_v42 = vmul.f32 %v20825_v2, %v11819_v32  ;;  %v11874_v28 = vmul.f32 %v20825_v2, %v11822_v34 }
0x1871   : > { %v11879_v7 = vmul.f32 %v20821_v23, %v11827_v59  ;;  %12183 = vmatprep.mubr.bf16.mxu0 %v11941_v9  ;;  %14257 = vmatprep.mubr.bf16.mxu1 %v11942_v24  ;;  %v11926_v41 = vadd.f32 %v20832_v63, %v11875_v25  ;;  %v11830_v6 = vmul.f32 %v16385_v47, %v20765_v13 }
0x1872   : > { %v16387_v60 = vpop.eup %16386  ;;  %v11927_v38 = vadd.f32 %v20837_v0, %v11876_v61  ;;  %12184 = vmatmul.mubr.bf16.vlgmr.msra.gmra.mrb[0].mxu0 %v11940_v51  ;;  %v11826_v3 = vmul.f32 %v16383_v36, %v20753_v16  ;;  %v11829_v11 = vmul.f32 %v16385_v47, %v20762_v31  ;;  %v11925_v48 = vadd.f32 %v20841_v26, %v11874_v28 }
0x1873   : > { %v11944_v39 = vpack.c.bf16 %v11926_v41, %v11923_v30  ;;  %v11882_v12 = vmul.f32 %v20821_v23, %v11830_v6  ;;  %v11930_v19 = vadd.f32 %v20837_v0, %v11879_v7  ;;  %v11833_v46 = vmul.f32 %v16387_v60, %v20784_v5 }
0x1874   : > { %v11945_v40 = vpack.c.bf16 %v11927_v38, %v11924_v57  ;;  %v16389_v18 = vpop.eup %16388  ;;  %v11878_v13 = vmul.f32 %v20817_v22, %v11826_v3  ;;  %v11881_v16 = vmul.f32 %v20817_v22, %v11829_v11  ;;  %v11922_v4 = vadd.f32 %v20841_v26, %v11871_v42 }
0x1875   : > { %12191 = vmatprep.mubr.bf16.mxu0 %v11944_v39  ;;  %v11933_v50 = vadd.f32 %v20837_v0, %v11882_v12  ;;  %v11836_v1 = vmul.f32 %v16389_v18, %v20793_v17  ;;  %v11885_v35 = vmul.f32 %v20821_v23, %v11833_v46  ;;  %v11825_v49 = vmul.f32 %v16383_v36, %v20750_v14 }
0x1876   : > { %14258 = vmatmul.mubr.bf16.vlgmr.msra.gmra.mrb[0].mxu1 %v11945_v40  ;;  %v11929_v31 = vadd.f32 %v20832_v63, %v11878_v13  ;;  %v11932_v20 = vadd.f32 %v20832_v63, %v11881_v16  ;;  %v11828_v8 = vmul.f32 %v16385_v47, %v20759_v10  ;;  %v11943_v55 = vpack.c.bf16 %v11925_v48, %v11922_v4 }
0x1877   : > { %v11948_v53 = vpack.c.bf16 %v11933_v50, %v11930_v19  ;;  %v11888_v5 = vmul.f32 %v20821_v23, %v11836_v1  ;;  %v11832_v52 = vmul.f32 %v16387_v60, %v20781_v43  ;;  %v11835_v17 = vmul.f32 %v16389_v18, %v20790_v15 }
0x1878   : > { %v11947_v27 = vpack.c.bf16 %v11932_v20, %v11929_v31  ;;  %v11936_v21 = vadd.f32 %v20837_v0, %v11885_v35  ;;  %v11880_v14 = vmul.f32 %v20825_v2, %v11828_v8  ;;  %v11877_v32 = vmul.f32 %v20825_v2, %v11825_v49 }
0x1879   : > { %14261 = vmatprep.mubr.bf16.mxu1 %v11948_v53  ;;  %v11939_v54 = vadd.f32 %v20837_v0, %v11888_v5  ;;  %v11887_v23 = vmul.f32 %v20817_v22, %v11835_v17  ;;  %v11884_v36 = vmul.f32 %v20817_v22, %v11832_v52  ;;  %v11834_v15 = vmul.f32 %v16389_v18, %v20787_v58 }
0x187a   : > { %12192 = vmatmul.mubr.bf16.gmra.mrb[4].mxu0 %v11943_v55  ;;  %v11931_v43 = vadd.f32 %v20841_v26, %v11880_v14  ;;  %v11928_v0 = vadd.f32 %v20841_v26, %v11877_v32  ;;  %v11831_v37 = vmul.f32 %v16387_v60, %v20778_v62  ;;  %v13478_v62 = vld [vmem:[#allocation18] ss:$0 sm:$0xff] }
0x187b   : > { %12199 = vmatprep.mubr.bf16.mxu0 %v11947_v27  ;;  %v11951_v10 = vpack.c.bf16 %v11939_v54, %v11936_v21  ;;  %v11938_v44 = vadd.f32 %v20832_v63, %v11887_v23  ;;  %v11935_v56 = vadd.f32 %v20832_v63, %v11884_v36  ;;  %v11886_v29 = vmul.f32 %v20825_v2, %v11834_v15 }
0x187c   : > { %v11946_v33 = vpack.c.bf16 %v11931_v43, %v11928_v0  ;;  %v11883_v22 = vmul.f32 %v20825_v2, %v11831_v37 }
0x187d   : > { %v11950_v30 = vpack.c.bf16 %v11938_v44, %v11935_v56  ;;  %v11937_v45 = vadd.f32 %v20841_v26, %v11886_v29 }
0x187e   : > { %14262 = vmatmul.mubr.bf16.gmra.mrb[4].mxu1 %v11951_v10  ;;  %v11934_v58 = vadd.f32 %v20841_v26, %v11883_v22 }
0x1880   : > { %v11949_v59 = vpack.c.bf16 %v11937_v45, %v11934_v58 }
0x1882   : > { %12200 = vmatmul.mubr.bf16.gmra.mrb[8].mxu0 %v11946_v33 }
0x1883   : > { %12207 = vmatprep.mubr.bf16.mxu0 %v11950_v30 }
0x188a   : > { %12208 = vmatmul.mubr.bf16.gmra.mrb[12].mxu0 %v11949_v59 }
0x1945   : > { %v13965_v9 = vpop.f32.mrb[0].mxu0 }
0x1946   : > { %v13966_v24 = vpop.f32.mrb[1].mxu0 }
0x1947   : > { %v13967_v63 = vadd.f32 %v13966_v24, %v13965_v9  ;;  %v13968_v25 = vpop.f32.mrb[2].mxu0 }
0x1948   : > { %v13969_v61 = vpop.f32.mrb[3].mxu0 }
0x1949   : > { %v14259_v47 = vpop.f32.mrb[0].mxu1  ;;  %v13970_v51 = vadd.f32 %v13969_v61, %v13968_v25  ;;  %v12186_v57 = vadd.f32 %v13967_v63, %v13478_v62 }
0x194a   : > { %v12250_v7 = vpop.f32.mrb[1].mxu1 }
0x194b   : > { %v14260_v2 = vpop.f32.mrb[2].mxu1  ;;  %v12251_v34 = vadd.f32 %v12250_v7, %v12186_v57  ;;  %v12189_v60 = vadd.f32 %v13970_v51, %v13478_v62 }
0x194c   : > { %v12253_v41 = vpop.f32.mrb[3].mxu1 }
0x194d   : > { %12281 = vst [vmem:[%s17417_s15] sm:$0xff] %v12251_v34  ;;  %v12254_v26 = vadd.f32 %v12253_v41, %v12189_v60  ;;  %v13971_v38 = vpop.f32.mrb[4].mxu0 }
0x194e   : > { %v13972_v6 = vpop.f32.mrb[5].mxu0 }
0x194f   : > { %12282 = vst [vmem:[%s17417_s15 + $0x8] sm:$0xff] %v12254_v26  ;;  %v13973_v42 = vadd.f32 %v13972_v6, %v13971_v38  ;;  %v13974_v28 = vpop.f32.mrb[6].mxu0 }
0x1950   : > { %v13975_v3 = vpop.f32.mrb[7].mxu0 }
0x1951   : > { %v14263_v39 = vpop.f32.mrb[4].mxu1  ;;  %v12194_v40 = vadd.f32 %v13973_v42, %v13478_v62  ;;  %v13976_v12 = vadd.f32 %v13975_v3, %v13974_v28 }
0x1952   : > { %v12266_v11 = vpop.f32.mrb[5].mxu1 }
0x1953   : > { %v14264_v18 = vpop.f32.mrb[6].mxu1  ;;  %v12259_v19 = vadd.f32 %v14259_v47, %v12194_v40  ;;  %v12197_v48 = vadd.f32 %v13976_v12, %v13478_v62 }
0x1954   : > { %v12269_v13 = vpop.f32.mrb[7].mxu1 }
0x1955   : > { %12283 = vst [vmem:[%s17417_s15 + $0x10] sm:$0xff] %v12259_v19  ;;  %v12262_v46 = vadd.f32 %v14260_v2, %v12197_v48  ;;  %v13977_v50 = vpop.f32.mrb[8].mxu0 }
0x1956   : > { %v13978_v16 = vpop.f32.mrb[9].mxu0 }
0x1957   : > { %12284 = vst [vmem:[%s17417_s15 + $0x18] sm:$0xff] %v12262_v46  ;;  %v13979_v1 = vadd.f32 %v13978_v16, %v13977_v50  ;;  %v13980_v4 = vpop.f32.mrb[10].mxu0 }
0x1958   : > { %v13981_v31 = vpop.f32.mrb[11].mxu0 }
0x1959   : > { %v12202_v35 = vadd.f32 %v13979_v1, %v13478_v62  ;;  %v13982_v49 = vadd.f32 %v13981_v31, %v13980_v4 }
0x195b   : > { %v12267_v53 = vadd.f32 %v12266_v11, %v12202_v35  ;;  %v12205_v20 = vadd.f32 %v13982_v49, %v13478_v62 }
0x195d   : > { %12285 = vst [vmem:[%s17417_s15 + $0x20] sm:$0xff] %v12267_v53  ;;  %v12270_v5 = vadd.f32 %v12269_v13, %v12205_v20  ;;  %v13983_v8 = vpop.f32.mrb[12].mxu0 }
0x195e   : > { %v13984_v55 = vpop.f32.mrb[13].mxu0 }
0x195f   : > { %12286 = vst [vmem:[%s17417_s15 + $0x28] sm:$0xff] %v12270_v5  ;;  %v13985_v52 = vadd.f32 %v13984_v55, %v13983_v8  ;;  %v13986_v17 = vpop.f32.mrb[14].mxu0 }
0x1960   : > { %v13987_v27 = vpop.f32.mrb[15].mxu0 }
0x1961   : > { %v12210_v21 = vadd.f32 %v13985_v52, %v13478_v62  ;;  %v13988_v54 = vadd.f32 %v13987_v27, %v13986_v17 }
0x1963   : > { %v12275_v14 = vadd.f32 %v14263_v39, %v12210_v21  ;;  %v12213_v32 = vadd.f32 %v13988_v54, %v13478_v62 }
0x1965   : > { %12287 = vst [vmem:[%s17417_s15 + $0x30] sm:$0xff] %v12275_v14  ;;  %v12278_v23 = vadd.f32 %v14264_v18, %v12213_v32 }
0x1967   : > { %12288 = vst [vmem:[%s17417_s15 + $0x38] sm:$0xff] %v12278_v23 }
0x1968 PF: > { %s21238_s5 = sld [smem:[#allocation32_spill]]  ;;  %s21239_s19 = sld [smem:[#allocation67_spill]] }
0x1969   : > { %s12303_s29 = sshll.u32 %s17417_s15, 4  ;;  %s12290_s13 = scalar_lea.sflag [#allocation5], %s17372_s1  ;;  %s20924_s29 = int_to_ptr.vmem [resolvable:$true] %s12303_s29 }
0x196a   : > { %s16684_s3 = scalar_lea.vmem %s20924_s29, 1024  ;;  %p21241_p12 = scmp.ne.s32.totalorder %s21113_s10, 0 }
0x196b   : > { %p16685_p13 = scmp.ne.s32.totalorder %s20924_s29, %s16684_s3  ;;  %s16850_s2 = smov [#allocation20]  }
0x196c   : > { %s16688_s27 = sshll.u32 %s16850_s2, 4  ;;  %s16689_s27 = int_to_ptr.vmem [resolvable:$false] %s16688_s27 }
0x196d   : > { %p16686_p9 = pnand %p16685_p13, %p21241_p12  ;;  %s16690_s11 = scalar_lea.vmem %s16689_s27, 2048 }
0x196e   : > { %s13508_s30 = sshll.u32 %s21238_s5, 10  ;;  %s21240_s25 = smov %s21239_s19 }
0x196f   : > { %s20921_s12 = scalar_lea.hbm %s21239_s19, %s13508_s30  ;;  %p16687_p10 = pneg %p16686_p9 }
0x1970   : > { %p16691_p1 = scmp.lt.s32.totalorder %s20924_s29, %s16689_s27  ;;  %p16692_p0 = scmp.lt.s32.totalorder %s16690_s11, %s16684_s3 }
0x1972   : > { %p16693_p2 = por %p16692_p0, %p16691_p1 }
0x1974   : > { %p16694_p7 = pnand %p16693_p2, %p16687_p10 }
0x1976   : > { %16697 = shalt.err (!%p16694_p7)
}
0x1977   : > { %s16698_s20 = scalar_lea.hbm %s20921_s12, 1024  ;;  %s16702_s24 = scalar_lea.hbm %s21240_s25, 2048 }
0x1978   : > { %p16699_p4 = scmp.ne.s32.totalorder %s20921_s12, %s16698_s20  ;;  %p16703_p8 = scmp.lt.u32.totalorder %s20921_s12, %s21240_s25 }
0x1979   : > { %p16704_p5 = scmp.lt.u32.totalorder %s16702_s24, %s16698_s20  ;;  %p16706_p13 = scmp.lt.u32.totalorder %s16698_s20, %s20921_s12 }
0x197a   : > { %p16700_p11 = pnand %p16699_p4, %p21241_p12 }
0x197b   : > { %p16705_p6 = por %p16704_p5, %p16703_p8 }
0x197c   : > { %p16701_p3 = pneg %p16700_p11 }
0x197d   : > { %p16707_p9 = por %p16706_p13, %p16705_p6 }
0x197f   : > { %p16708_p10 = pnand %p16707_p9, %p16701_p3 }
0x1981   : > { %16711 = shalt.err (!%p16708_p10)
}
0x1982   : > { %s16851_s30 = smov 128   ;;  %s16852_s16 = smov 8  }
0x1983   : > { %14703 = dma.vmem_to_hbm [thread:$0]  (%p21241_p12), %s20924_s29, 1024, %s20921_s12, %s12290_s13, %s16851_s30, %s16851_s30, %s16852_s16  }
0x1984 PF: > { %s21242_s14 = sld [smem:[#allocation30_spill]]  ;;  %s21243_s19 = sld [smem:[#allocation35_spill]] }
0x1985   : > { %p14748_p1 = scmp.ge.s32.totalorder %s16826_s23, 2 }
0x198a   : > { %s12318_s3 = sand.u32 1, %s21242_s14   ;;  %p21244_p0 = scmp.ne.s32.totalorder %s21243_s19, 0 }
0x198b   : > { %s12319_s2 = scalar_lea.sflag [#allocation5], %s12318_s3 }
0x198c   : > { %p14738_p2 = pnand %p14748_p1, %p21244_p0 }
0x198e   : > { %16781 = dma.done.wait (!%p14738_p2), %s12319_s2, 1024  }
0x198f   : > { %16783 = vsyncadd (!%p14738_p2), %s12319_s2, 4294966272  ;;  %s37_s23 = sadd.s32 1, %s16826_s23   ;;  %s21245_s13 = sld [smem:[#allocation28_spill]] }
0x1990   : > { %p34_p7 = scmp.ge.s32.totalorder %s37_s23, 14   ;;  %s21246_s14 = sld [smem:[#allocation29_spill]] }
0x1991   : > { %s21247_s15 = sld [smem:[#allocation38_spill]]  ;;  %s21248_s10 = sld [smem:[#allocation37_spill]] }
0x1992   : > { %s21249_s16 = smov %s16802_s17  ;;  %s21250_s17 = smov %s16806_s18 }
0x1993   : > { %s21251_s18 = smov %s17224_s7  ;;  %s21252_s19 = smov %s16818_s21 }
0x1994   : > { %s21253_s20 = smov %s16822_s22  ;;  %s21255_s22 = smov %s21261_s4 }
0x1995   :  { %36 = sbr.rel (!%p34_p7) target bundleno = 28 (0x1c), region = 197 }
0x1997   : > { %s21254_s21 = smov %s21248_s10 }
0x199c   :  { %12324 = vsyncpa [#allocation4], 1 }
0x199d   :  { %12326 = vsyncpa [#allocation4 + $0x1], 1 }
0x199e   :  { %12327 = vsyncpa [#allocation7], 1 }
0x199f   :  { %12329 = vsyncpa [#allocation7 + $0x1], 1 }
0x19a0   :  { %12330 = vsyncpa [#allocation10], 1 }
0x19a1   :  { %12332 = vsyncpa [#allocation10 + $0x1], 1 }
0x19a2   :  { %12333 = vsyncpa [#allocation13], 1 }
0x19a3   :  { %12335 = vsyncpa [#allocation13 + $0x1], 1 }
0x19a4   :  { %12336 = vsyncpa [#allocation16], 1 }
0x19a5   :  { %12337 = vsyncpa [#allocation19], 1 }
0x19a6   :  { %12338 = vsyncpa [#allocation5], 1 }
0x19a7   :  { %12340 = vsyncpa [#allocation5 + $0x1], 1 }

</bundles_post_ra>
